<compile_context>
chip_gen: v5e
topology: v5e:2x2
jax: 0.10.0
libtpu: 0.0.40
codegen_flags: <defaults>
</compile_context>

<pallas_src>
import functools
import math

import jax
import jax.numpy as jnp
from jax import lax
from jax.experimental import pallas as pl
from jax.experimental.pallas import tpu as pltpu


# ---------------------------------------------------------------------------
# small in-kernel helpers
# ---------------------------------------------------------------------------
_ROLL_IS_NUMPY = True  # pltpu.roll assumed to follow jnp.roll (out[i] = x[i - shift])


def _probe_roll_convention():
    """Run one tiny kernel to pin down pltpu.roll's rotation direction."""
    global _ROLL_IS_NUMPY

    def k(x_ref, o_ref):
        o_ref[...] = pltpu.roll(x_ref[...], 1, 1)

    try:
        x = jnp.arange(8 * 128, dtype=jnp.float32).reshape(8, 128)
        y = pl.pallas_call(k, out_shape=jax.ShapeDtypeStruct((8, 128), jnp.float32))(x)
        _ROLL_IS_NUMPY = bool(y[0, 1] == x[0, 0])
    except Exception:
        _ROLL_IS_NUMPY = True


def _shift_lanes(x, s):
    """out[..., i] = x[..., (i + s) mod N] via the XLU rotate.

    Wrapped lanes are always masked out (conv padding / border clamp) or get an
    exactly-zero tent weight by construction at the call sites.
    """
    if s == 0:
        return x
    n = x.shape[-1]
    shift = (-s) % n if _ROLL_IS_NUMPY else (s % n)
    return pltpu.roll(x, shift, axis=x.ndim - 1)


def _row_col_ids(H, W):
    """Row / column index of every flattened lane, shape [1, H*W] int32."""
    idx = lax.broadcasted_iota(jnp.int32, (1, H * W), 1)
    if W & (W - 1) == 0:                       # power of two: avoid VPU div/mod
        sh = W.bit_length() - 1
        return idx >> sh, idx & (W - 1)
    return idx // W, idx % W


def _group_norm(acc, gw, gb, num_groups, eps=1e-5):
    """GroupNorm on [C, HW]: reduce the 128-lane axis once, then a tiny
    per-group reduction on the resulting [C, 1] columns."""
    ch, hw = acc.shape
    cpg = ch // num_groups
    n = float(cpg * hw)
    s1 = jnp.sum(acc, axis=-1, keepdims=True)          # [ch, 1]
    s2 = jnp.sum(acc * acc, axis=-1, keepdims=True)    # [ch, 1]
    mean_parts, rstd_parts = [], []
    for g in range(num_groups):
        sl = slice(g * cpg, (g + 1) * cpg)
        gs1 = jnp.sum(s1[sl, :], keepdims=True)        # [1, 1]
        gs2 = jnp.sum(s2[sl, :], keepdims=True)
        mean = gs1 / n
        var = jnp.maximum(gs2 / n - mean * mean, 0.0)  # clamp: E[x^2]-m^2 can cancel < 0
        rstd = lax.rsqrt(var + eps)
        mean_parts.append(jnp.broadcast_to(mean, (cpg, 1)))
        rstd_parts.append(jnp.broadcast_to(rstd, (cpg, 1)))
    mean_c = jnp.concatenate(mean_parts, axis=0)       # [ch, 1]
    rstd_c = jnp.concatenate(rstd_parts, axis=0)
    return (acc - mean_c) * rstd_c * gw + gb


def _vmem_limit(nbytes):
    """VMEM request: generous but bounded by ~3/4 of the physical capacity
    (~48 MiB on v7x, ~96 MiB on v5e/v6e)."""
    try:
        cap = int(pltpu.get_tpu_info().vmem_capacity_bytes)
    except Exception:
        cap = 128 << 20
    ceiling = (cap * 3) // 4
    return int(min(max(2 * nbytes, 16 << 20), ceiling))


def _tap_group(cin, max_taps):
    """Taps per MXU matmul so the contraction dim stays <= ~256."""
    return max(1, min(max_taps, 256 // max(cin, 1)))


# ---------------------------------------------------------------------------
# Pallas kernel 1: offset branch (3x3 conv, per-tap-group MXU accumulation)
#                  + GroupNorm(K, 2K) + tanh
# ---------------------------------------------------------------------------
def _offset_kernel(x_ref, w_ref, b_ref, gw_ref, gb_ref, out_ref,
                   *, H, W, num_groups, tap_group):
    x = x_ref[0]                                       # [Cin, H*W] f32
    cin, HW = x.shape
    wfull = w_ref[...]                                 # [2K, 9*Cin] bf16, (ky,kx,c) cols
    hrow, wcol = _row_col_ids(H, W)

    acc = jnp.zeros((wfull.shape[0], HW), jnp.float32)
    group_taps, group_start, t_idx = [], 0, 0
    for ky in range(3):
        for kx in range(3):
            dy, dx = ky - 1, kx - 1
            t = _shift_lanes(x, dy * W + dx)
            conds = []
            if dy != 0:
                conds.append((hrow + dy >= 0) & (hrow + dy <= H - 1))
            if dx != 0:
                conds.append((wcol + dx >= 0) & (wcol + dx <= W - 1))
            if conds:
                valid = conds[0] if len(conds) == 1 else conds[0] & conds[1]
                t = jnp.where(valid, t, 0.0)           # conv zero padding (kills wrap too)
            group_taps.append(t.astype(jnp.bfloat16))
            t_idx += 1
            if len(group_taps) == tap_group or t_idx == 9:
                n_t = len(group_taps)
                col = group_taps[0] if n_t == 1 else jnp.concatenate(group_taps, axis=0)
                wg = wfull[:, group_start * cin:(group_start + n_t) * cin]
                acc = acc + jnp.dot(wg, col, preferred_element_type=jnp.float32)
                group_start += n_t
                group_taps = []

    acc = acc + b_ref[...]
    out_ref[0] = jnp.tanh(_group_norm(acc, gw_ref[...], gb_ref[...], num_groups))


def offset_branch(x_flat, w_col, b, gw, gb, *, H, W, num_groups):
    B, cin, HW = x_flat.shape
    ch = w_col.shape[0]
    tg = _tap_group(cin, 9)
    kern = functools.partial(_offset_kernel, H=H, W=W, num_groups=num_groups,
                             tap_group=tg)
    nbytes = 4 * HW * (4 * cin + 3 * ch) + 2 * HW * tg * cin + (1 << 20)
    return pl.pallas_call(
        kern,
        out_shape=jax.ShapeDtypeStruct((B, ch, HW), jnp.float32),
        grid=(B,),
        in_specs=[
            pl.BlockSpec((1, cin, HW), lambda b_: (b_, 0, 0)),
            pl.BlockSpec((ch, 9 * cin), lambda b_: (0, 0)),
            pl.BlockSpec((ch, 1), lambda b_: (0, 0)),
            pl.BlockSpec((ch, 1), lambda b_: (0, 0)),
            pl.BlockSpec((ch, 1), lambda b_: (0, 0)),
        ],
        out_specs=pl.BlockSpec((1, ch, HW), lambda b_: (b_, 0, 0)),
        compiler_params=pltpu.CompilerParams(
            dimension_semantics=("parallel",), vmem_limit_bytes=_vmem_limit(nbytes)),
    )(x_flat, w_col, b, gw, gb)


# ---------------------------------------------------------------------------
# Pallas kernel 2: coordinate maps + snake deformation (separable bilinear)
#                  + fused DSC conv + GroupNorm + ReLU, per-tap accumulation
# ---------------------------------------------------------------------------
def _dsc_kernel(feat_ref, off_ref, w_ref, b_ref, gw_ref, gb_ref, out_ref,
                *, H, W, K, D, morph, num_groups, extend_scope, order, tap_group):
    feat = feat_ref[0]                                 # [Cin, H*W] f32
    off_all = off_ref[0]                               # [2K, H*W] f32 (tanh offsets)
    cin, HW = feat.shape
    cout = w_ref.shape[0]
    wfull = w_ref[...]                                 # [Cout, K*Cin] bf16, processing-order
    center = K // 2

    hrow, wcol = _row_col_ids(H, W)
    if morph == 0:
        # static (clamped) kernel spread along x / lanes; learned offset along y / rows
        clamp_stride, bil_stride = 1, W
        hi_mask, lo_mask = (wcol == W - 1), (wcol == 0)
        base, cmax, off_base = hrow.astype(jnp.float32), float(H - 1), 0
    else:
        # static spread along y / rows; learned offset along x / lanes
        clamp_stride, bil_stride = W, 1
        hi_mask, lo_mask = (hrow == H - 1), (hrow == 0)
        base, cmax, off_base = wcol.astype(jnp.float32), float(W - 1), K

    # Outward cumulative offsets (center tap forced to 0), one [1, HW] row per tap.
    cum = [None] * K
    cum[center] = jnp.zeros((1, HW), jnp.float32)
    for i in range(1, center + 1):
        r_hi = off_base + center + i
        r_lo = off_base + center - i
        cum[center + i] = cum[center + i - 1] + off_all[r_hi:r_hi + 1, :]
        cum[center - i] = cum[center - i + 1] + off_all[r_lo:r_lo + 1, :]

    acc = jnp.zeros((cout, HW), jnp.float32)
    pos_f, neg_f = feat, feat                          # clamp-shift frontiers
    group_feats, group_start = [], 0
    for p_idx, k in enumerate(order):
        # Edge-clamped static shift for tap k, built incrementally from the center.
        if k == center:
            s_k = feat
        elif k > center:
            pos_f = jnp.where(hi_mask, pos_f, _shift_lanes(pos_f, clamp_stride))
            s_k = pos_f
        else:
            neg_f = jnp.where(lo_mask, neg_f, _shift_lanes(neg_f, -clamp_stride))
            s_k = neg_f

        # Clamped relative displacement along the learned axis, |rel| <= center*extend_scope.
        rel_k = jnp.clip(base + extend_scope * cum[k], 0.0, cmax) - base    # [1, HW]

        # 2-tap bilinear ("tent") interpolation unrolled over the (2D+1) reachable
        # integer shifts; wrapped lanes always get weight exactly 0.
        # TODO(synk): on v6e/v7x these FMAs could run in packed bf16; kept f32 for
        #             v5e portability and accuracy.
        dk = jnp.zeros((cin, HW), jnp.float32)
        for d in range(-D, D + 1):
            wgt = jnp.maximum(0.0, 1.0 - jnp.abs(rel_k - float(d)))        # [1, HW]
            dk = dk + wgt * _shift_lanes(s_k, d * bil_stride)
        group_feats.append(dk.astype(jnp.bfloat16))

        # Flush a tap group through the MXU (contraction dim ~ tap_group*Cin).
        if len(group_feats) == tap_group or p_idx == K - 1:
            n_t = len(group_feats)
            gf = group_feats[0] if n_t == 1 else jnp.concatenate(group_feats, axis=0)
            wg = wfull[:, group_start * cin:(group_start + n_t) * cin]
            acc = acc + jnp.dot(wg, gf, preferred_element_type=jnp.float32)
            group_start += n_t
            group_feats = []

    acc = acc + b_ref[...]
    normed = _group_norm(acc, gw_ref[...], gb_ref[...], num_groups)
    out_ref[0] = jnp.maximum(normed, 0.0)              # ReLU


def dsc_branch(feat, offset_flat, dsc_w, dsc_b, gw, gb, *, H, W, K, D, morph,
               num_groups, extend_scope, order):
    B, cin, HW = feat.shape
    cout = dsc_w.shape[0]
    ch_off = offset_flat.shape[1]                      # 2K
    tg = _tap_group(cin, K)
    kern = functools.partial(_dsc_kernel, H=H, W=W, K=K, D=D, morph=morph,
                             num_groups=num_groups, extend_scope=extend_scope,
                             order=order, tap_group=tg)
    nbytes = (4 * HW * (6 * cin + 2 * ch_off + 3 * cout + K)
              + 2 * HW * tg * cin + (1 << 20))
    return pl.pallas_call(
        kern,
        out_shape=jax.ShapeDtypeStruct((B, cout, HW), jnp.float32),
        grid=(B,),
        in_specs=[
            pl.BlockSpec((1, cin, HW), lambda b_: (b_, 0, 0)),
            pl.BlockSpec((1, ch_off, HW), lambda b_: (b_, 0, 0)),
            pl.BlockSpec((cout, K * cin), lambda b_: (0, 0)),
            pl.BlockSpec((cout, 1), lambda b_: (0, 0)),
            pl.BlockSpec((cout, 1), lambda b_: (0, 0)),
            pl.BlockSpec((cout, 1), lambda b_: (0, 0)),
        ],
        out_specs=pl.BlockSpec((1, cout, HW), lambda b_: (b_, 0, 0)),
        compiler_params=pltpu.CompilerParams(
            dimension_semantics=("parallel",), vmem_limit_bytes=_vmem_limit(nbytes)),
    )(feat, offset_flat, dsc_w, dsc_b, gw, gb)


# ---------------------------------------------------------------------------
# forward wrapper
# ---------------------------------------------------------------------------
def dsconv_forward(x, params, *, kernel_size=9, extend_scope=1.0, morph=0):
    if morph not in (0, 1):
        raise ValueError("morph should be 0 or 1.")
    B, cin, H, W = x.shape
    K = kernel_size
    assert K % 2 == 1, "odd kernel_size assumed (integer static spread)"
    center = K // 2
    HW = H * W
    cout = params["gn_w"].shape[0]

    x_flat = x.reshape(B, cin, HW)                     # free reshape on HBM

    # --- 1) offset = tanh(GN_K(Conv3x3(x)))  (weights pre-cast to bf16)
    w_col = (jnp.transpose(params["offset_w"], (0, 2, 3, 1))
             .reshape(2 * K, 9 * cin).astype(jnp.bfloat16))
    offset_flat = offset_branch(
        x_flat, w_col,
        params["offset_b"].reshape(2 * K, 1),
        params["gn_off_w"].reshape(2 * K, 1),
        params["gn_off_b"].reshape(2 * K, 1),
        H=H, W=W, num_groups=K)

    # --- 2)+3) coordinate maps, deformation, DSC conv, GN, ReLU fused in kernel 2.
    # Taps are processed outward from the center (for the incremental border-clamp
    # shifts); reorder the DSC weight columns to match that processing order.
    order = tuple([center] + [t for i in range(1, center + 1)
                              for t in (center + i, center - i)])
    if morph == 0:
        w_k = params["dsc_w_x"][:, :, :, 0]            # [cout, cin, K]
        dsc_b = params["dsc_b_x"]
    else:
        w_k = params["dsc_w_y"][:, :, 0, :]            # [cout, cin, K]
        dsc_b = params["dsc_b_y"]
    dsc_w = jnp.concatenate([w_k[:, :, k] for k in order], axis=1).astype(jnp.bfloat16)

    # |rel| <= center*extend_scope (tanh-bounded cumulative offsets), so only
    # shifts |d| <= ceil(center*extend_scope) can carry non-zero tent weight.
    D = int(math.ceil(center * extend_scope))

    out_flat = dsc_branch(
        x_flat, offset_flat, dsc_w,
        dsc_b.reshape(cout, 1),
        params["gn_w"].reshape(cout, 1),
        params["gn_b"].reshape(cout, 1),
        H=H, W=W, K=K, D=D, morph=morph,
        num_groups=max(cout // 4, 1), extend_scope=float(extend_scope), order=order)
    return out_flat.reshape(B, cout, H, W)


def init_params(key, cin, cout, K):
    ks = jax.random.split(key, 10)
    n = jax.random.normal
    return {
        "offset_w": 0.1 * n(ks[0], (2 * K, cin, 3, 3), jnp.float32),
        "offset_b": 0.1 * n(ks[1], (2 * K,), jnp.float32),
        "gn_off_w": 1.0 + 0.1 * n(ks[2], (2 * K,), jnp.float32),
        "gn_off_b": 0.1 * n(ks[3], (2 * K,), jnp.float32),
        "dsc_w_x": 0.1 * n(ks[4], (cout, cin, K, 1), jnp.float32),
        "dsc_b_x": 0.1 * n(ks[5], (cout,), jnp.float32),
        "dsc_w_y": 0.1 * n(ks[6], (cout, cin, 1, K), jnp.float32),
        "dsc_b_y": 0.1 * n(ks[7], (cout,), jnp.float32),
        "gn_w": 1.0 + 0.1 * n(ks[8], (cout,), jnp.float32),
        "gn_b": 0.1 * n(ks[9], (cout,), jnp.float32),
    }


if __name__ == "__main__":
    _probe_roll_convention()

    B, cin, cout, K, H, W = 2, 4, 8, 9, 16, 16
    key = jax.random.PRNGKey(0)
    kx_, kp = jax.random.split(key)
    x = jax.random.normal(kx_, (B, cin, H, W), jnp.float32)
    params = init_params(kp, cin, cout, K)

    fwd0 = jax.jit(functools.partial(dsconv_forward, kernel_size=K,
                                     extend_scope=1.0, morph=0))
    fwd1 = jax.jit(functools.partial(dsconv_forward, kernel_size=K,
                                     extend_scope=1.0, morph=1))
    out0 = jax.block_until_ready(fwd0(x, params))
    out1 = jax.block_until_ready(fwd1(x, params))
    assert out0.shape == (B, cout, H, W) and out1.shape == (B, cout, H, W)
    assert bool(jnp.all(jnp.isfinite(out0))) and bool(jnp.all(jnp.isfinite(out1)))
    # TODO(synk): the `if_offset` flag is unused by the reference forward(), so it is omitted.
    print("KERNEL_OK")
</pallas_src>

<mosaic_0001>
module attributes {stable_mosaic.version = 11 : i64} {
  func.func @k(%arg0: memref<8x128xf32, #tpu.memory_space<vmem>>, %arg1: memref<8x128xf32, #tpu.memory_space<vmem>>) attributes {dimension_semantics = [], scalar_prefetch = 0 : i64, scratch_operands = 0 : i64, tpu.core_type = #tpu.core_type<tc>} {
    %c0 = arith.constant 0 : index
    %c0_0 = arith.constant 0 : index
    %0 = vector.load %arg0[%c0, %c0_0] : memref<8x128xf32, #tpu.memory_space<vmem>>, vector<8x128xf32>
    %c1_i32 = arith.constant 1 : i32
    %1 = tpu.dynamic_rotate %0 by %c1_i32 dim 1 : vector<8x128xf32>, i32 -> vector<8x128xf32>
    %c0_1 = arith.constant 0 : index
    %c0_2 = arith.constant 0 : index
    %2 = vector.load %arg1[%c0_1, %c0_2] : memref<8x128xf32, #tpu.memory_space<vmem>>, vector<8x128xf32>
    tpu.vector_store %arg1[%c0_1, %c0_2], %1 {strides = array<i32>} : memref<8x128xf32, #tpu.memory_space<vmem>>, vector<8x128xf32>,
    return
  }
}

module attributes {stable_mosaic.version = 11 : i64} {
  func.func @_offset_kernel(%arg0: i32, %arg1: memref<1x4x256xf32, #tpu.memory_space<vmem>>, %arg2: memref<18x36xbf16, #tpu.memory_space<vmem>>, %arg3: memref<18x1xf32, #tpu.memory_space<vmem>>, %arg4: memref<18x1xf32, #tpu.memory_space<vmem>>, %arg5: memref<18x1xf32, #tpu.memory_space<vmem>>, %arg6: memref<1x18x256xf32, #tpu.memory_space<vmem>>) attributes {dimension_semantics = [#tpu.dimension_semantics<parallel>], iteration_bounds = array<i64: 2>, scalar_prefetch = 0 : i64, scratch_operands = 0 : i64, tpu.core_type = #tpu.core_type<tc>, window_params = [{transform_indices = @transform_0, window_bounds = array<i64: 1, 4, 256>}, {pipeline_mode = #tpu.pipeline_mode<synchronous>, transform_indices = @transform_1, window_bounds = array<i64: 18, 36>}, {pipeline_mode = #tpu.pipeline_mode<synchronous>, transform_indices = @transform_2, window_bounds = array<i64: 18, 1>}, {pipeline_mode = #tpu.pipeline_mode<synchronous>, transform_indices = @transform_3, window_bounds = array<i64: 18, 1>}, {pipeline_mode = #tpu.pipeline_mode<synchronous>, transform_indices = @transform_4, window_bounds = array<i64: 18, 1>}, {transform_indices = @transform_5, window_bounds = array<i64: 1, 18, 256>}]} {
    %c0 = arith.constant 0 : index
    %c0_0 = arith.constant 0 : index
    %c0_1 = arith.constant 0 : index
    %0 = vector.load %arg1[%c0, %c0_0, %c0_1] : memref<1x4x256xf32, #tpu.memory_space<vmem>>, vector<1x4x256xf32>
    %1 = vector.shape_cast %0 : vector<1x4x256xf32> to vector<4x256xf32>
    %c0_2 = arith.constant 0 : index
    %c0_3 = arith.constant 0 : index
    %2 = vector.load %arg2[%c0_2, %c0_3] : memref<18x36xbf16, #tpu.memory_space<vmem>>, vector<18x36xbf16>
    %3 = tpu.iota {dimensions = array<i32: 1>} : vector<1x256xi32>
    %c4_i32 = arith.constant 4 : i32
    %4 = vector.broadcast %c4_i32 : i32 to vector<1x256xi32>
    %5 = arith.shrsi %3, %4 : vector<1x256xi32>
    %c15_i32 = arith.constant 15 : i32
    %6 = vector.broadcast %c15_i32 : i32 to vector<1x256xi32>
    %7 = arith.andi %3, %6 : vector<1x256xi32>
    %cst = arith.constant 0.000000e+00 : f32
    %8 = vector.broadcast %cst : f32 to vector<18x256xf32>
    %c17_i32 = arith.constant 17 : i32
    %9 = tpu.dynamic_rotate %1 by %c17_i32 dim 1 : vector<4x256xf32>, i32 -> vector<4x256xf32>
    %c-1_i32 = arith.constant -1 : i32
    %10 = vector.broadcast %c-1_i32 : i32 to vector<1x256xi32>
    %11 = arith.addi %5, %10 : vector<1x256xi32>
    %c0_i32 = arith.constant 0 : i32
    %12 = vector.broadcast %c0_i32 : i32 to vector<1x256xi32>
    %13 = arith.cmpi sge, %11, %12 : vector<1x256xi32>
    %c-1_i32_4 = arith.constant -1 : i32
    %14 = vector.broadcast %c-1_i32_4 : i32 to vector<1x256xi32>
    %15 = arith.addi %5, %14 : vector<1x256xi32>
    %c15_i32_5 = arith.constant 15 : i32
    %16 = vector.broadcast %c15_i32_5 : i32 to vector<1x256xi32>
    %17 = arith.cmpi sle, %15, %16 : vector<1x256xi32>
    %18 = arith.andi %13, %17 : vector<1x256xi1>
    %c-1_i32_6 = arith.constant -1 : i32
    %19 = vector.broadcast %c-1_i32_6 : i32 to vector<1x256xi32>
    %20 = arith.addi %7, %19 : vector<1x256xi32>
    %c0_i32_7 = arith.constant 0 : i32
    %21 = vector.broadcast %c0_i32_7 : i32 to vector<1x256xi32>
    %22 = arith.cmpi sge, %20, %21 : vector<1x256xi32>
    %c-1_i32_8 = arith.constant -1 : i32
    %23 = vector.broadcast %c-1_i32_8 : i32 to vector<1x256xi32>
    %24 = arith.addi %7, %23 : vector<1x256xi32>
    %c15_i32_9 = arith.constant 15 : i32
    %25 = vector.broadcast %c15_i32_9 : i32 to vector<1x256xi32>
    %26 = arith.cmpi sle, %24, %25 : vector<1x256xi32>
    %27 = arith.andi %22, %26 : vector<1x256xi1>
    %28 = arith.andi %18, %27 : vector<1x256xi1>
    %cst_10 = arith.constant 0.000000e+00 : f32
    %29 = vector.shape_cast %28 : vector<1x256xi1> to vector<1x256xi1>
    %30 = vector.broadcast %29 : vector<1x256xi1> to vector<4x256xi1>
    %31 = vector.broadcast %cst_10 : f32 to vector<4x256xf32>
    %32 = arith.select %30, %9, %31 : vector<4x256xi1>, vector<4x256xf32>
    %33 = arith.truncf %32 : vector<4x256xf32> to vector<4x256xbf16>
    %c16_i32 = arith.constant 16 : i32
    %34 = tpu.dynamic_rotate %1 by %c16_i32 dim 1 : vector<4x256xf32>, i32 -> vector<4x256xf32>
    %c-1_i32_11 = arith.constant -1 : i32
    %35 = vector.broadcast %c-1_i32_11 : i32 to vector<1x256xi32>
    %36 = arith.addi %5, %35 : vector<1x256xi32>
    %c0_i32_12 = arith.constant 0 : i32
    %37 = vector.broadcast %c0_i32_12 : i32 to vector<1x256xi32>
    %38 = arith.cmpi sge, %36, %37 : vector<1x256xi32>
    %c-1_i32_13 = arith.constant -1 : i32
    %39 = vector.broadcast %c-1_i32_13 : i32 to vector<1x256xi32>
    %40 = arith.addi %5, %39 : vector<1x256xi32>
    %c15_i32_14 = arith.constant 15 : i32
    %41 = vector.broadcast %c15_i32_14 : i32 to vector<1x256xi32>
    %42 = arith.cmpi sle, %40, %41 : vector<1x256xi32>
    %43 = arith.andi %38, %42 : vector<1x256xi1>
    %cst_15 = arith.constant 0.000000e+00 : f32
    %44 = vector.shape_cast %43 : vector<1x256xi1> to vector<1x256xi1>
    %45 = vector.broadcast %44 : vector<1x256xi1> to vector<4x256xi1>
    %46 = vector.broadcast %cst_15 : f32 to vector<4x256xf32>
    %47 = arith.select %45, %34, %46 : vector<4x256xi1>, vector<4x256xf32>
    %48 = arith.truncf %47 : vector<4x256xf32> to vector<4x256xbf16>
    %c15_i32_16 = arith.constant 15 : i32
    %49 = tpu.dynamic_rotate %1 by %c15_i32_16 dim 1 : vector<4x256xf32>, i32 -> vector<4x256xf32>
    %c-1_i32_17 = arith.constant -1 : i32
    %50 = vector.broadcast %c-1_i32_17 : i32 to vector<1x256xi32>
    %51 = arith.addi %5, %50 : vector<1x256xi32>
    %c0_i32_18 = arith.constant 0 : i32
    %52 = vector.broadcast %c0_i32_18 : i32 to vector<1x256xi32>
    %53 = arith.cmpi sge, %51, %52 : vector<1x256xi32>
    %c-1_i32_19 = arith.constant -1 : i32
    %54 = vector.broadcast %c-1_i32_19 : i32 to vector<1x256xi32>
    %55 = arith.addi %5, %54 : vector<1x256xi32>
    %c15_i32_20 = arith.constant 15 : i32
    %56 = vector.broadcast %c15_i32_20 : i32 to vector<1x256xi32>
    %57 = arith.cmpi sle, %55, %56 : vector<1x256xi32>
    %58 = arith.andi %53, %57 : vector<1x256xi1>
    %c1_i32 = arith.constant 1 : i32
    %59 = vector.broadcast %c1_i32 : i32 to vector<1x256xi32>
    %60 = arith.addi %7, %59 : vector<1x256xi32>
    %c0_i32_21 = arith.constant 0 : i32
    %61 = vector.broadcast %c0_i32_21 : i32 to vector<1x256xi32>
    %62 = arith.cmpi sge, %60, %61 : vector<1x256xi32>
    %c1_i32_22 = arith.constant 1 : i32
    %63 = vector.broadcast %c1_i32_22 : i32 to vector<1x256xi32>
    %64 = arith.addi %7, %63 : vector<1x256xi32>
    %c15_i32_23 = arith.constant 15 : i32
    %65 = vector.broadcast %c15_i32_23 : i32 to vector<1x256xi32>
    %66 = arith.cmpi sle, %64, %65 : vector<1x256xi32>
    %67 = arith.andi %62, %66 : vector<1x256xi1>
    %68 = arith.andi %58, %67 : vector<1x256xi1>
    %cst_24 = arith.constant 0.000000e+00 : f32
    %69 = vector.shape_cast %68 : vector<1x256xi1> to vector<1x256xi1>
    %70 = vector.broadcast %69 : vector<1x256xi1> to vector<4x256xi1>
    %71 = vector.broadcast %cst_24 : f32 to vector<4x256xf32>
    %72 = arith.select %70, %49, %71 : vector<4x256xi1>, vector<4x256xf32>
    %73 = arith.truncf %72 : vector<4x256xf32> to vector<4x256xbf16>
    %c1_i32_25 = arith.constant 1 : i32
    %74 = tpu.dynamic_rotate %1 by %c1_i32_25 dim 1 : vector<4x256xf32>, i32 -> vector<4x256xf32>
    %c-1_i32_26 = arith.constant -1 : i32
    %75 = vector.broadcast %c-1_i32_26 : i32 to vector<1x256xi32>
    %76 = arith.addi %7, %75 : vector<1x256xi32>
    %c0_i32_27 = arith.constant 0 : i32
    %77 = vector.broadcast %c0_i32_27 : i32 to vector<1x256xi32>
    %78 = arith.cmpi sge, %76, %77 : vector<1x256xi32>
    %c-1_i32_28 = arith.constant -1 : i32
    %79 = vector.broadcast %c-1_i32_28 : i32 to vector<1x256xi32>
    %80 = arith.addi %7, %79 : vector<1x256xi32>
    %c15_i32_29 = arith.constant 15 : i32
    %81 = vector.broadcast %c15_i32_29 : i32 to vector<1x256xi32>
    %82 = arith.cmpi sle, %80, %81 : vector<1x256xi32>
    %83 = arith.andi %78, %82 : vector<1x256xi1>
    %cst_30 = arith.constant 0.000000e+00 : f32
    %84 = vector.shape_cast %83 : vector<1x256xi1> to vector<1x256xi1>
    %85 = vector.broadcast %84 : vector<1x256xi1> to vector<4x256xi1>
    %86 = vector.broadcast %cst_30 : f32 to vector<4x256xf32>
    %87 = arith.select %85, %74, %86 : vector<4x256xi1>, vector<4x256xf32>
    %88 = arith.truncf %87 : vector<4x256xf32> to vector<4x256xbf16>
    %89 = arith.truncf %1 : vector<4x256xf32> to vector<4x256xbf16>
    %c255_i32 = arith.constant 255 : i32
    %90 = tpu.dynamic_rotate %1 by %c255_i32 dim 1 : vector<4x256xf32>, i32 -> vector<4x256xf32>
    %c1_i32_31 = arith.constant 1 : i32
    %91 = vector.broadcast %c1_i32_31 : i32 to vector<1x256xi32>
    %92 = arith.addi %7, %91 : vector<1x256xi32>
    %c0_i32_32 = arith.constant 0 : i32
    %93 = vector.broadcast %c0_i32_32 : i32 to vector<1x256xi32>
    %94 = arith.cmpi sge, %92, %93 : vector<1x256xi32>
    %c1_i32_33 = arith.constant 1 : i32
    %95 = vector.broadcast %c1_i32_33 : i32 to vector<1x256xi32>
    %96 = arith.addi %7, %95 : vector<1x256xi32>
    %c15_i32_34 = arith.constant 15 : i32
    %97 = vector.broadcast %c15_i32_34 : i32 to vector<1x256xi32>
    %98 = arith.cmpi sle, %96, %97 : vector<1x256xi32>
    %99 = arith.andi %94, %98 : vector<1x256xi1>
    %cst_35 = arith.constant 0.000000e+00 : f32
    %100 = vector.shape_cast %99 : vector<1x256xi1> to vector<1x256xi1>
    %101 = vector.broadcast %100 : vector<1x256xi1> to vector<4x256xi1>
    %102 = vector.broadcast %cst_35 : f32 to vector<4x256xf32>
    %103 = arith.select %101, %90, %102 : vector<4x256xi1>, vector<4x256xf32>
    %104 = arith.truncf %103 : vector<4x256xf32> to vector<4x256xbf16>
    %c241_i32 = arith.constant 241 : i32
    %105 = tpu.dynamic_rotate %1 by %c241_i32 dim 1 : vector<4x256xf32>, i32 -> vector<4x256xf32>
    %c1_i32_36 = arith.constant 1 : i32
    %106 = vector.broadcast %c1_i32_36 : i32 to vector<1x256xi32>
    %107 = arith.addi %5, %106 : vector<1x256xi32>
    %c0_i32_37 = arith.constant 0 : i32
    %108 = vector.broadcast %c0_i32_37 : i32 to vector<1x256xi32>
    %109 = arith.cmpi sge, %107, %108 : vector<1x256xi32>
    %c1_i32_38 = arith.constant 1 : i32
    %110 = vector.broadcast %c1_i32_38 : i32 to vector<1x256xi32>
    %111 = arith.addi %5, %110 : vector<1x256xi32>
    %c15_i32_39 = arith.constant 15 : i32
    %112 = vector.broadcast %c15_i32_39 : i32 to vector<1x256xi32>
    %113 = arith.cmpi sle, %111, %112 : vector<1x256xi32>
    %114 = arith.andi %109, %113 : vector<1x256xi1>
    %c-1_i32_40 = arith.constant -1 : i32
    %115 = vector.broadcast %c-1_i32_40 : i32 to vector<1x256xi32>
    %116 = arith.addi %7, %115 : vector<1x256xi32>
    %c0_i32_41 = arith.constant 0 : i32
    %117 = vector.broadcast %c0_i32_41 : i32 to vector<1x256xi32>
    %118 = arith.cmpi sge, %116, %117 : vector<1x256xi32>
    %c-1_i32_42 = arith.constant -1 : i32
    %119 = vector.broadcast %c-1_i32_42 : i32 to vector<1x256xi32>
    %120 = arith.addi %7, %119 : vector<1x256xi32>
    %c15_i32_43 = arith.constant 15 : i32
    %121 = vector.broadcast %c15_i32_43 : i32 to vector<1x256xi32>
    %122 = arith.cmpi sle, %120, %121 : vector<1x256xi32>
    %123 = arith.andi %118, %122 : vector<1x256xi1>
    %124 = arith.andi %114, %123 : vector<1x256xi1>
    %cst_44 = arith.constant 0.000000e+00 : f32
    %125 = vector.shape_cast %124 : vector<1x256xi1> to vector<1x256xi1>
    %126 = vector.broadcast %125 : vector<1x256xi1> to vector<4x256xi1>
    %127 = vector.broadcast %cst_44 : f32 to vector<4x256xf32>
    %128 = arith.select %126, %105, %127 : vector<4x256xi1>, vector<4x256xf32>
    %129 = arith.truncf %128 : vector<4x256xf32> to vector<4x256xbf16>
    %c240_i32 = arith.constant 240 : i32
    %130 = tpu.dynamic_rotate %1 by %c240_i32 dim 1 : vector<4x256xf32>, i32 -> vector<4x256xf32>
    %c1_i32_45 = arith.constant 1 : i32
    %131 = vector.broadcast %c1_i32_45 : i32 to vector<1x256xi32>
    %132 = arith.addi %5, %131 : vector<1x256xi32>
    %c0_i32_46 = arith.constant 0 : i32
    %133 = vector.broadcast %c0_i32_46 : i32 to vector<1x256xi32>
    %134 = arith.cmpi sge, %132, %133 : vector<1x256xi32>
    %c1_i32_47 = arith.constant 1 : i32
    %135 = vector.broadcast %c1_i32_47 : i32 to vector<1x256xi32>
    %136 = arith.addi %5, %135 : vector<1x256xi32>
    %c15_i32_48 = arith.constant 15 : i32
    %137 = vector.broadcast %c15_i32_48 : i32 to vector<1x256xi32>
    %138 = arith.cmpi sle, %136, %137 : vector<1x256xi32>
    %139 = arith.andi %134, %138 : vector<1x256xi1>
    %cst_49 = arith.constant 0.000000e+00 : f32
    %140 = vector.shape_cast %139 : vector<1x256xi1> to vector<1x256xi1>
    %141 = vector.broadcast %140 : vector<1x256xi1> to vector<4x256xi1>
    %142 = vector.broadcast %cst_49 : f32 to vector<4x256xf32>
    %143 = arith.select %141, %130, %142 : vector<4x256xi1>, vector<4x256xf32>
    %144 = arith.truncf %143 : vector<4x256xf32> to vector<4x256xbf16>
    %c239_i32 = arith.constant 239 : i32
    %145 = tpu.dynamic_rotate %1 by %c239_i32 dim 1 : vector<4x256xf32>, i32 -> vector<4x256xf32>
    %c1_i32_50 = arith.constant 1 : i32
    %146 = vector.broadcast %c1_i32_50 : i32 to vector<1x256xi32>
    %147 = arith.addi %5, %146 : vector<1x256xi32>
    %c0_i32_51 = arith.constant 0 : i32
    %148 = vector.broadcast %c0_i32_51 : i32 to vector<1x256xi32>
    %149 = arith.cmpi sge, %147, %148 : vector<1x256xi32>
    %c1_i32_52 = arith.constant 1 : i32
    %150 = vector.broadcast %c1_i32_52 : i32 to vector<1x256xi32>
    %151 = arith.addi %5, %150 : vector<1x256xi32>
    %c15_i32_53 = arith.constant 15 : i32
    %152 = vector.broadcast %c15_i32_53 : i32 to vector<1x256xi32>
    %153 = arith.cmpi sle, %151, %152 : vector<1x256xi32>
    %154 = arith.andi %149, %153 : vector<1x256xi1>
    %c1_i32_54 = arith.constant 1 : i32
    %155 = vector.broadcast %c1_i32_54 : i32 to vector<1x256xi32>
    %156 = arith.addi %7, %155 : vector<1x256xi32>
    %c0_i32_55 = arith.constant 0 : i32
    %157 = vector.broadcast %c0_i32_55 : i32 to vector<1x256xi32>
    %158 = arith.cmpi sge, %156, %157 : vector<1x256xi32>
    %c1_i32_56 = arith.constant 1 : i32
    %159 = vector.broadcast %c1_i32_56 : i32 to vector<1x256xi32>
    %160 = arith.addi %7, %159 : vector<1x256xi32>
    %c15_i32_57 = arith.constant 15 : i32
    %161 = vector.broadcast %c15_i32_57 : i32 to vector<1x256xi32>
    %162 = arith.cmpi sle, %160, %161 : vector<1x256xi32>
    %163 = arith.andi %158, %162 : vector<1x256xi1>
    %164 = arith.andi %154, %163 : vector<1x256xi1>
    %cst_58 = arith.constant 0.000000e+00 : f32
    %165 = vector.shape_cast %164 : vector<1x256xi1> to vector<1x256xi1>
    %166 = vector.broadcast %165 : vector<1x256xi1> to vector<4x256xi1>
    %167 = vector.broadcast %cst_58 : f32 to vector<4x256xf32>
    %168 = arith.select %166, %145, %167 : vector<4x256xi1>, vector<4x256xf32>
    %169 = arith.truncf %168 : vector<4x256xf32> to vector<4x256xbf16>
    %170 = tpu.concatenate %33, %48, %73, %88, %89, %104, %129, %144, %169 in 0 : vector<4x256xbf16>, vector<4x256xbf16>, vector<4x256xbf16>, vector<4x256xbf16>, vector<4x256xbf16>, vector<4x256xbf16>, vector<4x256xbf16>, vector<4x256xbf16>, vector<4x256xbf16> -> vector<36x256xbf16>
    %cst_59 = arith.constant dense<0.000000e+00> : vector<18x256xf32>
    %171 = tpu.matmul %2, %170, %cst_59 {dimension_numbers = #tpu.dot_dimension_numbers<[1], [0], [0], [1], [0, 0, 1, 1], [], []>} : vector<18x36xbf16>, vector<36x256xbf16>, vector<18x256xf32> -> vector<18x256xf32>
    %172 = arith.addf %8, %171 : vector<18x256xf32>
    %c0_60 = arith.constant 0 : index
    %c0_61 = arith.constant 0 : index
    %173 = vector.load %arg3[%c0_60, %c0_61] : memref<18x1xf32, #tpu.memory_space<vmem>>, vector<18x1xf32>
    %174 = vector.broadcast %173 : vector<18x1xf32> to vector<18x256xf32>
    %175 = arith.addf %172, %174 : vector<18x256xf32>
    %c0_62 = arith.constant 0 : index
    %c0_63 = arith.constant 0 : index
    %176 = vector.load %arg4[%c0_62, %c0_63] : memref<18x1xf32, #tpu.memory_space<vmem>>, vector<18x1xf32>
    %c0_64 = arith.constant 0 : index
    %c0_65 = arith.constant 0 : index
    %177 = vector.load %arg5[%c0_64, %c0_65] : memref<18x1xf32, #tpu.memory_space<vmem>>, vector<18x1xf32>
    %cst_66 = arith.constant dense<0.000000e+00> : vector<18xf32>
    %178 = vector.multi_reduction <add>, %175, %cst_66 [1] : vector<18x256xf32> to vector<18xf32>
    %179 = vector.shape_cast %178 : vector<18xf32> to vector<18x1xf32>
    %180 = arith.mulf %175, %175 : vector<18x256xf32>
    %cst_67 = arith.constant dense<0.000000e+00> : vector<18xf32>
    %181 = vector.multi_reduction <add>, %180, %cst_67 [1] : vector<18x256xf32> to vector<18xf32>
    %182 = vector.shape_cast %181 : vector<18xf32> to vector<18x1xf32>
    %183 = vector.extract_strided_slice %179 {offsets = [0, 0], sizes = [2, 1], strides = [1, 1]} : vector<18x1xf32> to vector<2x1xf32>
    %184 = vector.shape_cast %183 : vector<2x1xf32> to vector<1x2x1xf32>
    %cst_68 = arith.constant dense<0.000000e+00> : vector<1xf32>
    %185 = vector.multi_reduction <add>, %184, %cst_68 [1, 2] : vector<1x2x1xf32> to vector<1xf32>
    %186 = vector.shape_cast %185 : vector<1xf32> to vector<1x1x1xf32>
    %187 = vector.extract %186[0, 0, 0] : f32 from vector<1x1x1xf32>
    %188 = vector.broadcast %187 : f32 to vector<1x1xf32>
    %189 = vector.extract_strided_slice %182 {offsets = [0, 0], sizes = [2, 1], strides = [1, 1]} : vector<18x1xf32> to vector<2x1xf32>
    %190 = vector.shape_cast %189 : vector<2x1xf32> to vector<1x2x1xf32>
    %cst_69 = arith.constant dense<0.000000e+00> : vector<1xf32>
    %191 = vector.multi_reduction <add>, %190, %cst_69 [1, 2] : vector<1x2x1xf32> to vector<1xf32>
    %192 = vector.shape_cast %191 : vector<1xf32> to vector<1x1x1xf32>
    %193 = vector.extract %192[0, 0, 0] : f32 from vector<1x1x1xf32>
    %194 = vector.broadcast %193 : f32 to vector<1x1xf32>
    %cst_70 = arith.constant 5.120000e+02 : f32
    %195 = vector.broadcast %cst_70 : f32 to vector<1x1xf32>
    %196 = arith.divf %188, %195 : vector<1x1xf32>
    %cst_71 = arith.constant 5.120000e+02 : f32
    %197 = vector.broadcast %cst_71 : f32 to vector<1x1xf32>
    %198 = arith.divf %194, %197 : vector<1x1xf32>
    %199 = arith.mulf %196, %196 : vector<1x1xf32>
    %200 = arith.subf %198, %199 : vector<1x1xf32>
    %cst_72 = arith.constant 0.000000e+00 : f32
    %201 = vector.broadcast %cst_72 : f32 to vector<1x1xf32>
    %202 = arith.maximumf %200, %201 : vector<1x1xf32>
    %cst_73 = arith.constant 9.99999974E-6 : f32
    %203 = vector.broadcast %cst_73 : f32 to vector<1x1xf32>
    %204 = arith.addf %202, %203 : vector<1x1xf32>
    %205 = math.rsqrt %204 : vector<1x1xf32>
    %206 = vector.shape_cast %196 : vector<1x1xf32> to vector<1x1xf32>
    %207 = vector.broadcast %206 : vector<1x1xf32> to vector<2x1xf32>
    %208 = vector.shape_cast %205 : vector<1x1xf32> to vector<1x1xf32>
    %209 = vector.broadcast %208 : vector<1x1xf32> to vector<2x1xf32>
    %210 = vector.extract_strided_slice %179 {offsets = [2, 0], sizes = [2, 1], strides = [1, 1]} : vector<18x1xf32> to vector<2x1xf32>
    %211 = vector.shape_cast %210 : vector<2x1xf32> to vector<1x2x1xf32>
    %cst_74 = arith.constant dense<0.000000e+00> : vector<1xf32>
    %212 = vector.multi_reduction <add>, %211, %cst_74 [1, 2] : vector<1x2x1xf32> to vector<1xf32>
    %213 = vector.shape_cast %212 : vector<1xf32> to vector<1x1x1xf32>
    %214 = vector.extract %213[0, 0, 0] : f32 from vector<1x1x1xf32>
    %215 = vector.broadcast %214 : f32 to vector<1x1xf32>
    %216 = vector.extract_strided_slice %182 {offsets = [2, 0], sizes = [2, 1], strides = [1, 1]} : vector<18x1xf32> to vector<2x1xf32>
    %217 = vector.shape_cast %216 : vector<2x1xf32> to vector<1x2x1xf32>
    %cst_75 = arith.constant dense<0.000000e+00> : vector<1xf32>
    %218 = vector.multi_reduction <add>, %217, %cst_75 [1, 2] : vector<1x2x1xf32> to vector<1xf32>
    %219 = vector.shape_cast %218 : vector<1xf32> to vector<1x1x1xf32>
    %220 = vector.extract %219[0, 0, 0] : f32 from vector<1x1x1xf32>
    %221 = vector.broadcast %220 : f32 to vector<1x1xf32>
    %cst_76 = arith.constant 5.120000e+02 : f32
    %222 = vector.broadcast %cst_76 : f32 to vector<1x1xf32>
    %223 = arith.divf %215, %222 : vector<1x1xf32>
    %cst_77 = arith.constant 5.120000e+02 : f32
    %224 = vector.broadcast %cst_77 : f32 to vector<1x1xf32>
    %225 = arith.divf %221, %224 : vector<1x1xf32>
    %226 = arith.mulf %223, %223 : vector<1x1xf32>
    %227 = arith.subf %225, %226 : vector<1x1xf32>
    %cst_78 = arith.constant 0.000000e+00 : f32
    %228 = vector.broadcast %cst_78 : f32 to vector<1x1xf32>
    %229 = arith.maximumf %227, %228 : vector<1x1xf32>
    %cst_79 = arith.constant 9.99999974E-6 : f32
    %230 = vector.broadcast %cst_79 : f32 to vector<1x1xf32>
    %231 = arith.addf %229, %230 : vector<1x1xf32>
    %232 = math.rsqrt %231 : vector<1x1xf32>
    %233 = vector.shape_cast %223 : vector<1x1xf32> to vector<1x1xf32>
    %234 = vector.broadcast %233 : vector<1x1xf32> to vector<2x1xf32>
    %235 = vector.shape_cast %232 : vector<1x1xf32> to vector<1x1xf32>
    %236 = vector.broadcast %235 : vector<1x1xf32> to vector<2x1xf32>
    %237 = vector.extract_strided_slice %179 {offsets = [4, 0], sizes = [2, 1], strides = [1, 1]} : vector<18x1xf32> to vector<2x1xf32>
    %238 = vector.shape_cast %237 : vector<2x1xf32> to vector<1x2x1xf32>
    %cst_80 = arith.constant dense<0.000000e+00> : vector<1xf32>
    %239 = vector.multi_reduction <add>, %238, %cst_80 [1, 2] : vector<1x2x1xf32> to vector<1xf32>
    %240 = vector.shape_cast %239 : vector<1xf32> to vector<1x1x1xf32>
    %241 = vector.extract %240[0, 0, 0] : f32 from vector<1x1x1xf32>
    %242 = vector.broadcast %241 : f32 to vector<1x1xf32>
    %243 = vector.extract_strided_slice %182 {offsets = [4, 0], sizes = [2, 1], strides = [1, 1]} : vector<18x1xf32> to vector<2x1xf32>
    %244 = vector.shape_cast %243 : vector<2x1xf32> to vector<1x2x1xf32>
    %cst_81 = arith.constant dense<0.000000e+00> : vector<1xf32>
    %245 = vector.multi_reduction <add>, %244, %cst_81 [1, 2] : vector<1x2x1xf32> to vector<1xf32>
    %246 = vector.shape_cast %245 : vector<1xf32> to vector<1x1x1xf32>
    %247 = vector.extract %246[0, 0, 0] : f32 from vector<1x1x1xf32>
    %248 = vector.broadcast %247 : f32 to vector<1x1xf32>
    %cst_82 = arith.constant 5.120000e+02 : f32
    %249 = vector.broadcast %cst_82 : f32 to vector<1x1xf32>
    %250 = arith.divf %242, %249 : vector<1x1xf32>
    %cst_83 = arith.constant 5.120000e+02 : f32
    %251 = vector.broadcast %cst_83 : f32 to vector<1x1xf32>
    %252 = arith.divf %248, %251 : vector<1x1xf32>
    %253 = arith.mulf %250, %250 : vector<1x1xf32>
    %254 = arith.subf %252, %253 : vector<1x1xf32>
    %cst_84 = arith.constant 0.000000e+00 : f32
    %255 = vector.broadcast %cst_84 : f32 to vector<1x1xf32>
    %256 = arith.maximumf %254, %255 : vector<1x1xf32>
    %cst_85 = arith.constant 9.99999974E-6 : f32
    %257 = vector.broadcast %cst_85 : f32 to vector<1x1xf32>
    %258 = arith.addf %256, %257 : vector<1x1xf32>
    %259 = math.rsqrt %258 : vector<1x1xf32>
    %260 = vector.shape_cast %250 : vector<1x1xf32> to vector<1x1xf32>
    %261 = vector.broadcast %260 : vector<1x1xf32> to vector<2x1xf32>
    %262 = vector.shape_cast %259 : vector<1x1xf32> to vector<1x1xf32>
    %263 = vector.broadcast %262 : vector<1x1xf32> to vector<2x1xf32>
    %264 = vector.extract_strided_slice %179 {offsets = [6, 0], sizes = [2, 1], strides = [1, 1]} : vector<18x1xf32> to vector<2x1xf32>
    %265 = vector.shape_cast %264 : vector<2x1xf32> to vector<1x2x1xf32>
    %cst_86 = arith.constant dense<0.000000e+00> : vector<1xf32>
    %266 = vector.multi_reduction <add>, %265, %cst_86 [1, 2] : vector<1x2x1xf32> to vector<1xf32>
    %267 = vector.shape_cast %266 : vector<1xf32> to vector<1x1x1xf32>
    %268 = vector.extract %267[0, 0, 0] : f32 from vector<1x1x1xf32>
    %269 = vector.broadcast %268 : f32 to vector<1x1xf32>
    %270 = vector.extract_strided_slice %182 {offsets = [6, 0], sizes = [2, 1], strides = [1, 1]} : vector<18x1xf32> to vector<2x1xf32>
    %271 = vector.shape_cast %270 : vector<2x1xf32> to vector<1x2x1xf32>
    %cst_87 = arith.constant dense<0.000000e+00> : vector<1xf32>
    %272 = vector.multi_reduction <add>, %271, %cst_87 [1, 2] : vector<1x2x1xf32> to vector<1xf32>
    %273 = vector.shape_cast %272 : vector<1xf32> to vector<1x1x1xf32>
    %274 = vector.extract %273[0, 0, 0] : f32 from vector<1x1x1xf32>
    %275 = vector.broadcast %274 : f32 to vector<1x1xf32>
    %cst_88 = arith.constant 5.120000e+02 : f32
    %276 = vector.broadcast %cst_88 : f32 to vector<1x1xf32>
    %277 = arith.divf %269, %276 : vector<1x1xf32>
    %cst_89 = arith.constant 5.120000e+02 : f32
    %278 = vector.broadcast %cst_89 : f32 to vector<1x1xf32>
    %279 = arith.divf %275, %278 : vector<1x1xf32>
    %280 = arith.mulf %277, %277 : vector<1x1xf32>
    %281 = arith.subf %279, %280 : vector<1x1xf32>
    %cst_90 = arith.constant 0.000000e+00 : f32
    %282 = vector.broadcast %cst_90 : f32 to vector<1x1xf32>
    %283 = arith.maximumf %281, %282 : vector<1x1xf32>
    %cst_91 = arith.constant 9.99999974E-6 : f32
    %284 = vector.broadcast %cst_91 : f32 to vector<1x1xf32>
    %285 = arith.addf %283, %284 : vector<1x1xf32>
    %286 = math.rsqrt %285 : vector<1x1xf32>
    %287 = vector.shape_cast %277 : vector<1x1xf32> to vector<1x1xf32>
    %288 = vector.broadcast %287 : vector<1x1xf32> to vector<2x1xf32>
    %289 = vector.shape_cast %286 : vector<1x1xf32> to vector<1x1xf32>
    %290 = vector.broadcast %289 : vector<1x1xf32> to vector<2x1xf32>
    %291 = vector.extract_strided_slice %179 {offsets = [8, 0], sizes = [2, 1], strides = [1, 1]} : vector<18x1xf32> to vector<2x1xf32>
    %292 = vector.shape_cast %291 : vector<2x1xf32> to vector<1x2x1xf32>
    %cst_92 = arith.constant dense<0.000000e+00> : vector<1xf32>
    %293 = vector.multi_reduction <add>, %292, %cst_92 [1, 2] : vector<1x2x1xf32> to vector<1xf32>
    %294 = vector.shape_cast %293 : vector<1xf32> to vector<1x1x1xf32>
    %295 = vector.extract %294[0, 0, 0] : f32 from vector<1x1x1xf32>
    %296 = vector.broadcast %295 : f32 to vector<1x1xf32>
    %297 = vector.extract_strided_slice %182 {offsets = [8, 0], sizes = [2, 1], strides = [1, 1]} : vector<18x1xf32> to vector<2x1xf32>
    %298 = vector.shape_cast %297 : vector<2x1xf32> to vector<1x2x1xf32>
    %cst_93 = arith.constant dense<0.000000e+00> : vector<1xf32>
    %299 = vector.multi_reduction <add>, %298, %cst_93 [1, 2] : vector<1x2x1xf32> to vector<1xf32>
    %300 = vector.shape_cast %299 : vector<1xf32> to vector<1x1x1xf32>
    %301 = vector.extract %300[0, 0, 0] : f32 from vector<1x1x1xf32>
    %302 = vector.broadcast %301 : f32 to vector<1x1xf32>
    %cst_94 = arith.constant 5.120000e+02 : f32
    %303 = vector.broadcast %cst_94 : f32 to vector<1x1xf32>
    %304 = arith.divf %296, %303 : vector<1x1xf32>
    %cst_95 = arith.constant 5.120000e+02 : f32
    %305 = vector.broadcast %cst_95 : f32 to vector<1x1xf32>
    %306 = arith.divf %302, %305 : vector<1x1xf32>
    %307 = arith.mulf %304, %304 : vector<1x1xf32>
    %308 = arith.subf %306, %307 : vector<1x1xf32>
    %cst_96 = arith.constant 0.000000e+00 : f32
    %309 = vector.broadcast %cst_96 : f32 to vector<1x1xf32>
    %310 = arith.maximumf %308, %309 : vector<1x1xf32>
    %cst_97 = arith.constant 9.99999974E-6 : f32
    %311 = vector.broadcast %cst_97 : f32 to vector<1x1xf32>
    %312 = arith.addf %310, %311 : vector<1x1xf32>
    %313 = math.rsqrt %312 : vector<1x1xf32>
    %314 = vector.shape_cast %304 : vector<1x1xf32> to vector<1x1xf32>
    %315 = vector.broadcast %314 : vector<1x1xf32> to vector<2x1xf32>
    %316 = vector.shape_cast %313 : vector<1x1xf32> to vector<1x1xf32>
    %317 = vector.broadcast %316 : vector<1x1xf32> to vector<2x1xf32>
    %318 = vector.extract_strided_slice %179 {offsets = [10, 0], sizes = [2, 1], strides = [1, 1]} : vector<18x1xf32> to vector<2x1xf32>
    %319 = vector.shape_cast %318 : vector<2x1xf32> to vector<1x2x1xf32>
    %cst_98 = arith.constant dense<0.000000e+00> : vector<1xf32>
    %320 = vector.multi_reduction <add>, %319, %cst_98 [1, 2] : vector<1x2x1xf32> to vector<1xf32>
    %321 = vector.shape_cast %320 : vector<1xf32> to vector<1x1x1xf32>
    %322 = vector.extract %321[0, 0, 0] : f32 from vector<1x1x1xf32>
    %323 = vector.broadcast %322 : f32 to vector<1x1xf32>
    %324 = vector.extract_strided_slice %182 {offsets = [10, 0], sizes = [2, 1], strides = [1, 1]} : vector<18x1xf32> to vector<2x1xf32>
    %325 = vector.shape_cast %324 : vector<2x1xf32> to vector<1x2x1xf32>
    %cst_99 = arith.constant dense<0.000000e+00> : vector<1xf32>
    %326 = vector.multi_reduction <add>, %325, %cst_99 [1, 2] : vector<1x2x1xf32> to vector<1xf32>
    %327 = vector.shape_cast %326 : vector<1xf32> to vector<1x1x1xf32>
    %328 = vector.extract %327[0, 0, 0] : f32 from vector<1x1x1xf32>
    %329 = vector.broadcast %328 : f32 to vector<1x1xf32>
    %cst_100 = arith.constant 5.120000e+02 : f32
    %330 = vector.broadcast %cst_100 : f32 to vector<1x1xf32>
    %331 = arith.divf %323, %330 : vector<1x1xf32>
    %cst_101 = arith.constant 5.120000e+02 : f32
    %332 = vector.broadcast %cst_101 : f32 to vector<1x1xf32>
    %333 = arith.divf %329, %332 : vector<1x1xf32>
    %334 = arith.mulf %331, %331 : vector<1x1xf32>
    %335 = arith.subf %333, %334 : vector<1x1xf32>
    %cst_102 = arith.constant 0.000000e+00 : f32
    %336 = vector.broadcast %cst_102 : f32 to vector<1x1xf32>
    %337 = arith.maximumf %335, %336 : vector<1x1xf32>
    %cst_103 = arith.constant 9.99999974E-6 : f32
    %338 = vector.broadcast %cst_103 : f32 to vector<1x1xf32>
    %339 = arith.addf %337, %338 : vector<1x1xf32>
    %340 = math.rsqrt %339 : vector<1x1xf32>
    %341 = vector.shape_cast %331 : vector<1x1xf32> to vector<1x1xf32>
    %342 = vector.broadcast %341 : vector<1x1xf32> to vector<2x1xf32>
    %343 = vector.shape_cast %340 : vector<1x1xf32> to vector<1x1xf32>
    %344 = vector.broadcast %343 : vector<1x1xf32> to vector<2x1xf32>
    %345 = vector.extract_strided_slice %179 {offsets = [12, 0], sizes = [2, 1], strides = [1, 1]} : vector<18x1xf32> to vector<2x1xf32>
    %346 = vector.shape_cast %345 : vector<2x1xf32> to vector<1x2x1xf32>
    %cst_104 = arith.constant dense<0.000000e+00> : vector<1xf32>
    %347 = vector.multi_reduction <add>, %346, %cst_104 [1, 2] : vector<1x2x1xf32> to vector<1xf32>
    %348 = vector.shape_cast %347 : vector<1xf32> to vector<1x1x1xf32>
    %349 = vector.extract %348[0, 0, 0] : f32 from vector<1x1x1xf32>
    %350 = vector.broadcast %349 : f32 to vector<1x1xf32>
    %351 = vector.extract_strided_slice %182 {offsets = [12, 0], sizes = [2, 1], strides = [1, 1]} : vector<18x1xf32> to vector<2x1xf32>
    %352 = vector.shape_cast %351 : vector<2x1xf32> to vector<1x2x1xf32>
    %cst_105 = arith.constant dense<0.000000e+00> : vector<1xf32>
    %353 = vector.multi_reduction <add>, %352, %cst_105 [1, 2] : vector<1x2x1xf32> to vector<1xf32>
    %354 = vector.shape_cast %353 : vector<1xf32> to vector<1x1x1xf32>
    %355 = vector.extract %354[0, 0, 0] : f32 from vector<1x1x1xf32>
    %356 = vector.broadcast %355 : f32 to vector<1x1xf32>
    %cst_106 = arith.constant 5.120000e+02 : f32
    %357 = vector.broadcast %cst_106 : f32 to vector<1x1xf32>
    %358 = arith.divf %350, %357 : vector<1x1xf32>
    %cst_107 = arith.constant 5.120000e+02 : f32
    %359 = vector.broadcast %cst_107 : f32 to vector<1x1xf32>
    %360 = arith.divf %356, %359 : vector<1x1xf32>
    %361 = arith.mulf %358, %358 : vector<1x1xf32>
    %362 = arith.subf %360, %361 : vector<1x1xf32>
    %cst_108 = arith.constant 0.000000e+00 : f32
    %363 = vector.broadcast %cst_108 : f32 to vector<1x1xf32>
    %364 = arith.maximumf %362, %363 : vector<1x1xf32>
    %cst_109 = arith.constant 9.99999974E-6 : f32
    %365 = vector.broadcast %cst_109 : f32 to vector<1x1xf32>
    %366 = arith.addf %364, %365 : vector<1x1xf32>
    %367 = math.rsqrt %366 : vector<1x1xf32>
    %368 = vector.shape_cast %358 : vector<1x1xf32> to vector<1x1xf32>
    %369 = vector.broadcast %368 : vector<1x1xf32> to vector<2x1xf32>
    %370 = vector.shape_cast %367 : vector<1x1xf32> to vector<1x1xf32>
    %371 = vector.broadcast %370 : vector<1x1xf32> to vector<2x1xf32>
    %372 = vector.extract_strided_slice %179 {offsets = [14, 0], sizes = [2, 1], strides = [1, 1]} : vector<18x1xf32> to vector<2x1xf32>
    %373 = vector.shape_cast %372 : vector<2x1xf32> to vector<1x2x1xf32>
    %cst_110 = arith.constant dense<0.000000e+00> : vector<1xf32>
    %374 = vector.multi_reduction <add>, %373, %cst_110 [1, 2] : vector<1x2x1xf32> to vector<1xf32>
    %375 = vector.shape_cast %374 : vector<1xf32> to vector<1x1x1xf32>
    %376 = vector.extract %375[0, 0, 0] : f32 from vector<1x1x1xf32>
    %377 = vector.broadcast %376 : f32 to vector<1x1xf32>
    %378 = vector.extract_strided_slice %182 {offsets = [14, 0], sizes = [2, 1], strides = [1, 1]} : vector<18x1xf32> to vector<2x1xf32>
    %379 = vector.shape_cast %378 : vector<2x1xf32> to vector<1x2x1xf32>
    %cst_111 = arith.constant dense<0.000000e+00> : vector<1xf32>
    %380 = vector.multi_reduction <add>, %379, %cst_111 [1, 2] : vector<1x2x1xf32> to vector<1xf32>
    %381 = vector.shape_cast %380 : vector<1xf32> to vector<1x1x1xf32>
    %382 = vector.extract %381[0, 0, 0] : f32 from vector<1x1x1xf32>
    %383 = vector.broadcast %382 : f32 to vector<1x1xf32>
    %cst_112 = arith.constant 5.120000e+02 : f32
    %384 = vector.broadcast %cst_112 : f32 to vector<1x1xf32>
    %385 = arith.divf %377, %384 : vector<1x1xf32>
    %cst_113 = arith.constant 5.120000e+02 : f32
    %386 = vector.broadcast %cst_113 : f32 to vector<1x1xf32>
    %387 = arith.divf %383, %386 : vector<1x1xf32>
    %388 = arith.mulf %385, %385 : vector<1x1xf32>
    %389 = arith.subf %387, %388 : vector<1x1xf32>
    %cst_114 = arith.constant 0.000000e+00 : f32
    %390 = vector.broadcast %cst_114 : f32 to vector<1x1xf32>
    %391 = arith.maximumf %389, %390 : vector<1x1xf32>
    %cst_115 = arith.constant 9.99999974E-6 : f32
    %392 = vector.broadcast %cst_115 : f32 to vector<1x1xf32>
    %393 = arith.addf %391, %392 : vector<1x1xf32>
    %394 = math.rsqrt %393 : vector<1x1xf32>
    %395 = vector.shape_cast %385 : vector<1x1xf32> to vector<1x1xf32>
    %396 = vector.broadcast %395 : vector<1x1xf32> to vector<2x1xf32>
    %397 = vector.shape_cast %394 : vector<1x1xf32> to vector<1x1xf32>
    %398 = vector.broadcast %397 : vector<1x1xf32> to vector<2x1xf32>
    %399 = vector.extract_strided_slice %179 {offsets = [16, 0], sizes = [2, 1], strides = [1, 1]} : vector<18x1xf32> to vector<2x1xf32>
    %400 = vector.shape_cast %399 : vector<2x1xf32> to vector<1x2x1xf32>
    %cst_116 = arith.constant dense<0.000000e+00> : vector<1xf32>
    %401 = vector.multi_reduction <add>, %400, %cst_116 [1, 2] : vector<1x2x1xf32> to vector<1xf32>
    %402 = vector.shape_cast %401 : vector<1xf32> to vector<1x1x1xf32>
    %403 = vector.extract %402[0, 0, 0] : f32 from vector<1x1x1xf32>
    %404 = vector.broadcast %403 : f32 to vector<1x1xf32>
    %405 = vector.extract_strided_slice %182 {offsets = [16, 0], sizes = [2, 1], strides = [1, 1]} : vector<18x1xf32> to vector<2x1xf32>
    %406 = vector.shape_cast %405 : vector<2x1xf32> to vector<1x2x1xf32>
    %cst_117 = arith.constant dense<0.000000e+00> : vector<1xf32>
    %407 = vector.multi_reduction <add>, %406, %cst_117 [1, 2] : vector<1x2x1xf32> to vector<1xf32>
    %408 = vector.shape_cast %407 : vector<1xf32> to vector<1x1x1xf32>
    %409 = vector.extract %408[0, 0, 0] : f32 from vector<1x1x1xf32>
    %410 = vector.broadcast %409 : f32 to vector<1x1xf32>
    %cst_118 = arith.constant 5.120000e+02 : f32
    %411 = vector.broadcast %cst_118 : f32 to vector<1x1xf32>
    %412 = arith.divf %404, %411 : vector<1x1xf32>
    %cst_119 = arith.constant 5.120000e+02 : f32
    %413 = vector.broadcast %cst_119 : f32 to vector<1x1xf32>
    %414 = arith.divf %410, %413 : vector<1x1xf32>
    %415 = arith.mulf %412, %412 : vector<1x1xf32>
    %416 = arith.subf %414, %415 : vector<1x1xf32>
    %cst_120 = arith.constant 0.000000e+00 : f32
    %417 = vector.broadcast %cst_120 : f32 to vector<1x1xf32>
    %418 = arith.maximumf %416, %417 : vector<1x1xf32>
    %cst_121 = arith.constant 9.99999974E-6 : f32
    %419 = vector.broadcast %cst_121 : f32 to vector<1x1xf32>
    %420 = arith.addf %418, %419 : vector<1x1xf32>
    %421 = math.rsqrt %420 : vector<1x1xf32>
    %422 = vector.shape_cast %412 : vector<1x1xf32> to vector<1x1xf32>
    %423 = vector.broadcast %422 : vector<1x1xf32> to vector<2x1xf32>
    %424 = vector.shape_cast %421 : vector<1x1xf32> to vector<1x1xf32>
    %425 = vector.broadcast %424 : vector<1x1xf32> to vector<2x1xf32>
    %426 = tpu.concatenate %207, %234, %261, %288, %315, %342, %369, %396, %423 in 0 : vector<2x1xf32>, vector<2x1xf32>, vector<2x1xf32>, vector<2x1xf32>, vector<2x1xf32>, vector<2x1xf32>, vector<2x1xf32>, vector<2x1xf32>, vector<2x1xf32> -> vector<18x1xf32>
    %427 = tpu.concatenate %209, %236, %263, %290, %317, %344, %371, %398, %425 in 0 : vector<2x1xf32>, vector<2x1xf32>, vector<2x1xf32>, vector<2x1xf32>, vector<2x1xf32>, vector<2x1xf32>, vector<2x1xf32>, vector<2x1xf32>, vector<2x1xf32> -> vector<18x1xf32>
    %428 = vector.broadcast %426 : vector<18x1xf32> to vector<18x256xf32>
    %429 = arith.subf %175, %428 : vector<18x256xf32>
    %430 = vector.broadcast %427 : vector<18x1xf32> to vector<18x256xf32>
    %431 = arith.mulf %429, %430 : vector<18x256xf32>
    %432 = vector.broadcast %176 : vector<18x1xf32> to vector<18x256xf32>
    %433 = arith.mulf %431, %432 : vector<18x256xf32>
    %434 = vector.broadcast %177 : vector<18x1xf32> to vector<18x256xf32>
    %435 = arith.addf %433, %434 : vector<18x256xf32>
    %436 = math.tanh %435 : vector<18x256xf32>
    %c0_122 = arith.constant 0 : index
    %c0_123 = arith.constant 0 : index
    %c0_124 = arith.constant 0 : index
    %437 = vector.load %arg6[%c0_122, %c0_123, %c0_124] : memref<1x18x256xf32, #tpu.memory_space<vmem>>, vector<1x18x256xf32>
    %438 = vector.shape_cast %437 : vector<1x18x256xf32> to vector<18x256xf32>
    %439 = vector.shape_cast %436 : vector<18x256xf32> to vector<1x18x256xf32>
    tpu.vector_store %arg6[%c0_122, %c0_123, %c0_124], %439 {strides = array<i32>} : memref<1x18x256xf32, #tpu.memory_space<vmem>>, vector<1x18x256xf32>,
    return
  }
  func.func @transform_0(%arg0: i32) -> (i32, i32, i32) {
    %c0_i32 = arith.constant 0 : i32
    %c0_i32_0 = arith.constant 0 : i32
    %c0_i32_1 = arith.constant 0 : i32
    return %arg0, %c0_i32, %c0_i32_0 : i32, i32, i32
  }
  func.func @transform_1(%arg0: i32) -> (i32, i32) {
    %c0_i32 = arith.constant 0 : i32
    %c0_i32_0 = arith.constant 0 : i32
    %c0_i32_1 = arith.constant 0 : i32
    return %c0_i32, %c0_i32_0 : i32, i32
  }
  func.func @transform_2(%arg0: i32) -> (i32, i32) {
    %c0_i32 = arith.constant 0 : i32
    %c0_i32_0 = arith.constant 0 : i32
    %c0_i32_1 = arith.constant 0 : i32
    return %c0_i32, %c0_i32_0 : i32, i32
  }
  func.func @transform_3(%arg0: i32) -> (i32, i32) {
    %c0_i32 = arith.constant 0 : i32
    %c0_i32_0 = arith.constant 0 : i32
    %c0_i32_1 = arith.constant 0 : i32
    return %c0_i32, %c0_i32_0 : i32, i32
  }
  func.func @transform_4(%arg0: i32) -> (i32, i32) {
    %c0_i32 = arith.constant 0 : i32
    %c0_i32_0 = arith.constant 0 : i32
    %c0_i32_1 = arith.constant 0 : i32
    return %c0_i32, %c0_i32_0 : i32, i32
  }
  func.func @transform_5(%arg0: i32) -> (i32, i32, i32) {
    %c0_i32 = arith.constant 0 : i32
    %c0_i32_0 = arith.constant 0 : i32
    %c0_i32_1 = arith.constant 0 : i32
    return %arg0, %c0_i32, %c0_i32_0 : i32, i32, i32
  }
}

module attributes {stable_mosaic.version = 11 : i64} {
  func.func @_dsc_kernel(%arg0: i32, %arg1: memref<1x4x256xf32, #tpu.memory_space<vmem>>, %arg2: memref<1x18x256xf32, #tpu.memory_space<vmem>>, %arg3: memref<8x36xbf16, #tpu.memory_space<vmem>>, %arg4: memref<8x1xf32, #tpu.memory_space<vmem>>, %arg5: memref<8x1xf32, #tpu.memory_space<vmem>>, %arg6: memref<8x1xf32, #tpu.memory_space<vmem>>, %arg7: memref<1x8x256xf32, #tpu.memory_space<vmem>>) attributes {dimension_semantics = [#tpu.dimension_semantics<parallel>], iteration_bounds = array<i64: 2>, scalar_prefetch = 0 : i64, scratch_operands = 0 : i64, tpu.core_type = #tpu.core_type<tc>, window_params = [{transform_indices = @transform_0, window_bounds = array<i64: 1, 4, 256>}, {transform_indices = @transform_1, window_bounds = array<i64: 1, 18, 256>}, {pipeline_mode = #tpu.pipeline_mode<synchronous>, transform_indices = @transform_2, window_bounds = array<i64: 8, 36>}, {pipeline_mode = #tpu.pipeline_mode<synchronous>, transform_indices = @transform_3, window_bounds = array<i64: 8, 1>}, {pipeline_mode = #tpu.pipeline_mode<synchronous>, transform_indices = @transform_4, window_bounds = array<i64: 8, 1>}, {pipeline_mode = #tpu.pipeline_mode<synchronous>, transform_indices = @transform_5, window_bounds = array<i64: 8, 1>}, {transform_indices = @transform_6, window_bounds = array<i64: 1, 8, 256>}]} {
    %c0 = arith.constant 0 : index
    %c0_0 = arith.constant 0 : index
    %c0_1 = arith.constant 0 : index
    %0 = vector.load %arg1[%c0, %c0_0, %c0_1] : memref<1x4x256xf32, #tpu.memory_space<vmem>>, vector<1x4x256xf32>
    %1 = vector.shape_cast %0 : vector<1x4x256xf32> to vector<4x256xf32>
    %c0_2 = arith.constant 0 : index
    %c0_3 = arith.constant 0 : index
    %c0_4 = arith.constant 0 : index
    %2 = vector.load %arg2[%c0_2, %c0_3, %c0_4] : memref<1x18x256xf32, #tpu.memory_space<vmem>>, vector<1x18x256xf32>
    %3 = vector.shape_cast %2 : vector<1x18x256xf32> to vector<18x256xf32>
    %c0_5 = arith.constant 0 : index
    %c0_6 = arith.constant 0 : index
    %4 = vector.load %arg3[%c0_5, %c0_6] : memref<8x36xbf16, #tpu.memory_space<vmem>>, vector<8x36xbf16>
    %5 = tpu.iota {dimensions = array<i32: 1>} : vector<1x256xi32>
    %c4_i32 = arith.constant 4 : i32
    %6 = vector.broadcast %c4_i32 : i32 to vector<1x256xi32>
    %7 = arith.shrsi %5, %6 : vector<1x256xi32>
    %c15_i32 = arith.constant 15 : i32
    %8 = vector.broadcast %c15_i32 : i32 to vector<1x256xi32>
    %9 = arith.andi %5, %8 : vector<1x256xi32>
    %c15_i32_7 = arith.constant 15 : i32
    %10 = vector.broadcast %c15_i32_7 : i32 to vector<1x256xi32>
    %11 = arith.cmpi eq, %9, %10 : vector<1x256xi32>
    %c0_i32 = arith.constant 0 : i32
    %12 = vector.broadcast %c0_i32 : i32 to vector<1x256xi32>
    %13 = arith.cmpi eq, %9, %12 : vector<1x256xi32>
    %14 = arith.sitofp %7 : vector<1x256xi32> to vector<1x256xf32>
    %cst = arith.constant 0.000000e+00 : f32
    %15 = vector.broadcast %cst : f32 to vector<1x256xf32>
    %16 = vector.extract_strided_slice %3 {offsets = [5, 0], sizes = [1, 256], strides = [1, 1]} : vector<18x256xf32> to vector<1x256xf32>
    %17 = arith.addf %15, %16 : vector<1x256xf32>
    %18 = vector.extract_strided_slice %3 {offsets = [3, 0], sizes = [1, 256], strides = [1, 1]} : vector<18x256xf32> to vector<1x256xf32>
    %19 = arith.addf %15, %18 : vector<1x256xf32>
    %20 = vector.extract_strided_slice %3 {offsets = [6, 0], sizes = [1, 256], strides = [1, 1]} : vector<18x256xf32> to vector<1x256xf32>
    %21 = arith.addf %17, %20 : vector<1x256xf32>
    %22 = vector.extract_strided_slice %3 {offsets = [2, 0], sizes = [1, 256], strides = [1, 1]} : vector<18x256xf32> to vector<1x256xf32>
    %23 = arith.addf %19, %22 : vector<1x256xf32>
    %24 = vector.extract_strided_slice %3 {offsets = [7, 0], sizes = [1, 256], strides = [1, 1]} : vector<18x256xf32> to vector<1x256xf32>
    %25 = arith.addf %21, %24 : vector<1x256xf32>
    %26 = vector.extract_strided_slice %3 {offsets = [1, 0], sizes = [1, 256], strides = [1, 1]} : vector<18x256xf32> to vector<1x256xf32>
    %27 = arith.addf %23, %26 : vector<1x256xf32>
    %28 = vector.extract_strided_slice %3 {offsets = [8, 0], sizes = [1, 256], strides = [1, 1]} : vector<18x256xf32> to vector<1x256xf32>
    %29 = arith.addf %25, %28 : vector<1x256xf32>
    %30 = vector.extract_strided_slice %3 {offsets = [0, 0], sizes = [1, 256], strides = [1, 1]} : vector<18x256xf32> to vector<1x256xf32>
    %31 = arith.addf %27, %30 : vector<1x256xf32>
    %cst_8 = arith.constant 0.000000e+00 : f32
    %32 = vector.broadcast %cst_8 : f32 to vector<8x256xf32>
    %cst_9 = arith.constant 1.000000e+00 : f32
    %33 = vector.broadcast %cst_9 : f32 to vector<1x256xf32>
    %34 = arith.mulf %33, %15 : vector<1x256xf32>
    %35 = arith.addf %14, %34 : vector<1x256xf32>
    %cst_10 = arith.constant 0.000000e+00 : f32
    %cst_11 = arith.constant 1.500000e+01 : f32
    %36 = vector.broadcast %cst_10 : f32 to vector<1x256xf32>
    %37 = arith.maximumf %36, %35 : vector<1x256xf32>
    %38 = vector.broadcast %cst_11 : f32 to vector<1x256xf32>
    %39 = arith.minimumf %38, %37 : vector<1x256xf32>
    %40 = arith.subf %39, %14 : vector<1x256xf32>
    %cst_12 = arith.constant 0.000000e+00 : f32
    %41 = vector.broadcast %cst_12 : f32 to vector<4x256xf32>
    %cst_13 = arith.constant -4.000000e+00 : f32
    %42 = vector.broadcast %cst_13 : f32 to vector<1x256xf32>
    %43 = arith.subf %40, %42 : vector<1x256xf32>
    %44 = math.absf %43 : vector<1x256xf32>
    %cst_14 = arith.constant 1.000000e+00 : f32
    %45 = vector.broadcast %cst_14 : f32 to vector<1x256xf32>
    %46 = arith.subf %45, %44 : vector<1x256xf32>
    %cst_15 = arith.constant 0.000000e+00 : f32
    %47 = vector.broadcast %cst_15 : f32 to vector<1x256xf32>
    %48 = arith.maximumf %47, %46 : vector<1x256xf32>
    %c64_i32 = arith.constant 64 : i32
    %49 = tpu.dynamic_rotate %1 by %c64_i32 dim 1 : vector<4x256xf32>, i32 -> vector<4x256xf32>
    %50 = vector.broadcast %48 : vector<1x256xf32> to vector<4x256xf32>
    %51 = arith.mulf %50, %49 : vector<4x256xf32>
    %52 = arith.addf %41, %51 : vector<4x256xf32>
    %cst_16 = arith.constant -3.000000e+00 : f32
    %53 = vector.broadcast %cst_16 : f32 to vector<1x256xf32>
    %54 = arith.subf %40, %53 : vector<1x256xf32>
    %55 = math.absf %54 : vector<1x256xf32>
    %cst_17 = arith.constant 1.000000e+00 : f32
    %56 = vector.broadcast %cst_17 : f32 to vector<1x256xf32>
    %57 = arith.subf %56, %55 : vector<1x256xf32>
    %cst_18 = arith.constant 0.000000e+00 : f32
    %58 = vector.broadcast %cst_18 : f32 to vector<1x256xf32>
    %59 = arith.maximumf %58, %57 : vector<1x256xf32>
    %c48_i32 = arith.constant 48 : i32
    %60 = tpu.dynamic_rotate %1 by %c48_i32 dim 1 : vector<4x256xf32>, i32 -> vector<4x256xf32>
    %61 = vector.broadcast %59 : vector<1x256xf32> to vector<4x256xf32>
    %62 = arith.mulf %61, %60 : vector<4x256xf32>
    %63 = arith.addf %52, %62 : vector<4x256xf32>
    %cst_19 = arith.constant -2.000000e+00 : f32
    %64 = vector.broadcast %cst_19 : f32 to vector<1x256xf32>
    %65 = arith.subf %40, %64 : vector<1x256xf32>
    %66 = math.absf %65 : vector<1x256xf32>
    %cst_20 = arith.constant 1.000000e+00 : f32
    %67 = vector.broadcast %cst_20 : f32 to vector<1x256xf32>
    %68 = arith.subf %67, %66 : vector<1x256xf32>
    %cst_21 = arith.constant 0.000000e+00 : f32
    %69 = vector.broadcast %cst_21 : f32 to vector<1x256xf32>
    %70 = arith.maximumf %69, %68 : vector<1x256xf32>
    %c32_i32 = arith.constant 32 : i32
    %71 = tpu.dynamic_rotate %1 by %c32_i32 dim 1 : vector<4x256xf32>, i32 -> vector<4x256xf32>
    %72 = vector.broadcast %70 : vector<1x256xf32> to vector<4x256xf32>
    %73 = arith.mulf %72, %71 : vector<4x256xf32>
    %74 = arith.addf %63, %73 : vector<4x256xf32>
    %cst_22 = arith.constant -1.000000e+00 : f32
    %75 = vector.broadcast %cst_22 : f32 to vector<1x256xf32>
    %76 = arith.subf %40, %75 : vector<1x256xf32>
    %77 = math.absf %76 : vector<1x256xf32>
    %cst_23 = arith.constant 1.000000e+00 : f32
    %78 = vector.broadcast %cst_23 : f32 to vector<1x256xf32>
    %79 = arith.subf %78, %77 : vector<1x256xf32>
    %cst_24 = arith.constant 0.000000e+00 : f32
    %80 = vector.broadcast %cst_24 : f32 to vector<1x256xf32>
    %81 = arith.maximumf %80, %79 : vector<1x256xf32>
    %c16_i32 = arith.constant 16 : i32
    %82 = tpu.dynamic_rotate %1 by %c16_i32 dim 1 : vector<4x256xf32>, i32 -> vector<4x256xf32>
    %83 = vector.broadcast %81 : vector<1x256xf32> to vector<4x256xf32>
    %84 = arith.mulf %83, %82 : vector<4x256xf32>
    %85 = arith.addf %74, %84 : vector<4x256xf32>
    %cst_25 = arith.constant 0.000000e+00 : f32
    %86 = vector.broadcast %cst_25 : f32 to vector<1x256xf32>
    %87 = arith.subf %40, %86 : vector<1x256xf32>
    %88 = math.absf %87 : vector<1x256xf32>
    %cst_26 = arith.constant 1.000000e+00 : f32
    %89 = vector.broadcast %cst_26 : f32 to vector<1x256xf32>
    %90 = arith.subf %89, %88 : vector<1x256xf32>
    %cst_27 = arith.constant 0.000000e+00 : f32
    %91 = vector.broadcast %cst_27 : f32 to vector<1x256xf32>
    %92 = arith.maximumf %91, %90 : vector<1x256xf32>
    %93 = vector.broadcast %92 : vector<1x256xf32> to vector<4x256xf32>
    %94 = arith.mulf %93, %1 : vector<4x256xf32>
    %95 = arith.addf %85, %94 : vector<4x256xf32>
    %cst_28 = arith.constant 1.000000e+00 : f32
    %96 = vector.broadcast %cst_28 : f32 to vector<1x256xf32>
    %97 = arith.subf %40, %96 : vector<1x256xf32>
    %98 = math.absf %97 : vector<1x256xf32>
    %cst_29 = arith.constant 1.000000e+00 : f32
    %99 = vector.broadcast %cst_29 : f32 to vector<1x256xf32>
    %100 = arith.subf %99, %98 : vector<1x256xf32>
    %cst_30 = arith.constant 0.000000e+00 : f32
    %101 = vector.broadcast %cst_30 : f32 to vector<1x256xf32>
    %102 = arith.maximumf %101, %100 : vector<1x256xf32>
    %c240_i32 = arith.constant 240 : i32
    %103 = tpu.dynamic_rotate %1 by %c240_i32 dim 1 : vector<4x256xf32>, i32 -> vector<4x256xf32>
    %104 = vector.broadcast %102 : vector<1x256xf32> to vector<4x256xf32>
    %105 = arith.mulf %104, %103 : vector<4x256xf32>
    %106 = arith.addf %95, %105 : vector<4x256xf32>
    %cst_31 = arith.constant 2.000000e+00 : f32
    %107 = vector.broadcast %cst_31 : f32 to vector<1x256xf32>
    %108 = arith.subf %40, %107 : vector<1x256xf32>
    %109 = math.absf %108 : vector<1x256xf32>
    %cst_32 = arith.constant 1.000000e+00 : f32
    %110 = vector.broadcast %cst_32 : f32 to vector<1x256xf32>
    %111 = arith.subf %110, %109 : vector<1x256xf32>
    %cst_33 = arith.constant 0.000000e+00 : f32
    %112 = vector.broadcast %cst_33 : f32 to vector<1x256xf32>
    %113 = arith.maximumf %112, %111 : vector<1x256xf32>
    %c224_i32 = arith.constant 224 : i32
    %114 = tpu.dynamic_rotate %1 by %c224_i32 dim 1 : vector<4x256xf32>, i32 -> vector<4x256xf32>
    %115 = vector.broadcast %113 : vector<1x256xf32> to vector<4x256xf32>
    %116 = arith.mulf %115, %114 : vector<4x256xf32>
    %117 = arith.addf %106, %116 : vector<4x256xf32>
    %cst_34 = arith.constant 3.000000e+00 : f32
    %118 = vector.broadcast %cst_34 : f32 to vector<1x256xf32>
    %119 = arith.subf %40, %118 : vector<1x256xf32>
    %120 = math.absf %119 : vector<1x256xf32>
    %cst_35 = arith.constant 1.000000e+00 : f32
    %121 = vector.broadcast %cst_35 : f32 to vector<1x256xf32>
    %122 = arith.subf %121, %120 : vector<1x256xf32>
    %cst_36 = arith.constant 0.000000e+00 : f32
    %123 = vector.broadcast %cst_36 : f32 to vector<1x256xf32>
    %124 = arith.maximumf %123, %122 : vector<1x256xf32>
    %c208_i32 = arith.constant 208 : i32
    %125 = tpu.dynamic_rotate %1 by %c208_i32 dim 1 : vector<4x256xf32>, i32 -> vector<4x256xf32>
    %126 = vector.broadcast %124 : vector<1x256xf32> to vector<4x256xf32>
    %127 = arith.mulf %126, %125 : vector<4x256xf32>
    %128 = arith.addf %117, %127 : vector<4x256xf32>
    %cst_37 = arith.constant 4.000000e+00 : f32
    %129 = vector.broadcast %cst_37 : f32 to vector<1x256xf32>
    %130 = arith.subf %40, %129 : vector<1x256xf32>
    %131 = math.absf %130 : vector<1x256xf32>
    %cst_38 = arith.constant 1.000000e+00 : f32
    %132 = vector.broadcast %cst_38 : f32 to vector<1x256xf32>
    %133 = arith.subf %132, %131 : vector<1x256xf32>
    %cst_39 = arith.constant 0.000000e+00 : f32
    %134 = vector.broadcast %cst_39 : f32 to vector<1x256xf32>
    %135 = arith.maximumf %134, %133 : vector<1x256xf32>
    %c192_i32 = arith.constant 192 : i32
    %136 = tpu.dynamic_rotate %1 by %c192_i32 dim 1 : vector<4x256xf32>, i32 -> vector<4x256xf32>
    %137 = vector.broadcast %135 : vector<1x256xf32> to vector<4x256xf32>
    %138 = arith.mulf %137, %136 : vector<4x256xf32>
    %139 = arith.addf %128, %138 : vector<4x256xf32>
    %140 = arith.truncf %139 : vector<4x256xf32> to vector<4x256xbf16>
    %c255_i32 = arith.constant 255 : i32
    %141 = tpu.dynamic_rotate %1 by %c255_i32 dim 1 : vector<4x256xf32>, i32 -> vector<4x256xf32>
    %142 = vector.shape_cast %11 : vector<1x256xi1> to vector<1x256xi1>
    %143 = vector.broadcast %142 : vector<1x256xi1> to vector<4x256xi1>
    %144 = arith.select %143, %1, %141 : vector<4x256xi1>, vector<4x256xf32>
    %cst_40 = arith.constant 1.000000e+00 : f32
    %145 = vector.broadcast %cst_40 : f32 to vector<1x256xf32>
    %146 = arith.mulf %145, %17 : vector<1x256xf32>
    %147 = arith.addf %14, %146 : vector<1x256xf32>
    %cst_41 = arith.constant 0.000000e+00 : f32
    %cst_42 = arith.constant 1.500000e+01 : f32
    %148 = vector.broadcast %cst_41 : f32 to vector<1x256xf32>
    %149 = arith.maximumf %148, %147 : vector<1x256xf32>
    %150 = vector.broadcast %cst_42 : f32 to vector<1x256xf32>
    %151 = arith.minimumf %150, %149 : vector<1x256xf32>
    %152 = arith.subf %151, %14 : vector<1x256xf32>
    %cst_43 = arith.constant 0.000000e+00 : f32
    %153 = vector.broadcast %cst_43 : f32 to vector<4x256xf32>
    %cst_44 = arith.constant -4.000000e+00 : f32
    %154 = vector.broadcast %cst_44 : f32 to vector<1x256xf32>
    %155 = arith.subf %152, %154 : vector<1x256xf32>
    %156 = math.absf %155 : vector<1x256xf32>
    %cst_45 = arith.constant 1.000000e+00 : f32
    %157 = vector.broadcast %cst_45 : f32 to vector<1x256xf32>
    %158 = arith.subf %157, %156 : vector<1x256xf32>
    %cst_46 = arith.constant 0.000000e+00 : f32
    %159 = vector.broadcast %cst_46 : f32 to vector<1x256xf32>
    %160 = arith.maximumf %159, %158 : vector<1x256xf32>
    %c64_i32_47 = arith.constant 64 : i32
    %161 = tpu.dynamic_rotate %144 by %c64_i32_47 dim 1 : vector<4x256xf32>, i32 -> vector<4x256xf32>
    %162 = vector.broadcast %160 : vector<1x256xf32> to vector<4x256xf32>
    %163 = arith.mulf %162, %161 : vector<4x256xf32>
    %164 = arith.addf %153, %163 : vector<4x256xf32>
    %cst_48 = arith.constant -3.000000e+00 : f32
    %165 = vector.broadcast %cst_48 : f32 to vector<1x256xf32>
    %166 = arith.subf %152, %165 : vector<1x256xf32>
    %167 = math.absf %166 : vector<1x256xf32>
    %cst_49 = arith.constant 1.000000e+00 : f32
    %168 = vector.broadcast %cst_49 : f32 to vector<1x256xf32>
    %169 = arith.subf %168, %167 : vector<1x256xf32>
    %cst_50 = arith.constant 0.000000e+00 : f32
    %170 = vector.broadcast %cst_50 : f32 to vector<1x256xf32>
    %171 = arith.maximumf %170, %169 : vector<1x256xf32>
    %c48_i32_51 = arith.constant 48 : i32
    %172 = tpu.dynamic_rotate %144 by %c48_i32_51 dim 1 : vector<4x256xf32>, i32 -> vector<4x256xf32>
    %173 = vector.broadcast %171 : vector<1x256xf32> to vector<4x256xf32>
    %174 = arith.mulf %173, %172 : vector<4x256xf32>
    %175 = arith.addf %164, %174 : vector<4x256xf32>
    %cst_52 = arith.constant -2.000000e+00 : f32
    %176 = vector.broadcast %cst_52 : f32 to vector<1x256xf32>
    %177 = arith.subf %152, %176 : vector<1x256xf32>
    %178 = math.absf %177 : vector<1x256xf32>
    %cst_53 = arith.constant 1.000000e+00 : f32
    %179 = vector.broadcast %cst_53 : f32 to vector<1x256xf32>
    %180 = arith.subf %179, %178 : vector<1x256xf32>
    %cst_54 = arith.constant 0.000000e+00 : f32
    %181 = vector.broadcast %cst_54 : f32 to vector<1x256xf32>
    %182 = arith.maximumf %181, %180 : vector<1x256xf32>
    %c32_i32_55 = arith.constant 32 : i32
    %183 = tpu.dynamic_rotate %144 by %c32_i32_55 dim 1 : vector<4x256xf32>, i32 -> vector<4x256xf32>
    %184 = vector.broadcast %182 : vector<1x256xf32> to vector<4x256xf32>
    %185 = arith.mulf %184, %183 : vector<4x256xf32>
    %186 = arith.addf %175, %185 : vector<4x256xf32>
    %cst_56 = arith.constant -1.000000e+00 : f32
    %187 = vector.broadcast %cst_56 : f32 to vector<1x256xf32>
    %188 = arith.subf %152, %187 : vector<1x256xf32>
    %189 = math.absf %188 : vector<1x256xf32>
    %cst_57 = arith.constant 1.000000e+00 : f32
    %190 = vector.broadcast %cst_57 : f32 to vector<1x256xf32>
    %191 = arith.subf %190, %189 : vector<1x256xf32>
    %cst_58 = arith.constant 0.000000e+00 : f32
    %192 = vector.broadcast %cst_58 : f32 to vector<1x256xf32>
    %193 = arith.maximumf %192, %191 : vector<1x256xf32>
    %c16_i32_59 = arith.constant 16 : i32
    %194 = tpu.dynamic_rotate %144 by %c16_i32_59 dim 1 : vector<4x256xf32>, i32 -> vector<4x256xf32>
    %195 = vector.broadcast %193 : vector<1x256xf32> to vector<4x256xf32>
    %196 = arith.mulf %195, %194 : vector<4x256xf32>
    %197 = arith.addf %186, %196 : vector<4x256xf32>
    %cst_60 = arith.constant 0.000000e+00 : f32
    %198 = vector.broadcast %cst_60 : f32 to vector<1x256xf32>
    %199 = arith.subf %152, %198 : vector<1x256xf32>
    %200 = math.absf %199 : vector<1x256xf32>
    %cst_61 = arith.constant 1.000000e+00 : f32
    %201 = vector.broadcast %cst_61 : f32 to vector<1x256xf32>
    %202 = arith.subf %201, %200 : vector<1x256xf32>
    %cst_62 = arith.constant 0.000000e+00 : f32
    %203 = vector.broadcast %cst_62 : f32 to vector<1x256xf32>
    %204 = arith.maximumf %203, %202 : vector<1x256xf32>
    %205 = vector.broadcast %204 : vector<1x256xf32> to vector<4x256xf32>
    %206 = arith.mulf %205, %144 : vector<4x256xf32>
    %207 = arith.addf %197, %206 : vector<4x256xf32>
    %cst_63 = arith.constant 1.000000e+00 : f32
    %208 = vector.broadcast %cst_63 : f32 to vector<1x256xf32>
    %209 = arith.subf %152, %208 : vector<1x256xf32>
    %210 = math.absf %209 : vector<1x256xf32>
    %cst_64 = arith.constant 1.000000e+00 : f32
    %211 = vector.broadcast %cst_64 : f32 to vector<1x256xf32>
    %212 = arith.subf %211, %210 : vector<1x256xf32>
    %cst_65 = arith.constant 0.000000e+00 : f32
    %213 = vector.broadcast %cst_65 : f32 to vector<1x256xf32>
    %214 = arith.maximumf %213, %212 : vector<1x256xf32>
    %c240_i32_66 = arith.constant 240 : i32
    %215 = tpu.dynamic_rotate %144 by %c240_i32_66 dim 1 : vector<4x256xf32>, i32 -> vector<4x256xf32>
    %216 = vector.broadcast %214 : vector<1x256xf32> to vector<4x256xf32>
    %217 = arith.mulf %216, %215 : vector<4x256xf32>
    %218 = arith.addf %207, %217 : vector<4x256xf32>
    %cst_67 = arith.constant 2.000000e+00 : f32
    %219 = vector.broadcast %cst_67 : f32 to vector<1x256xf32>
    %220 = arith.subf %152, %219 : vector<1x256xf32>
    %221 = math.absf %220 : vector<1x256xf32>
    %cst_68 = arith.constant 1.000000e+00 : f32
    %222 = vector.broadcast %cst_68 : f32 to vector<1x256xf32>
    %223 = arith.subf %222, %221 : vector<1x256xf32>
    %cst_69 = arith.constant 0.000000e+00 : f32
    %224 = vector.broadcast %cst_69 : f32 to vector<1x256xf32>
    %225 = arith.maximumf %224, %223 : vector<1x256xf32>
    %c224_i32_70 = arith.constant 224 : i32
    %226 = tpu.dynamic_rotate %144 by %c224_i32_70 dim 1 : vector<4x256xf32>, i32 -> vector<4x256xf32>
    %227 = vector.broadcast %225 : vector<1x256xf32> to vector<4x256xf32>
    %228 = arith.mulf %227, %226 : vector<4x256xf32>
    %229 = arith.addf %218, %228 : vector<4x256xf32>
    %cst_71 = arith.constant 3.000000e+00 : f32
    %230 = vector.broadcast %cst_71 : f32 to vector<1x256xf32>
    %231 = arith.subf %152, %230 : vector<1x256xf32>
    %232 = math.absf %231 : vector<1x256xf32>
    %cst_72 = arith.constant 1.000000e+00 : f32
    %233 = vector.broadcast %cst_72 : f32 to vector<1x256xf32>
    %234 = arith.subf %233, %232 : vector<1x256xf32>
    %cst_73 = arith.constant 0.000000e+00 : f32
    %235 = vector.broadcast %cst_73 : f32 to vector<1x256xf32>
    %236 = arith.maximumf %235, %234 : vector<1x256xf32>
    %c208_i32_74 = arith.constant 208 : i32
    %237 = tpu.dynamic_rotate %144 by %c208_i32_74 dim 1 : vector<4x256xf32>, i32 -> vector<4x256xf32>
    %238 = vector.broadcast %236 : vector<1x256xf32> to vector<4x256xf32>
    %239 = arith.mulf %238, %237 : vector<4x256xf32>
    %240 = arith.addf %229, %239 : vector<4x256xf32>
    %cst_75 = arith.constant 4.000000e+00 : f32
    %241 = vector.broadcast %cst_75 : f32 to vector<1x256xf32>
    %242 = arith.subf %152, %241 : vector<1x256xf32>
    %243 = math.absf %242 : vector<1x256xf32>
    %cst_76 = arith.constant 1.000000e+00 : f32
    %244 = vector.broadcast %cst_76 : f32 to vector<1x256xf32>
    %245 = arith.subf %244, %243 : vector<1x256xf32>
    %cst_77 = arith.constant 0.000000e+00 : f32
    %246 = vector.broadcast %cst_77 : f32 to vector<1x256xf32>
    %247 = arith.maximumf %246, %245 : vector<1x256xf32>
    %c192_i32_78 = arith.constant 192 : i32
    %248 = tpu.dynamic_rotate %144 by %c192_i32_78 dim 1 : vector<4x256xf32>, i32 -> vector<4x256xf32>
    %249 = vector.broadcast %247 : vector<1x256xf32> to vector<4x256xf32>
    %250 = arith.mulf %249, %248 : vector<4x256xf32>
    %251 = arith.addf %240, %250 : vector<4x256xf32>
    %252 = arith.truncf %251 : vector<4x256xf32> to vector<4x256xbf16>
    %c1_i32 = arith.constant 1 : i32
    %253 = tpu.dynamic_rotate %1 by %c1_i32 dim 1 : vector<4x256xf32>, i32 -> vector<4x256xf32>
    %254 = vector.shape_cast %13 : vector<1x256xi1> to vector<1x256xi1>
    %255 = vector.broadcast %254 : vector<1x256xi1> to vector<4x256xi1>
    %256 = arith.select %255, %1, %253 : vector<4x256xi1>, vector<4x256xf32>
    %cst_79 = arith.constant 1.000000e+00 : f32
    %257 = vector.broadcast %cst_79 : f32 to vector<1x256xf32>
    %258 = arith.mulf %257, %19 : vector<1x256xf32>
    %259 = arith.addf %14, %258 : vector<1x256xf32>
    %cst_80 = arith.constant 0.000000e+00 : f32
    %cst_81 = arith.constant 1.500000e+01 : f32
    %260 = vector.broadcast %cst_80 : f32 to vector<1x256xf32>
    %261 = arith.maximumf %260, %259 : vector<1x256xf32>
    %262 = vector.broadcast %cst_81 : f32 to vector<1x256xf32>
    %263 = arith.minimumf %262, %261 : vector<1x256xf32>
    %264 = arith.subf %263, %14 : vector<1x256xf32>
    %cst_82 = arith.constant 0.000000e+00 : f32
    %265 = vector.broadcast %cst_82 : f32 to vector<4x256xf32>
    %cst_83 = arith.constant -4.000000e+00 : f32
    %266 = vector.broadcast %cst_83 : f32 to vector<1x256xf32>
    %267 = arith.subf %264, %266 : vector<1x256xf32>
    %268 = math.absf %267 : vector<1x256xf32>
    %cst_84 = arith.constant 1.000000e+00 : f32
    %269 = vector.broadcast %cst_84 : f32 to vector<1x256xf32>
    %270 = arith.subf %269, %268 : vector<1x256xf32>
    %cst_85 = arith.constant 0.000000e+00 : f32
    %271 = vector.broadcast %cst_85 : f32 to vector<1x256xf32>
    %272 = arith.maximumf %271, %270 : vector<1x256xf32>
    %c64_i32_86 = arith.constant 64 : i32
    %273 = tpu.dynamic_rotate %256 by %c64_i32_86 dim 1 : vector<4x256xf32>, i32 -> vector<4x256xf32>
    %274 = vector.broadcast %272 : vector<1x256xf32> to vector<4x256xf32>
    %275 = arith.mulf %274, %273 : vector<4x256xf32>
    %276 = arith.addf %265, %275 : vector<4x256xf32>
    %cst_87 = arith.constant -3.000000e+00 : f32
    %277 = vector.broadcast %cst_87 : f32 to vector<1x256xf32>
    %278 = arith.subf %264, %277 : vector<1x256xf32>
    %279 = math.absf %278 : vector<1x256xf32>
    %cst_88 = arith.constant 1.000000e+00 : f32
    %280 = vector.broadcast %cst_88 : f32 to vector<1x256xf32>
    %281 = arith.subf %280, %279 : vector<1x256xf32>
    %cst_89 = arith.constant 0.000000e+00 : f32
    %282 = vector.broadcast %cst_89 : f32 to vector<1x256xf32>
    %283 = arith.maximumf %282, %281 : vector<1x256xf32>
    %c48_i32_90 = arith.constant 48 : i32
    %284 = tpu.dynamic_rotate %256 by %c48_i32_90 dim 1 : vector<4x256xf32>, i32 -> vector<4x256xf32>
    %285 = vector.broadcast %283 : vector<1x256xf32> to vector<4x256xf32>
    %286 = arith.mulf %285, %284 : vector<4x256xf32>
    %287 = arith.addf %276, %286 : vector<4x256xf32>
    %cst_91 = arith.constant -2.000000e+00 : f32
    %288 = vector.broadcast %cst_91 : f32 to vector<1x256xf32>
    %289 = arith.subf %264, %288 : vector<1x256xf32>
    %290 = math.absf %289 : vector<1x256xf32>
    %cst_92 = arith.constant 1.000000e+00 : f32
    %291 = vector.broadcast %cst_92 : f32 to vector<1x256xf32>
    %292 = arith.subf %291, %290 : vector<1x256xf32>
    %cst_93 = arith.constant 0.000000e+00 : f32
    %293 = vector.broadcast %cst_93 : f32 to vector<1x256xf32>
    %294 = arith.maximumf %293, %292 : vector<1x256xf32>
    %c32_i32_94 = arith.constant 32 : i32
    %295 = tpu.dynamic_rotate %256 by %c32_i32_94 dim 1 : vector<4x256xf32>, i32 -> vector<4x256xf32>
    %296 = vector.broadcast %294 : vector<1x256xf32> to vector<4x256xf32>
    %297 = arith.mulf %296, %295 : vector<4x256xf32>
    %298 = arith.addf %287, %297 : vector<4x256xf32>
    %cst_95 = arith.constant -1.000000e+00 : f32
    %299 = vector.broadcast %cst_95 : f32 to vector<1x256xf32>
    %300 = arith.subf %264, %299 : vector<1x256xf32>
    %301 = math.absf %300 : vector<1x256xf32>
    %cst_96 = arith.constant 1.000000e+00 : f32
    %302 = vector.broadcast %cst_96 : f32 to vector<1x256xf32>
    %303 = arith.subf %302, %301 : vector<1x256xf32>
    %cst_97 = arith.constant 0.000000e+00 : f32
    %304 = vector.broadcast %cst_97 : f32 to vector<1x256xf32>
    %305 = arith.maximumf %304, %303 : vector<1x256xf32>
    %c16_i32_98 = arith.constant 16 : i32
    %306 = tpu.dynamic_rotate %256 by %c16_i32_98 dim 1 : vector<4x256xf32>, i32 -> vector<4x256xf32>
    %307 = vector.broadcast %305 : vector<1x256xf32> to vector<4x256xf32>
    %308 = arith.mulf %307, %306 : vector<4x256xf32>
    %309 = arith.addf %298, %308 : vector<4x256xf32>
    %cst_99 = arith.constant 0.000000e+00 : f32
    %310 = vector.broadcast %cst_99 : f32 to vector<1x256xf32>
    %311 = arith.subf %264, %310 : vector<1x256xf32>
    %312 = math.absf %311 : vector<1x256xf32>
    %cst_100 = arith.constant 1.000000e+00 : f32
    %313 = vector.broadcast %cst_100 : f32 to vector<1x256xf32>
    %314 = arith.subf %313, %312 : vector<1x256xf32>
    %cst_101 = arith.constant 0.000000e+00 : f32
    %315 = vector.broadcast %cst_101 : f32 to vector<1x256xf32>
    %316 = arith.maximumf %315, %314 : vector<1x256xf32>
    %317 = vector.broadcast %316 : vector<1x256xf32> to vector<4x256xf32>
    %318 = arith.mulf %317, %256 : vector<4x256xf32>
    %319 = arith.addf %309, %318 : vector<4x256xf32>
    %cst_102 = arith.constant 1.000000e+00 : f32
    %320 = vector.broadcast %cst_102 : f32 to vector<1x256xf32>
    %321 = arith.subf %264, %320 : vector<1x256xf32>
    %322 = math.absf %321 : vector<1x256xf32>
    %cst_103 = arith.constant 1.000000e+00 : f32
    %323 = vector.broadcast %cst_103 : f32 to vector<1x256xf32>
    %324 = arith.subf %323, %322 : vector<1x256xf32>
    %cst_104 = arith.constant 0.000000e+00 : f32
    %325 = vector.broadcast %cst_104 : f32 to vector<1x256xf32>
    %326 = arith.maximumf %325, %324 : vector<1x256xf32>
    %c240_i32_105 = arith.constant 240 : i32
    %327 = tpu.dynamic_rotate %256 by %c240_i32_105 dim 1 : vector<4x256xf32>, i32 -> vector<4x256xf32>
    %328 = vector.broadcast %326 : vector<1x256xf32> to vector<4x256xf32>
    %329 = arith.mulf %328, %327 : vector<4x256xf32>
    %330 = arith.addf %319, %329 : vector<4x256xf32>
    %cst_106 = arith.constant 2.000000e+00 : f32
    %331 = vector.broadcast %cst_106 : f32 to vector<1x256xf32>
    %332 = arith.subf %264, %331 : vector<1x256xf32>
    %333 = math.absf %332 : vector<1x256xf32>
    %cst_107 = arith.constant 1.000000e+00 : f32
    %334 = vector.broadcast %cst_107 : f32 to vector<1x256xf32>
    %335 = arith.subf %334, %333 : vector<1x256xf32>
    %cst_108 = arith.constant 0.000000e+00 : f32
    %336 = vector.broadcast %cst_108 : f32 to vector<1x256xf32>
    %337 = arith.maximumf %336, %335 : vector<1x256xf32>
    %c224_i32_109 = arith.constant 224 : i32
    %338 = tpu.dynamic_rotate %256 by %c224_i32_109 dim 1 : vector<4x256xf32>, i32 -> vector<4x256xf32>
    %339 = vector.broadcast %337 : vector<1x256xf32> to vector<4x256xf32>
    %340 = arith.mulf %339, %338 : vector<4x256xf32>
    %341 = arith.addf %330, %340 : vector<4x256xf32>
    %cst_110 = arith.constant 3.000000e+00 : f32
    %342 = vector.broadcast %cst_110 : f32 to vector<1x256xf32>
    %343 = arith.subf %264, %342 : vector<1x256xf32>
    %344 = math.absf %343 : vector<1x256xf32>
    %cst_111 = arith.constant 1.000000e+00 : f32
    %345 = vector.broadcast %cst_111 : f32 to vector<1x256xf32>
    %346 = arith.subf %345, %344 : vector<1x256xf32>
    %cst_112 = arith.constant 0.000000e+00 : f32
    %347 = vector.broadcast %cst_112 : f32 to vector<1x256xf32>
    %348 = arith.maximumf %347, %346 : vector<1x256xf32>
    %c208_i32_113 = arith.constant 208 : i32
    %349 = tpu.dynamic_rotate %256 by %c208_i32_113 dim 1 : vector<4x256xf32>, i32 -> vector<4x256xf32>
    %350 = vector.broadcast %348 : vector<1x256xf32> to vector<4x256xf32>
    %351 = arith.mulf %350, %349 : vector<4x256xf32>
    %352 = arith.addf %341, %351 : vector<4x256xf32>
    %cst_114 = arith.constant 4.000000e+00 : f32
    %353 = vector.broadcast %cst_114 : f32 to vector<1x256xf32>
    %354 = arith.subf %264, %353 : vector<1x256xf32>
    %355 = math.absf %354 : vector<1x256xf32>
    %cst_115 = arith.constant 1.000000e+00 : f32
    %356 = vector.broadcast %cst_115 : f32 to vector<1x256xf32>
    %357 = arith.subf %356, %355 : vector<1x256xf32>
    %cst_116 = arith.constant 0.000000e+00 : f32
    %358 = vector.broadcast %cst_116 : f32 to vector<1x256xf32>
    %359 = arith.maximumf %358, %357 : vector<1x256xf32>
    %c192_i32_117 = arith.constant 192 : i32
    %360 = tpu.dynamic_rotate %256 by %c192_i32_117 dim 1 : vector<4x256xf32>, i32 -> vector<4x256xf32>
    %361 = vector.broadcast %359 : vector<1x256xf32> to vector<4x256xf32>
    %362 = arith.mulf %361, %360 : vector<4x256xf32>
    %363 = arith.addf %352, %362 : vector<4x256xf32>
    %364 = arith.truncf %363 : vector<4x256xf32> to vector<4x256xbf16>
    %c255_i32_118 = arith.constant 255 : i32
    %365 = tpu.dynamic_rotate %144 by %c255_i32_118 dim 1 : vector<4x256xf32>, i32 -> vector<4x256xf32>
    %366 = vector.shape_cast %11 : vector<1x256xi1> to vector<1x256xi1>
    %367 = vector.broadcast %366 : vector<1x256xi1> to vector<4x256xi1>
    %368 = arith.select %367, %144, %365 : vector<4x256xi1>, vector<4x256xf32>
    %cst_119 = arith.constant 1.000000e+00 : f32
    %369 = vector.broadcast %cst_119 : f32 to vector<1x256xf32>
    %370 = arith.mulf %369, %21 : vector<1x256xf32>
    %371 = arith.addf %14, %370 : vector<1x256xf32>
    %cst_120 = arith.constant 0.000000e+00 : f32
    %cst_121 = arith.constant 1.500000e+01 : f32
    %372 = vector.broadcast %cst_120 : f32 to vector<1x256xf32>
    %373 = arith.maximumf %372, %371 : vector<1x256xf32>
    %374 = vector.broadcast %cst_121 : f32 to vector<1x256xf32>
    %375 = arith.minimumf %374, %373 : vector<1x256xf32>
    %376 = arith.subf %375, %14 : vector<1x256xf32>
    %cst_122 = arith.constant 0.000000e+00 : f32
    %377 = vector.broadcast %cst_122 : f32 to vector<4x256xf32>
    %cst_123 = arith.constant -4.000000e+00 : f32
    %378 = vector.broadcast %cst_123 : f32 to vector<1x256xf32>
    %379 = arith.subf %376, %378 : vector<1x256xf32>
    %380 = math.absf %379 : vector<1x256xf32>
    %cst_124 = arith.constant 1.000000e+00 : f32
    %381 = vector.broadcast %cst_124 : f32 to vector<1x256xf32>
    %382 = arith.subf %381, %380 : vector<1x256xf32>
    %cst_125 = arith.constant 0.000000e+00 : f32
    %383 = vector.broadcast %cst_125 : f32 to vector<1x256xf32>
    %384 = arith.maximumf %383, %382 : vector<1x256xf32>
    %c64_i32_126 = arith.constant 64 : i32
    %385 = tpu.dynamic_rotate %368 by %c64_i32_126 dim 1 : vector<4x256xf32>, i32 -> vector<4x256xf32>
    %386 = vector.broadcast %384 : vector<1x256xf32> to vector<4x256xf32>
    %387 = arith.mulf %386, %385 : vector<4x256xf32>
    %388 = arith.addf %377, %387 : vector<4x256xf32>
    %cst_127 = arith.constant -3.000000e+00 : f32
    %389 = vector.broadcast %cst_127 : f32 to vector<1x256xf32>
    %390 = arith.subf %376, %389 : vector<1x256xf32>
    %391 = math.absf %390 : vector<1x256xf32>
    %cst_128 = arith.constant 1.000000e+00 : f32
    %392 = vector.broadcast %cst_128 : f32 to vector<1x256xf32>
    %393 = arith.subf %392, %391 : vector<1x256xf32>
    %cst_129 = arith.constant 0.000000e+00 : f32
    %394 = vector.broadcast %cst_129 : f32 to vector<1x256xf32>
    %395 = arith.maximumf %394, %393 : vector<1x256xf32>
    %c48_i32_130 = arith.constant 48 : i32
    %396 = tpu.dynamic_rotate %368 by %c48_i32_130 dim 1 : vector<4x256xf32>, i32 -> vector<4x256xf32>
    %397 = vector.broadcast %395 : vector<1x256xf32> to vector<4x256xf32>
    %398 = arith.mulf %397, %396 : vector<4x256xf32>
    %399 = arith.addf %388, %398 : vector<4x256xf32>
    %cst_131 = arith.constant -2.000000e+00 : f32
    %400 = vector.broadcast %cst_131 : f32 to vector<1x256xf32>
    %401 = arith.subf %376, %400 : vector<1x256xf32>
    %402 = math.absf %401 : vector<1x256xf32>
    %cst_132 = arith.constant 1.000000e+00 : f32
    %403 = vector.broadcast %cst_132 : f32 to vector<1x256xf32>
    %404 = arith.subf %403, %402 : vector<1x256xf32>
    %cst_133 = arith.constant 0.000000e+00 : f32
    %405 = vector.broadcast %cst_133 : f32 to vector<1x256xf32>
    %406 = arith.maximumf %405, %404 : vector<1x256xf32>
    %c32_i32_134 = arith.constant 32 : i32
    %407 = tpu.dynamic_rotate %368 by %c32_i32_134 dim 1 : vector<4x256xf32>, i32 -> vector<4x256xf32>
    %408 = vector.broadcast %406 : vector<1x256xf32> to vector<4x256xf32>
    %409 = arith.mulf %408, %407 : vector<4x256xf32>
    %410 = arith.addf %399, %409 : vector<4x256xf32>
    %cst_135 = arith.constant -1.000000e+00 : f32
    %411 = vector.broadcast %cst_135 : f32 to vector<1x256xf32>
    %412 = arith.subf %376, %411 : vector<1x256xf32>
    %413 = math.absf %412 : vector<1x256xf32>
    %cst_136 = arith.constant 1.000000e+00 : f32
    %414 = vector.broadcast %cst_136 : f32 to vector<1x256xf32>
    %415 = arith.subf %414, %413 : vector<1x256xf32>
    %cst_137 = arith.constant 0.000000e+00 : f32
    %416 = vector.broadcast %cst_137 : f32 to vector<1x256xf32>
    %417 = arith.maximumf %416, %415 : vector<1x256xf32>
    %c16_i32_138 = arith.constant 16 : i32
    %418 = tpu.dynamic_rotate %368 by %c16_i32_138 dim 1 : vector<4x256xf32>, i32 -> vector<4x256xf32>
    %419 = vector.broadcast %417 : vector<1x256xf32> to vector<4x256xf32>
    %420 = arith.mulf %419, %418 : vector<4x256xf32>
    %421 = arith.addf %410, %420 : vector<4x256xf32>
    %cst_139 = arith.constant 0.000000e+00 : f32
    %422 = vector.broadcast %cst_139 : f32 to vector<1x256xf32>
    %423 = arith.subf %376, %422 : vector<1x256xf32>
    %424 = math.absf %423 : vector<1x256xf32>
    %cst_140 = arith.constant 1.000000e+00 : f32
    %425 = vector.broadcast %cst_140 : f32 to vector<1x256xf32>
    %426 = arith.subf %425, %424 : vector<1x256xf32>
    %cst_141 = arith.constant 0.000000e+00 : f32
    %427 = vector.broadcast %cst_141 : f32 to vector<1x256xf32>
    %428 = arith.maximumf %427, %426 : vector<1x256xf32>
    %429 = vector.broadcast %428 : vector<1x256xf32> to vector<4x256xf32>
    %430 = arith.mulf %429, %368 : vector<4x256xf32>
    %431 = arith.addf %421, %430 : vector<4x256xf32>
    %cst_142 = arith.constant 1.000000e+00 : f32
    %432 = vector.broadcast %cst_142 : f32 to vector<1x256xf32>
    %433 = arith.subf %376, %432 : vector<1x256xf32>
    %434 = math.absf %433 : vector<1x256xf32>
    %cst_143 = arith.constant 1.000000e+00 : f32
    %435 = vector.broadcast %cst_143 : f32 to vector<1x256xf32>
    %436 = arith.subf %435, %434 : vector<1x256xf32>
    %cst_144 = arith.constant 0.000000e+00 : f32
    %437 = vector.broadcast %cst_144 : f32 to vector<1x256xf32>
    %438 = arith.maximumf %437, %436 : vector<1x256xf32>
    %c240_i32_145 = arith.constant 240 : i32
    %439 = tpu.dynamic_rotate %368 by %c240_i32_145 dim 1 : vector<4x256xf32>, i32 -> vector<4x256xf32>
    %440 = vector.broadcast %438 : vector<1x256xf32> to vector<4x256xf32>
    %441 = arith.mulf %440, %439 : vector<4x256xf32>
    %442 = arith.addf %431, %441 : vector<4x256xf32>
    %cst_146 = arith.constant 2.000000e+00 : f32
    %443 = vector.broadcast %cst_146 : f32 to vector<1x256xf32>
    %444 = arith.subf %376, %443 : vector<1x256xf32>
    %445 = math.absf %444 : vector<1x256xf32>
    %cst_147 = arith.constant 1.000000e+00 : f32
    %446 = vector.broadcast %cst_147 : f32 to vector<1x256xf32>
    %447 = arith.subf %446, %445 : vector<1x256xf32>
    %cst_148 = arith.constant 0.000000e+00 : f32
    %448 = vector.broadcast %cst_148 : f32 to vector<1x256xf32>
    %449 = arith.maximumf %448, %447 : vector<1x256xf32>
    %c224_i32_149 = arith.constant 224 : i32
    %450 = tpu.dynamic_rotate %368 by %c224_i32_149 dim 1 : vector<4x256xf32>, i32 -> vector<4x256xf32>
    %451 = vector.broadcast %449 : vector<1x256xf32> to vector<4x256xf32>
    %452 = arith.mulf %451, %450 : vector<4x256xf32>
    %453 = arith.addf %442, %452 : vector<4x256xf32>
    %cst_150 = arith.constant 3.000000e+00 : f32
    %454 = vector.broadcast %cst_150 : f32 to vector<1x256xf32>
    %455 = arith.subf %376, %454 : vector<1x256xf32>
    %456 = math.absf %455 : vector<1x256xf32>
    %cst_151 = arith.constant 1.000000e+00 : f32
    %457 = vector.broadcast %cst_151 : f32 to vector<1x256xf32>
    %458 = arith.subf %457, %456 : vector<1x256xf32>
    %cst_152 = arith.constant 0.000000e+00 : f32
    %459 = vector.broadcast %cst_152 : f32 to vector<1x256xf32>
    %460 = arith.maximumf %459, %458 : vector<1x256xf32>
    %c208_i32_153 = arith.constant 208 : i32
    %461 = tpu.dynamic_rotate %368 by %c208_i32_153 dim 1 : vector<4x256xf32>, i32 -> vector<4x256xf32>
    %462 = vector.broadcast %460 : vector<1x256xf32> to vector<4x256xf32>
    %463 = arith.mulf %462, %461 : vector<4x256xf32>
    %464 = arith.addf %453, %463 : vector<4x256xf32>
    %cst_154 = arith.constant 4.000000e+00 : f32
    %465 = vector.broadcast %cst_154 : f32 to vector<1x256xf32>
    %466 = arith.subf %376, %465 : vector<1x256xf32>
    %467 = math.absf %466 : vector<1x256xf32>
    %cst_155 = arith.constant 1.000000e+00 : f32
    %468 = vector.broadcast %cst_155 : f32 to vector<1x256xf32>
    %469 = arith.subf %468, %467 : vector<1x256xf32>
    %cst_156 = arith.constant 0.000000e+00 : f32
    %470 = vector.broadcast %cst_156 : f32 to vector<1x256xf32>
    %471 = arith.maximumf %470, %469 : vector<1x256xf32>
    %c192_i32_157 = arith.constant 192 : i32
    %472 = tpu.dynamic_rotate %368 by %c192_i32_157 dim 1 : vector<4x256xf32>, i32 -> vector<4x256xf32>
    %473 = vector.broadcast %471 : vector<1x256xf32> to vector<4x256xf32>
    %474 = arith.mulf %473, %472 : vector<4x256xf32>
    %475 = arith.addf %464, %474 : vector<4x256xf32>
    %476 = arith.truncf %475 : vector<4x256xf32> to vector<4x256xbf16>
    %c1_i32_158 = arith.constant 1 : i32
    %477 = tpu.dynamic_rotate %256 by %c1_i32_158 dim 1 : vector<4x256xf32>, i32 -> vector<4x256xf32>
    %478 = vector.shape_cast %13 : vector<1x256xi1> to vector<1x256xi1>
    %479 = vector.broadcast %478 : vector<1x256xi1> to vector<4x256xi1>
    %480 = arith.select %479, %256, %477 : vector<4x256xi1>, vector<4x256xf32>
    %cst_159 = arith.constant 1.000000e+00 : f32
    %481 = vector.broadcast %cst_159 : f32 to vector<1x256xf32>
    %482 = arith.mulf %481, %23 : vector<1x256xf32>
    %483 = arith.addf %14, %482 : vector<1x256xf32>
    %cst_160 = arith.constant 0.000000e+00 : f32
    %cst_161 = arith.constant 1.500000e+01 : f32
    %484 = vector.broadcast %cst_160 : f32 to vector<1x256xf32>
    %485 = arith.maximumf %484, %483 : vector<1x256xf32>
    %486 = vector.broadcast %cst_161 : f32 to vector<1x256xf32>
    %487 = arith.minimumf %486, %485 : vector<1x256xf32>
    %488 = arith.subf %487, %14 : vector<1x256xf32>
    %cst_162 = arith.constant 0.000000e+00 : f32
    %489 = vector.broadcast %cst_162 : f32 to vector<4x256xf32>
    %cst_163 = arith.constant -4.000000e+00 : f32
    %490 = vector.broadcast %cst_163 : f32 to vector<1x256xf32>
    %491 = arith.subf %488, %490 : vector<1x256xf32>
    %492 = math.absf %491 : vector<1x256xf32>
    %cst_164 = arith.constant 1.000000e+00 : f32
    %493 = vector.broadcast %cst_164 : f32 to vector<1x256xf32>
    %494 = arith.subf %493, %492 : vector<1x256xf32>
    %cst_165 = arith.constant 0.000000e+00 : f32
    %495 = vector.broadcast %cst_165 : f32 to vector<1x256xf32>
    %496 = arith.maximumf %495, %494 : vector<1x256xf32>
    %c64_i32_166 = arith.constant 64 : i32
    %497 = tpu.dynamic_rotate %480 by %c64_i32_166 dim 1 : vector<4x256xf32>, i32 -> vector<4x256xf32>
    %498 = vector.broadcast %496 : vector<1x256xf32> to vector<4x256xf32>
    %499 = arith.mulf %498, %497 : vector<4x256xf32>
    %500 = arith.addf %489, %499 : vector<4x256xf32>
    %cst_167 = arith.constant -3.000000e+00 : f32
    %501 = vector.broadcast %cst_167 : f32 to vector<1x256xf32>
    %502 = arith.subf %488, %501 : vector<1x256xf32>
    %503 = math.absf %502 : vector<1x256xf32>
    %cst_168 = arith.constant 1.000000e+00 : f32
    %504 = vector.broadcast %cst_168 : f32 to vector<1x256xf32>
    %505 = arith.subf %504, %503 : vector<1x256xf32>
    %cst_169 = arith.constant 0.000000e+00 : f32
    %506 = vector.broadcast %cst_169 : f32 to vector<1x256xf32>
    %507 = arith.maximumf %506, %505 : vector<1x256xf32>
    %c48_i32_170 = arith.constant 48 : i32
    %508 = tpu.dynamic_rotate %480 by %c48_i32_170 dim 1 : vector<4x256xf32>, i32 -> vector<4x256xf32>
    %509 = vector.broadcast %507 : vector<1x256xf32> to vector<4x256xf32>
    %510 = arith.mulf %509, %508 : vector<4x256xf32>
    %511 = arith.addf %500, %510 : vector<4x256xf32>
    %cst_171 = arith.constant -2.000000e+00 : f32
    %512 = vector.broadcast %cst_171 : f32 to vector<1x256xf32>
    %513 = arith.subf %488, %512 : vector<1x256xf32>
    %514 = math.absf %513 : vector<1x256xf32>
    %cst_172 = arith.constant 1.000000e+00 : f32
    %515 = vector.broadcast %cst_172 : f32 to vector<1x256xf32>
    %516 = arith.subf %515, %514 : vector<1x256xf32>
    %cst_173 = arith.constant 0.000000e+00 : f32
    %517 = vector.broadcast %cst_173 : f32 to vector<1x256xf32>
    %518 = arith.maximumf %517, %516 : vector<1x256xf32>
    %c32_i32_174 = arith.constant 32 : i32
    %519 = tpu.dynamic_rotate %480 by %c32_i32_174 dim 1 : vector<4x256xf32>, i32 -> vector<4x256xf32>
    %520 = vector.broadcast %518 : vector<1x256xf32> to vector<4x256xf32>
    %521 = arith.mulf %520, %519 : vector<4x256xf32>
    %522 = arith.addf %511, %521 : vector<4x256xf32>
    %cst_175 = arith.constant -1.000000e+00 : f32
    %523 = vector.broadcast %cst_175 : f32 to vector<1x256xf32>
    %524 = arith.subf %488, %523 : vector<1x256xf32>
    %525 = math.absf %524 : vector<1x256xf32>
    %cst_176 = arith.constant 1.000000e+00 : f32
    %526 = vector.broadcast %cst_176 : f32 to vector<1x256xf32>
    %527 = arith.subf %526, %525 : vector<1x256xf32>
    %cst_177 = arith.constant 0.000000e+00 : f32
    %528 = vector.broadcast %cst_177 : f32 to vector<1x256xf32>
    %529 = arith.maximumf %528, %527 : vector<1x256xf32>
    %c16_i32_178 = arith.constant 16 : i32
    %530 = tpu.dynamic_rotate %480 by %c16_i32_178 dim 1 : vector<4x256xf32>, i32 -> vector<4x256xf32>
    %531 = vector.broadcast %529 : vector<1x256xf32> to vector<4x256xf32>
    %532 = arith.mulf %531, %530 : vector<4x256xf32>
    %533 = arith.addf %522, %532 : vector<4x256xf32>
    %cst_179 = arith.constant 0.000000e+00 : f32
    %534 = vector.broadcast %cst_179 : f32 to vector<1x256xf32>
    %535 = arith.subf %488, %534 : vector<1x256xf32>
    %536 = math.absf %535 : vector<1x256xf32>
    %cst_180 = arith.constant 1.000000e+00 : f32
    %537 = vector.broadcast %cst_180 : f32 to vector<1x256xf32>
    %538 = arith.subf %537, %536 : vector<1x256xf32>
    %cst_181 = arith.constant 0.000000e+00 : f32
    %539 = vector.broadcast %cst_181 : f32 to vector<1x256xf32>
    %540 = arith.maximumf %539, %538 : vector<1x256xf32>
    %541 = vector.broadcast %540 : vector<1x256xf32> to vector<4x256xf32>
    %542 = arith.mulf %541, %480 : vector<4x256xf32>
    %543 = arith.addf %533, %542 : vector<4x256xf32>
    %cst_182 = arith.constant 1.000000e+00 : f32
    %544 = vector.broadcast %cst_182 : f32 to vector<1x256xf32>
    %545 = arith.subf %488, %544 : vector<1x256xf32>
    %546 = math.absf %545 : vector<1x256xf32>
    %cst_183 = arith.constant 1.000000e+00 : f32
    %547 = vector.broadcast %cst_183 : f32 to vector<1x256xf32>
    %548 = arith.subf %547, %546 : vector<1x256xf32>
    %cst_184 = arith.constant 0.000000e+00 : f32
    %549 = vector.broadcast %cst_184 : f32 to vector<1x256xf32>
    %550 = arith.maximumf %549, %548 : vector<1x256xf32>
    %c240_i32_185 = arith.constant 240 : i32
    %551 = tpu.dynamic_rotate %480 by %c240_i32_185 dim 1 : vector<4x256xf32>, i32 -> vector<4x256xf32>
    %552 = vector.broadcast %550 : vector<1x256xf32> to vector<4x256xf32>
    %553 = arith.mulf %552, %551 : vector<4x256xf32>
    %554 = arith.addf %543, %553 : vector<4x256xf32>
    %cst_186 = arith.constant 2.000000e+00 : f32
    %555 = vector.broadcast %cst_186 : f32 to vector<1x256xf32>
    %556 = arith.subf %488, %555 : vector<1x256xf32>
    %557 = math.absf %556 : vector<1x256xf32>
    %cst_187 = arith.constant 1.000000e+00 : f32
    %558 = vector.broadcast %cst_187 : f32 to vector<1x256xf32>
    %559 = arith.subf %558, %557 : vector<1x256xf32>
    %cst_188 = arith.constant 0.000000e+00 : f32
    %560 = vector.broadcast %cst_188 : f32 to vector<1x256xf32>
    %561 = arith.maximumf %560, %559 : vector<1x256xf32>
    %c224_i32_189 = arith.constant 224 : i32
    %562 = tpu.dynamic_rotate %480 by %c224_i32_189 dim 1 : vector<4x256xf32>, i32 -> vector<4x256xf32>
    %563 = vector.broadcast %561 : vector<1x256xf32> to vector<4x256xf32>
    %564 = arith.mulf %563, %562 : vector<4x256xf32>
    %565 = arith.addf %554, %564 : vector<4x256xf32>
    %cst_190 = arith.constant 3.000000e+00 : f32
    %566 = vector.broadcast %cst_190 : f32 to vector<1x256xf32>
    %567 = arith.subf %488, %566 : vector<1x256xf32>
    %568 = math.absf %567 : vector<1x256xf32>
    %cst_191 = arith.constant 1.000000e+00 : f32
    %569 = vector.broadcast %cst_191 : f32 to vector<1x256xf32>
    %570 = arith.subf %569, %568 : vector<1x256xf32>
    %cst_192 = arith.constant 0.000000e+00 : f32
    %571 = vector.broadcast %cst_192 : f32 to vector<1x256xf32>
    %572 = arith.maximumf %571, %570 : vector<1x256xf32>
    %c208_i32_193 = arith.constant 208 : i32
    %573 = tpu.dynamic_rotate %480 by %c208_i32_193 dim 1 : vector<4x256xf32>, i32 -> vector<4x256xf32>
    %574 = vector.broadcast %572 : vector<1x256xf32> to vector<4x256xf32>
    %575 = arith.mulf %574, %573 : vector<4x256xf32>
    %576 = arith.addf %565, %575 : vector<4x256xf32>
    %cst_194 = arith.constant 4.000000e+00 : f32
    %577 = vector.broadcast %cst_194 : f32 to vector<1x256xf32>
    %578 = arith.subf %488, %577 : vector<1x256xf32>
    %579 = math.absf %578 : vector<1x256xf32>
    %cst_195 = arith.constant 1.000000e+00 : f32
    %580 = vector.broadcast %cst_195 : f32 to vector<1x256xf32>
    %581 = arith.subf %580, %579 : vector<1x256xf32>
    %cst_196 = arith.constant 0.000000e+00 : f32
    %582 = vector.broadcast %cst_196 : f32 to vector<1x256xf32>
    %583 = arith.maximumf %582, %581 : vector<1x256xf32>
    %c192_i32_197 = arith.constant 192 : i32
    %584 = tpu.dynamic_rotate %480 by %c192_i32_197 dim 1 : vector<4x256xf32>, i32 -> vector<4x256xf32>
    %585 = vector.broadcast %583 : vector<1x256xf32> to vector<4x256xf32>
    %586 = arith.mulf %585, %584 : vector<4x256xf32>
    %587 = arith.addf %576, %586 : vector<4x256xf32>
    %588 = arith.truncf %587 : vector<4x256xf32> to vector<4x256xbf16>
    %c255_i32_198 = arith.constant 255 : i32
    %589 = tpu.dynamic_rotate %368 by %c255_i32_198 dim 1 : vector<4x256xf32>, i32 -> vector<4x256xf32>
    %590 = vector.shape_cast %11 : vector<1x256xi1> to vector<1x256xi1>
    %591 = vector.broadcast %590 : vector<1x256xi1> to vector<4x256xi1>
    %592 = arith.select %591, %368, %589 : vector<4x256xi1>, vector<4x256xf32>
    %cst_199 = arith.constant 1.000000e+00 : f32
    %593 = vector.broadcast %cst_199 : f32 to vector<1x256xf32>
    %594 = arith.mulf %593, %25 : vector<1x256xf32>
    %595 = arith.addf %14, %594 : vector<1x256xf32>
    %cst_200 = arith.constant 0.000000e+00 : f32
    %cst_201 = arith.constant 1.500000e+01 : f32
    %596 = vector.broadcast %cst_200 : f32 to vector<1x256xf32>
    %597 = arith.maximumf %596, %595 : vector<1x256xf32>
    %598 = vector.broadcast %cst_201 : f32 to vector<1x256xf32>
    %599 = arith.minimumf %598, %597 : vector<1x256xf32>
    %600 = arith.subf %599, %14 : vector<1x256xf32>
    %cst_202 = arith.constant 0.000000e+00 : f32
    %601 = vector.broadcast %cst_202 : f32 to vector<4x256xf32>
    %cst_203 = arith.constant -4.000000e+00 : f32
    %602 = vector.broadcast %cst_203 : f32 to vector<1x256xf32>
    %603 = arith.subf %600, %602 : vector<1x256xf32>
    %604 = math.absf %603 : vector<1x256xf32>
    %cst_204 = arith.constant 1.000000e+00 : f32
    %605 = vector.broadcast %cst_204 : f32 to vector<1x256xf32>
    %606 = arith.subf %605, %604 : vector<1x256xf32>
    %cst_205 = arith.constant 0.000000e+00 : f32
    %607 = vector.broadcast %cst_205 : f32 to vector<1x256xf32>
    %608 = arith.maximumf %607, %606 : vector<1x256xf32>
    %c64_i32_206 = arith.constant 64 : i32
    %609 = tpu.dynamic_rotate %592 by %c64_i32_206 dim 1 : vector<4x256xf32>, i32 -> vector<4x256xf32>
    %610 = vector.broadcast %608 : vector<1x256xf32> to vector<4x256xf32>
    %611 = arith.mulf %610, %609 : vector<4x256xf32>
    %612 = arith.addf %601, %611 : vector<4x256xf32>
    %cst_207 = arith.constant -3.000000e+00 : f32
    %613 = vector.broadcast %cst_207 : f32 to vector<1x256xf32>
    %614 = arith.subf %600, %613 : vector<1x256xf32>
    %615 = math.absf %614 : vector<1x256xf32>
    %cst_208 = arith.constant 1.000000e+00 : f32
    %616 = vector.broadcast %cst_208 : f32 to vector<1x256xf32>
    %617 = arith.subf %616, %615 : vector<1x256xf32>
    %cst_209 = arith.constant 0.000000e+00 : f32
    %618 = vector.broadcast %cst_209 : f32 to vector<1x256xf32>
    %619 = arith.maximumf %618, %617 : vector<1x256xf32>
    %c48_i32_210 = arith.constant 48 : i32
    %620 = tpu.dynamic_rotate %592 by %c48_i32_210 dim 1 : vector<4x256xf32>, i32 -> vector<4x256xf32>
    %621 = vector.broadcast %619 : vector<1x256xf32> to vector<4x256xf32>
    %622 = arith.mulf %621, %620 : vector<4x256xf32>
    %623 = arith.addf %612, %622 : vector<4x256xf32>
    %cst_211 = arith.constant -2.000000e+00 : f32
    %624 = vector.broadcast %cst_211 : f32 to vector<1x256xf32>
    %625 = arith.subf %600, %624 : vector<1x256xf32>
    %626 = math.absf %625 : vector<1x256xf32>
    %cst_212 = arith.constant 1.000000e+00 : f32
    %627 = vector.broadcast %cst_212 : f32 to vector<1x256xf32>
    %628 = arith.subf %627, %626 : vector<1x256xf32>
    %cst_213 = arith.constant 0.000000e+00 : f32
    %629 = vector.broadcast %cst_213 : f32 to vector<1x256xf32>
    %630 = arith.maximumf %629, %628 : vector<1x256xf32>
    %c32_i32_214 = arith.constant 32 : i32
    %631 = tpu.dynamic_rotate %592 by %c32_i32_214 dim 1 : vector<4x256xf32>, i32 -> vector<4x256xf32>
    %632 = vector.broadcast %630 : vector<1x256xf32> to vector<4x256xf32>
    %633 = arith.mulf %632, %631 : vector<4x256xf32>
    %634 = arith.addf %623, %633 : vector<4x256xf32>
    %cst_215 = arith.constant -1.000000e+00 : f32
    %635 = vector.broadcast %cst_215 : f32 to vector<1x256xf32>
    %636 = arith.subf %600, %635 : vector<1x256xf32>
    %637 = math.absf %636 : vector<1x256xf32>
    %cst_216 = arith.constant 1.000000e+00 : f32
    %638 = vector.broadcast %cst_216 : f32 to vector<1x256xf32>
    %639 = arith.subf %638, %637 : vector<1x256xf32>
    %cst_217 = arith.constant 0.000000e+00 : f32
    %640 = vector.broadcast %cst_217 : f32 to vector<1x256xf32>
    %641 = arith.maximumf %640, %639 : vector<1x256xf32>
    %c16_i32_218 = arith.constant 16 : i32
    %642 = tpu.dynamic_rotate %592 by %c16_i32_218 dim 1 : vector<4x256xf32>, i32 -> vector<4x256xf32>
    %643 = vector.broadcast %641 : vector<1x256xf32> to vector<4x256xf32>
    %644 = arith.mulf %643, %642 : vector<4x256xf32>
    %645 = arith.addf %634, %644 : vector<4x256xf32>
    %cst_219 = arith.constant 0.000000e+00 : f32
    %646 = vector.broadcast %cst_219 : f32 to vector<1x256xf32>
    %647 = arith.subf %600, %646 : vector<1x256xf32>
    %648 = math.absf %647 : vector<1x256xf32>
    %cst_220 = arith.constant 1.000000e+00 : f32
    %649 = vector.broadcast %cst_220 : f32 to vector<1x256xf32>
    %650 = arith.subf %649, %648 : vector<1x256xf32>
    %cst_221 = arith.constant 0.000000e+00 : f32
    %651 = vector.broadcast %cst_221 : f32 to vector<1x256xf32>
    %652 = arith.maximumf %651, %650 : vector<1x256xf32>
    %653 = vector.broadcast %652 : vector<1x256xf32> to vector<4x256xf32>
    %654 = arith.mulf %653, %592 : vector<4x256xf32>
    %655 = arith.addf %645, %654 : vector<4x256xf32>
    %cst_222 = arith.constant 1.000000e+00 : f32
    %656 = vector.broadcast %cst_222 : f32 to vector<1x256xf32>
    %657 = arith.subf %600, %656 : vector<1x256xf32>
    %658 = math.absf %657 : vector<1x256xf32>
    %cst_223 = arith.constant 1.000000e+00 : f32
    %659 = vector.broadcast %cst_223 : f32 to vector<1x256xf32>
    %660 = arith.subf %659, %658 : vector<1x256xf32>
    %cst_224 = arith.constant 0.000000e+00 : f32
    %661 = vector.broadcast %cst_224 : f32 to vector<1x256xf32>
    %662 = arith.maximumf %661, %660 : vector<1x256xf32>
    %c240_i32_225 = arith.constant 240 : i32
    %663 = tpu.dynamic_rotate %592 by %c240_i32_225 dim 1 : vector<4x256xf32>, i32 -> vector<4x256xf32>
    %664 = vector.broadcast %662 : vector<1x256xf32> to vector<4x256xf32>
    %665 = arith.mulf %664, %663 : vector<4x256xf32>
    %666 = arith.addf %655, %665 : vector<4x256xf32>
    %cst_226 = arith.constant 2.000000e+00 : f32
    %667 = vector.broadcast %cst_226 : f32 to vector<1x256xf32>
    %668 = arith.subf %600, %667 : vector<1x256xf32>
    %669 = math.absf %668 : vector<1x256xf32>
    %cst_227 = arith.constant 1.000000e+00 : f32
    %670 = vector.broadcast %cst_227 : f32 to vector<1x256xf32>
    %671 = arith.subf %670, %669 : vector<1x256xf32>
    %cst_228 = arith.constant 0.000000e+00 : f32
    %672 = vector.broadcast %cst_228 : f32 to vector<1x256xf32>
    %673 = arith.maximumf %672, %671 : vector<1x256xf32>
    %c224_i32_229 = arith.constant 224 : i32
    %674 = tpu.dynamic_rotate %592 by %c224_i32_229 dim 1 : vector<4x256xf32>, i32 -> vector<4x256xf32>
    %675 = vector.broadcast %673 : vector<1x256xf32> to vector<4x256xf32>
    %676 = arith.mulf %675, %674 : vector<4x256xf32>
    %677 = arith.addf %666, %676 : vector<4x256xf32>
    %cst_230 = arith.constant 3.000000e+00 : f32
    %678 = vector.broadcast %cst_230 : f32 to vector<1x256xf32>
    %679 = arith.subf %600, %678 : vector<1x256xf32>
    %680 = math.absf %679 : vector<1x256xf32>
    %cst_231 = arith.constant 1.000000e+00 : f32
    %681 = vector.broadcast %cst_231 : f32 to vector<1x256xf32>
    %682 = arith.subf %681, %680 : vector<1x256xf32>
    %cst_232 = arith.constant 0.000000e+00 : f32
    %683 = vector.broadcast %cst_232 : f32 to vector<1x256xf32>
    %684 = arith.maximumf %683, %682 : vector<1x256xf32>
    %c208_i32_233 = arith.constant 208 : i32
    %685 = tpu.dynamic_rotate %592 by %c208_i32_233 dim 1 : vector<4x256xf32>, i32 -> vector<4x256xf32>
    %686 = vector.broadcast %684 : vector<1x256xf32> to vector<4x256xf32>
    %687 = arith.mulf %686, %685 : vector<4x256xf32>
    %688 = arith.addf %677, %687 : vector<4x256xf32>
    %cst_234 = arith.constant 4.000000e+00 : f32
    %689 = vector.broadcast %cst_234 : f32 to vector<1x256xf32>
    %690 = arith.subf %600, %689 : vector<1x256xf32>
    %691 = math.absf %690 : vector<1x256xf32>
    %cst_235 = arith.constant 1.000000e+00 : f32
    %692 = vector.broadcast %cst_235 : f32 to vector<1x256xf32>
    %693 = arith.subf %692, %691 : vector<1x256xf32>
    %cst_236 = arith.constant 0.000000e+00 : f32
    %694 = vector.broadcast %cst_236 : f32 to vector<1x256xf32>
    %695 = arith.maximumf %694, %693 : vector<1x256xf32>
    %c192_i32_237 = arith.constant 192 : i32
    %696 = tpu.dynamic_rotate %592 by %c192_i32_237 dim 1 : vector<4x256xf32>, i32 -> vector<4x256xf32>
    %697 = vector.broadcast %695 : vector<1x256xf32> to vector<4x256xf32>
    %698 = arith.mulf %697, %696 : vector<4x256xf32>
    %699 = arith.addf %688, %698 : vector<4x256xf32>
    %700 = arith.truncf %699 : vector<4x256xf32> to vector<4x256xbf16>
    %c1_i32_238 = arith.constant 1 : i32
    %701 = tpu.dynamic_rotate %480 by %c1_i32_238 dim 1 : vector<4x256xf32>, i32 -> vector<4x256xf32>
    %702 = vector.shape_cast %13 : vector<1x256xi1> to vector<1x256xi1>
    %703 = vector.broadcast %702 : vector<1x256xi1> to vector<4x256xi1>
    %704 = arith.select %703, %480, %701 : vector<4x256xi1>, vector<4x256xf32>
    %cst_239 = arith.constant 1.000000e+00 : f32
    %705 = vector.broadcast %cst_239 : f32 to vector<1x256xf32>
    %706 = arith.mulf %705, %27 : vector<1x256xf32>
    %707 = arith.addf %14, %706 : vector<1x256xf32>
    %cst_240 = arith.constant 0.000000e+00 : f32
    %cst_241 = arith.constant 1.500000e+01 : f32
    %708 = vector.broadcast %cst_240 : f32 to vector<1x256xf32>
    %709 = arith.maximumf %708, %707 : vector<1x256xf32>
    %710 = vector.broadcast %cst_241 : f32 to vector<1x256xf32>
    %711 = arith.minimumf %710, %709 : vector<1x256xf32>
    %712 = arith.subf %711, %14 : vector<1x256xf32>
    %cst_242 = arith.constant 0.000000e+00 : f32
    %713 = vector.broadcast %cst_242 : f32 to vector<4x256xf32>
    %cst_243 = arith.constant -4.000000e+00 : f32
    %714 = vector.broadcast %cst_243 : f32 to vector<1x256xf32>
    %715 = arith.subf %712, %714 : vector<1x256xf32>
    %716 = math.absf %715 : vector<1x256xf32>
    %cst_244 = arith.constant 1.000000e+00 : f32
    %717 = vector.broadcast %cst_244 : f32 to vector<1x256xf32>
    %718 = arith.subf %717, %716 : vector<1x256xf32>
    %cst_245 = arith.constant 0.000000e+00 : f32
    %719 = vector.broadcast %cst_245 : f32 to vector<1x256xf32>
    %720 = arith.maximumf %719, %718 : vector<1x256xf32>
    %c64_i32_246 = arith.constant 64 : i32
    %721 = tpu.dynamic_rotate %704 by %c64_i32_246 dim 1 : vector<4x256xf32>, i32 -> vector<4x256xf32>
    %722 = vector.broadcast %720 : vector<1x256xf32> to vector<4x256xf32>
    %723 = arith.mulf %722, %721 : vector<4x256xf32>
    %724 = arith.addf %713, %723 : vector<4x256xf32>
    %cst_247 = arith.constant -3.000000e+00 : f32
    %725 = vector.broadcast %cst_247 : f32 to vector<1x256xf32>
    %726 = arith.subf %712, %725 : vector<1x256xf32>
    %727 = math.absf %726 : vector<1x256xf32>
    %cst_248 = arith.constant 1.000000e+00 : f32
    %728 = vector.broadcast %cst_248 : f32 to vector<1x256xf32>
    %729 = arith.subf %728, %727 : vector<1x256xf32>
    %cst_249 = arith.constant 0.000000e+00 : f32
    %730 = vector.broadcast %cst_249 : f32 to vector<1x256xf32>
    %731 = arith.maximumf %730, %729 : vector<1x256xf32>
    %c48_i32_250 = arith.constant 48 : i32
    %732 = tpu.dynamic_rotate %704 by %c48_i32_250 dim 1 : vector<4x256xf32>, i32 -> vector<4x256xf32>
    %733 = vector.broadcast %731 : vector<1x256xf32> to vector<4x256xf32>
    %734 = arith.mulf %733, %732 : vector<4x256xf32>
    %735 = arith.addf %724, %734 : vector<4x256xf32>
    %cst_251 = arith.constant -2.000000e+00 : f32
    %736 = vector.broadcast %cst_251 : f32 to vector<1x256xf32>
    %737 = arith.subf %712, %736 : vector<1x256xf32>
    %738 = math.absf %737 : vector<1x256xf32>
    %cst_252 = arith.constant 1.000000e+00 : f32
    %739 = vector.broadcast %cst_252 : f32 to vector<1x256xf32>
    %740 = arith.subf %739, %738 : vector<1x256xf32>
    %cst_253 = arith.constant 0.000000e+00 : f32
    %741 = vector.broadcast %cst_253 : f32 to vector<1x256xf32>
    %742 = arith.maximumf %741, %740 : vector<1x256xf32>
    %c32_i32_254 = arith.constant 32 : i32
    %743 = tpu.dynamic_rotate %704 by %c32_i32_254 dim 1 : vector<4x256xf32>, i32 -> vector<4x256xf32>
    %744 = vector.broadcast %742 : vector<1x256xf32> to vector<4x256xf32>
    %745 = arith.mulf %744, %743 : vector<4x256xf32>
    %746 = arith.addf %735, %745 : vector<4x256xf32>
    %cst_255 = arith.constant -1.000000e+00 : f32
    %747 = vector.broadcast %cst_255 : f32 to vector<1x256xf32>
    %748 = arith.subf %712, %747 : vector<1x256xf32>
    %749 = math.absf %748 : vector<1x256xf32>
    %cst_256 = arith.constant 1.000000e+00 : f32
    %750 = vector.broadcast %cst_256 : f32 to vector<1x256xf32>
    %751 = arith.subf %750, %749 : vector<1x256xf32>
    %cst_257 = arith.constant 0.000000e+00 : f32
    %752 = vector.broadcast %cst_257 : f32 to vector<1x256xf32>
    %753 = arith.maximumf %752, %751 : vector<1x256xf32>
    %c16_i32_258 = arith.constant 16 : i32
    %754 = tpu.dynamic_rotate %704 by %c16_i32_258 dim 1 : vector<4x256xf32>, i32 -> vector<4x256xf32>
    %755 = vector.broadcast %753 : vector<1x256xf32> to vector<4x256xf32>
    %756 = arith.mulf %755, %754 : vector<4x256xf32>
    %757 = arith.addf %746, %756 : vector<4x256xf32>
    %cst_259 = arith.constant 0.000000e+00 : f32
    %758 = vector.broadcast %cst_259 : f32 to vector<1x256xf32>
    %759 = arith.subf %712, %758 : vector<1x256xf32>
    %760 = math.absf %759 : vector<1x256xf32>
    %cst_260 = arith.constant 1.000000e+00 : f32
    %761 = vector.broadcast %cst_260 : f32 to vector<1x256xf32>
    %762 = arith.subf %761, %760 : vector<1x256xf32>
    %cst_261 = arith.constant 0.000000e+00 : f32
    %763 = vector.broadcast %cst_261 : f32 to vector<1x256xf32>
    %764 = arith.maximumf %763, %762 : vector<1x256xf32>
    %765 = vector.broadcast %764 : vector<1x256xf32> to vector<4x256xf32>
    %766 = arith.mulf %765, %704 : vector<4x256xf32>
    %767 = arith.addf %757, %766 : vector<4x256xf32>
    %cst_262 = arith.constant 1.000000e+00 : f32
    %768 = vector.broadcast %cst_262 : f32 to vector<1x256xf32>
    %769 = arith.subf %712, %768 : vector<1x256xf32>
    %770 = math.absf %769 : vector<1x256xf32>
    %cst_263 = arith.constant 1.000000e+00 : f32
    %771 = vector.broadcast %cst_263 : f32 to vector<1x256xf32>
    %772 = arith.subf %771, %770 : vector<1x256xf32>
    %cst_264 = arith.constant 0.000000e+00 : f32
    %773 = vector.broadcast %cst_264 : f32 to vector<1x256xf32>
    %774 = arith.maximumf %773, %772 : vector<1x256xf32>
    %c240_i32_265 = arith.constant 240 : i32
    %775 = tpu.dynamic_rotate %704 by %c240_i32_265 dim 1 : vector<4x256xf32>, i32 -> vector<4x256xf32>
    %776 = vector.broadcast %774 : vector<1x256xf32> to vector<4x256xf32>
    %777 = arith.mulf %776, %775 : vector<4x256xf32>
    %778 = arith.addf %767, %777 : vector<4x256xf32>
    %cst_266 = arith.constant 2.000000e+00 : f32
    %779 = vector.broadcast %cst_266 : f32 to vector<1x256xf32>
    %780 = arith.subf %712, %779 : vector<1x256xf32>
    %781 = math.absf %780 : vector<1x256xf32>
    %cst_267 = arith.constant 1.000000e+00 : f32
    %782 = vector.broadcast %cst_267 : f32 to vector<1x256xf32>
    %783 = arith.subf %782, %781 : vector<1x256xf32>
    %cst_268 = arith.constant 0.000000e+00 : f32
    %784 = vector.broadcast %cst_268 : f32 to vector<1x256xf32>
    %785 = arith.maximumf %784, %783 : vector<1x256xf32>
    %c224_i32_269 = arith.constant 224 : i32
    %786 = tpu.dynamic_rotate %704 by %c224_i32_269 dim 1 : vector<4x256xf32>, i32 -> vector<4x256xf32>
    %787 = vector.broadcast %785 : vector<1x256xf32> to vector<4x256xf32>
    %788 = arith.mulf %787, %786 : vector<4x256xf32>
    %789 = arith.addf %778, %788 : vector<4x256xf32>
    %cst_270 = arith.constant 3.000000e+00 : f32
    %790 = vector.broadcast %cst_270 : f32 to vector<1x256xf32>
    %791 = arith.subf %712, %790 : vector<1x256xf32>
    %792 = math.absf %791 : vector<1x256xf32>
    %cst_271 = arith.constant 1.000000e+00 : f32
    %793 = vector.broadcast %cst_271 : f32 to vector<1x256xf32>
    %794 = arith.subf %793, %792 : vector<1x256xf32>
    %cst_272 = arith.constant 0.000000e+00 : f32
    %795 = vector.broadcast %cst_272 : f32 to vector<1x256xf32>
    %796 = arith.maximumf %795, %794 : vector<1x256xf32>
    %c208_i32_273 = arith.constant 208 : i32
    %797 = tpu.dynamic_rotate %704 by %c208_i32_273 dim 1 : vector<4x256xf32>, i32 -> vector<4x256xf32>
    %798 = vector.broadcast %796 : vector<1x256xf32> to vector<4x256xf32>
    %799 = arith.mulf %798, %797 : vector<4x256xf32>
    %800 = arith.addf %789, %799 : vector<4x256xf32>
    %cst_274 = arith.constant 4.000000e+00 : f32
    %801 = vector.broadcast %cst_274 : f32 to vector<1x256xf32>
    %802 = arith.subf %712, %801 : vector<1x256xf32>
    %803 = math.absf %802 : vector<1x256xf32>
    %cst_275 = arith.constant 1.000000e+00 : f32
    %804 = vector.broadcast %cst_275 : f32 to vector<1x256xf32>
    %805 = arith.subf %804, %803 : vector<1x256xf32>
    %cst_276 = arith.constant 0.000000e+00 : f32
    %806 = vector.broadcast %cst_276 : f32 to vector<1x256xf32>
    %807 = arith.maximumf %806, %805 : vector<1x256xf32>
    %c192_i32_277 = arith.constant 192 : i32
    %808 = tpu.dynamic_rotate %704 by %c192_i32_277 dim 1 : vector<4x256xf32>, i32 -> vector<4x256xf32>
    %809 = vector.broadcast %807 : vector<1x256xf32> to vector<4x256xf32>
    %810 = arith.mulf %809, %808 : vector<4x256xf32>
    %811 = arith.addf %800, %810 : vector<4x256xf32>
    %812 = arith.truncf %811 : vector<4x256xf32> to vector<4x256xbf16>
    %c255_i32_278 = arith.constant 255 : i32
    %813 = tpu.dynamic_rotate %592 by %c255_i32_278 dim 1 : vector<4x256xf32>, i32 -> vector<4x256xf32>
    %814 = vector.shape_cast %11 : vector<1x256xi1> to vector<1x256xi1>
    %815 = vector.broadcast %814 : vector<1x256xi1> to vector<4x256xi1>
    %816 = arith.select %815, %592, %813 : vector<4x256xi1>, vector<4x256xf32>
    %cst_279 = arith.constant 1.000000e+00 : f32
    %817 = vector.broadcast %cst_279 : f32 to vector<1x256xf32>
    %818 = arith.mulf %817, %29 : vector<1x256xf32>
    %819 = arith.addf %14, %818 : vector<1x256xf32>
    %cst_280 = arith.constant 0.000000e+00 : f32
    %cst_281 = arith.constant 1.500000e+01 : f32
    %820 = vector.broadcast %cst_280 : f32 to vector<1x256xf32>
    %821 = arith.maximumf %820, %819 : vector<1x256xf32>
    %822 = vector.broadcast %cst_281 : f32 to vector<1x256xf32>
    %823 = arith.minimumf %822, %821 : vector<1x256xf32>
    %824 = arith.subf %823, %14 : vector<1x256xf32>
    %cst_282 = arith.constant 0.000000e+00 : f32
    %825 = vector.broadcast %cst_282 : f32 to vector<4x256xf32>
    %cst_283 = arith.constant -4.000000e+00 : f32
    %826 = vector.broadcast %cst_283 : f32 to vector<1x256xf32>
    %827 = arith.subf %824, %826 : vector<1x256xf32>
    %828 = math.absf %827 : vector<1x256xf32>
    %cst_284 = arith.constant 1.000000e+00 : f32
    %829 = vector.broadcast %cst_284 : f32 to vector<1x256xf32>
    %830 = arith.subf %829, %828 : vector<1x256xf32>
    %cst_285 = arith.constant 0.000000e+00 : f32
    %831 = vector.broadcast %cst_285 : f32 to vector<1x256xf32>
    %832 = arith.maximumf %831, %830 : vector<1x256xf32>
    %c64_i32_286 = arith.constant 64 : i32
    %833 = tpu.dynamic_rotate %816 by %c64_i32_286 dim 1 : vector<4x256xf32>, i32 -> vector<4x256xf32>
    %834 = vector.broadcast %832 : vector<1x256xf32> to vector<4x256xf32>
    %835 = arith.mulf %834, %833 : vector<4x256xf32>
    %836 = arith.addf %825, %835 : vector<4x256xf32>
    %cst_287 = arith.constant -3.000000e+00 : f32
    %837 = vector.broadcast %cst_287 : f32 to vector<1x256xf32>
    %838 = arith.subf %824, %837 : vector<1x256xf32>
    %839 = math.absf %838 : vector<1x256xf32>
    %cst_288 = arith.constant 1.000000e+00 : f32
    %840 = vector.broadcast %cst_288 : f32 to vector<1x256xf32>
    %841 = arith.subf %840, %839 : vector<1x256xf32>
    %cst_289 = arith.constant 0.000000e+00 : f32
    %842 = vector.broadcast %cst_289 : f32 to vector<1x256xf32>
    %843 = arith.maximumf %842, %841 : vector<1x256xf32>
    %c48_i32_290 = arith.constant 48 : i32
    %844 = tpu.dynamic_rotate %816 by %c48_i32_290 dim 1 : vector<4x256xf32>, i32 -> vector<4x256xf32>
    %845 = vector.broadcast %843 : vector<1x256xf32> to vector<4x256xf32>
    %846 = arith.mulf %845, %844 : vector<4x256xf32>
    %847 = arith.addf %836, %846 : vector<4x256xf32>
    %cst_291 = arith.constant -2.000000e+00 : f32
    %848 = vector.broadcast %cst_291 : f32 to vector<1x256xf32>
    %849 = arith.subf %824, %848 : vector<1x256xf32>
    %850 = math.absf %849 : vector<1x256xf32>
    %cst_292 = arith.constant 1.000000e+00 : f32
    %851 = vector.broadcast %cst_292 : f32 to vector<1x256xf32>
    %852 = arith.subf %851, %850 : vector<1x256xf32>
    %cst_293 = arith.constant 0.000000e+00 : f32
    %853 = vector.broadcast %cst_293 : f32 to vector<1x256xf32>
    %854 = arith.maximumf %853, %852 : vector<1x256xf32>
    %c32_i32_294 = arith.constant 32 : i32
    %855 = tpu.dynamic_rotate %816 by %c32_i32_294 dim 1 : vector<4x256xf32>, i32 -> vector<4x256xf32>
    %856 = vector.broadcast %854 : vector<1x256xf32> to vector<4x256xf32>
    %857 = arith.mulf %856, %855 : vector<4x256xf32>
    %858 = arith.addf %847, %857 : vector<4x256xf32>
    %cst_295 = arith.constant -1.000000e+00 : f32
    %859 = vector.broadcast %cst_295 : f32 to vector<1x256xf32>
    %860 = arith.subf %824, %859 : vector<1x256xf32>
    %861 = math.absf %860 : vector<1x256xf32>
    %cst_296 = arith.constant 1.000000e+00 : f32
    %862 = vector.broadcast %cst_296 : f32 to vector<1x256xf32>
    %863 = arith.subf %862, %861 : vector<1x256xf32>
    %cst_297 = arith.constant 0.000000e+00 : f32
    %864 = vector.broadcast %cst_297 : f32 to vector<1x256xf32>
    %865 = arith.maximumf %864, %863 : vector<1x256xf32>
    %c16_i32_298 = arith.constant 16 : i32
    %866 = tpu.dynamic_rotate %816 by %c16_i32_298 dim 1 : vector<4x256xf32>, i32 -> vector<4x256xf32>
    %867 = vector.broadcast %865 : vector<1x256xf32> to vector<4x256xf32>
    %868 = arith.mulf %867, %866 : vector<4x256xf32>
    %869 = arith.addf %858, %868 : vector<4x256xf32>
    %cst_299 = arith.constant 0.000000e+00 : f32
    %870 = vector.broadcast %cst_299 : f32 to vector<1x256xf32>
    %871 = arith.subf %824, %870 : vector<1x256xf32>
    %872 = math.absf %871 : vector<1x256xf32>
    %cst_300 = arith.constant 1.000000e+00 : f32
    %873 = vector.broadcast %cst_300 : f32 to vector<1x256xf32>
    %874 = arith.subf %873, %872 : vector<1x256xf32>
    %cst_301 = arith.constant 0.000000e+00 : f32
    %875 = vector.broadcast %cst_301 : f32 to vector<1x256xf32>
    %876 = arith.maximumf %875, %874 : vector<1x256xf32>
    %877 = vector.broadcast %876 : vector<1x256xf32> to vector<4x256xf32>
    %878 = arith.mulf %877, %816 : vector<4x256xf32>
    %879 = arith.addf %869, %878 : vector<4x256xf32>
    %cst_302 = arith.constant 1.000000e+00 : f32
    %880 = vector.broadcast %cst_302 : f32 to vector<1x256xf32>
    %881 = arith.subf %824, %880 : vector<1x256xf32>
    %882 = math.absf %881 : vector<1x256xf32>
    %cst_303 = arith.constant 1.000000e+00 : f32
    %883 = vector.broadcast %cst_303 : f32 to vector<1x256xf32>
    %884 = arith.subf %883, %882 : vector<1x256xf32>
    %cst_304 = arith.constant 0.000000e+00 : f32
    %885 = vector.broadcast %cst_304 : f32 to vector<1x256xf32>
    %886 = arith.maximumf %885, %884 : vector<1x256xf32>
    %c240_i32_305 = arith.constant 240 : i32
    %887 = tpu.dynamic_rotate %816 by %c240_i32_305 dim 1 : vector<4x256xf32>, i32 -> vector<4x256xf32>
    %888 = vector.broadcast %886 : vector<1x256xf32> to vector<4x256xf32>
    %889 = arith.mulf %888, %887 : vector<4x256xf32>
    %890 = arith.addf %879, %889 : vector<4x256xf32>
    %cst_306 = arith.constant 2.000000e+00 : f32
    %891 = vector.broadcast %cst_306 : f32 to vector<1x256xf32>
    %892 = arith.subf %824, %891 : vector<1x256xf32>
    %893 = math.absf %892 : vector<1x256xf32>
    %cst_307 = arith.constant 1.000000e+00 : f32
    %894 = vector.broadcast %cst_307 : f32 to vector<1x256xf32>
    %895 = arith.subf %894, %893 : vector<1x256xf32>
    %cst_308 = arith.constant 0.000000e+00 : f32
    %896 = vector.broadcast %cst_308 : f32 to vector<1x256xf32>
    %897 = arith.maximumf %896, %895 : vector<1x256xf32>
    %c224_i32_309 = arith.constant 224 : i32
    %898 = tpu.dynamic_rotate %816 by %c224_i32_309 dim 1 : vector<4x256xf32>, i32 -> vector<4x256xf32>
    %899 = vector.broadcast %897 : vector<1x256xf32> to vector<4x256xf32>
    %900 = arith.mulf %899, %898 : vector<4x256xf32>
    %901 = arith.addf %890, %900 : vector<4x256xf32>
    %cst_310 = arith.constant 3.000000e+00 : f32
    %902 = vector.broadcast %cst_310 : f32 to vector<1x256xf32>
    %903 = arith.subf %824, %902 : vector<1x256xf32>
    %904 = math.absf %903 : vector<1x256xf32>
    %cst_311 = arith.constant 1.000000e+00 : f32
    %905 = vector.broadcast %cst_311 : f32 to vector<1x256xf32>
    %906 = arith.subf %905, %904 : vector<1x256xf32>
    %cst_312 = arith.constant 0.000000e+00 : f32
    %907 = vector.broadcast %cst_312 : f32 to vector<1x256xf32>
    %908 = arith.maximumf %907, %906 : vector<1x256xf32>
    %c208_i32_313 = arith.constant 208 : i32
    %909 = tpu.dynamic_rotate %816 by %c208_i32_313 dim 1 : vector<4x256xf32>, i32 -> vector<4x256xf32>
    %910 = vector.broadcast %908 : vector<1x256xf32> to vector<4x256xf32>
    %911 = arith.mulf %910, %909 : vector<4x256xf32>
    %912 = arith.addf %901, %911 : vector<4x256xf32>
    %cst_314 = arith.constant 4.000000e+00 : f32
    %913 = vector.broadcast %cst_314 : f32 to vector<1x256xf32>
    %914 = arith.subf %824, %913 : vector<1x256xf32>
    %915 = math.absf %914 : vector<1x256xf32>
    %cst_315 = arith.constant 1.000000e+00 : f32
    %916 = vector.broadcast %cst_315 : f32 to vector<1x256xf32>
    %917 = arith.subf %916, %915 : vector<1x256xf32>
    %cst_316 = arith.constant 0.000000e+00 : f32
    %918 = vector.broadcast %cst_316 : f32 to vector<1x256xf32>
    %919 = arith.maximumf %918, %917 : vector<1x256xf32>
    %c192_i32_317 = arith.constant 192 : i32
    %920 = tpu.dynamic_rotate %816 by %c192_i32_317 dim 1 : vector<4x256xf32>, i32 -> vector<4x256xf32>
    %921 = vector.broadcast %919 : vector<1x256xf32> to vector<4x256xf32>
    %922 = arith.mulf %921, %920 : vector<4x256xf32>
    %923 = arith.addf %912, %922 : vector<4x256xf32>
    %924 = arith.truncf %923 : vector<4x256xf32> to vector<4x256xbf16>
    %c1_i32_318 = arith.constant 1 : i32
    %925 = tpu.dynamic_rotate %704 by %c1_i32_318 dim 1 : vector<4x256xf32>, i32 -> vector<4x256xf32>
    %926 = vector.shape_cast %13 : vector<1x256xi1> to vector<1x256xi1>
    %927 = vector.broadcast %926 : vector<1x256xi1> to vector<4x256xi1>
    %928 = arith.select %927, %704, %925 : vector<4x256xi1>, vector<4x256xf32>
    %cst_319 = arith.constant 1.000000e+00 : f32
    %929 = vector.broadcast %cst_319 : f32 to vector<1x256xf32>
    %930 = arith.mulf %929, %31 : vector<1x256xf32>
    %931 = arith.addf %14, %930 : vector<1x256xf32>
    %cst_320 = arith.constant 0.000000e+00 : f32
    %cst_321 = arith.constant 1.500000e+01 : f32
    %932 = vector.broadcast %cst_320 : f32 to vector<1x256xf32>
    %933 = arith.maximumf %932, %931 : vector<1x256xf32>
    %934 = vector.broadcast %cst_321 : f32 to vector<1x256xf32>
    %935 = arith.minimumf %934, %933 : vector<1x256xf32>
    %936 = arith.subf %935, %14 : vector<1x256xf32>
    %cst_322 = arith.constant 0.000000e+00 : f32
    %937 = vector.broadcast %cst_322 : f32 to vector<4x256xf32>
    %cst_323 = arith.constant -4.000000e+00 : f32
    %938 = vector.broadcast %cst_323 : f32 to vector<1x256xf32>
    %939 = arith.subf %936, %938 : vector<1x256xf32>
    %940 = math.absf %939 : vector<1x256xf32>
    %cst_324 = arith.constant 1.000000e+00 : f32
    %941 = vector.broadcast %cst_324 : f32 to vector<1x256xf32>
    %942 = arith.subf %941, %940 : vector<1x256xf32>
    %cst_325 = arith.constant 0.000000e+00 : f32
    %943 = vector.broadcast %cst_325 : f32 to vector<1x256xf32>
    %944 = arith.maximumf %943, %942 : vector<1x256xf32>
    %c64_i32_326 = arith.constant 64 : i32
    %945 = tpu.dynamic_rotate %928 by %c64_i32_326 dim 1 : vector<4x256xf32>, i32 -> vector<4x256xf32>
    %946 = vector.broadcast %944 : vector<1x256xf32> to vector<4x256xf32>
    %947 = arith.mulf %946, %945 : vector<4x256xf32>
    %948 = arith.addf %937, %947 : vector<4x256xf32>
    %cst_327 = arith.constant -3.000000e+00 : f32
    %949 = vector.broadcast %cst_327 : f32 to vector<1x256xf32>
    %950 = arith.subf %936, %949 : vector<1x256xf32>
    %951 = math.absf %950 : vector<1x256xf32>
    %cst_328 = arith.constant 1.000000e+00 : f32
    %952 = vector.broadcast %cst_328 : f32 to vector<1x256xf32>
    %953 = arith.subf %952, %951 : vector<1x256xf32>
    %cst_329 = arith.constant 0.000000e+00 : f32
    %954 = vector.broadcast %cst_329 : f32 to vector<1x256xf32>
    %955 = arith.maximumf %954, %953 : vector<1x256xf32>
    %c48_i32_330 = arith.constant 48 : i32
    %956 = tpu.dynamic_rotate %928 by %c48_i32_330 dim 1 : vector<4x256xf32>, i32 -> vector<4x256xf32>
    %957 = vector.broadcast %955 : vector<1x256xf32> to vector<4x256xf32>
    %958 = arith.mulf %957, %956 : vector<4x256xf32>
    %959 = arith.addf %948, %958 : vector<4x256xf32>
    %cst_331 = arith.constant -2.000000e+00 : f32
    %960 = vector.broadcast %cst_331 : f32 to vector<1x256xf32>
    %961 = arith.subf %936, %960 : vector<1x256xf32>
    %962 = math.absf %961 : vector<1x256xf32>
    %cst_332 = arith.constant 1.000000e+00 : f32
    %963 = vector.broadcast %cst_332 : f32 to vector<1x256xf32>
    %964 = arith.subf %963, %962 : vector<1x256xf32>
    %cst_333 = arith.constant 0.000000e+00 : f32
    %965 = vector.broadcast %cst_333 : f32 to vector<1x256xf32>
    %966 = arith.maximumf %965, %964 : vector<1x256xf32>
    %c32_i32_334 = arith.constant 32 : i32
    %967 = tpu.dynamic_rotate %928 by %c32_i32_334 dim 1 : vector<4x256xf32>, i32 -> vector<4x256xf32>
    %968 = vector.broadcast %966 : vector<1x256xf32> to vector<4x256xf32>
    %969 = arith.mulf %968, %967 : vector<4x256xf32>
    %970 = arith.addf %959, %969 : vector<4x256xf32>
    %cst_335 = arith.constant -1.000000e+00 : f32
    %971 = vector.broadcast %cst_335 : f32 to vector<1x256xf32>
    %972 = arith.subf %936, %971 : vector<1x256xf32>
    %973 = math.absf %972 : vector<1x256xf32>
    %cst_336 = arith.constant 1.000000e+00 : f32
    %974 = vector.broadcast %cst_336 : f32 to vector<1x256xf32>
    %975 = arith.subf %974, %973 : vector<1x256xf32>
    %cst_337 = arith.constant 0.000000e+00 : f32
    %976 = vector.broadcast %cst_337 : f32 to vector<1x256xf32>
    %977 = arith.maximumf %976, %975 : vector<1x256xf32>
    %c16_i32_338 = arith.constant 16 : i32
    %978 = tpu.dynamic_rotate %928 by %c16_i32_338 dim 1 : vector<4x256xf32>, i32 -> vector<4x256xf32>
    %979 = vector.broadcast %977 : vector<1x256xf32> to vector<4x256xf32>
    %980 = arith.mulf %979, %978 : vector<4x256xf32>
    %981 = arith.addf %970, %980 : vector<4x256xf32>
    %cst_339 = arith.constant 0.000000e+00 : f32
    %982 = vector.broadcast %cst_339 : f32 to vector<1x256xf32>
    %983 = arith.subf %936, %982 : vector<1x256xf32>
    %984 = math.absf %983 : vector<1x256xf32>
    %cst_340 = arith.constant 1.000000e+00 : f32
    %985 = vector.broadcast %cst_340 : f32 to vector<1x256xf32>
    %986 = arith.subf %985, %984 : vector<1x256xf32>
    %cst_341 = arith.constant 0.000000e+00 : f32
    %987 = vector.broadcast %cst_341 : f32 to vector<1x256xf32>
    %988 = arith.maximumf %987, %986 : vector<1x256xf32>
    %989 = vector.broadcast %988 : vector<1x256xf32> to vector<4x256xf32>
    %990 = arith.mulf %989, %928 : vector<4x256xf32>
    %991 = arith.addf %981, %990 : vector<4x256xf32>
    %cst_342 = arith.constant 1.000000e+00 : f32
    %992 = vector.broadcast %cst_342 : f32 to vector<1x256xf32>
    %993 = arith.subf %936, %992 : vector<1x256xf32>
    %994 = math.absf %993 : vector<1x256xf32>
    %cst_343 = arith.constant 1.000000e+00 : f32
    %995 = vector.broadcast %cst_343 : f32 to vector<1x256xf32>
    %996 = arith.subf %995, %994 : vector<1x256xf32>
    %cst_344 = arith.constant 0.000000e+00 : f32
    %997 = vector.broadcast %cst_344 : f32 to vector<1x256xf32>
    %998 = arith.maximumf %997, %996 : vector<1x256xf32>
    %c240_i32_345 = arith.constant 240 : i32
    %999 = tpu.dynamic_rotate %928 by %c240_i32_345 dim 1 : vector<4x256xf32>, i32 -> vector<4x256xf32>
    %1000 = vector.broadcast %998 : vector<1x256xf32> to vector<4x256xf32>
    %1001 = arith.mulf %1000, %999 : vector<4x256xf32>
    %1002 = arith.addf %991, %1001 : vector<4x256xf32>
    %cst_346 = arith.constant 2.000000e+00 : f32
    %1003 = vector.broadcast %cst_346 : f32 to vector<1x256xf32>
    %1004 = arith.subf %936, %1003 : vector<1x256xf32>
    %1005 = math.absf %1004 : vector<1x256xf32>
    %cst_347 = arith.constant 1.000000e+00 : f32
    %1006 = vector.broadcast %cst_347 : f32 to vector<1x256xf32>
    %1007 = arith.subf %1006, %1005 : vector<1x256xf32>
    %cst_348 = arith.constant 0.000000e+00 : f32
    %1008 = vector.broadcast %cst_348 : f32 to vector<1x256xf32>
    %1009 = arith.maximumf %1008, %1007 : vector<1x256xf32>
    %c224_i32_349 = arith.constant 224 : i32
    %1010 = tpu.dynamic_rotate %928 by %c224_i32_349 dim 1 : vector<4x256xf32>, i32 -> vector<4x256xf32>
    %1011 = vector.broadcast %1009 : vector<1x256xf32> to vector<4x256xf32>
    %1012 = arith.mulf %1011, %1010 : vector<4x256xf32>
    %1013 = arith.addf %1002, %1012 : vector<4x256xf32>
    %cst_350 = arith.constant 3.000000e+00 : f32
    %1014 = vector.broadcast %cst_350 : f32 to vector<1x256xf32>
    %1015 = arith.subf %936, %1014 : vector<1x256xf32>
    %1016 = math.absf %1015 : vector<1x256xf32>
    %cst_351 = arith.constant 1.000000e+00 : f32
    %1017 = vector.broadcast %cst_351 : f32 to vector<1x256xf32>
    %1018 = arith.subf %1017, %1016 : vector<1x256xf32>
    %cst_352 = arith.constant 0.000000e+00 : f32
    %1019 = vector.broadcast %cst_352 : f32 to vector<1x256xf32>
    %1020 = arith.maximumf %1019, %1018 : vector<1x256xf32>
    %c208_i32_353 = arith.constant 208 : i32
    %1021 = tpu.dynamic_rotate %928 by %c208_i32_353 dim 1 : vector<4x256xf32>, i32 -> vector<4x256xf32>
    %1022 = vector.broadcast %1020 : vector<1x256xf32> to vector<4x256xf32>
    %1023 = arith.mulf %1022, %1021 : vector<4x256xf32>
    %1024 = arith.addf %1013, %1023 : vector<4x256xf32>
    %cst_354 = arith.constant 4.000000e+00 : f32
    %1025 = vector.broadcast %cst_354 : f32 to vector<1x256xf32>
    %1026 = arith.subf %936, %1025 : vector<1x256xf32>
    %1027 = math.absf %1026 : vector<1x256xf32>
    %cst_355 = arith.constant 1.000000e+00 : f32
    %1028 = vector.broadcast %cst_355 : f32 to vector<1x256xf32>
    %1029 = arith.subf %1028, %1027 : vector<1x256xf32>
    %cst_356 = arith.constant 0.000000e+00 : f32
    %1030 = vector.broadcast %cst_356 : f32 to vector<1x256xf32>
    %1031 = arith.maximumf %1030, %1029 : vector<1x256xf32>
    %c192_i32_357 = arith.constant 192 : i32
    %1032 = tpu.dynamic_rotate %928 by %c192_i32_357 dim 1 : vector<4x256xf32>, i32 -> vector<4x256xf32>
    %1033 = vector.broadcast %1031 : vector<1x256xf32> to vector<4x256xf32>
    %1034 = arith.mulf %1033, %1032 : vector<4x256xf32>
    %1035 = arith.addf %1024, %1034 : vector<4x256xf32>
    %1036 = arith.truncf %1035 : vector<4x256xf32> to vector<4x256xbf16>
    %1037 = tpu.concatenate %140, %252, %364, %476, %588, %700, %812, %924, %1036 in 0 : vector<4x256xbf16>, vector<4x256xbf16>, vector<4x256xbf16>, vector<4x256xbf16>, vector<4x256xbf16>, vector<4x256xbf16>, vector<4x256xbf16>, vector<4x256xbf16>, vector<4x256xbf16> -> vector<36x256xbf16>
    %cst_358 = arith.constant dense<0.000000e+00> : vector<8x256xf32>
    %1038 = tpu.matmul %4, %1037, %cst_358 {dimension_numbers = #tpu.dot_dimension_numbers<[1], [0], [0], [1], [0, 0, 1, 1], [], []>} : vector<8x36xbf16>, vector<36x256xbf16>, vector<8x256xf32> -> vector<8x256xf32>
    %1039 = arith.addf %32, %1038 : vector<8x256xf32>
    %c0_359 = arith.constant 0 : index
    %c0_360 = arith.constant 0 : index
    %1040 = vector.load %arg4[%c0_359, %c0_360] : memref<8x1xf32, #tpu.memory_space<vmem>>, vector<8x1xf32>
    %1041 = vector.broadcast %1040 : vector<8x1xf32> to vector<8x256xf32>
    %1042 = arith.addf %1039, %1041 : vector<8x256xf32>
    %c0_361 = arith.constant 0 : index
    %c0_362 = arith.constant 0 : index
    %1043 = vector.load %arg5[%c0_361, %c0_362] : memref<8x1xf32, #tpu.memory_space<vmem>>, vector<8x1xf32>
    %c0_363 = arith.constant 0 : index
    %c0_364 = arith.constant 0 : index
    %1044 = vector.load %arg6[%c0_363, %c0_364] : memref<8x1xf32, #tpu.memory_space<vmem>>, vector<8x1xf32>
    %cst_365 = arith.constant dense<0.000000e+00> : vector<8xf32>
    %1045 = vector.multi_reduction <add>, %1042, %cst_365 [1] : vector<8x256xf32> to vector<8xf32>
    %1046 = vector.shape_cast %1045 : vector<8xf32> to vector<8x1xf32>
    %1047 = arith.mulf %1042, %1042 : vector<8x256xf32>
    %cst_366 = arith.constant dense<0.000000e+00> : vector<8xf32>
    %1048 = vector.multi_reduction <add>, %1047, %cst_366 [1] : vector<8x256xf32> to vector<8xf32>
    %1049 = vector.shape_cast %1048 : vector<8xf32> to vector<8x1xf32>
    %1050 = vector.extract_strided_slice %1046 {offsets = [0, 0], sizes = [4, 1], strides = [1, 1]} : vector<8x1xf32> to vector<4x1xf32>
    %1051 = vector.shape_cast %1050 : vector<4x1xf32> to vector<1x4x1xf32>
    %cst_367 = arith.constant dense<0.000000e+00> : vector<1xf32>
    %1052 = vector.multi_reduction <add>, %1051, %cst_367 [1, 2] : vector<1x4x1xf32> to vector<1xf32>
    %1053 = vector.shape_cast %1052 : vector<1xf32> to vector<1x1x1xf32>
    %1054 = vector.extract %1053[0, 0, 0] : f32 from vector<1x1x1xf32>
    %1055 = vector.broadcast %1054 : f32 to vector<1x1xf32>
    %1056 = vector.extract_strided_slice %1049 {offsets = [0, 0], sizes = [4, 1], strides = [1, 1]} : vector<8x1xf32> to vector<4x1xf32>
    %1057 = vector.shape_cast %1056 : vector<4x1xf32> to vector<1x4x1xf32>
    %cst_368 = arith.constant dense<0.000000e+00> : vector<1xf32>
    %1058 = vector.multi_reduction <add>, %1057, %cst_368 [1, 2] : vector<1x4x1xf32> to vector<1xf32>
    %1059 = vector.shape_cast %1058 : vector<1xf32> to vector<1x1x1xf32>
    %1060 = vector.extract %1059[0, 0, 0] : f32 from vector<1x1x1xf32>
    %1061 = vector.broadcast %1060 : f32 to vector<1x1xf32>
    %cst_369 = arith.constant 1.024000e+03 : f32
    %1062 = vector.broadcast %cst_369 : f32 to vector<1x1xf32>
    %1063 = arith.divf %1055, %1062 : vector<1x1xf32>
    %cst_370 = arith.constant 1.024000e+03 : f32
    %1064 = vector.broadcast %cst_370 : f32 to vector<1x1xf32>
    %1065 = arith.divf %1061, %1064 : vector<1x1xf32>
    %1066 = arith.mulf %1063, %1063 : vector<1x1xf32>
    %1067 = arith.subf %1065, %1066 : vector<1x1xf32>
    %cst_371 = arith.constant 0.000000e+00 : f32
    %1068 = vector.broadcast %cst_371 : f32 to vector<1x1xf32>
    %1069 = arith.maximumf %1067, %1068 : vector<1x1xf32>
    %cst_372 = arith.constant 9.99999974E-6 : f32
    %1070 = vector.broadcast %cst_372 : f32 to vector<1x1xf32>
    %1071 = arith.addf %1069, %1070 : vector<1x1xf32>
    %1072 = math.rsqrt %1071 : vector<1x1xf32>
    %1073 = vector.shape_cast %1063 : vector<1x1xf32> to vector<1x1xf32>
    %1074 = vector.broadcast %1073 : vector<1x1xf32> to vector<4x1xf32>
    %1075 = vector.shape_cast %1072 : vector<1x1xf32> to vector<1x1xf32>
    %1076 = vector.broadcast %1075 : vector<1x1xf32> to vector<4x1xf32>
    %1077 = vector.extract_strided_slice %1046 {offsets = [4, 0], sizes = [4, 1], strides = [1, 1]} : vector<8x1xf32> to vector<4x1xf32>
    %1078 = vector.shape_cast %1077 : vector<4x1xf32> to vector<1x4x1xf32>
    %cst_373 = arith.constant dense<0.000000e+00> : vector<1xf32>
    %1079 = vector.multi_reduction <add>, %1078, %cst_373 [1, 2] : vector<1x4x1xf32> to vector<1xf32>
    %1080 = vector.shape_cast %1079 : vector<1xf32> to vector<1x1x1xf32>
    %1081 = vector.extract %1080[0, 0, 0] : f32 from vector<1x1x1xf32>
    %1082 = vector.broadcast %1081 : f32 to vector<1x1xf32>
    %1083 = vector.extract_strided_slice %1049 {offsets = [4, 0], sizes = [4, 1], strides = [1, 1]} : vector<8x1xf32> to vector<4x1xf32>
    %1084 = vector.shape_cast %1083 : vector<4x1xf32> to vector<1x4x1xf32>
    %cst_374 = arith.constant dense<0.000000e+00> : vector<1xf32>
    %1085 = vector.multi_reduction <add>, %1084, %cst_374 [1, 2] : vector<1x4x1xf32> to vector<1xf32>
    %1086 = vector.shape_cast %1085 : vector<1xf32> to vector<1x1x1xf32>
    %1087 = vector.extract %1086[0, 0, 0] : f32 from vector<1x1x1xf32>
    %1088 = vector.broadcast %1087 : f32 to vector<1x1xf32>
    %cst_375 = arith.constant 1.024000e+03 : f32
    %1089 = vector.broadcast %cst_375 : f32 to vector<1x1xf32>
    %1090 = arith.divf %1082, %1089 : vector<1x1xf32>
    %cst_376 = arith.constant 1.024000e+03 : f32
    %1091 = vector.broadcast %cst_376 : f32 to vector<1x1xf32>
    %1092 = arith.divf %1088, %1091 : vector<1x1xf32>
    %1093 = arith.mulf %1090, %1090 : vector<1x1xf32>
    %1094 = arith.subf %1092, %1093 : vector<1x1xf32>
    %cst_377 = arith.constant 0.000000e+00 : f32
    %1095 = vector.broadcast %cst_377 : f32 to vector<1x1xf32>
    %1096 = arith.maximumf %1094, %1095 : vector<1x1xf32>
    %cst_378 = arith.constant 9.99999974E-6 : f32
    %1097 = vector.broadcast %cst_378 : f32 to vector<1x1xf32>
    %1098 = arith.addf %1096, %1097 : vector<1x1xf32>
    %1099 = math.rsqrt %1098 : vector<1x1xf32>
    %1100 = vector.shape_cast %1090 : vector<1x1xf32> to vector<1x1xf32>
    %1101 = vector.broadcast %1100 : vector<1x1xf32> to vector<4x1xf32>
    %1102 = vector.shape_cast %1099 : vector<1x1xf32> to vector<1x1xf32>
    %1103 = vector.broadcast %1102 : vector<1x1xf32> to vector<4x1xf32>
    %1104 = tpu.concatenate %1074, %1101 in 0 : vector<4x1xf32>, vector<4x1xf32> -> vector<8x1xf32>
    %1105 = tpu.concatenate %1076, %1103 in 0 : vector<4x1xf32>, vector<4x1xf32> -> vector<8x1xf32>
    %1106 = vector.broadcast %1104 : vector<8x1xf32> to vector<8x256xf32>
    %1107 = arith.subf %1042, %1106 : vector<8x256xf32>
    %1108 = vector.broadcast %1105 : vector<8x1xf32> to vector<8x256xf32>
    %1109 = arith.mulf %1107, %1108 : vector<8x256xf32>
    %1110 = vector.broadcast %1043 : vector<8x1xf32> to vector<8x256xf32>
    %1111 = arith.mulf %1109, %1110 : vector<8x256xf32>
    %1112 = vector.broadcast %1044 : vector<8x1xf32> to vector<8x256xf32>
    %1113 = arith.addf %1111, %1112 : vector<8x256xf32>
    %cst_379 = arith.constant 0.000000e+00 : f32
    %1114 = vector.broadcast %cst_379 : f32 to vector<8x256xf32>
    %1115 = arith.maximumf %1113, %1114 : vector<8x256xf32>
    %c0_380 = arith.constant 0 : index
    %c0_381 = arith.constant 0 : index
    %c0_382 = arith.constant 0 : index
    %1116 = vector.load %arg7[%c0_380, %c0_381, %c0_382] : memref<1x8x256xf32, #tpu.memory_space<vmem>>, vector<1x8x256xf32>
    %1117 = vector.shape_cast %1116 : vector<1x8x256xf32> to vector<8x256xf32>
    %1118 = vector.shape_cast %1115 : vector<8x256xf32> to vector<1x8x256xf32>
    tpu.vector_store %arg7[%c0_380, %c0_381, %c0_382], %1118 {strides = array<i32>} : memref<1x8x256xf32, #tpu.memory_space<vmem>>, vector<1x8x256xf32>,
    return
  }
  func.func @transform_0(%arg0: i32) -> (i32, i32, i32) {
    %c0_i32 = arith.constant 0 : i32
    %c0_i32_0 = arith.constant 0 : i32
    %c0_i32_1 = arith.constant 0 : i32
    return %arg0, %c0_i32, %c0_i32_0 : i32, i32, i32
  }
  func.func @transform_1(%arg0: i32) -> (i32, i32, i32) {
    %c0_i32 = arith.constant 0 : i32
    %c0_i32_0 = arith.constant 0 : i32
    %c0_i32_1 = arith.constant 0 : i32
    return %arg0, %c0_i32, %c0_i32_0 : i32, i32, i32
  }
  func.func @transform_2(%arg0: i32) -> (i32, i32) {
    %c0_i32 = arith.constant 0 : i32
    %c0_i32_0 = arith.constant 0 : i32
    %c0_i32_1 = arith.constant 0 : i32
    return %c0_i32, %c0_i32_0 : i32, i32
  }
  func.func @transform_3(%arg0: i32) -> (i32, i32) {
    %c0_i32 = arith.constant 0 : i32
    %c0_i32_0 = arith.constant 0 : i32
    %c0_i32_1 = arith.constant 0 : i32
    return %c0_i32, %c0_i32_0 : i32, i32
  }
  func.func @transform_4(%arg0: i32) -> (i32, i32) {
    %c0_i32 = arith.constant 0 : i32
    %c0_i32_0 = arith.constant 0 : i32
    %c0_i32_1 = arith.constant 0 : i32
    return %c0_i32, %c0_i32_0 : i32, i32
  }
  func.func @transform_5(%arg0: i32) -> (i32, i32) {
    %c0_i32 = arith.constant 0 : i32
    %c0_i32_0 = arith.constant 0 : i32
    %c0_i32_1 = arith.constant 0 : i32
    return %c0_i32, %c0_i32_0 : i32, i32
  }
  func.func @transform_6(%arg0: i32) -> (i32, i32, i32) {
    %c0_i32 = arith.constant 0 : i32
    %c0_i32_0 = arith.constant 0 : i32
    %c0_i32_1 = arith.constant 0 : i32
    return %arg0, %c0_i32, %c0_i32_0 : i32, i32, i32
  }
}

</mosaic_0001>

<bundles_post_ra>
// kernel: tpu_custom_call.1
= control target key start
LH: loop header
LB: loop body
LE: loop exit
PB: predicated region body
PF: predicated region fallthrough
CT: control target
= control target key end

     0   :  { %6 = vsyncpa [#allocation3], 0  ;;  %s118_s0 = inlined_call_operand.hbm [shape: f32[8,128], index: 0, kind: input, shape index: {}]   ;;  %s119_s1 = inlined_call_operand.hbm [shape: f32[8,128], index: 1, kind: output, shape index: {}]  }
   0x1   :  { %7 = vsyncpa [#allocation4], 0  ;;  %s13_s8 = sshll.u32 %s118_s0, 4  ;;  %s99_s9 = smov [#allocation2]   ;;  %s14_s8 = int_to_ptr.hbm [resolvable:$true] %s13_s8 }
   0x2   :  { %s15_s10 = sshll.u32 %s99_s9, 4  ;;  %s16_s10 = int_to_ptr.vmem [resolvable:$true] %s15_s10 }
   0x3   :  { %18 = dma.hbm_to_vmem [thread:$0]  %s14_s8, 128, %s16_s10, [#allocation3]  }
   0x4   :  { %95 = dma.done.wait [#allocation3], 128  }
   0x5   :  { %96 = vsyncadd [#allocation3], 4294967168  ;;  %v23_v0 = vld [vmem:[#allocation2] sm:$0xff]  ;;  %s100_s11 = smov 1   ;;  %s101_s12 = smov [#allocation5]  }
   0x6   :  { %24 = vrot.lane.b32.xlu0 %v23_v0, %s100_s11  ;;  %s32_s13 = sshll.u32 %s101_s12, 4  ;;  %s34_s16 = sshll.u32 %s119_s1, 4  ;;  %s33_s13 = int_to_ptr.vmem [resolvable:$true] %s32_s13  ;;  %s35_s16 = int_to_ptr.hbm [resolvable:$true] %s34_s16 }
  0x78   :  { %v25_v1 = vpop.permute.xlu0 %24 }
  0x79   :  { %26 = vst [vmem:[#allocation5] sm:$0xff] %v25_v1 }
  0x7a   :  { %37 = dma.vmem_to_hbm [thread:$0]  %s33_s13, 128, %s35_s16, [#allocation4]  }
  0x7b   :  { %97 = dma.done.wait [#allocation4], 128  }
  0x7c   :  { %98 = vsyncadd [#allocation4], 4294967168 }
  0x7d   :  { %42 = vsyncpa [#allocation3], 1 }
  0x7e   :  { %43 = vsyncpa [#allocation4], 1 }

// kernel: dsconv_forward.2
= control target key start
LH: loop header
LB: loop body
LE: loop exit
PB: predicated region body
PF: predicated region fallthrough
CT: control target
= control target key end

     0   :  { %s1378_s18 = smov 0   ;;  %s1818_s0 = inlined_call_operand.vmem [shape: f32[2,4,256], index: 0, kind: input, shape index: {}]   ;;  %s1819_s1 = inlined_call_operand.vmem [shape: bf16[18,36], index: 1, kind: input, shape index: {}]   ;;  %s1820_s2 = inlined_call_operand.vmem [shape: f32[18,1], index: 2, kind: input, shape index: {}]   ;;  %s1821_s3 = inlined_call_operand.vmem [shape: f32[18,1], index: 3, kind: input, shape index: {}]   ;;  %s1822_s4 = inlined_call_operand.vmem [shape: f32[18,1], index: 4, kind: input, shape index: {}]   ;;  %s1823_s5 = inlined_call_operand.vmem [shape: f32[2,18,256], index: 5, kind: output, shape index: {}]  }
   0x1 LB: > { %s1174_s19 = sadd.s32 4294967295, %s1336_s18   ;;  %p1178_p0 = scmp.ge.s32.totalorder %s1336_s18, 1  ;;  %s1336_s18 = sphi %s1378_s18, %s15_s18  }
   0x2   : > { %p187_p1 = scmp.lt.s32.totalorder %s1336_s18, 3 }
   0x4   : > { %p188_p2 = pnand %p1178_p0, %p187_p1 }
   0x5   : > { %p215_p3 = scmp.lt.s32.totalorder (!%p188_p2), %s1174_s19, 1  ;;  %s1338_s24 = smov (!%p188_p2), 127  }
   0x6   : > { %191 = sbr.rel (%p188_p2) target bundleno = 859 (0x35b), region = 40  ;;  %s1339_s25 = smov (!%p188_p2), 16  }
   0x7   : > { %s1340_s26 = smov (!%p188_p2), 113   ;;  %s1341_s27 = smov (!%p188_p2), 17  }
   0x8   : > { %s1342_s28 = smov (!%p188_p2), 112   ;;  %s1343_s29 = smov (!%p188_p2), 111  }
   0x9   : > { %s1344_s30 = smov (!%p188_p2), 15   ;;  %s1345_s6 = smov (!%p188_p2), 1  }
   0xb   : > { %s1857_s19 = smov (!%p215_p3, %s1174_s19), 1  ;;  %v230_v27 = vlaneseq }
   0xc   : > { %s1192_s20 = sshll.u32 %s1857_s19, 3 }
   0xd   : > { %s219_s23 = scalar_lea.vmem %s1818_s0, %s1192_s20  ;;  %v1396_v28 = vand.u32 127, %v230_v27  ;;  %v1346_v27 = vmov 0  }
   0xe   : > { %v226_v0 = vld [vmem:[%s219_s23] sm:$0xff]  ;;  %1297 = vset.pattern.permute.xlu1 %v1346_v27  ;;  %1296 = vset.pattern.permute.xlu0 %v1346_v27 }
   0xf   : > { %238 = vst [vmem:[#allocation1] ss:$2 sm:$0xff] %v226_v0  ;;  %v232_v29 = vadd.s32 128, %v1396_v28  ;;  %v233_v30 = vshra.s32 %v1396_v28, 4  ;;  %v235_v32 = vand.u32 15, %v1396_v28  ;;  %vm357_vm1 = vcmp.lt.s32.totalorder %v1396_v28, 127  ;;  %1295 = vset.pattern.permute.xlu2 %v1346_v27 }
  0x10   : > { %vm284_vm5 = vcmp.lt.s32.totalorder %v1396_v28, 16 }
  0x11   : > { %v236_v33 = vand.u32 15, %v232_v29  ;;  %v234_v34 = vshra.s32 %v232_v29, 4  ;;  %v379_v35 = vadd.s32 1, %v233_v30  ;;  %v1401_v37 = vadd.s32 1, %v235_v32  ;;  %v524_v29 = vld [vmem:[%s1820_s2] sm:$0xff] }
  0x12   : > { %v250_v39 = vadd.s32 4294967295, %v233_v30  ;;  %v1405_v43 = vadd.s32 4294967295, %v235_v32 }
  0x13   : > { %v1403_v38 = vadd.s32 1, %v236_v33  ;;  %v251_v42 = vadd.s32 4294967295, %v234_v34  ;;  %v380_v44 = vadd.s32 1, %v234_v34  ;;  %vm381_vm0 = vcmp.ge.s32.totalorder %v379_v35, 0 }
  0x14   : > { %vm383_vm2 = vcmp.le.s32.totalorder %v379_v35, 15  ;;  %vm310_vm3 = vcmp.le.s32.totalorder %v1401_v37, 15  ;;  %vm252_vm6 = vcmp.ge.s32.totalorder %v250_v39, 0  ;;  %vm254_vm7 = vcmp.le.s32.totalorder %v250_v39, 15 }
  0x15   : > { %vm311_vm4 = vcmp.le.s32.totalorder %v1403_v38, 15  ;;  %vm253_vm8 = vcmp.ge.s32.totalorder %v251_v42, 0  ;;  %vm255_vm9 = vcmp.le.s32.totalorder %v251_v42, 15  ;;  %v1411_v51 = vadd.s32 4294967295, %v236_v33  ;;  %vm1415_vm12 = vmand %vm381_vm0, %vm383_vm2 }
  0x16   : > { %v239_v1 = vld.sshfl [vmem:[#allocation1] sm:$0xff pattern:$0x75316420]  ;;  %v240_v2 = vld.sshfl [vmem:[#allocation1 + $0x8] sm:$0xff pattern:$0x75316420]  ;;  %vm1421_vm14 = vmand %vm252_vm6, %vm254_vm7 }
  0x17   : > { %275 = vst [vmem:[#allocation1] ss:$2 sm:$0xff] %v226_v0  ;;  %v1260_v18 = vpack.i.bf16 %v240_v2, %v239_v1  ;;  %vm382_vm10 = vcmp.ge.s32.totalorder %v380_v44, 0  ;;  %vm384_vm11 = vcmp.le.s32.totalorder %v380_v44, 15  ;;  %vm260_vm13 = vcmp.ge.s32.totalorder %v1405_v43, 0  ;;  %vm1429_vm15 = vmand %vm253_vm8, %vm255_vm9 }
  0x18   : > { %vm247_vm0 = vcmp.lt.s32.totalorder %v1396_v28, 17  ;;  %vm261_vm2 = vcmp.ge.s32.totalorder %v1411_v51, 0  ;;  %vm376_vm6 = vcmp.lt.s32.totalorder %v1396_v28, 113  ;;  %vm1450_vm7 = vmand %vm1421_vm14, %vm260_vm13 }
  0x19   : > { %vm1466_vm8 = vmand %vm1415_vm12, %vm260_vm13 }
  0x1e   : > { %v276_v3 = vld.sshfl [vmem:[#allocation1] sm:$0xff pattern:$0x75316420]  ;;  %v277_v4 = vld.sshfl [vmem:[#allocation1 + $0x8] sm:$0xff pattern:$0x75316420] }
  0x1f   : > { %294 = vst [vmem:[#allocation1] ss:$2 sm:$0xff] %v226_v0  ;;  %v1255_v14 = vpack.i.bf16 %v277_v4, %v276_v3 }
  0x21   : > { %1256 = vrot.lane.b32.xlu2 %v1255_v14, %s1339_s25 }
  0x26   : > { %v295_v5 = vld.sshfl [vmem:[#allocation1] sm:$0xff pattern:$0x75316420]  ;;  %v296_v6 = vld.sshfl [vmem:[#allocation1 + $0x8] sm:$0xff pattern:$0x75316420] }
  0x27   : > { %323 = vst [vmem:[#allocation1] ss:$2 sm:$0xff] %v226_v0  ;;  %v1290_v22 = vpack.i.bf16 %v296_v6, %v295_v5 }
  0x29   : > { %1261 = vrot.lane.b32.xlu2 %v1260_v18, %s1341_s27 }
  0x2e   : > { %v324_v7 = vld.sshfl [vmem:[#allocation1] sm:$0xff pattern:$0x75316420]  ;;  %v325_v8 = vld.sshfl [vmem:[#allocation1 + $0x8] sm:$0xff pattern:$0x75316420] }
  0x2f   : > { %342 = vst [vmem:[#allocation1] ss:$2 sm:$0xff] %v226_v0  ;;  %v1285_v26 = vpack.i.bf16 %v325_v8, %v324_v7 }
  0x31   : > { %529 = vperm.xlu2 %1295, %v524_v29  }
  0x36   : > { %v1392_v9 = vld.sshfl [vmem:[#allocation1] sm:$0xff pattern:$0x75316420]  ;;  %v1394_v10 = vld.sshfl [vmem:[#allocation1 + $0x8] sm:$0xff pattern:$0x75316420] }
  0x37   : > { %348 = vst [vmem:[#allocation1] ss:$2 sm:$0xff] %v226_v0 }
  0x3e   : > { %v349_v11 = vld.sshfl [vmem:[#allocation1] sm:$0xff pattern:$0x75316420]  ;;  %v350_v12 = vld.sshfl [vmem:[#allocation1 + $0x8] sm:$0xff pattern:$0x75316420] }
  0x3f   : > { %367 = vst [vmem:[#allocation1] ss:$2 sm:$0xff] %v226_v0  ;;  %v1265_v13 = vpack.i.bf16 %v350_v12, %v349_v11 }
  0x41   : > { %1266 = vrot.lane.b32.xlu0 %v1265_v13, %s1338_s24 }
  0x46   : > { %v368_v15 = vld.sshfl [vmem:[#allocation1] sm:$0xff pattern:$0x75316420]  ;;  %v369_v16 = vld.sshfl [vmem:[#allocation1 + $0x8] sm:$0xff pattern:$0x75316420] }
  0x47   : > { %v1270_v17 = vpack.i.bf16 %v369_v16, %v368_v15  ;;  %396 = vst [vmem:[#allocation1] ss:$2 sm:$0xff] %v226_v0 }
  0x49   : > { %1271 = vrot.lane.b32.xlu1 %v1270_v17, %s1340_s26 }
  0x4e   : > { %v397_v19 = vld.sshfl [vmem:[#allocation1] sm:$0xff pattern:$0x75316420]  ;;  %v398_v20 = vld.sshfl [vmem:[#allocation1 + $0x8] sm:$0xff pattern:$0x75316420] }
  0x4f   : > { %v1275_v21 = vpack.i.bf16 %v398_v20, %v397_v19  ;;  %415 = vst [vmem:[#allocation1] ss:$2 sm:$0xff] %v226_v0  ;;  %v347_v0 = vpack.c.bf16 %v1394_v10, %v1392_v9 }
  0x51   : > { %1276 = vrot.lane.b32.xlu1 %v1275_v21, %s1342_s28  ;;  %v461_v13 = vunpack.c.l.b16 %v347_v0  ;;  %v462_v20 = vunpack.c.h.b16 %v347_v0  ;;  %v526_v21 = vld [vmem:[%s1820_s2 + $0x10] sm:$0x3] }
  0x53   : > { %v463_v42 = vpack.c.b16 %v461_v13, %v461_v13  ;;  %v464_v44 = vpack.c.b16 %v462_v20, %v462_v20 }
  0x56   : > { %v416_v23 = vld.sshfl [vmem:[#allocation1] sm:$0xff pattern:$0x75316420]  ;;  %v417_v24 = vld.sshfl [vmem:[#allocation1 + $0x8] sm:$0xff pattern:$0x75316420] }
  0x57   : > { %v1280_v25 = vpack.i.bf16 %v417_v24, %v416_v23 }
  0x59   : > { %1281 = vrot.lane.b32.xlu0 %v1280_v25, %s1343_s29  ;;  %1291 = vrot.lane.b32.xlu1 %v1290_v22, %s1344_s30  ;;  %v525_v22 = vld [vmem:[%s1820_s2 + $0x8] sm:$0xff] }
  0x61   : > { %1286 = vrot.lane.b32.xlu0 %v1285_v26, %s1345_s6  ;;  %539 = vperm.xlu1 %1297, %v526_v21  }
  0x69   : > { %534 = vperm.xlu0 %1296, %v525_v22  }
  0x7b   : > { %v1257_v31 = vpop.permute.xlu2 %1256 }
  0x7c   : > { %v1259_v45 = vunpack.i.h.bf16 %v1257_v31  ;;  %v1258_v46 = vunpack.i.l.bf16 %v1257_v31 }
  0x7e   : > { %v285_v59 = vsel %vm284_vm5, %v1258_v46, %v1259_v45  ;;  %v286_v63 = vsel %vm284_vm5, %v1259_v45, %v1258_v46  ;;  %vm1458_vm5 = vmand %vm1429_vm15, %vm261_vm2 }
  0x7f   : > { %v291_v7 = vsel %vm1421_vm14, %v286_v63, 0.0  ;;  %v292_v8 = vsel %vm1429_vm15, %v285_v59, 0.0 }
  0x80   : > { %v1487_v19 = vpack.c.bf16 %v292_v8, %v291_v7 }
  0x82   : > { %v442_v39 = vunpack.c.l.b16 %v1487_v19 }
  0x83   : > { %v1262_v47 = vpop.permute.xlu2 %1261 }
  0x84   : > { %v1264_v54 = vunpack.i.h.bf16 %v1262_v47  ;;  %v1263_v55 = vunpack.i.l.bf16 %v1262_v47 }
  0x86   : > { %v248_v4 = vsel %vm247_vm0, %v1263_v55, %v1264_v54  ;;  %v249_v5 = vsel %vm247_vm0, %v1264_v54, %v1263_v55  ;;  %vm489_vm0 = vcmask 1041408  }
  0x87   : > { %v272_v16 = vsel %vm1450_vm7, %v249_v5, 0.0  ;;  %v273_v17 = vsel %vm1458_vm5, %v248_v4, 0.0  ;;  %vm1516_vm7 = vmand %vm1421_vm14, %vm310_vm3  ;;  %vm332_vm5 = vcmp.lt.s32.totalorder %v1396_v28, 1 }
  0x88   : > { %v1506_v33 = vpack.c.bf16 %v273_v17, %v272_v16 }
  0x8a   : > { %v438_v6 = vunpack.c.h.b16 %v1506_v33 }
  0xb3   : > { %v1267_v36 = vpop.permute.xlu0 %1266 }
  0xb4   : > { %v1269_v40 = vunpack.i.h.bf16 %v1267_v36  ;;  %v1268_v41 = vunpack.i.l.bf16 %v1267_v36 }
  0xb6   : > { %v358_v49 = vsel %vm357_vm1, %v1268_v41, %v1269_v40  ;;  %v359_v50 = vsel %vm357_vm1, %v1269_v40, %v1268_v41  ;;  %vm1436_vm1 = vmand %vm382_vm10, %vm384_vm11  ;;  %vm405_vm10 = vcmp.lt.s32.totalorder %v1396_v28, 112  ;;  %vm424_vm11 = vcmp.lt.s32.totalorder %v1396_v28, 111 }
  0xb7   : > { %v364_v56 = vsel %vm310_vm3, %v358_v49, 0.0  ;;  %v365_v57 = vsel %vm311_vm4, %v359_v50, 0.0  ;;  %vm1478_vm9 = vmand %vm1436_vm1, %vm261_vm2  ;;  %v443_v40 = vunpack.c.h.b16 %v1487_v19  ;;  %v437_v49 = vunpack.c.l.b16 %v1506_v33 }
  0xb8   : > { %v366_v2 = vpack.c.bf16 %v365_v57, %v364_v56  ;;  %vm1534_vm14 = vmand %vm1436_vm1, %vm311_vm4 }
  0xba   : > { %v466_v18 = vunpack.c.l.b16 %v366_v2  ;;  %v467_v30 = vunpack.c.h.b16 %v366_v2  ;;  %v444_v2 = vpack.c.b16 %v442_v39, %v442_v39 }
  0xbb   : > { %v1272_v48 = vpop.permute.xlu1 %1271 }
  0xbc   : > { %v1274_v61 = vunpack.i.h.bf16 %v1272_v48  ;;  %v1273_v62 = vunpack.i.l.bf16 %v1272_v48  ;;  %v468_v36 = vpack.c.b16 %v466_v18, %v466_v18  ;;  %v469_v48 = vpack.c.b16 %v467_v30, %v467_v30 }
  0xbd   : > { %v439_v18 = vpack.c.b16 %v437_v49, %v437_v49  ;;  %v446_v19 = vrot.slane %v444_v2, 6 }
  0xbe   : > { %v377_v10 = vsel %vm376_vm6, %v1273_v62, %v1274_v61  ;;  %v378_v11 = vsel %vm376_vm6, %v1274_v61, %v1273_v62  ;;  %vm303_vm6 = vcmp.lt.s32.totalorder %v1396_v28, 15  ;;  %v470_v56 = vrot.slane %v468_v36, 6 }
  0xbf   : > { %v393_v23 = vsel %vm1466_vm8, %v377_v10, 0.0  ;;  %v394_v24 = vsel %vm1478_vm9, %v378_v11, 0.0  ;;  %vm1525_vm8 = vmand %vm1415_vm12, %vm310_vm3  ;;  %vm496_vm9 = vcmask 1043456   ;;  %v471_v9 = vrot.slane %v469_v48, 6 }
  0xc0   : > { %v395_v34 = vpack.c.bf16 %v394_v24, %v393_v23  ;;  %vm1542_vm3 = vmand %vm1429_vm15, %vm311_vm4  ;;  %vm501_vm4 = vcmask 1045504   ;;  %v510_v13 = vsel %vm489_vm0, %v463_v42, %v470_v56  ;;  %v229_v42 = vld [vmem:[%s1819_s1 + $0x8] sm:$0x1]  ;;  %v492_v51 = vsel %vm489_vm0, %v439_v18, %v446_v19 }
  0xc1   : > { %v513_v27 = vsel %vm489_vm0, %v464_v44, %v471_v9 }
  0xc2   : > { %v473_v57 = vunpack.c.l.b16 %v395_v34  ;;  %v474_v1 = vunpack.c.h.b16 %v395_v34 }
  0xc3   : > { %v1277_v12 = vpop.permute.xlu1 %1276 }
  0xc4   : > { %v1279_v14 = vunpack.i.h.bf16 %v1277_v12  ;;  %v1278_v15 = vunpack.i.l.bf16 %v1277_v12  ;;  %v475_v7 = vpack.c.b16 %v473_v57, %v473_v57  ;;  %v476_v17 = vpack.c.b16 %v474_v1, %v474_v1 }
  0xc6   : > { %v406_v25 = vsel %vm405_vm10, %v1278_v15, %v1279_v14  ;;  %v407_v26 = vsel %vm405_vm10, %v1279_v14, %v1278_v15  ;;  %v445_v14 = vpack.c.b16 %v443_v40, %v443_v40  ;;  %v517_v39 = vsel %vm496_vm9, %v513_v27, %v476_v17 }
  0xc7   : > { %v412_v31 = vsel %vm1415_vm12, %v406_v25, 0.0  ;;  %v413_v32 = vsel %vm1436_vm1, %v407_v26, 0.0  ;;  %v515_v25 = vsel %vm496_vm9, %v510_v13, %v475_v7  ;;  %v440_v40 = vpack.c.b16 %v438_v6, %v438_v6 }
  0xc8   : > { %v414_v35 = vpack.c.bf16 %v413_v32, %v412_v31  ;;  %v447_v41 = vrot.slane %v445_v14, 6  ;;  %vm550_vm12 = vcmask 293888  }
  0xca   : > { %v478_v59 = vunpack.c.l.b16 %v414_v35  ;;  %v479_v61 = vunpack.c.h.b16 %v414_v35 }
  0xcb   : > { %v1282_v45 = vpop.permute.xlu0 %1281  ;;  %v1292_v46 = vpop.permute.xlu1 %1291 }
  0xcc   : > { %v1284_v50 = vunpack.i.h.bf16 %v1282_v45  ;;  %v1283_v53 = vunpack.i.l.bf16 %v1282_v45  ;;  %v1294_v54 = vunpack.i.h.bf16 %v1292_v46  ;;  %v1293_v55 = vunpack.i.l.bf16 %v1292_v46 }
  0xcd   : > { %v480_v8 = vpack.c.b16 %v478_v59, %v478_v59  ;;  %v481_v10 = vpack.c.b16 %v479_v61, %v479_v61  ;;  %v1193_v61 = vld [vmem:[%s1819_s1] sm:$0xff] }
  0xce   : > { %v425_v62 = vsel %vm424_vm11, %v1283_v53, %v1284_v50  ;;  %v426_v60 = vsel %vm424_vm11, %v1284_v50, %v1283_v53  ;;  %v304_v63 = vsel %vm303_vm6, %v1293_v55, %v1294_v54  ;;  %v305_v38 = vsel %vm303_vm6, %v1294_v54, %v1293_v55 }
  0xcf   : > { %v433_v58 = vsel %vm1525_vm8, %v425_v62, 0.0  ;;  %v434_v0 = vsel %vm1534_vm14, %v426_v60, 0.0  ;;  %v320_v3 = vsel %vm1516_vm7, %v305_v38, 0.0  ;;  %v321_v4 = vsel %vm1542_vm3, %v304_v63, 0.0  ;;  %v530_v60 = vpop.permute.xlu2 %529 }
  0xd0   : > { %v435_v5 = vpack.c.bf16 %v434_v0, %v433_v58  ;;  %v322_v15 = vpack.c.bf16 %v321_v4, %v320_v3  ;;  %v482_v24 = vrot.slane %v480_v8, 2  ;;  %v483_v26 = vrot.slane %v481_v10, 2 }
  0xd1   : > { %v495_v53 = vsel %vm489_vm0, %v440_v40, %v447_v41  ;;  %v547_v54 = vunpack.c.l.b16 %v229_v42 }
  0xd2   : > { %v485_v11 = vunpack.c.l.b16 %v435_v5  ;;  %v486_v12 = vunpack.c.h.b16 %v435_v5  ;;  %v449_v35 = vunpack.c.l.b16 %v322_v15  ;;  %v450_v36 = vunpack.c.h.b16 %v322_v15 }
  0xd3   : > { %v1287_v16 = vpop.permute.xlu0 %1286  ;;  %v519_v43 = vsel %vm501_vm4, %v515_v25, %v482_v24  ;;  %v522_v46 = vsel %vm501_vm4, %v517_v39, %v483_v26  ;;  %v549_v62 = vpack.c.b16 %v547_v54, %v547_v54  ;;  %v540_v3 = vpop.permute.xlu1 %539 }
  0xd4   : > { %v1289_v20 = vunpack.i.h.bf16 %v1287_v16  ;;  %v1288_v21 = vunpack.i.l.bf16 %v1287_v16  ;;  %v487_v22 = vpack.c.b16 %v485_v11, %v485_v11  ;;  %v488_v23 = vpack.c.b16 %v486_v12, %v486_v12 }
  0xd5   : > { %v451_v47 = vpack.c.b16 %v449_v35, %v449_v35  ;;  %v452_v48 = vpack.c.b16 %v450_v36, %v450_v36 }
  0xd6   : > { %v333_v29 = vsel %vm332_vm5, %v1288_v21, %v1289_v20  ;;  %v334_v30 = vsel %vm332_vm5, %v1289_v20, %v1288_v21  ;;  %v558_v31 = vsel %vm489_vm0, %v487_v22, 0  ;;  %v561_v32 = vsel %vm489_vm0, %v488_v23, 0 }
  0xd7   : > { %v339_v33 = vsel %vm260_vm13, %v334_v30, 0.0  ;;  %v340_v34 = vsel %vm261_vm2, %v333_v29, 0.0  ;;  %568 = vmatpush.bf16.msra.mxu0 %v558_v31  ;;  %1194 = vmatpush.bf16.msra.mxu2 %v558_v31  ;;  %v498_v52 = vsel %vm496_vm9, %v492_v51, %v451_v47  ;;  %v500_v56 = vsel %vm496_vm9, %v495_v53, %v452_v48 }
  0xd8   : > { %586 = vmatpush.bf16.msra.mxu1 %v561_v32  ;;  %1197 = vmatpush.bf16.msra.mxu3 %v561_v32  ;;  %v341_v28 = vpack.c.bf16 %v340_v34, %v339_v33  ;;  %vm633_vm13 = vcmask 1024  }
  0xda   : > { %v454_v44 = vunpack.c.l.b16 %v341_v28  ;;  %v455_v45 = vunpack.c.h.b16 %v341_v28 }
  0xdb   : > { %569 = vmatpush.bf16.msra.mxu0 %v519_v43  ;;  %1195 = vmatpush.bf16.msra.mxu2 %v519_v43  ;;  %v535_v7 = vpop.permute.xlu0 %534 }
  0xdc   : > { %587 = vmatpush.bf16.msra.mxu1 %v522_v46  ;;  %1198 = vmatpush.bf16.msra.mxu3 %v522_v46  ;;  %v456_v49 = vpack.c.b16 %v454_v44, %v454_v44  ;;  %v457_v50 = vpack.c.b16 %v455_v45, %v455_v45 }
  0xde   : > { %v458_v55 = vrot.slane %v456_v49, 2  ;;  %v459_v37 = vrot.slane %v457_v50, 2 }
  0xe0   : > { %v503_v57 = vsel %vm501_vm4, %v498_v52, %v458_v55  ;;  %v506_v59 = vsel %vm501_vm4, %v500_v56, %v459_v37 }
  0xe1   : > { %570 = vmatpush.bf16.msra.mxu0 %v503_v57  ;;  %1196 = vmatpush.bf16.msra.mxu2 %v503_v57 }
  0xe2   : > { %588 = vmatpush.bf16.msra.mxu1 %v506_v59  ;;  %1199 = vmatpush.bf16.msra.mxu3 %v506_v59 }
  0xe4   : > { %1186 = vmatmul.msk.bf16.vlgmr.msra.gmra.mxu0 %vm550_vm12, %v1193_v61  ;;  %1187 = vmatmul.msk.bf16.vlgmr.msra.gmra.mxu2 %vm550_vm12, %v549_v62 }
  0xe5   : > { %1188 = vmatmul.msk.bf16.vlgmr.msra.gmra.mxu1 %vm550_vm12, %v1193_v61  ;;  %1189 = vmatmul.msk.bf16.vlgmr.msra.gmra.mxu3 %vm550_vm12, %v549_v62 }
 0x161   : > { %v572_v63 = vpop.f32.mrf.mxu0 }
 0x162   : > { %v1591_v38 = vadd.f32 %v572_v63, %v530_v60  ;;  %v590_v58 = vpop.f32.mrf.mxu1 }
 0x163   : > { %v1593_v0 = vadd.f32 %v590_v58, %v530_v60 }
 0x164   : > { %v616_v1 = vmul.f32 %v1591_v38, %v1591_v38 }
 0x165   : > { %v605_v2 = vadd.f32 %v1593_v0, %v1591_v38  ;;  %v617_v4 = vmul.f32 %v1593_v0, %v1593_v0 }
 0x167   : > { %606 = vadd.xlane.f32.xlu2 %v605_v2  ;;  %v577_v5 = vpop.f32.mrf.mxu2  ;;  %v622_v6 = vadd.f32 %v617_v4, %v616_v1  ;;  %v600_v4 = vld [vmem:[%s1821_s3 + $0x8] sm:$0xff] }
 0x168   : > { %v1601_v8 = vadd.f32 %v577_v5, %v540_v3  ;;  %v595_v9 = vpop.f32.mrf.mxu3  ;;  %v601_v5 = vld [vmem:[%s1821_s3 + $0x10] sm:$0x3] }
 0x169   : > { %v1603_v10 = vadd.f32 %v595_v9, %v540_v3  ;;  %623 = vadd.xlane.f32.xlu0 %v622_v6  ;;  %v574_v11 = vpop.f32.mrf.mxu0  ;;  %v599_v3 = vld [vmem:[%s1821_s3] sm:$0xff] }
 0x16a   : > { %v1605_v12 = vadd.f32 %v574_v11, %v535_v7  ;;  %v592_v13 = vpop.f32.mrf.mxu1  ;;  %v611_v14 = vsel %vm489_vm0, %v1601_v8, 0.0  ;;  %v620_v18 = vmul.f32 %v1601_v8, %v1601_v8 }
 0x16b   : > { %v1609_v15 = vadd.f32 %v592_v13, %v535_v7  ;;  %v612_v16 = vsel %vm489_vm0, %v1603_v10, 0.0  ;;  %v621_v19 = vmul.f32 %v1603_v10, %v1603_v10 }
 0x16c   : > { %v613_v17 = vadd.f32 %v612_v16, %v611_v14  ;;  %v628_v23 = vsel %vm489_vm0, %v620_v18, 0.0  ;;  %v618_v25 = vmul.f32 %v1605_v12, %v1605_v12 }
 0x16d   : > { %v608_v20 = vadd.f32 %v1609_v15, %v1605_v12  ;;  %v629_v24 = vsel %vm489_vm0, %v621_v19, 0.0  ;;  %v619_v26 = vmul.f32 %v1609_v15, %v1609_v15 }
 0x16e   : > { %v630_v27 = vadd.f32 %v629_v24, %v628_v23 }
 0x16f   : > { %609 = vadd.xlane.f32.xlu1 %v608_v20  ;;  %614 = vadd.xlane.f32.xlu2 %v613_v17  ;;  %v579_v21 = vpop.f32.mrf.mxu2  ;;  %v625_v29 = vadd.f32 %v619_v26, %v618_v25 }
 0x170   : > { %v597_v22 = vpop.f32.mrf.mxu3 }
 0x177   : > { %626 = vadd.xlane.f32.xlu2 %v625_v29  ;;  %631 = vadd.xlane.f32.xlu1 %v630_v27 }
 0x1da   : > { %v607_v30 = vpop.xlane.xlu2 %606 }
 0x1db   : > { %v634_v31 = vsel %vm633_vm13, %v607_v30, 0.0  ;;  %v680_v32 = vrot.slane %v607_v30, 2  ;;  %v765_v36 = vrot.slane %v607_v30, 6  ;;  %v723_v39 = vrot.slane %v607_v30, 4 }
 0x1dc   : > { %v624_v33 = vpop.xlane.xlu0 %623  ;;  %635 = vadd.xlane.f32.xlu2 %v634_v31 }
 0x1dd   : > { %v645_v34 = vsel %vm633_vm13, %v624_v33, 0.0  ;;  %v682_v35 = vsel %vm633_vm13, %v680_v32, 0.0  ;;  %v736_v28 = vrot.slane %v624_v33, 4  ;;  %v767_v40 = vsel %vm633_vm13, %v765_v36, 0.0 }
 0x1de   : > { %646 = vadd.xlane.f32.xlu0 %v645_v34  ;;  %683 = vadd.xlane.f32.xlu1 %v682_v35  ;;  %v725_v41 = vsel %vm633_vm13, %v723_v39, 0.0  ;;  %v694_v44 = vrot.slane %v624_v33, 2  ;;  %v778_v51 = vrot.slane %v624_v33, 6 }
 0x1df   : > { %v738_v42 = vsel %vm633_vm13, %v736_v28, 0.0 }
 0x1e0   : > { %v696_v46 = vsel %vm633_vm13, %v694_v44, 0.0  ;;  %v780_v47 = vsel %vm633_vm13, %v778_v51, 0.0 }
 0x1e2   : > { %v615_v43 = vpop.xlane.xlu2 %614  ;;  %v610_v45 = vpop.xlane.xlu1 %609 }
 0x1e3   : > { %v807_v48 = vsel %vm633_vm13, %v610_v45, 0.0  ;;  %v846_v50 = vrot.slane %v610_v45, 2  ;;  %v931_v53 = vrot.slane %v610_v45, 6  ;;  %v889_v52 = vrot.slane %v610_v45, 4 }
 0x1e4   : > { %768 = vadd.xlane.f32.xlu2 %v767_v40  ;;  %v973_v1 = vsel %vm633_vm13, %v615_v43, 0.0 }
 0x1e5   : > { %v848_v55 = vsel %vm633_vm13, %v846_v50, 0.0  ;;  %v933_v37 = vsel %vm633_vm13, %v931_v53, 0.0  ;;  %v891_v59 = vsel %vm633_vm13, %v889_v52, 0.0 }
 0x1e6   : > { %726 = vadd.xlane.f32.xlu0 %v725_v41  ;;  %739 = vadd.xlane.f32.xlu1 %v738_v42 }
 0x1ea   : > { %v627_v49 = vpop.xlane.xlu2 %626  ;;  %v632_v63 = vpop.xlane.xlu1 %631 }
 0x1eb   : > { %v818_v54 = vsel %vm633_vm13, %v627_v49, 0.0  ;;  %v902_v56 = vrot.slane %v627_v49, 4  ;;  %v860_v57 = vrot.slane %v627_v49, 2  ;;  %v944_v60 = vrot.slane %v627_v49, 6 }
 0x1ec   : > { %697 = vadd.xlane.f32.xlu2 %v696_v46  ;;  %v984_v2 = vsel %vm633_vm13, %v632_v63, 0.0 }
 0x1ed   : > { %v904_v61 = vsel %vm633_vm13, %v902_v56, 0.0  ;;  %v862_v62 = vsel %vm633_vm13, %v860_v57, 0.0  ;;  %v946_v58 = vsel %vm633_vm13, %v944_v60, 0.0 }
 0x1ee   : > { %781 = vadd.xlane.f32.xlu0 %v780_v47  ;;  %808 = vadd.xlane.f32.xlu1 %v807_v48 }
 0x1f4   : > { %819 = vadd.xlane.f32.xlu2 %v818_v54 }
 0x1f6   : > { %849 = vadd.xlane.f32.xlu0 %v848_v55  ;;  %934 = vadd.xlane.f32.xlu1 %v933_v37 }
 0x1fc   : > { %892 = vadd.xlane.f32.xlu2 %v891_v59 }
 0x1fe   : > { %905 = vadd.xlane.f32.xlu0 %v904_v61  ;;  %863 = vadd.xlane.f32.xlu1 %v862_v62 }
 0x204   : > { %947 = vadd.xlane.f32.xlu2 %v946_v58 }
 0x206   : > { %974 = vadd.xlane.f32.xlu0 %v973_v1  ;;  %985 = vadd.xlane.f32.xlu1 %v984_v2 }
 0x21a   : > { %1067 = vperm.xlu0 %1296, %v599_v3  }
 0x21c   : > { %1072 = vperm.xlu2 %1295, %v600_v4  }
 0x21f   : > { %1077 = vperm.xlu1 %1297, %v601_v5  }
 0x24f   : > { %v636_v6 = vpop.xlane.xlu2 %635 }
 0x250   : > { %v637_v7 = vrot.slane %v636_v6, 4 }
 0x251   : > { %v647_v9 = vpop.xlane.xlu0 %646  ;;  %v684_v11 = vpop.xlane.xlu1 %683 }
 0x252   : > { %v638_v13 = vadd.f32 %v637_v7, %v636_v6  ;;  %v648_v14 = vrot.slane %v647_v9, 4  ;;  %v685_v16 = vrot.slane %v684_v11, 4 }
 0x254   : > { %v639_v17 = vrot.slane %v638_v13, 2  ;;  %v649_v18 = vadd.f32 %v648_v14, %v647_v9  ;;  %v686_v19 = vadd.f32 %v685_v16, %v684_v11 }
 0x256   : > { %v650_v20 = vrot.slane %v649_v18, 2  ;;  %v687_v21 = vrot.slane %v686_v19, 2  ;;  %v640_v22 = vadd.f32 %v639_v17, %v638_v13 }
 0x257   : > { %v769_v23 = vpop.xlane.xlu2 %768 }
 0x258   : > { %v641_v24 = vrot.slane %v640_v22, 1  ;;  %v651_v25 = vadd.f32 %v650_v20, %v649_v18  ;;  %v688_v26 = vadd.f32 %v687_v21, %v686_v19  ;;  %v770_v27 = vrot.slane %v769_v23, 4 }
 0x259   : > { %v727_v29 = vpop.xlane.xlu0 %726  ;;  %v740_v30 = vpop.xlane.xlu1 %739 }
 0x25a   : > { %v728_v31 = vrot.slane %v727_v29, 4  ;;  %v741_v32 = vrot.slane %v740_v30, 4  ;;  %v642_v33 = vadd.f32 %v641_v24, %v640_v22  ;;  %v652_v34 = vrot.slane %v651_v25, 1 }
 0x25b   : > { %v689_v35 = vrot.slane %v688_v26, 1  ;;  %v771_v28 = vadd.f32 %v770_v27, %v769_v23 }
 0x25c   : > { %v729_v36 = vadd.f32 %v728_v31, %v727_v29  ;;  %v742_v39 = vadd.f32 %v741_v32, %v740_v30  ;;  %1201 = vpush %v642_v33  ;;  %v653_v40 = vadd.f32 %v652_v34, %v651_v25  ;;  %v1347_v34 = vmov 512.0  }
 0x25d   : > { %v690_v41 = vadd.f32 %v689_v35, %v688_v26  ;;  %v772_v45 = vrot.slane %v771_v28, 2  ;;  %1298 = vrcp.f32 %v1347_v34 }
 0x25e   : > { %v730_v42 = vrot.slane %v729_v36, 2  ;;  %v743_v43 = vrot.slane %v742_v39, 2  ;;  %1203 = vpush %v653_v40 }
 0x25f   : > { %v698_v44 = vpop.xlane.xlu2 %697  ;;  %1205 = vpush %v690_v41  ;;  %v773_v56 = vadd.f32 %v772_v45, %v771_v28 }
 0x260   : > { %v699_v51 = vrot.slane %v698_v44, 4  ;;  %v731_v53 = vadd.f32 %v730_v42, %v729_v36  ;;  %v744_v54 = vadd.f32 %v743_v43, %v742_v39 }
 0x261   : > { %v782_v46 = vpop.xlane.xlu0 %781  ;;  %v809_v47 = vpop.xlane.xlu1 %808  ;;  %v774_v6 = vrot.slane %v773_v56, 1 }
 0x262   : > { %v700_v48 = vadd.f32 %v699_v51, %v698_v44  ;;  %v783_v49 = vrot.slane %v782_v46, 4  ;;  %v810_v50 = vrot.slane %v809_v47, 4  ;;  %v732_v60 = vrot.slane %v731_v53, 1 }
 0x263   : > { %v745_v63 = vrot.slane %v744_v54, 1  ;;  %v775_v21 = vadd.f32 %v774_v6, %v773_v56 }
 0x264   : > { %v701_v55 = vrot.slane %v700_v48, 2  ;;  %v784_v37 = vadd.f32 %v783_v49, %v782_v46  ;;  %v811_v52 = vadd.f32 %v810_v50, %v809_v47  ;;  %v733_v14 = vadd.f32 %v732_v60, %v731_v53 }
 0x265   : > { %v746_v20 = vadd.f32 %v745_v63, %v744_v54 }
 0x266   : > { %v785_v57 = vrot.slane %v784_v37, 2  ;;  %v812_v59 = vrot.slane %v811_v52, 2  ;;  %v702_v61 = vadd.f32 %v701_v55, %v700_v48  ;;  %v1299_v48 = vpop.eup %1298 }
 0x267   : > { %v820_v62 = vpop.xlane.xlu2 %819  ;;  %vm661_vm15 = vweird.f32 %v1299_v48 }
 0x268   : > { %v821_v58 = vrot.slane %v820_v62, 4  ;;  %v703_v1 = vrot.slane %v702_v61, 1  ;;  %v786_v2 = vadd.f32 %v785_v57, %v784_v37  ;;  %v813_v3 = vadd.f32 %v812_v59, %v811_v52 }
 0x269   : > { %v850_v4 = vpop.xlane.xlu0 %849  ;;  %v935_v5 = vpop.xlane.xlu1 %934 }
 0x26a   : > { %v822_v7 = vadd.f32 %v821_v58, %v820_v62  ;;  %v851_v9 = vrot.slane %v850_v4, 4  ;;  %v704_v11 = vadd.f32 %v703_v1, %v702_v61  ;;  %v936_v13 = vrot.slane %v935_v5, 4 }
 0x26b   : > { %v787_v16 = vrot.slane %v786_v2, 1  ;;  %v814_v17 = vrot.slane %v813_v3, 1  ;;  %v657_v58 = vmul.f32 512.0, %v1299_v48 }
 0x26c   : > { %v823_v18 = vrot.slane %v822_v7, 2  ;;  %v852_v19 = vadd.f32 %v851_v9, %v850_v4  ;;  %1207 = vpush %v704_v11  ;;  %v937_v26 = vadd.f32 %v936_v13, %v935_v5 }
 0x26d   : > { %1209 = vpush %v733_v14  ;;  %v788_v22 = vadd.f32 %v787_v16, %v786_v2  ;;  %v815_v23 = vadd.f32 %v814_v17, %v813_v3 }
 0x26e   : > { %v853_v24 = vrot.slane %v852_v19, 2  ;;  %1211 = vpush %v746_v20  ;;  %v824_v25 = vadd.f32 %v823_v18, %v822_v7  ;;  %v938_v40 = vrot.slane %v937_v26, 2  ;;  %v658_v18 = vsub.f32 1.0, %v657_v58 }
 0x26f   : > { %1213 = vpush %v775_v21  ;;  %v893_v27 = vpop.xlane.xlu2 %892 }
 0x270   : > { %1215 = vpush %v788_v22  ;;  %v894_v29 = vrot.slane %v893_v27, 4  ;;  %v825_v30 = vrot.slane %v824_v25, 1  ;;  %v854_v31 = vadd.f32 %v853_v24, %v852_v19  ;;  %v939_v50 = vadd.f32 %v938_v40, %v937_v26 }
 0x271   : > { %1217 = vpush %v815_v23  ;;  %v906_v32 = vpop.xlane.xlu0 %905  ;;  %v864_v33 = vpop.xlane.xlu1 %863  ;;  %v659_v24 = vmul.f32 %v1299_v48, %v658_v18 }
 0x272   : > { %v895_v35 = vadd.f32 %v894_v29, %v893_v27  ;;  %v907_v36 = vrot.slane %v906_v32, 4  ;;  %v865_v39 = vrot.slane %v864_v33, 4  ;;  %v826_v28 = vadd.f32 %v825_v30, %v824_v25 }
 0x273   : > { %v855_v41 = vrot.slane %v854_v31, 1  ;;  %v940_v63 = vrot.slane %v939_v50, 1  ;;  %v660_v25 = vadd.f32 %v1299_v48, %v659_v24 }
 0x274   : > { %v896_v42 = vrot.slane %v895_v35, 2  ;;  %v908_v43 = vadd.f32 %v907_v36, %v906_v32  ;;  %v866_v44 = vadd.f32 %v865_v39, %v864_v33  ;;  %1219 = vpush %v826_v28 }
 0x275   : > { %v856_v51 = vadd.f32 %v855_v41, %v854_v31  ;;  %v941_v13 = vadd.f32 %v940_v63, %v939_v50  ;;  %v1652_v26 = vsel %vm661_vm15, %v1299_v48, %v660_v25 }
 0x276   : > { %v909_v45 = vrot.slane %v908_v43, 2  ;;  %v867_v46 = vrot.slane %v866_v44, 2  ;;  %v897_v47 = vadd.f32 %v896_v42, %v895_v35 }
 0x277   : > { %1221 = vpush %v856_v51  ;;  %v948_v49 = vpop.xlane.xlu2 %947 }
 0x278   : > { %v949_v53 = vrot.slane %v948_v49, 4  ;;  %v868_v54 = vadd.f32 %v867_v46, %v866_v44  ;;  %v910_v55 = vadd.f32 %v909_v45, %v908_v43  ;;  %v898_v56 = vrot.slane %v897_v47, 1 }
 0x279   : > { %v975_v37 = vpop.xlane.xlu0 %974  ;;  %v986_v52 = vpop.xlane.xlu1 %985 }
 0x27a   : > { %v950_v57 = vadd.f32 %v949_v53, %v948_v49  ;;  %v976_v59 = vrot.slane %v975_v37, 4  ;;  %v987_v61 = vrot.slane %v986_v52, 4  ;;  %v869_v62 = vrot.slane %v868_v54, 1 }
 0x27b   : > { %v911_v60 = vrot.slane %v910_v55, 1  ;;  %v899_v5 = vadd.f32 %v898_v56, %v897_v47 }
 0x27c   : > { %v951_v1 = vrot.slane %v950_v57, 2  ;;  %v977_v2 = vadd.f32 %v976_v59, %v975_v37  ;;  %v988_v3 = vadd.f32 %v987_v61, %v986_v52  ;;  %v870_v4 = vadd.f32 %v869_v62, %v868_v54 }
 0x27d   : > { %v912_v6 = vadd.f32 %v911_v60, %v910_v55 }
 0x27e   : > { %v978_v7 = vrot.slane %v977_v2, 2  ;;  %v989_v9 = vrot.slane %v988_v3, 2  ;;  %1223 = vpush %v870_v4  ;;  %v952_v11 = vadd.f32 %v951_v1, %v950_v57 }
 0x27f   : > { %1225 = vpush %v899_v5 }
 0x280   : > { %1227 = vpush %v912_v6  ;;  %v953_v14 = vrot.slane %v952_v11, 1  ;;  %v979_v16 = vadd.f32 %v978_v7, %v977_v2  ;;  %v990_v17 = vadd.f32 %v989_v9, %v988_v3 }
 0x281   : > { %1229 = vpush %v941_v13 }
 0x282   : > { %v954_v19 = vadd.f32 %v953_v14, %v952_v11  ;;  %v980_v20 = vrot.slane %v979_v16, 1  ;;  %v991_v21 = vrot.slane %v990_v17, 1 }
 0x284   : > { %1231 = vpush %v954_v19  ;;  %v981_v22 = vadd.f32 %v980_v20, %v979_v16  ;;  %v992_v23 = vadd.f32 %v991_v21, %v990_v17 }
 0x286   : > { %1233 = vpush %v981_v22 }
 0x287   : > { %1235 = vpush %v992_v23 }
 0x28d   : > { %s1202_s25 = spop %1201 }
 0x28e   : > { %v644_v27 = vstv %s1202_s25 }
 0x28f   : > { %v663_v29 = vmul.f32 %v1652_v26, %v644_v27  ;;  %s1204_s26 = spop %1203 }
 0x290   : > { %v655_v31 = vstv %s1204_s26  ;;  %s1206_s27 = spop %1205  ;;  %s1200_s26 = smul.u32 48, %s1857_s19 }
 0x291   : > { %v665_v30 = vmul.f32 %v663_v29, %v663_v29  ;;  %v664_v32 = vmul.f32 %v1652_v26, %v655_v31  ;;  %v692_v36 = vstv %s1206_s27 }
 0x292   : > { %v707_v39 = vmul.f32 %v692_v36, %v1652_v26 }
 0x293   : > { %v666_v33 = vsub.f32 %v664_v32, %v665_v30 }
 0x294   : > { %v709_v40 = vmul.f32 %v707_v39, %v707_v39  ;;  %v1011_v45 = vsel %vm489_vm0, %v663_v29, %v707_v39 }
 0x295   : > { %v667_v34 = vmax.f32 %v666_v33, 0.0 }
 0x297   : > { %v1656_v35 = vadd.f32 1e-05, %v667_v34 }
 0x299   : > { %1300 = vrsqrt.f32 %v1656_v35  ;;  %vm675_vm2 = vweird.f32 %v1656_v35 }
 0x29d   : > { %s1208_s28 = spop %1207 }
 0x29e   : > { %v706_v28 = vstv %s1208_s28  ;;  %s1210_s29 = spop %1209 }
 0x29f   : > { %v708_v41 = vmul.f32 %v706_v28, %v1652_v26  ;;  %v735_v42 = vstv %s1210_s29  ;;  %s1212_s30 = spop %1211  ;;  %v1662_v51 = vpop.eup %1300  ;;  %s1805_s29 = scalar_lea.vmem %s1823_s5, %s1200_s26 }
 0x2a0   : > { %v749_v43 = vmul.f32 %v735_v42, %v1652_v26  ;;  %v748_v44 = vstv %s1212_s30  ;;  %s1214_s6 = spop %1213  ;;  %v670_v52 = vmul.f32 %v1662_v51, %v1656_v35  ;;  %vm676_vm1 = vweird.f32 %v1662_v51 }
 0x2a1   : > { %v710_v46 = vsub.f32 %v708_v41, %v709_v40  ;;  %s1216_s7 = spop %1215  ;;  %v750_v48 = vmul.f32 %v748_v44, %v1652_v26  ;;  %v777_v49 = vstv %s1214_s6  ;;  %vm1737_vm5 = vmor %vm675_vm2, %vm676_vm1 }
 0x2a2   : > { %v751_v47 = vmul.f32 %v749_v43, %v749_v43  ;;  %v790_v50 = vstv %s1216_s7  ;;  %s1218_s8 = spop %1217  ;;  %v791_v54 = vmul.f32 %v777_v49, %v1652_v26  ;;  %v1012_v37 = vsel %vm496_vm9, %v1011_v45, %v749_v43 }
 0x2a3   : > { %v711_v53 = vmax.f32 %v710_v46, 0.0  ;;  %v792_v55 = vmul.f32 %v790_v50, %v1652_v26  ;;  %v817_v57 = vstv %s1218_s8  ;;  %v671_v2 = vmul.f32 %v1662_v51, %v670_v52 }
 0x2a4   : > { %v752_v56 = vsub.f32 %v750_v48, %v751_v47  ;;  %v793_v61 = vmul.f32 %v791_v54, %v791_v54  ;;  %v829_v62 = vmul.f32 %v817_v57, %v1652_v26  ;;  %v1013_v63 = vsel %vm501_vm4, %v1012_v37, %v791_v54 }
 0x2a5   : > { %v1671_v59 = vadd.f32 1e-05, %v711_v53  ;;  %s1220_s9 = spop %1219  ;;  %1025 = vperm.xlu2 %1295, %v1013_v63   ;;  %v672_v13 = vmul.f32 0.5, %v671_v2 }
 0x2a6   : > { %v753_v60 = vmax.f32 %v752_v56, 0.0  ;;  %v828_v58 = vstv %s1220_s9  ;;  %v794_v1 = vsub.f32 %v792_v55, %v793_v61  ;;  %v831_v4 = vmul.f32 %v829_v62, %v829_v62 }
 0x2a7   : > { %1302 = vrsqrt.f32 %v1671_v59  ;;  %v830_v5 = vmul.f32 %v828_v58, %v1652_v26  ;;  %v673_v21 = vsub.f32 1.5, %v672_v13  ;;  %vm719_vm10 = vweird.f32 %v1671_v59 }
 0x2a8   : > { %v1677_v3 = vadd.f32 1e-05, %v753_v60  ;;  %s1222_s10 = spop %1221  ;;  %v795_v6 = vmax.f32 %v794_v1, 0.0 }
 0x2a9   : > { %v832_v7 = vsub.f32 %v830_v5, %v831_v4  ;;  %v858_v9 = vstv %s1222_s10  ;;  %v674_v53 = vmul.f32 %v1662_v51, %v673_v21 }
 0x2aa   : > { %1304 = vrsqrt.f32 %v1677_v3  ;;  %v1681_v11 = vadd.f32 1e-05, %v795_v6  ;;  %v873_v17 = vmul.f32 %v858_v9, %v1652_v26  ;;  %vm761_vm8 = vweird.f32 %v1677_v3 }
 0x2ab   : > { %v833_v14 = vmax.f32 %v832_v7, 0.0  ;;  %v678_v35 = vsel %vm1737_vm5, %v1662_v51, %v674_v53 }
 0x2ac   : > { %1306 = vrsqrt.f32 %v1681_v11  ;;  %v875_v25 = vmul.f32 %v873_v17, %v873_v17  ;;  %v1014_v31 = vsel %vm489_vm0, %v829_v62, %v873_v17  ;;  %vm803_vm12 = vweird.f32 %v1681_v11 }
 0x2ad   : > { %v1683_v16 = vpop.eup %1302  ;;  %v1689_v19 = vadd.f32 1e-05, %v833_v14 }
 0x2ae   : > { %v714_v18 = vmul.f32 %v1683_v16, %v1671_v59  ;;  %vm720_vm11 = vweird.f32 %v1683_v16 }
 0x2af   : > { %s1224_s11 = spop %1223  ;;  %1308 = vrsqrt.f32 %v1689_v19  ;;  %vm1725_vm7 = vmor %vm719_vm10, %vm720_vm11 }
 0x2b0   : > { %v1692_v20 = vpop.eup %1304  ;;  %v715_v22 = vmul.f32 %v1683_v16, %v714_v18  ;;  %v872_v23 = vstv %s1224_s11  ;;  %s1226_s12 = spop %1225 }
 0x2b1   : > { %v756_v24 = vmul.f32 %v1692_v20, %v1677_v3  ;;  %v874_v27 = vmul.f32 %v872_v23, %v1652_v26  ;;  %v901_v29 = vstv %s1226_s12  ;;  %s1228_s13 = spop %1227  ;;  %vm762_vm6 = vweird.f32 %v1692_v20 }
 0x2b2   : > { %v716_v30 = vmul.f32 0.5, %v715_v22  ;;  %v915_v32 = vmul.f32 %v901_v29, %v1652_v26  ;;  %v914_v33 = vstv %s1228_s13  ;;  %s1230_s14 = spop %1229  ;;  %v1702_v34 = vpop.eup %1306  ;;  %vm1756_vm14 = vmor %vm761_vm8, %vm762_vm6  ;;  %vm841_vm6 = vweird.f32 %v1689_v19 }
 0x2b3   : > { %v757_v36 = vmul.f32 %v1692_v20, %v756_v24  ;;  %v876_v39 = vsub.f32 %v874_v27, %v875_v25  ;;  %v916_v28 = vmul.f32 %v914_v33, %v1652_v26  ;;  %v943_v40 = vstv %s1230_s14 }
 0x2b4   : > { %v717_v41 = vsub.f32 1.5, %v716_v30  ;;  %v798_v42 = vmul.f32 %v1702_v34, %v1681_v11  ;;  %v917_v43 = vmul.f32 %v915_v32, %v915_v32  ;;  %v957_v44 = vmul.f32 %v943_v40, %v1652_v26 }
 0x2b5   : > { %v758_v45 = vmul.f32 0.5, %v757_v36  ;;  %v877_v46 = vmax.f32 %v876_v39, 0.0  ;;  %v1015_v47 = vsel %vm496_vm9, %v1014_v31, %v915_v32  ;;  %s1232_s15 = spop %1231  ;;  %v1711_v48 = vpop.eup %1308  ;;  %vm804_vm3 = vweird.f32 %v1702_v34 }
 0x2b6   : > { %v918_v49 = vsub.f32 %v916_v28, %v917_v43  ;;  %v1016_v50 = vsel %vm501_vm4, %v1015_v47, %v957_v44  ;;  %v799_v55 = vmul.f32 %v1702_v34, %v798_v42  ;;  %v956_v56 = vstv %s1232_s15  ;;  %vm805_vm13 = vmor %vm803_vm12, %vm804_vm3 }
 0x2b7   : > { %v759_v54 = vsub.f32 1.5, %v758_v45  ;;  %v1717_v37 = vadd.f32 1e-05, %v877_v46  ;;  %1030 = vperm.xlu0 %1296, %v1016_v50   ;;  %s1234_s16 = spop %1233  ;;  %v718_v61 = vmul.f32 %v1683_v16, %v717_v41  ;;  %v836_v60 = vmul.f32 %v1711_v48, %v1689_v19 }
 0x2b8   : > { %v919_v52 = vmax.f32 %v918_v49, 0.0  ;;  %v983_v57 = vstv %s1234_s16  ;;  %s1236_s17 = spop %1235  ;;  %v959_v63 = vmul.f32 %v957_v44, %v957_v44  ;;  %v958_v58 = vmul.f32 %v956_v56, %v1652_v26 }
 0x2b9   : > { %1310 = vrsqrt.f32 %v1717_v37  ;;  %v995_v2 = vmul.f32 %v983_v57, %v1652_v26  ;;  %v994_v4 = vstv %s1236_s17  ;;  %v722_v5 = vsel %vm1725_vm7, %v1683_v16, %v718_v61 }
 0x2ba   : > { %v1741_v59 = vadd.f32 1e-05, %v919_v52  ;;  %v960_v6 = vsub.f32 %v958_v58, %v959_v63  ;;  %v760_v7 = vmul.f32 %v1692_v20, %v759_v54  ;;  %v996_v13 = vmul.f32 %v994_v4, %v1652_v26 }
 0x2bb   : > { %v997_v9 = vmul.f32 %v995_v2, %v995_v2  ;;  %1035 = vperm.xlu1 %1297, %v995_v2   ;;  %v800_v3 = vmul.f32 0.5, %v799_v55  ;;  %v1017_v17 = vsel %vm489_vm0, %v678_v35, %v722_v5  ;;  %v837_v18 = vmul.f32 %v1711_v48, %v836_v60  ;;  %v603_v5 = vld [vmem:[%s1822_s4 + $0x8] sm:$0xff]  ;;  %v1073_v35 = vpop.permute.xlu2 %1072 }
 0x2bc   : > { %1312 = vrsqrt.f32 %v1741_v59  ;;  %v961_v16 = vmax.f32 %v960_v6, 0.0  ;;  %v764_v51 = vsel %vm1756_vm14, %v1692_v20, %v760_v7  ;;  %vm842_vm1 = vweird.f32 %v1711_v48  ;;  %v604_v6 = vld [vmem:[%s1822_s4 + $0x10] sm:$0x3]  ;;  %v1068_v7 = vpop.permute.xlu0 %1067 }
 0x2bd   : > { %v998_v21 = vsub.f32 %v996_v13, %v997_v9  ;;  %v801_v22 = vsub.f32 1.5, %v800_v3  ;;  %v1018_v29 = vsel %vm496_vm9, %v1017_v17, %v764_v51  ;;  %v838_v30 = vmul.f32 0.5, %v837_v18  ;;  %vm843_vm7 = vmor %vm841_vm6, %vm842_vm1 }
 0x2be   : > { %v962_v23 = vadd.f32 1e-05, %v961_v16  ;;  %vm885_vm2 = vweird.f32 %v1717_v37  ;;  %vm927_vm5 = vweird.f32 %v1741_v59 }
 0x2bf   : > { %v1311_v26 = vpop.eup %1310  ;;  %v999_v25 = vmax.f32 %v998_v21, 0.0  ;;  %v802_v27 = vmul.f32 %v1702_v34, %v801_v22  ;;  %v839_v40 = vsub.f32 1.5, %v838_v30 }
 0x2c0   : > { %v880_v24 = vmul.f32 %v1311_v26, %v1717_v37  ;;  %1314 = vrsqrt.f32 %v962_v23  ;;  %vm886_vm15 = vweird.f32 %v1311_v26  ;;  %vm969_vm3 = vweird.f32 %v962_v23 }
 0x2c1   : > { %v1000_v32 = vadd.f32 1e-05, %v999_v25  ;;  %v806_v33 = vsel %vm805_vm13, %v1702_v34, %v802_v27  ;;  %v602_v34 = vld [vmem:[%s1822_s4] sm:$0xff]  ;;  %v840_v50 = vmul.f32 %v1711_v48, %v839_v40  ;;  %vm1779_vm10 = vmor %vm885_vm2, %vm886_vm15 }
 0x2c2   : > { %v1313_v20 = vpop.eup %1312  ;;  %v881_v31 = vmul.f32 %v1311_v26, %v880_v24  ;;  %v1019_v39 = vsel %vm501_vm4, %v1018_v29, %v806_v33  ;;  %v1078_v29 = vpop.permute.xlu1 %1077 }
 0x2c3   : > { %v922_v36 = vmul.f32 %v1313_v20, %v1741_v59  ;;  %1316 = vrsqrt.f32 %v1000_v32  ;;  %1046 = vperm.xlu0 %1296, %v1019_v39   ;;  %vm928_vm11 = vweird.f32 %v1313_v20  ;;  %v844_v57 = vsel %vm843_vm7, %v1711_v48, %v840_v50 }
 0x2c4   : > { %v882_v11 = vmul.f32 0.5, %v881_v31  ;;  %vm929_vm8 = vmor %vm927_vm5, %vm928_vm11  ;;  %vm1007_vm15 = vweird.f32 %v1000_v32 }
 0x2c5   : > { %v923_v28 = vmul.f32 %v1313_v20, %v922_v36 }
 0x2c6   : > { %v883_v41 = vsub.f32 1.5, %v882_v11  ;;  %v1315_v42 = vpop.eup %1314 }
 0x2c7   : > { %v924_v43 = vmul.f32 0.5, %v923_v28  ;;  %v964_v44 = vmul.f32 %v1315_v42, %v962_v23  ;;  %vm970_vm14 = vweird.f32 %v1315_v42 }
 0x2c8   : > { %v884_v45 = vmul.f32 %v1311_v26, %v883_v41  ;;  %vm971_vm12 = vmor %vm969_vm3, %vm970_vm14 }
 0x2c9   : > { %v925_v46 = vsub.f32 1.5, %v924_v43  ;;  %v1317_v47 = vpop.eup %1316  ;;  %v965_v49 = vmul.f32 %v1315_v42, %v964_v44 }
 0x2ca   : > { %v1002_v54 = vmul.f32 %v1317_v47, %v1000_v32  ;;  %v888_v52 = vsel %vm1779_vm10, %v1311_v26, %v884_v45  ;;  %vm1008_vm13 = vweird.f32 %v1317_v47 }
 0x2cb   : > { %v926_v55 = vmul.f32 %v1313_v20, %v925_v46  ;;  %1088 = vperm.xlu0 %1296, %v602_v34   ;;  %v966_v56 = vmul.f32 0.5, %v965_v49  ;;  %v1020_v60 = vsel %vm489_vm0, %v844_v57, %v888_v52  ;;  %vm1009_vm1 = vmor %vm1007_vm15, %vm1008_vm13 }
 0x2cc   : > { %v1003_v37 = vmul.f32 %v1317_v47, %v1002_v54 }
 0x2cd   : > { %v967_v61 = vsub.f32 1.5, %v966_v56  ;;  %v930_v62 = vsel %vm929_vm8, %v1313_v20, %v926_v55 }
 0x2ce   : > { %v1004_v63 = vmul.f32 0.5, %v1003_v37  ;;  %v1021_v2 = vsel %vm496_vm9, %v1020_v60, %v930_v62 }
 0x2cf   : > { %v968_v58 = vmul.f32 %v1315_v42, %v967_v61 }
 0x2d0   : > { %v1005_v19 = vsub.f32 1.5, %v1004_v63 }
 0x2d1   : > { %v972_v1 = vsel %vm971_vm12, %v1315_v42, %v968_v58 }
 0x2d2   : > { %v1022_v59 = vsel %vm501_vm4, %v1021_v2, %v972_v1  ;;  %v1006_v4 = vmul.f32 %v1317_v47, %v1005_v19 }
 0x2d3   : > { %1051 = vperm.xlu2 %1295, %v1022_v59  }
 0x2d4   : > { %v1010_v48 = vsel %vm1009_vm1, %v1317_v47, %v1006_v4 }
 0x2d5   : > { %1056 = vperm.xlu1 %1297, %v1010_v48  }
 0x2db   : > { %1093 = vperm.xlu2 %1295, %v603_v5  }
 0x2dd   : > { %1098 = vperm.xlu1 %1297, %v604_v6  }
 0x2ff   : > { %v1026_v9 = vpop.permute.xlu2 %1025 }
 0x300   : > { %v1038_v23 = vsub.f32 %v1591_v38, %v1026_v9  ;;  %v1039_v24 = vsub.f32 %v1593_v0, %v1026_v9 }
 0x329   : > { %v1031_v13 = vpop.permute.xlu0 %1030 }
 0x32a   : > { %v1040_v3 = vsub.f32 %v1605_v12, %v1031_v13  ;;  %v1041_v16 = vsub.f32 %v1609_v15, %v1031_v13 }
 0x32d   : > { %v1052_v14 = vpop.permute.xlu2 %1051  ;;  %v1036_v36 = vpop.permute.xlu1 %1035 }
 0x32e   : > { %v1061_v51 = vmul.f32 %v1052_v14, %v1040_v3  ;;  %v1062_v17 = vmul.f32 %v1052_v14, %v1041_v16  ;;  %v1042_v40 = vsub.f32 %v1601_v8, %v1036_v36  ;;  %v1043_v41 = vsub.f32 %v1603_v10, %v1036_v36 }
 0x330   : > { %v1082_v18 = vmul.f32 %v1073_v35, %v1061_v51  ;;  %v1083_v21 = vmul.f32 %v1073_v35, %v1062_v17 }
 0x335   : > { %v1047_v22 = vpop.permute.xlu0 %1046  ;;  %v1094_v26 = vpop.permute.xlu2 %1093 }
 0x336   : > { %v1103_v25 = vadd.f32 %v1094_v26, %v1082_v18  ;;  %v1104_v27 = vadd.f32 %v1094_v26, %v1083_v21  ;;  %v1059_v20 = vmul.f32 %v1047_v22, %v1038_v23  ;;  %v1060_v30 = vmul.f32 %v1047_v22, %v1039_v24 }
 0x338   : > { %1318 = vtanh.f32 %v1103_v25  ;;  %v1080_v12 = vmul.f32 %v1068_v7, %v1059_v20  ;;  %v1081_v38 = vmul.f32 %v1068_v7, %v1060_v30 }
 0x339   : > { %1320 = vtanh.f32 %v1104_v27 }
 0x33d   : > { %v1089_v15 = vpop.permute.xlu0 %1088 }
 0x33e   : > { %v1319_v0 = vpop.eup %1318  ;;  %v1101_v31 = vadd.f32 %v1089_v15, %v1080_v12  ;;  %v1102_v32 = vadd.f32 %v1089_v15, %v1081_v38 }
 0x33f   : > { %v1321_v33 = vpop.eup %1320  ;;  %1115 = vst [vmem:[%s1805_s29 + $0x10] sm:$0xff] %v1319_v0 }
 0x340   : > { %1116 = vst [vmem:[%s1805_s29 + $0x18] sm:$0xff] %v1321_v33  ;;  %1322 = vtanh.f32 %v1101_v31 }
 0x341   : > { %1324 = vtanh.f32 %v1102_v32 }
 0x346   : > { %v1323_v39 = vpop.eup %1322 }
 0x347   : > { %v1325_v11 = vpop.eup %1324  ;;  %1113 = vst [vmem:[%s1805_s29] sm:$0xff] %v1323_v39  ;;  %v1057_v28 = vpop.permute.xlu1 %1056 }
 0x348   : > { %1114 = vst [vmem:[%s1805_s29 + $0x8] sm:$0xff] %v1325_v11  ;;  %v1063_v42 = vmul.f32 %v1057_v28, %v1042_v40  ;;  %v1064_v43 = vmul.f32 %v1057_v28, %v1043_v41 }
 0x34a   : > { %v1084_v44 = vmul.f32 %v1078_v29, %v1063_v42  ;;  %v1085_v45 = vmul.f32 %v1078_v29, %v1064_v43 }
 0x34f   : > { %v1099_v46 = vpop.permute.xlu1 %1098 }
 0x350   : > { %v1105_v34 = vadd.f32 %v1099_v46, %v1084_v44  ;;  %v1106_v47 = vadd.f32 %v1099_v46, %v1085_v45 }
 0x352   : > { %1326 = vtanh.f32 %v1105_v34 }
 0x353   : > { %1328 = vtanh.f32 %v1106_v47 }
 0x358   : > { %v1327_v49 = vpop.eup %1326 }
 0x359   : > { %v1329_v50 = vpop.eup %1328  ;;  %1117 = vst [vmem:[%s1805_s29 + $0x20] sm:$0x3] %v1327_v49 }
 0x35a   : > { %1118 = vst [vmem:[%s1805_s29 + $0x28] sm:$0x3] %v1329_v50 }
 0x35b PF: > { %s15_s18 = sadd.s32 1, %s1336_s18  }
 0x35c   : > { %p12_p4 = scmp.ge.s32.totalorder %s15_s18, 4  }
 0x35e   :  { %14 = sbr.rel (!%p12_p4) target bundleno = 1 (0x1), region = 70 }

// kernel: dsconv_forward.3
= control target key start
LH: loop header
LB: loop body
LE: loop exit
PB: predicated region body
PF: predicated region fallthrough
CT: control target
= control target key end

     0   :  { %s2566_s21 = smov 0   ;;  %s4021_s0 = inlined_call_operand.vmem [shape: f32[2,4,256], index: 0, kind: input, shape index: {}]   ;;  %s4022_s1 = inlined_call_operand.vmem [shape: f32[2,18,256], index: 1, kind: input, shape index: {}]   ;;  %s4023_s2 = inlined_call_operand.vmem [shape: bf16[8,36], index: 2, kind: input, shape index: {}]   ;;  %s4024_s3 = inlined_call_operand.vmem [shape: f32[8,1], index: 3, kind: input, shape index: {}]   ;;  %s4025_s4 = inlined_call_operand.vmem [shape: f32[8,1], index: 4, kind: input, shape index: {}]   ;;  %s4026_s5 = inlined_call_operand.vmem [shape: f32[8,1], index: 5, kind: input, shape index: {}]   ;;  %s4027_s6 = inlined_call_operand.vmem [shape: f32[2,8,256], index: 6, kind: output, shape index: {}]  }
   0x1 LB: > { %s2327_s22 = sadd.s32 4294967295, %s2518_s21   ;;  %p2331_p0 = scmp.ge.s32.totalorder %s2518_s21, 1  ;;  %s2518_s21 = sphi %s2566_s21, %s16_s21  }
   0x2   : > { %p222_p1 = scmp.lt.s32.totalorder %s2518_s21, 3 }
   0x4   : > { %p223_p2 = pnand %p2331_p0, %p222_p1 }
   0x6   : > { %226 = sbr.rel (%p223_p2) target bundleno = 1377 (0x561), region = 44 }
   0xb   : > { %p257_p3 = scmp.lt.s32.totalorder %s2327_s22, 1  ;;  %s2520_s27 = smov 64   ;;  %v279_v25 = vlaneseq  ;;  %vm2049_vm13 = vcmask 1041408   ;;  %vm2056_vm14 = vcmask 1043456   ;;  %vm2061_vm15 = vcmask 1045504  }
   0xc   : > { %s2521_s28 = smov 48   ;;  %s2522_s29 = smov 32  }
   0xd   : > { %s4123_s22 = smov (!%p257_p3, %s2327_s22), 1  ;;  %s2523_s30 = smov 16   ;;  %v2625_v26 = vand.u32 127, %v279_v25 }
   0xe   : > { %s2469_s23 = sshll.u32 %s4123_s22, 3  ;;  %s2524_s7 = smov 112  }
   0xf   : > { %s261_s26 = scalar_lea.vmem %s4021_s0, %s2469_s23  ;;  %s2525_s8 = smov 96   ;;  %v2628_v27 = vadd.s32 128, %v2625_v26  ;;  %v282_v28 = vshra.s32 %v2625_v26, 4  ;;  %vm360_vm0 = vcmp.lt.s32.totalorder %v2625_v26, 64  ;;  %vm384_vm1 = vcmp.lt.s32.totalorder %v2625_v26, 48 }
  0x10   : > { %v2580_v0 = vld [vmem:[%s261_s26] sm:$0xff]  ;;  %s2526_s9 = smov 80   ;;  %s2527_s10 = smov 127   ;;  %vm408_vm2 = vcmp.lt.s32.totalorder %v2625_v26, 32  ;;  %vm432_vm3 = vcmp.lt.s32.totalorder %v2625_v26, 16  ;;  %vm471_vm4 = vcmp.lt.s32.totalorder %v2625_v26, 112 }
  0x11   : > { %351 = vst [vmem:[#allocation1] ss:$2 sm:$0xff] %v2580_v0  ;;  %s2528_s11 = smov 1   ;;  %v283_v29 = vshra.s32 %v2628_v27, 4  ;;  %v2632_v30 = vcvt.s32.f32 %v282_v28  ;;  %vm495_vm5 = vcmp.lt.s32.totalorder %v2625_v26, 96  ;;  %vm519_vm6 = vcmp.lt.s32.totalorder %v2625_v26, 80 }
  0x12   : > { %vm559_vm7 = vcmp.lt.s32.totalorder %v2625_v26, 127  ;;  %vm757_vm10 = vcmp.lt.s32.totalorder %v2625_v26, 1  ;;  %s2471_s12 = smul.u32 48, %s4123_s22 }
  0x13   : > { %v2634_v31 = vcvt.s32.f32 %v283_v29  ;;  %v336_v32 = vmax.f32 %v2632_v30, 0.0 }
  0x14   : > { %s2813_s15 = scalar_lea.vmem %s4022_s1, %s2471_s12 }
  0x15   : > { %v337_v33 = vmax.f32 %v2634_v31, 0.0  ;;  %v338_v34 = vmin.f32 %v336_v32, 15.0 }
  0x17   : > { %v339_v35 = vmin.f32 %v337_v33, 15.0  ;;  %v2639_v36 = vsub.f32 %v338_v34, %v2632_v30 }
  0x18   : > { %v352_v1 = vld.sshfl [vmem:[#allocation1] sm:$0xff pattern:$0x75316420]  ;;  %v353_v2 = vld.sshfl [vmem:[#allocation1 + $0x8] sm:$0xff pattern:$0x75316420] }
  0x19   : > { %356 = vrot.lane.b32.xlu1 %v352_v1, %s2520_s27  ;;  %375 = vst [vmem:[#allocation1] ss:$2 sm:$0xff] %v2580_v0  ;;  %358 = vrot.lane.b32.xlu2 %v353_v2, %s2520_s27  ;;  %v2642_v38 = vsub.f32 %v339_v35, %v2634_v31  ;;  %v2337_v40 = vadd.f32 4.0, %v2639_v36  ;;  %v2339_v42 = vadd.f32 3.0, %v2639_v36  ;;  %v2341_v44 = vadd.f32 2.0, %v2639_v36 }
  0x1a   : > { %4058 = vst [vmem:[#allocation4_spill] sm:$0xff] %v2639_v36  ;;  %v2343_v54 = vadd.f32 1.0, %v2639_v36 }
  0x1b   : > { %4059 = vst [vmem:[#allocation5_spill] sm:$0xff] %v2642_v38  ;;  %v2338_v41 = vadd.f32 4.0, %v2642_v38  ;;  %v2340_v43 = vadd.f32 3.0, %v2642_v38  ;;  %v2342_v45 = vadd.f32 2.0, %v2642_v38  ;;  %v344_v46 = vand.u32 2147483647, %v2337_v40 }
  0x1c   : > { %v369_v48 = vand.u32 2147483647, %v2339_v42  ;;  %v393_v52 = vand.u32 2147483647, %v2341_v44  ;;  %v2344_v55 = vadd.f32 1.0, %v2642_v38  ;;  %v2348_v42 = vadd.f32 -2.0, %v2642_v38 }
  0x1d   : > { %v345_v47 = vand.u32 2147483647, %v2338_v41  ;;  %v370_v49 = vand.u32 2147483647, %v2340_v43  ;;  %v394_v53 = vand.u32 2147483647, %v2342_v45 }
  0x1e   : > { %v346_v56 = vsub.f32 1.0, %v344_v46  ;;  %v371_v58 = vsub.f32 1.0, %v369_v48  ;;  %v395_v61 = vsub.f32 1.0, %v393_v52  ;;  %v417_v63 = vand.u32 2147483647, %v2343_v54 }
  0x1f   : > { %v347_v57 = vsub.f32 1.0, %v345_v47  ;;  %v372_v59 = vsub.f32 1.0, %v370_v49  ;;  %v396_v62 = vsub.f32 1.0, %v394_v53  ;;  %v418_v1 = vand.u32 2147483647, %v2344_v55 }
  0x20   : > { %v377_v3 = vld.sshfl [vmem:[#allocation1 + $0x8] sm:$0xff pattern:$0x75316420]  ;;  %v376_v4 = vld.sshfl [vmem:[#allocation1] sm:$0xff pattern:$0x75316420] }
  0x21   : > { %382 = vrot.lane.b32.xlu1 %v377_v3, %s2521_s28  ;;  %380 = vrot.lane.b32.xlu0 %v376_v4, %s2521_s28  ;;  %399 = vst [vmem:[#allocation1] ss:$2 sm:$0xff] %v2580_v0  ;;  %v348_v2 = vmax.f32 %v346_v56, 0.0  ;;  %v349_v3 = vmax.f32 %v347_v57, 0.0  ;;  %v373_v4 = vmax.f32 %v371_v58, 0.0  ;;  %v2347_v41 = vadd.f32 -2.0, %v2639_v36 }
  0x22   : > { %v481_v56 = vand.u32 2147483647, %v2348_v42 }
  0x23   : > { %v480_v55 = vand.u32 2147483647, %v2347_v41 }
  0x28   : > { %v401_v5 = vld.sshfl [vmem:[#allocation1 + $0x8] sm:$0xff pattern:$0x75316420]  ;;  %v400_v6 = vld.sshfl [vmem:[#allocation1] sm:$0xff pattern:$0x75316420] }
  0x29   : > { %406 = vrot.lane.b32.xlu0 %v401_v5, %s2522_s29  ;;  %423 = vst [vmem:[#allocation1] ss:$2 sm:$0xff] %v2580_v0  ;;  %404 = vrot.lane.b32.xlu2 %v400_v6, %s2522_s29  ;;  %v374_v5 = vmax.f32 %v372_v59, 0.0 }
  0x30   : > { %v424_v7 = vld.sshfl [vmem:[#allocation1] sm:$0xff pattern:$0x75316420]  ;;  %v425_v8 = vld.sshfl [vmem:[#allocation1 + $0x8] sm:$0xff pattern:$0x75316420] }
  0x31   : > { %428 = vrot.lane.b32.xlu1 %v424_v7, %s2523_s30  ;;  %445 = vst [vmem:[#allocation1] ss:$2 sm:$0xff] %v2580_v0  ;;  %430 = vrot.lane.b32.xlu2 %v425_v8, %s2523_s30 }
  0x38   : > { %v2595_v9 = vld.sshfl [vmem:[#allocation1] sm:$0xff pattern:$0x75316420]  ;;  %v2597_v10 = vld.sshfl [vmem:[#allocation1 + $0x8] sm:$0xff pattern:$0x75316420] }
  0x39   : > { %462 = vst [vmem:[#allocation1] ss:$2 sm:$0xff] %v2580_v0 }
  0x40   : > { %v464_v11 = vld.sshfl [vmem:[#allocation1 + $0x8] sm:$0xff pattern:$0x75316420]  ;;  %v463_v12 = vld.sshfl [vmem:[#allocation1] sm:$0xff pattern:$0x75316420] }
  0x41   : > { %469 = vrot.lane.b32.xlu1 %v464_v11, %s2524_s7  ;;  %467 = vrot.lane.b32.xlu0 %v463_v12, %s2524_s7  ;;  %486 = vst [vmem:[#allocation1] ss:$2 sm:$0xff] %v2580_v0  ;;  %v397_v12 = vmax.f32 %v395_v61, 0.0 }
  0x48   : > { %v488_v13 = vld.sshfl [vmem:[#allocation1 + $0x8] sm:$0xff pattern:$0x75316420]  ;;  %v487_v14 = vld.sshfl [vmem:[#allocation1] sm:$0xff pattern:$0x75316420] }
  0x49   : > { %493 = vrot.lane.b32.xlu0 %v488_v13, %s2525_s8  ;;  %510 = vst [vmem:[#allocation1] ss:$2 sm:$0xff] %v2580_v0  ;;  %491 = vrot.lane.b32.xlu2 %v487_v14, %s2525_s8  ;;  %v398_v13 = vmax.f32 %v396_v62, 0.0  ;;  %v439_v14 = vand.u32 2147483647, %v2639_v36 }
  0x50   : > { %v511_v15 = vld.sshfl [vmem:[#allocation1] sm:$0xff pattern:$0x75316420]  ;;  %v512_v16 = vld.sshfl [vmem:[#allocation1 + $0x8] sm:$0xff pattern:$0x75316420] }
  0x51   : > { %515 = vrot.lane.b32.xlu1 %v511_v15, %s2526_s9  ;;  %534 = vst [vmem:[#allocation1] ss:$2 sm:$0xff] %v2580_v0  ;;  %517 = vrot.lane.b32.xlu2 %v512_v16, %s2526_s9  ;;  %v440_v15 = vand.u32 2147483647, %v2642_v38  ;;  %v419_v16 = vsub.f32 1.0, %v417_v63 }
  0x53   : > { %v442_v40 = vsub.f32 1.0, %v440_v15  ;;  %v421_v43 = vmax.f32 %v419_v16, 0.0 }
  0x55   : > { %v444_v54 = vmax.f32 %v442_v40, 0.0 }
  0x58   : > { %v2609_v17 = vld.sshfl [vmem:[#allocation1] sm:$0xff pattern:$0x75316420]  ;;  %v2611_v18 = vld.sshfl [vmem:[#allocation1 + $0x8] sm:$0xff pattern:$0x75316420] }
  0x59   : > { %4056 = vst [vmem:[#allocation2_spill] sm:$0xff] %v2609_v17 }
  0x5a   : > { %4057 = vst [vmem:[#allocation3_spill] sm:$0xff] %v2611_v18 }
  0x5b   : > { %550 = vst [vmem:[#allocation1] ss:$2 sm:$0xff] %v2580_v0 }
  0x62   : > { %v551_v19 = vld.sshfl [vmem:[#allocation1] sm:$0xff pattern:$0x75316420]  ;;  %v552_v20 = vld.sshfl [vmem:[#allocation1 + $0x8] sm:$0xff pattern:$0x75316420] }
  0x63   : > { %555 = vrot.lane.b32.xlu1 %v551_v19, %s2527_s10  ;;  %566 = vst [vmem:[#allocation1] ss:$2 sm:$0xff] %v2580_v0  ;;  %v420_v19 = vsub.f32 1.0, %v418_v1  ;;  %v451_v1 = vmul.f32 %v2597_v10, %v444_v54 }
  0x65   : > { %v422_v44 = vmax.f32 %v420_v19, 0.0 }
  0x6a   : > { %v2616_v21 = vld.sshfl [vmem:[#allocation1] sm:$0xff pattern:$0x75316420]  ;;  %v2618_v22 = vld.sshfl [vmem:[#allocation1 + $0x8] sm:$0xff pattern:$0x75316420] }
  0x6b   : > { %557 = vrot.lane.b32.xlu1 %v552_v20, %s2527_s10  ;;  %748 = vst [vmem:[#allocation1] ss:$2 sm:$0xff] %v2580_v0  ;;  %v2345_v20 = vadd.f32 -1.0, %v2639_v36 }
  0x6d   : > { %v456_v45 = vand.u32 2147483647, %v2345_v20 }
  0x6f   : > { %v458_v57 = vsub.f32 1.0, %v456_v45 }
  0x72   : > { %v749_v23 = vld.sshfl [vmem:[#allocation1] sm:$0xff pattern:$0x75316420]  ;;  %v750_v24 = vld.sshfl [vmem:[#allocation1 + $0x8] sm:$0xff pattern:$0x75316420] }
  0x73   : > { %753 = vrot.lane.b32.xlu0 %v749_v23, %s2528_s11  ;;  %764 = vst [vmem:[#allocation1] ss:$2 sm:$0xff] %v2580_v0  ;;  %v359_v39 = vpop.permute.xlu2 %358  ;;  %v2346_v23 = vadd.f32 -1.0, %v2642_v38 }
  0x75   : > { %v457_v46 = vand.u32 2147483647, %v2346_v23 }
  0x77   : > { %v459_v58 = vsub.f32 1.0, %v457_v46 }
  0x79   : > { %v461_v15 = vmax.f32 %v459_v58, 0.0 }
  0x7a   : > { %v766_v58 = vld.sshfl [vmem:[#allocation1 + $0x8] sm:$0xff pattern:$0x75316420] }
  0x7b   : > { %755 = vrot.lane.b32.xlu0 %v750_v24, %s2528_s11 }
  0x83   : > { %v405_v60 = vpop.permute.xlu2 %404 }
  0x8b   : > { %v357_v37 = vpop.permute.xlu1 %356 }
  0x8c   : > { %v361_v6 = vsel %vm360_vm0, %v357_v37, %v359_v39  ;;  %v362_v7 = vsel %vm360_vm0, %v359_v39, %v357_v37  ;;  %v431_v37 = vpop.permute.xlu2 %430  ;;  %v441_v39 = vsub.f32 1.0, %v439_v14  ;;  %v460_v14 = vmax.f32 %v458_v57, 0.0  ;;  %v765_v57 = vld.sshfl [vmem:[#allocation1] sm:$0xff pattern:$0x75316420] }
  0x8d   : > { %v363_v24 = vmul.f32 %v362_v7, %v348_v2  ;;  %v364_v25 = vmul.f32 %v361_v6, %v349_v3  ;;  %874 = vst [vmem:[#allocation1] ss:$2 sm:$0xff] %v2580_v0 }
  0x8e   : > { %v443_v53 = vmax.f32 %v441_v39, 0.0 }
  0x90   : > { %v450_v3 = vmul.f32 %v2595_v9, %v443_v53 }
  0x93   : > { %v383_v50 = vpop.permute.xlu1 %382  ;;  %v381_v51 = vpop.permute.xlu0 %380 }
  0x94   : > { %v385_v8 = vsel %vm384_vm1, %v381_v51, %v383_v50  ;;  %v386_v11 = vsel %vm384_vm1, %v383_v50, %v381_v51 }
  0x95   : > { %v387_v28 = vmul.f32 %v386_v11, %v373_v4  ;;  %v388_v29 = vmul.f32 %v385_v8, %v374_v5  ;;  %v482_v4 = vsub.f32 1.0, %v480_v55  ;;  %v483_v5 = vsub.f32 1.0, %v481_v56 }
  0x96   : > { %v2349_v8 = vadd.f32 -3.0, %v2639_v36  ;;  %v2350_v11 = vadd.f32 -3.0, %v2642_v38  ;;  %v284_v55 = vand.u32 15, %v2625_v26  ;;  %v285_v56 = vand.u32 15, %v2628_v27 }
  0x97   : > { %v389_v47 = vadd.f32 %v387_v28, %v363_v24  ;;  %v390_v48 = vadd.f32 %v388_v29, %v364_v25  ;;  %v484_v10 = vmax.f32 %v482_v4, 0.0  ;;  %v485_v19 = vmax.f32 %v483_v5, 0.0 }
  0x98   : > { %v504_v9 = vand.u32 2147483647, %v2349_v8  ;;  %v505_v20 = vand.u32 2147483647, %v2350_v11  ;;  %vm2705_vm8 = vcmp.eq.s32.totalorder %v284_v55, 15  ;;  %vm2709_vm9 = vcmp.eq.s32.totalorder %v285_v56, 15 }
  0x99   : > { %vm2752_vm11 = vcmp.eq.s32.totalorder %v284_v55, 0  ;;  %vm2768_vm12 = vcmp.eq.s32.totalorder %v285_v56, 0  ;;  %v875_v8 = vld.sshfl [vmem:[#allocation1] sm:$0xff pattern:$0x75316420] }
  0x9a   : > { %v876_v11 = vld.sshfl [vmem:[#allocation1 + $0x8] sm:$0xff pattern:$0x75316420] }
  0x9b   : > { %v407_v32 = vpop.permute.xlu0 %406  ;;  %1062 = vst [vmem:[#allocation1] ss:$2 sm:$0xff] %v2580_v0 }
  0x9c   : > { %v409_v34 = vsel %vm408_vm2, %v405_v60, %v407_v32  ;;  %v410_v35 = vsel %vm408_vm2, %v407_v32, %v405_v60 }
  0x9d   : > { %v411_v49 = vmul.f32 %v410_v35, %v397_v12  ;;  %v412_v50 = vmul.f32 %v409_v34, %v398_v13  ;;  %v506_v34 = vsub.f32 1.0, %v504_v9  ;;  %v507_v35 = vsub.f32 1.0, %v505_v20 }
  0x9f   : > { %v413_v59 = vadd.f32 %v411_v49, %v389_v47  ;;  %v414_v60 = vadd.f32 %v412_v50, %v390_v48  ;;  %v508_v45 = vmax.f32 %v506_v34, 0.0  ;;  %v509_v46 = vmax.f32 %v507_v35, 0.0 }
  0xa3   : > { %v429_v33 = vpop.permute.xlu1 %428  ;;  %v492_v16 = vpop.permute.xlu2 %491 }
  0xa4   : > { %v433_v51 = vsel %vm432_vm3, %v429_v33, %v431_v37  ;;  %v434_v52 = vsel %vm432_vm3, %v431_v37, %v429_v33 }
  0xa5   : > { %v435_v61 = vmul.f32 %v434_v52, %v421_v43  ;;  %v436_v62 = vmul.f32 %v433_v51, %v422_v44 }
  0xa7   : > { %v437_v12 = vadd.f32 %v435_v61, %v413_v59  ;;  %v438_v13 = vadd.f32 %v436_v62, %v414_v60 }
  0xa9   : > { %v453_v23 = vadd.f32 %v451_v1, %v438_v13  ;;  %v452_v24 = vadd.f32 %v450_v3, %v437_v12  ;;  %v2818_v13 = vld [vmem:[%s2813_s15] sm:$0xff] }
  0xab   : > { %v518_v44 = vpop.permute.xlu2 %517 }
  0xb3   : > { %v470_v63 = vpop.permute.xlu1 %469  ;;  %v468_v2 = vpop.permute.xlu0 %467 }
  0xb4   : > { %v472_v6 = vsel %vm471_vm4, %v468_v2, %v470_v63  ;;  %v473_v7 = vsel %vm471_vm4, %v470_v63, %v468_v2 }
  0xb5   : > { %v474_v25 = vmul.f32 %v472_v6, %v460_v14  ;;  %v475_v28 = vmul.f32 %v473_v7, %v461_v15  ;;  %v2821_v14 = vld [vmem:[%s2813_s15 + $0x8] sm:$0xff]  ;;  %v573_v15 = vadd.f32 %v2632_v30, %v2818_v13 }
  0xb7   : > { %v476_v37 = vadd.f32 %v474_v25, %v452_v24  ;;  %v477_v39 = vadd.f32 %v475_v28, %v453_v23  ;;  %v575_v9 = vmax.f32 %v573_v15, 0.0 }
  0xb9   : > { %v577_v24 = vmin.f32 %v575_v9, 15.0 }
  0xbb   : > { %v494_v29 = vpop.permute.xlu0 %493  ;;  %v2835_v28 = vsub.f32 %v577_v24, %v2632_v30 }
  0xbc   : > { %v496_v32 = vsel %vm495_vm5, %v492_v16, %v494_v29  ;;  %v497_v33 = vsel %vm495_vm5, %v494_v29, %v492_v16  ;;  %v2827_v16 = vld.sshfl [vmem:[#allocation1] sm:$0xff pattern:$0x75316420] }
  0xbd   : > { %v498_v40 = vmul.f32 %v496_v32, %v484_v10  ;;  %v499_v41 = vmul.f32 %v497_v33, %v485_v19  ;;  %v574_v10 = vadd.f32 %v2634_v31, %v2821_v14  ;;  %v2829_v19 = vld.sshfl [vmem:[#allocation1 + $0x8] sm:$0xff pattern:$0x75316420]  ;;  %v2353_v32 = vadd.f32 4.0, %v2835_v28 }
  0xbe   : > { %1250 = vst [vmem:[#allocation1] ss:$2 sm:$0xff] %v2580_v0  ;;  %v2355_v35 = vadd.f32 3.0, %v2835_v28  ;;  %v2359_v9 = vadd.f32 1.0, %v2835_v28 }
  0xbf   : > { %v500_v42 = vadd.f32 %v498_v40, %v476_v37  ;;  %v501_v43 = vadd.f32 %v499_v41, %v477_v39  ;;  %v576_v20 = vmax.f32 %v574_v10, 0.0 }
  0xc1   : > { %v578_v25 = vmin.f32 %v576_v20, 15.0 }
  0xc3   : > { %v516_v47 = vpop.permute.xlu1 %515  ;;  %v2838_v29 = vsub.f32 %v578_v25, %v2634_v31 }
  0xc4   : > { %v520_v48 = vsel %vm519_vm6, %v516_v47, %v518_v44  ;;  %v521_v49 = vsel %vm519_vm6, %v518_v44, %v516_v47  ;;  %v603_v47 = vand.u32 2147483647, %v2355_v35 }
  0xc5   : > { %v522_v50 = vmul.f32 %v520_v48, %v508_v45  ;;  %v523_v51 = vmul.f32 %v521_v49, %v509_v46  ;;  %v2354_v33 = vadd.f32 4.0, %v2838_v29  ;;  %v2356_v37 = vadd.f32 3.0, %v2838_v29 }
  0xc6   : > { %v2357_v49 = vadd.f32 2.0, %v2835_v28  ;;  %v2870_v55 = vsub.f32 1.0, %v603_v47  ;;  %v2360_v20 = vadd.f32 1.0, %v2838_v29  ;;  %v643_v47 = vand.u32 2147483647, %v2359_v9 }
  0xc7   : > { %v2697_v52 = vadd.f32 %v522_v50, %v500_v42  ;;  %v2699_v53 = vadd.f32 %v523_v51, %v501_v43  ;;  %v583_v43 = vand.u32 2147483647, %v2353_v32  ;;  %v584_v44 = vand.u32 2147483647, %v2354_v33 }
  0xc8   : > { %v604_v48 = vand.u32 2147483647, %v2356_v37  ;;  %v2358_v50 = vadd.f32 2.0, %v2838_v29  ;;  %v2361_v9 = vadd.f32 -1.0, %v2835_v28 }
  0xc9   : > { %4060 = vst [vmem:[#allocation6_spill] sm:$0xff] %v2697_v52  ;;  %v2866_v51 = vsub.f32 1.0, %v583_v43 }
  0xca   : > { %4061 = vst [vmem:[#allocation7_spill] sm:$0xff] %v2699_v53  ;;  %v2872_v56 = vsub.f32 1.0, %v604_v48  ;;  %v644_v48 = vand.u32 2147483647, %v2360_v20 }
  0xd5   : > { %v556_v54 = vpop.permute.xlu1 %555 }
  0xdd   : > { %v558_v61 = vpop.permute.xlu1 %557 }
  0xde   : > { %v560_v62 = vsel %vm559_vm7, %v556_v54, %v558_v61  ;;  %v561_v27 = vsel %vm559_vm7, %v558_v61, %v556_v54  ;;  %v2868_v54 = vsub.f32 1.0, %v584_v44 }
  0xdf   : > { %v2720_v63 = vsel %vm2705_vm8, %v2616_v21, %v560_v62  ;;  %v2725_v1 = vsel %vm2709_vm9, %v2618_v22, %v561_v27  ;;  %v623_v62 = vand.u32 2147483647, %v2357_v49  ;;  %v624_v27 = vand.u32 2147483647, %v2358_v50 }
  0xe0   : > { %870 = vrot.lane.b32.xlu1 %v2725_v1, %s2527_s10  ;;  %609 = vrot.lane.b32.xlu2 %v2720_v63, %s2521_s28 }
  0xe1   : > { %868 = vrot.lane.b32.xlu0 %v2720_v63, %s2527_s10  ;;  %v2894_v15 = vsub.f32 1.0, %v623_v62  ;;  %v2896_v10 = vsub.f32 1.0, %v624_v27 }
  0xe5   : > { %v754_v21 = vpop.permute.xlu0 %753 }
  0xe8   : > { %591 = vrot.lane.b32.xlu1 %v2725_v1, %s2520_s27  ;;  %629 = vrot.lane.b32.xlu2 %v2720_v63, %s2522_s29 }
  0xe9   : > { %589 = vrot.lane.b32.xlu0 %v2720_v63, %s2520_s27 }
  0xed   : > { %v756_v22 = vpop.permute.xlu0 %755 }
  0xee   : > { %v759_v3 = vsel %vm757_vm10, %v756_v22, %v754_v21  ;;  %v758_v6 = vsel %vm757_vm10, %v754_v21, %v756_v22 }
  0xef   : > { %v2760_v4 = vsel %vm2752_vm11, %v765_v57, %v759_v3  ;;  %v2776_v7 = vsel %vm2768_vm12, %v766_v58, %v758_v6  ;;  %v4037_v3 = vmax.f32 %v2866_v51, 0.0  ;;  %v4032_v6 = vmax.f32 %v2868_v54, 0.0 }
  0xf0   : > { %651 = vrot.lane.b32.xlu1 %v2725_v1, %s2523_s30  ;;  %701 = vrot.lane.b32.xlu2 %v2720_v63, %s2525_s8 }
  0xf1   : > { %611 = vrot.lane.b32.xlu0 %v2725_v1, %s2521_s28  ;;  %v595_v24 = vperm.slane %v4037_v3, 5  ;;  %v596_v25 = vperm.slane %v4032_v6, 5 }
  0xf8   : > { %683 = vrot.lane.b32.xlu1 %v2725_v1, %s2524_s7  ;;  %723 = vrot.lane.b32.xlu2 %v2725_v1, %s2526_s9 }
  0xf9   : > { %631 = vrot.lane.b32.xlu0 %v2725_v1, %s2522_s29 }
 0x100   : > { %721 = vrot.lane.b32.xlu1 %v2720_v63, %s2526_s9  ;;  %1056 = vrot.lane.b32.xlu2 %v2760_v4, %s2528_s11 }
 0x101   : > { %649 = vrot.lane.b32.xlu0 %v2720_v63, %s2523_s30 }
 0x108   : > { %773 = vrot.lane.b32.xlu1 %v2776_v7, %s2520_s27  ;;  %1058 = vrot.lane.b32.xlu2 %v2776_v7, %s2528_s11 }
 0x109   : > { %681 = vrot.lane.b32.xlu0 %v2720_v63, %s2524_s7 }
 0x110   : > { %825 = vrot.lane.b32.xlu1 %v2760_v4, %s2524_s7  ;;  %783 = vrot.lane.b32.xlu2 %v2760_v4, %s2521_s28 }
 0x111   : > { %703 = vrot.lane.b32.xlu0 %v2725_v1, %s2525_s8 }
 0x118   : > { %795 = vrot.lane.b32.xlu2 %v2760_v4, %s2522_s29 }
 0x119   : > { %771 = vrot.lane.b32.xlu0 %v2760_v4, %s2520_s27 }
 0x120   : > { %807 = vrot.lane.b32.xlu2 %v2760_v4, %s2523_s30 }
 0x121   : > { %785 = vrot.lane.b32.xlu0 %v2776_v7, %s2521_s28 }
 0x128   : > { %827 = vrot.lane.b32.xlu2 %v2776_v7, %s2524_s7 }
 0x129   : > { %797 = vrot.lane.b32.xlu0 %v2776_v7, %s2522_s29 }
 0x130   : > { %837 = vrot.lane.b32.xlu2 %v2760_v4, %s2525_s8 }
 0x131   : > { %809 = vrot.lane.b32.xlu0 %v2776_v7, %s2523_s30 }
 0x139   : > { %839 = vrot.lane.b32.xlu0 %v2776_v7, %s2525_s8 }
 0x13a   : > { %v2815_v12 = vpop.permute.xlu2 %609 }
 0x142   : > { %v2832_v23 = vpop.permute.xlu2 %629 }
 0x14a   : > { %v2842_v34 = vpop.permute.xlu2 %701 }
 0x152   : > { %v871_v39 = vpop.permute.xlu1 %870  ;;  %v2874_v58 = vpop.permute.xlu2 %723 }
 0x153   : > { %v869_v40 = vpop.permute.xlu0 %868 }
 0x154   : > { %v872_v41 = vsel %vm559_vm7, %v869_v40, %v871_v39  ;;  %v873_v42 = vsel %vm559_vm7, %v871_v39, %v869_v40  ;;  %v4030_v39 = vmax.f32 %v2894_v15, 0.0  ;;  %v4029_v40 = vmax.f32 %v2896_v10, 0.0 }
 0x155   : > { %v2852_v45 = vsel %vm2705_vm8, %v875_v8, %v872_v41  ;;  %v2856_v46 = vsel %vm2709_vm9, %v876_v11, %v873_v42  ;;  %v4031_v8 = vmax.f32 %v2870_v55, 0.0  ;;  %v4028_v11 = vmax.f32 %v2872_v56, 0.0 }
 0x156   : > { %1246 = vrot.lane.b32.xlu2 %v2856_v46, %s2527_s10  ;;  %917 = vrot.lane.b32.xlu0 %v2852_v45, %s2521_s28  ;;  %v661_v41 = vand.u32 2147483647, %v2835_v28  ;;  %v662_v42 = vand.u32 2147483647, %v2838_v29 }
 0x157   : > { %1244 = vrot.lane.b32.xlu1 %v2852_v45, %s2527_s10  ;;  %v615_v32 = vperm.slane %v4031_v8, 5  ;;  %v616_v33 = vperm.slane %v4028_v11, 5 }
 0x158   : > { %v2933_v20 = vsub.f32 1.0, %v662_v42 }
 0x15a   : > { %v592_v57 = vpop.permute.xlu1 %591  ;;  %v2920_v49 = vpop.permute.xlu2 %1056 }
 0x15b   : > { %v590_v61 = vpop.permute.xlu0 %589 }
 0x15c   : > { %v2878_v21 = vsel %vm360_vm0, %v590_v61, %v592_v57  ;;  %v2882_v22 = vsel %vm360_vm0, %v592_v57, %v590_v61 }
 0x15d   : > { %v597_v50 = vmul.f32 %v595_v24, %v2882_v22  ;;  %v598_v57 = vmul.f32 %v596_v25, %v2878_v21  ;;  %v2362_v24 = vadd.f32 -1.0, %v2838_v29  ;;  %v635_v25 = vperm.slane %v4030_v39, 5 }
 0x15e   : > { %899 = vrot.lane.b32.xlu2 %v2856_v46, %s2520_s27  ;;  %939 = vrot.lane.b32.xlu0 %v2856_v46, %s2522_s29 }
 0x15f   : > { %897 = vrot.lane.b32.xlu1 %v2852_v45, %s2520_s27 }
 0x162   : > { %v2908_v35 = vpop.permute.xlu1 %651 }
 0x163   : > { %v612_v37 = vpop.permute.xlu0 %611 }
 0x164   : > { %v613_v43 = vsel %vm384_vm1, %v2815_v12, %v612_v37  ;;  %v614_v44 = vsel %vm384_vm1, %v612_v37, %v2815_v12  ;;  %v2930_v12 = vsub.f32 1.0, %v661_v41  ;;  %v2942_v37 = vsub.f32 1.0, %v644_v48 }
 0x165   : > { %v617_v61 = vmul.f32 %v615_v32, %v614_v44  ;;  %v618_v62 = vmul.f32 %v616_v33, %v613_v43  ;;  %v636_v32 = vperm.slane %v4029_v40, 5  ;;  %v2940_v33 = vsub.f32 1.0, %v643_v47 }
 0x166   : > { %937 = vrot.lane.b32.xlu2 %v2852_v45, %s2522_s29  ;;  %1009 = vrot.lane.b32.xlu0 %v2852_v45, %s2525_s8  ;;  %v4033_v44 = vmax.f32 %v2930_v12, 0.0  ;;  %v676_v47 = vand.u32 2147483647, %v2362_v24  ;;  %v4036_v39 = vmax.f32 %v2942_v37, 0.0 }
 0x167   : > { %v619_v27 = vadd.f32 %v617_v61, %v597_v50  ;;  %v620_v11 = vadd.f32 %v618_v62, %v598_v57  ;;  %919 = vrot.lane.b32.xlu1 %v2856_v46, %s2521_s28  ;;  %v675_v50 = vand.u32 2147483647, %v2361_v9  ;;  %v4035_v61 = vmax.f32 %v2933_v20, 0.0  ;;  %v1059_v9 = vpop.permute.xlu2 %1058 }
 0x168   : > { %v4034_v40 = vmax.f32 %v2940_v33, 0.0  ;;  %v1060_v24 = vsel %vm757_vm10, %v2920_v49, %v1059_v9 }
 0x16a   : > { %v2944_v43 = vpop.permute.xlu1 %683 }
 0x16b   : > { %v632_v41 = vpop.permute.xlu0 %631 }
 0x16c   : > { %v633_v42 = vsel %vm408_vm2, %v2832_v23, %v632_v41  ;;  %v634_v57 = vsel %vm408_vm2, %v632_v41, %v2832_v23  ;;  %v2962_v23 = vsub.f32 1.0, %v675_v50  ;;  %v2363_v41 = vadd.f32 -2.0, %v2835_v28 }
 0x16d   : > { %v637_v62 = vmul.f32 %v635_v25, %v634_v57  ;;  %v638_v48 = vmul.f32 %v636_v32, %v633_v42  ;;  %v667_v25 = vperm.slane %v4033_v44, 5  ;;  %v2969_v32 = vsub.f32 1.0, %v676_v47 }
 0x16e   : > { %959 = vrot.lane.b32.xlu2 %v2856_v46, %s2523_s30  ;;  %1029 = vrot.lane.b32.xlu0 %v2852_v45, %s2526_s9  ;;  %v668_v50 = vperm.slane %v4035_v61, 5  ;;  %v2364_v42 = vadd.f32 -2.0, %v2838_v29  ;;  %v2367_v57 = vadd.f32 -4.0, %v2835_v28  ;;  %v2365_v47 = vadd.f32 -3.0, %v2835_v28 }
 0x16f   : > { %v639_v8 = vadd.f32 %v637_v62, %v619_v27  ;;  %v640_v6 = vadd.f32 %v638_v48, %v620_v11  ;;  %957 = vrot.lane.b32.xlu1 %v2852_v45, %s2523_s30  ;;  %v655_v27 = vperm.slane %v4034_v40, 5  ;;  %v656_v11 = vperm.slane %v4036_v39, 5 }
 0x170   : > { %v2368_v62 = vadd.f32 -4.0, %v2838_v29  ;;  %v2366_v48 = vadd.f32 -3.0, %v2838_v29  ;;  %v2986_v40 = vsel %vm2768_vm12, %v2829_v19, %v1060_v24  ;;  %v680_v24 = vmax.f32 %v2969_v32, 0.0 }
 0x171   : > { %v695_v53 = vand.u32 2147483647, %v2363_v41  ;;  %v696_v36 = vand.u32 2147483647, %v2364_v42  ;;  %v735_v17 = vand.u32 2147483647, %v2367_v57 }
 0x172   : > { %v722_v44 = vpop.permute.xlu1 %721  ;;  %v715_v28 = vand.u32 2147483647, %v2365_v47  ;;  %v716_v18 = vand.u32 2147483647, %v2366_v48  ;;  %v736_v41 = vand.u32 2147483647, %v2368_v62 }
 0x173   : > { %v2991_v61 = vsel %vm519_vm6, %v722_v44, %v2874_v58  ;;  %v2996_v39 = vsel %vm519_vm6, %v2874_v58, %v722_v44  ;;  %v650_v3 = vpop.permute.xlu0 %649  ;;  %v670_v58 = vmul.f32 %v668_v50, %v2725_v1  ;;  %v669_v44 = vmul.f32 %v667_v25, %v2720_v63 }
 0x174   : > { %v653_v29 = vsel %vm432_vm3, %v650_v3, %v2908_v35  ;;  %v654_v19 = vsel %vm432_vm3, %v2908_v35, %v650_v3  ;;  %v688_v42 = vperm.slane %v680_v24, 5  ;;  %v3018_v57 = vsub.f32 1.0, %v695_v53 }
 0x175   : > { %v657_v52 = vmul.f32 %v655_v27, %v654_v19  ;;  %v658_v38 = vmul.f32 %v656_v11, %v653_v29  ;;  %v4070_v27 = vmax.f32 %v2962_v23, 0.0  ;;  %v1061_v63 = vsel %vm757_vm10, %v1059_v9, %v2920_v49 }
 0x176   : > { %991 = vrot.lane.b32.xlu2 %v2856_v46, %s2524_s7  ;;  %1434 = vrot.lane.b32.xlu0 %v2986_v40, %s2528_s11  ;;  %v3031_v62 = vsub.f32 1.0, %v736_v41  ;;  %v3036_v53 = vsel %vm2752_vm11, %v2827_v16, %v1061_v63 }
 0x177   : > { %v659_v3 = vadd.f32 %v657_v52, %v639_v8  ;;  %v660_v35 = vadd.f32 %v658_v38, %v640_v6  ;;  %989 = vrot.lane.b32.xlu1 %v2852_v45, %s2524_s7  ;;  %v687_v11 = vperm.slane %v4070_v27, 5  ;;  %v3023_v52 = vsub.f32 1.0, %v696_v36 }
 0x178   : > { %v3025_v38 = vsub.f32 1.0, %v735_v17  ;;  %v3027_v6 = vsub.f32 1.0, %v715_v28  ;;  %v3029_v8 = vsub.f32 1.0, %v716_v18  ;;  %4074 = vst [vmem:[#allocation11_spill] sm:$0xff] %v3031_v62  ;;  %v699_v18 = vmax.f32 %v3018_v57, 0.0 }
 0x179   : > { %v672_v1 = vadd.f32 %v670_v58, %v660_v35  ;;  %v671_v25 = vadd.f32 %v669_v44, %v659_v3  ;;  %v700_v47 = vmax.f32 %v3023_v52, 0.0  ;;  %v4042_v58 = vmax.f32 %v3031_v62, 0.0 }
 0x17a   : > { %4071 = vst [vmem:[#allocation8_spill] sm:$0xff] %v3025_v38  ;;  %v4041_v16 = vmax.f32 %v3027_v6, 0.0  ;;  %v4040_v48 = vmax.f32 %v3029_v8, 0.0  ;;  %v4043_v19 = vmax.f32 %v3025_v38, 0.0  ;;  %v707_v44 = vperm.slane %v699_v18, 5 }
 0x17b   : > { %4072 = vst [vmem:[#allocation9_spill] sm:$0xff] %v3027_v6  ;;  %v682_v50 = vpop.permute.xlu0 %681  ;;  %v708_v3 = vperm.slane %v700_v47, 5  ;;  %v296_v52 = vrot.slane %v2818_v13, 1 }
 0x17c   : > { %4073 = vst [vmem:[#allocation10_spill] sm:$0xff] %v3029_v8  ;;  %v685_v49 = vsel %vm471_vm4, %v682_v50, %v2944_v43  ;;  %v686_v17 = vsel %vm471_vm4, %v2944_v43, %v682_v50  ;;  %v784_v43 = vpop.permute.xlu2 %783  ;;  %v727_v35 = vperm.slane %v4041_v16, 5  ;;  %v728_v41 = vperm.slane %v4040_v48, 5 }
 0x17d   : > { %v689_v36 = vmul.f32 %v687_v11, %v685_v49  ;;  %v690_v9 = vmul.f32 %v688_v42, %v686_v17  ;;  %v741_v63 = vperm.slane %v4043_v19, 5 }
 0x17e   : > { %1432 = vrot.lane.b32.xlu2 %v3036_v53, %s2528_s11  ;;  %1087 = vrot.lane.b32.xlu0 %v2986_v40, %s2520_s27  ;;  %v729_v49 = vmul.f32 %v727_v35, %v2991_v61  ;;  %v730_v17 = vmul.f32 %v728_v41, %v2996_v39 }
 0x17f   : > { %v691_v28 = vadd.f32 %v689_v36, %v671_v25  ;;  %v692_v29 = vadd.f32 %v690_v9, %v672_v1  ;;  %1011 = vrot.lane.b32.xlu1 %v2856_v46, %s2525_s8  ;;  %v742_v1 = vperm.slane %v4042_v58, 5  ;;  %v743_v9 = vmul.f32 %v741_v63, %v2878_v21 }
 0x180   : > { %v4078_v21 = vmax.f32 %v2866_v51, 0.0 }
 0x183   : > { %v704_v27 = vpop.permute.xlu0 %703 }
 0x184   : > { %v705_v11 = vsel %vm495_vm5, %v2842_v34, %v704_v27  ;;  %v706_v42 = vsel %vm495_vm5, %v704_v27, %v2842_v34 }
 0x185   : > { %v709_v25 = vmul.f32 %v707_v44, %v705_v11  ;;  %v710_v50 = vmul.f32 %v708_v3, %v706_v42  ;;  %v744_v44 = vmul.f32 %v742_v1, %v2882_v22  ;;  %v796_v11 = vpop.permute.xlu2 %795  ;;  %v774_v42 = vpop.permute.xlu1 %773  ;;  %v777_v22 = vperm.slane %v4078_v21, 3 }
 0x186   : > { %1085 = vrot.lane.b32.xlu2 %v3036_v53, %s2520_s27  ;;  %1147 = vrot.lane.b32.xlu0 %v2986_v40, %s2523_s30 }
 0x187   : > { %v711_v36 = vadd.f32 %v709_v25, %v691_v28  ;;  %v712_v34 = vadd.f32 %v710_v50, %v692_v29  ;;  %1105 = vrot.lane.b32.xlu1 %v3036_v53, %s2521_s28  ;;  %v4079_v29 = vmax.f32 %v2868_v54, 0.0 }
 0x189   : > { %v731_v3 = vadd.f32 %v729_v49, %v711_v36  ;;  %v732_v27 = vadd.f32 %v730_v17, %v712_v34  ;;  %v778_v35 = vperm.slane %v4079_v29, 3  ;;  %v4082_v36 = vmax.f32 %v2894_v15, 0.0 }
 0x18a   : > { %v4083_v34 = vmax.f32 %v2896_v10, 0.0  ;;  %v4084_v10 = vmax.f32 %v2940_v33, 0.0 }
 0x18b   : > { %v745_v48 = vadd.f32 %v743_v9, %v731_v3  ;;  %v746_v16 = vadd.f32 %v744_v44, %v732_v27  ;;  %v772_v58 = vpop.permute.xlu0 %771 }
 0x18c   : > { %v3086_v61 = vsel %vm360_vm0, %v772_v58, %v774_v42  ;;  %v3090_v39 = vsel %vm360_vm0, %v774_v42, %v772_v58  ;;  %v4080_v58 = vmax.f32 %v2870_v55, 0.0  ;;  %v802_v9 = vperm.slane %v4083_v34, 3  ;;  %v1251_v34 = vld.sshfl [vmem:[#allocation1] sm:$0xff pattern:$0x75316420] }
 0x18d   : > { %4075 = vst [vmem:[#allocation12_spill] sm:$0xff] %v3086_v61  ;;  %v3092_v28 = vpack.c.bf16 %v746_v16, %v745_v48  ;;  %v4081_v16 = vmax.f32 %v2872_v56, 0.0  ;;  %v808_v1 = vpop.permute.xlu2 %807  ;;  %v779_v51 = vmul.f32 %v777_v22, %v3090_v39  ;;  %v780_v49 = vmul.f32 %v778_v35, %v3086_v61 }
 0x18e   : > { %4076 = vst [vmem:[#allocation13_spill] sm:$0xff] %v3090_v39  ;;  %1107 = vrot.lane.b32.xlu2 %v2986_v40, %s2521_s28  ;;  %1177 = vrot.lane.b32.xlu0 %v3036_v53, %s2524_s7  ;;  %v789_v41 = vperm.slane %v4080_v58, 3  ;;  %v813_v35 = vperm.slane %v4084_v10, 3  ;;  %v4085_v58 = vmax.f32 %v2942_v37, 0.0 }
 0x18f   : > { %4077 = vst [vmem:[#allocation14_spill] sm:$0xff] %v3092_v28  ;;  %1125 = vrot.lane.b32.xlu1 %v3036_v53, %s2522_s29  ;;  %v790_v48 = vperm.slane %v4081_v16, 3  ;;  %v4086_v16 = vmax.f32 %v2930_v12, 0.0 }
 0x193   : > { %v786_v63 = vpop.permute.xlu0 %785 }
 0x194   : > { %v787_v25 = vsel %vm384_vm1, %v784_v43, %v786_v63  ;;  %v788_v50 = vsel %vm384_vm1, %v786_v63, %v784_v43  ;;  %v801_v43 = vperm.slane %v4082_v36, 3  ;;  %v4087_v63 = vmax.f32 %v2933_v20, 0.0 }
 0x195   : > { %v791_v54 = vmul.f32 %v789_v41, %v788_v50  ;;  %v792_v17 = vmul.f32 %v790_v48, %v787_v25  ;;  %v828_v22 = vpop.permute.xlu2 %827  ;;  %v826_v41 = vpop.permute.xlu1 %825  ;;  %v819_v48 = vperm.slane %v4086_v16, 3 }
 0x196   : > { %1127 = vrot.lane.b32.xlu2 %v2986_v40, %s2522_s29  ;;  %1199 = vrot.lane.b32.xlu0 %v2986_v40, %s2525_s8  ;;  %v820_v25 = vperm.slane %v4087_v63, 3  ;;  %v829_v12 = vsel %vm471_vm4, %v826_v41, %v828_v22  ;;  %v830_v20 = vsel %vm471_vm4, %v828_v22, %v826_v41  ;;  %v3174_v41 = vadd.f32 %v296_v52, %v2818_v13 }
 0x197   : > { %v793_v55 = vadd.f32 %v791_v54, %v779_v51  ;;  %v794_v56 = vadd.f32 %v792_v17, %v780_v49  ;;  %1179 = vrot.lane.b32.xlu1 %v2986_v40, %s2524_s7  ;;  %v4088_v51 = vmax.f32 %v2962_v23, 0.0  ;;  %v832_v54 = vperm.slane %v680_v24, 3 }
 0x198   : > { %v821_v23 = vmul.f32 %v819_v48, %v2760_v4  ;;  %v822_v32 = vmul.f32 %v820_v25, %v2776_v7  ;;  %v881_v48 = vadd.f32 %v3174_v41, %v2632_v30 }
 0x199   : > { %v831_v49 = vperm.slane %v4088_v51, 3 }
 0x19b   : > { %v798_v44 = vpop.permute.xlu0 %797  ;;  %v833_v36 = vmul.f32 %v831_v49, %v829_v12 }
 0x19c   : > { %v799_v3 = vsel %vm408_vm2, %v796_v11, %v798_v44  ;;  %v800_v27 = vsel %vm408_vm2, %v798_v44, %v796_v11  ;;  %v814_v11 = vperm.slane %v4085_v58, 3 }
 0x19d   : > { %v803_v42 = vmul.f32 %v801_v43, %v800_v27  ;;  %v804_v21 = vmul.f32 %v802_v9, %v799_v3  ;;  %v834_v43 = vmul.f32 %v832_v54, %v830_v20  ;;  %v1252_v9 = vld.sshfl [vmem:[#allocation1 + $0x8] sm:$0xff pattern:$0x75316420]  ;;  %v843_v27 = vperm.slane %v699_v18, 3 }
 0x19e   : > { %1145 = vrot.lane.b32.xlu2 %v3036_v53, %s2523_s30  ;;  %1217 = vrot.lane.b32.xlu0 %v3036_v53, %s2526_s9  ;;  %1438 = vst [vmem:[#allocation1] ss:$2 sm:$0xff] %v2580_v0  ;;  %v297_v18 = vrot.slane %v2821_v14, 1 }
 0x19f   : > { %v805_v15 = vadd.f32 %v803_v42, %v793_v55  ;;  %v806_v29 = vadd.f32 %v804_v21, %v794_v56  ;;  %1219 = vrot.lane.b32.xlu1 %v2986_v40, %s2526_s9  ;;  %v844_v42 = vperm.slane %v700_v47, 3 }
 0x1a0   : > { %v3177_v16 = vadd.f32 %v297_v18, %v2821_v14 }
 0x1a2   : > { %v882_v63 = vadd.f32 %v3177_v16, %v2634_v31 }
 0x1a3   : > { %v810_v50 = vpop.permute.xlu0 %809 }
 0x1a4   : > { %v811_v33 = vsel %vm432_vm3, %v808_v1, %v810_v50  ;;  %v812_v37 = vsel %vm432_vm3, %v810_v50, %v808_v1  ;;  %v838_v1 = vpop.permute.xlu2 %837  ;;  %v883_v50 = vmax.f32 %v881_v48, 0.0  ;;  %v884_v51 = vmax.f32 %v882_v63, 0.0 }
 0x1a5   : > { %v815_v17 = vmul.f32 %v813_v35, %v812_v37  ;;  %v816_v55 = vmul.f32 %v814_v11, %v811_v33 }
 0x1a6   : > { %1197 = vrot.lane.b32.xlu2 %v3036_v53, %s2525_s8  ;;  %v885_v49 = vmin.f32 %v883_v50, 15.0  ;;  %v886_v54 = vmin.f32 %v884_v51, 15.0 }
 0x1a7   : > { %v817_v24 = vadd.f32 %v815_v17, %v805_v15  ;;  %v818_v56 = vadd.f32 %v816_v55, %v806_v29 }
 0x1a8   : > { %v3184_v37 = vsub.f32 %v885_v49, %v2632_v30  ;;  %v3187_v12 = vsub.f32 %v886_v54, %v2634_v31 }
 0x1a9   : > { %v823_v44 = vadd.f32 %v821_v23, %v817_v24  ;;  %v824_v3 = vadd.f32 %v822_v32, %v818_v56 }
 0x1aa   : > { %4091 = vst [vmem:[#allocation17_spill] sm:$0xff] %v3187_v12  ;;  %v2369_v20 = vadd.f32 4.0, %v3184_v37  ;;  %v2370_v17 = vadd.f32 4.0, %v3187_v12  ;;  %v2371_v55 = vadd.f32 3.0, %v3184_v37  ;;  %v2372_v23 = vadd.f32 3.0, %v3187_v12 }
 0x1ab   : > { %v835_v21 = vadd.f32 %v833_v36, %v823_v44  ;;  %v836_v22 = vadd.f32 %v834_v43, %v824_v3  ;;  %v840_v10 = vpop.permute.xlu0 %839  ;;  %v2373_v56 = vadd.f32 2.0, %v3184_v37  ;;  %v2374_v36 = vadd.f32 2.0, %v3187_v12 }
 0x1ac   : > { %v841_v15 = vsel %vm495_vm5, %v838_v1, %v840_v10  ;;  %v842_v29 = vsel %vm495_vm5, %v840_v10, %v838_v1  ;;  %v302_v43 = vrot.slane %v2818_v13, 7  ;;  %v891_v44 = vand.u32 2147483647, %v2369_v20 }
 0x1ad   : > { %v845_v35 = vmul.f32 %v843_v27, %v841_v15  ;;  %v846_v58 = vmul.f32 %v844_v42, %v842_v29  ;;  %v892_v3 = vand.u32 2147483647, %v2370_v17  ;;  %v303_v27 = vrot.slane %v2821_v14, 7 }
 0x1ae   : > { %v912_v10 = vand.u32 2147483647, %v2372_v23  ;;  %v931_v52 = vand.u32 2147483647, %v2373_v56  ;;  %v932_v18 = vand.u32 2147483647, %v2374_v36 }
 0x1af   : > { %v3167_v11 = vadd.f32 %v845_v35, %v835_v21  ;;  %v3169_v57 = vadd.f32 %v846_v58, %v836_v22  ;;  %v911_v22 = vand.u32 2147483647, %v2371_v55  ;;  %v3213_v35 = vld.sshfl [vmem:[#allocation1] sm:$0xff pattern:$0x75316420]  ;;  %v893_v48 = vsub.f32 1.0, %v891_v44 }
 0x1b0   : > { %v1247_v47 = vpop.permute.xlu2 %1246  ;;  %v3215_v58 = vld.sshfl [vmem:[#allocation1 + $0x8] sm:$0xff pattern:$0x75316420]  ;;  %v894_v63 = vsub.f32 1.0, %v892_v3  ;;  %v914_v51 = vsub.f32 1.0, %v912_v10  ;;  %v933_v54 = vsub.f32 1.0, %v931_v52  ;;  %v3232_v55 = vadd.f32 %v303_v27, %v2821_v14 }
 0x1b1   : > { %4089 = vst [vmem:[#allocation15_spill] sm:$0xff] %v3167_v11  ;;  %v913_v50 = vsub.f32 1.0, %v911_v22  ;;  %v934_v20 = vsub.f32 1.0, %v932_v18  ;;  %v895_v3 = vmax.f32 %v893_v48, 0.0  ;;  %v2378_v48 = vadd.f32 -1.0, %v3187_v12 }
 0x1b2   : > { %4090 = vst [vmem:[#allocation16_spill] sm:$0xff] %v3169_v57  ;;  %v896_v27 = vmax.f32 %v894_v63, 0.0  ;;  %v1070_v22 = vadd.f32 %v3232_v55, %v2634_v31  ;;  %v935_v52 = vmax.f32 %v933_v54, 0.0  ;;  %v970_v54 = vand.u32 2147483647, %v3187_v12 }
 0x1b3   : > { %1626 = vst [vmem:[#allocation1] ss:$2 sm:$0xff] %v2580_v0  ;;  %v936_v18 = vmax.f32 %v934_v20, 0.0  ;;  %v903_v63 = vperm.slane %v895_v3, 5 }
 0x1b4   : > { %v943_v57 = vperm.slane %v935_v52, 5  ;;  %v972_v52 = vsub.f32 1.0, %v970_v54 }
 0x1b8   : > { %v900_v25 = vpop.permute.xlu2 %899 }
 0x1c0   : > { %v938_v33 = vpop.permute.xlu2 %937 }
 0x1c8   : > { %v3193_v32 = vpop.permute.xlu2 %959  ;;  %v3195_v24 = vpop.permute.xlu0 %917 }
 0x1c9   : > { %v1245_v1 = vpop.permute.xlu1 %1244 }
 0x1ca   : > { %v1248_v42 = vsel %vm559_vm7, %v1245_v1, %v1247_v47  ;;  %v1249_v21 = vsel %vm559_vm7, %v1247_v47, %v1245_v1  ;;  %v2376_v47 = vadd.f32 1.0, %v3187_v12 }
 0x1cb   : > { %v3207_v15 = vsel %vm2705_vm8, %v1251_v34, %v1248_v42  ;;  %v3211_v29 = vsel %vm2709_vm9, %v1252_v9, %v1249_v21  ;;  %v3223_v34 = vadd.f32 %v302_v43, %v2818_v13  ;;  %v2375_v9 = vadd.f32 1.0, %v3184_v37 }
 0x1cc   : > { %1275 = vrot.lane.b32.xlu1 %v3211_v29, %s2520_s27  ;;  %1622 = vrot.lane.b32.xlu0 %v3211_v29, %s2527_s10  ;;  %v952_v1 = vand.u32 2147483647, %v2376_v47  ;;  %v915_v42 = vmax.f32 %v913_v50, 0.0  ;;  %v916_v21 = vmax.f32 %v914_v51, 0.0  ;;  %v2377_v47 = vadd.f32 -1.0, %v3184_v37 }
 0x1cd   : > { %1620 = vrot.lane.b32.xlu2 %v3207_v15, %s2527_s10  ;;  %v1069_v13 = vadd.f32 %v3223_v34, %v2632_v30  ;;  %v951_v43 = vand.u32 2147483647, %v2375_v9  ;;  %v904_v50 = vperm.slane %v896_v27, 5 }
 0x1ce   : > { %v954_v9 = vsub.f32 1.0, %v952_v1  ;;  %v923_v51 = vperm.slane %v915_v42, 5  ;;  %v983_v42 = vand.u32 2147483647, %v2377_v47 }
 0x1cf   : > { %v1071_v10 = vmax.f32 %v1069_v13, 0.0  ;;  %v1072_v13 = vmax.f32 %v1070_v22, 0.0 }
 0x1d0   : > { %v3229_v49 = vpop.permute.xlu2 %991  ;;  %v940_v17 = vpop.permute.xlu0 %939  ;;  %v956_v8 = vmax.f32 %v954_v9, 0.0 }
 0x1d1   : > { %v898_v23 = vpop.permute.xlu1 %897  ;;  %v941_v56 = vsel %vm408_vm2, %v938_v33, %v940_v17  ;;  %v942_v36 = vsel %vm408_vm2, %v940_v17, %v938_v33  ;;  %v969_v33 = vand.u32 2147483647, %v3184_v37  ;;  %v924_v17 = vperm.slane %v916_v21, 5 }
 0x1d2   : > { %v3242_v44 = vsel %vm360_vm0, %v898_v23, %v900_v25  ;;  %v3246_v14 = vsel %vm360_vm0, %v900_v25, %v898_v23  ;;  %v953_v25 = vsub.f32 1.0, %v951_v43  ;;  %v1073_v28 = vmin.f32 %v1071_v10, 15.0 }
 0x1d3   : > { %4092 = vst [vmem:[#allocation18_spill] sm:$0xff] %v3242_v44  ;;  %v971_v20 = vsub.f32 1.0, %v969_v33  ;;  %v944_v43 = vperm.slane %v936_v18, 5  ;;  %v984_v21 = vand.u32 2147483647, %v2378_v48  ;;  %v905_v6 = vmul.f32 %v903_v63, %v3246_v14 }
 0x1d4   : > { %4093 = vst [vmem:[#allocation19_spill] sm:$0xff] %v3246_v14  ;;  %1315 = vrot.lane.b32.xlu1 %v3211_v29, %s2522_s29  ;;  %1273 = vrot.lane.b32.xlu0 %v3207_v15, %s2520_s27  ;;  %v955_v11 = vmax.f32 %v953_v25, 0.0  ;;  %v906_v33 = vmul.f32 %v904_v50, %v3242_v44  ;;  %v2379_v25 = vadd.f32 -2.0, %v3184_v37  ;;  %v1074_v9 = vmin.f32 %v1072_v13, 15.0 }
 0x1d5   : > { %1293 = vrot.lane.b32.xlu2 %v3207_v15, %s2521_s28  ;;  %v973_v18 = vmax.f32 %v971_v20, 0.0  ;;  %v946_v47 = vmul.f32 %v944_v43, %v941_v56  ;;  %v964_v50 = vperm.slane %v956_v8, 5  ;;  %v985_v20 = vsub.f32 1.0, %v983_v42 }
 0x1d6   : > { %v963_v63 = vperm.slane %v955_v11, 5  ;;  %v1003_v13 = vand.u32 2147483647, %v2379_v25  ;;  %v3295_v42 = vsub.f32 %v1074_v9, %v2634_v31 }
 0x1d7   : > { %v975_v56 = vperm.slane %v973_v18, 5 }
 0x1d8   : > { %v3259_v23 = vpop.permute.xlu2 %1432  ;;  %v3261_v19 = vpop.permute.xlu0 %1009  ;;  %v2386_v25 = vadd.f32 4.0, %v3295_v42  ;;  %v1005_v9 = vsub.f32 1.0, %v1003_v13 }
 0x1d9   : > { %v920_v1 = vpop.permute.xlu1 %919  ;;  %v977_v18 = vmul.f32 %v975_v56, %v2852_v45 }
 0x1da   : > { %v921_v3 = vsel %vm384_vm1, %v3195_v24, %v920_v1  ;;  %v922_v27 = vsel %vm384_vm1, %v920_v1, %v3195_v24  ;;  %v945_v24 = vmul.f32 %v943_v57, %v942_v36  ;;  %v1080_v56 = vand.u32 2147483647, %v2386_v25 }
 0x1db   : > { %v925_v22 = vmul.f32 %v923_v51, %v922_v27  ;;  %v926_v10 = vmul.f32 %v924_v17, %v921_v3  ;;  %v2380_v51 = vadd.f32 -2.0, %v3187_v12  ;;  %v3281_v17 = vsub.f32 %v1073_v28, %v2632_v30 }
 0x1dc   : > { %1335 = vrot.lane.b32.xlu1 %v3211_v29, %s2523_s30  ;;  %1295 = vrot.lane.b32.xlu0 %v3211_v29, %s2521_s28  ;;  %v986_v27 = vsub.f32 1.0, %v984_v21  ;;  %v1082_v25 = vsub.f32 1.0, %v1080_v56 }
 0x1dd   : > { %v927_v48 = vadd.f32 %v925_v22, %v905_v6  ;;  %v928_v1 = vadd.f32 %v926_v10, %v906_v33  ;;  %1367 = vrot.lane.b32.xlu2 %v3211_v29, %s2524_s7  ;;  %v974_v6 = vmax.f32 %v972_v52, 0.0  ;;  %v2385_v11 = vadd.f32 4.0, %v3281_v17 }
 0x1de   : > { %v1004_v43 = vand.u32 2147483647, %v2380_v51  ;;  %v987_v22 = vmax.f32 %v985_v20, 0.0  ;;  %v988_v10 = vmax.f32 %v986_v27, 0.0  ;;  %v2388_v20 = vadd.f32 3.0, %v3295_v42 }
 0x1df   : > { %v947_v3 = vadd.f32 %v945_v24, %v927_v48  ;;  %v948_v54 = vadd.f32 %v946_v47, %v928_v1  ;;  %v976_v52 = vperm.slane %v974_v6, 5  ;;  %v1079_v47 = vand.u32 2147483647, %v2385_v11 }
 0x1e0   : > { %v3283_v14 = vpop.permute.xlu2 %1085  ;;  %v3285_v57 = vpop.permute.xlu0 %1029  ;;  %v1006_v48 = vsub.f32 1.0, %v1004_v43  ;;  %v2387_v1 = vadd.f32 3.0, %v3281_v17 }
 0x1e1   : > { %4094 = vst [vmem:[#allocation20_spill] sm:$0xff] %v3285_v57  ;;  %v958_v36 = vpop.permute.xlu1 %957  ;;  %v978_v6 = vmul.f32 %v976_v52, %v2856_v46 }
 0x1e2   : > { %v961_v8 = vsel %vm432_vm3, %v958_v36, %v3193_v32  ;;  %v962_v28 = vsel %vm432_vm3, %v3193_v32, %v958_v36  ;;  %v1081_v36 = vsub.f32 1.0, %v1079_v47 }
 0x1e3   : > { %v965_v21 = vmul.f32 %v963_v63, %v962_v28  ;;  %v966_v33 = vmul.f32 %v964_v50, %v961_v8  ;;  %v995_v63 = vperm.slane %v987_v22, 5  ;;  %v996_v50 = vperm.slane %v988_v10, 5 }
 0x1e4   : > { %1365 = vrot.lane.b32.xlu1 %v3207_v15, %s2524_s7  ;;  %1313 = vrot.lane.b32.xlu0 %v3207_v15, %s2522_s29  ;;  %v1008_v8 = vmax.f32 %v1006_v48, 0.0  ;;  %v1099_v28 = vand.u32 2147483647, %v2387_v1  ;;  %v1100_v22 = vand.u32 2147483647, %v2388_v20  ;;  %v2389_v10 = vadd.f32 2.0, %v3281_v17 }
 0x1e5   : > { %v967_v32 = vadd.f32 %v965_v21, %v947_v3  ;;  %v968_v24 = vadd.f32 %v966_v33, %v948_v54  ;;  %1385 = vrot.lane.b32.xlu2 %v3207_v15, %s2525_s8  ;;  %v1007_v54 = vmax.f32 %v1005_v9, 0.0  ;;  %v1158_v9 = vand.u32 2147483647, %v3295_v42 }
 0x1e6   : > { %v1016_v48 = vperm.slane %v1008_v8, 5  ;;  %v1083_v1 = vmax.f32 %v1081_v36, 0.0  ;;  %v1119_v56 = vand.u32 2147483647, %v2389_v10 }
 0x1e7   : > { %v979_v51 = vadd.f32 %v977_v18, %v967_v32  ;;  %v980_v43 = vadd.f32 %v978_v6, %v968_v24  ;;  %v1101_v32 = vsub.f32 1.0, %v1099_v28  ;;  %v1157_v24 = vand.u32 2147483647, %v3281_v17 }
 0x1e8   : > { %v3307_v27 = vpop.permute.xlu2 %1107  ;;  %v1435_v45 = vpop.permute.xlu0 %1434  ;;  %v1015_v47 = vperm.slane %v1007_v54, 5  ;;  %v2391_v6 = vadd.f32 1.0, %v3281_v17 }
 0x1e9   : > { %v990_v3 = vpop.permute.xlu1 %989 }
 0x1ea   : > { %v993_v13 = vsel %vm471_vm4, %v990_v3, %v3229_v49  ;;  %v994_v11 = vsel %vm471_vm4, %v3229_v49, %v990_v3  ;;  %v2390_v49 = vadd.f32 2.0, %v3295_v42  ;;  %v2392_v3 = vadd.f32 1.0, %v3295_v42 }
 0x1eb   : > { %v997_v21 = vmul.f32 %v995_v63, %v993_v13  ;;  %v998_v33 = vmul.f32 %v996_v50, %v994_v11  ;;  %v1102_v63 = vsub.f32 1.0, %v1100_v22  ;;  %v1436_v50 = vsel %vm757_vm10, %v3259_v23, %v1435_v45 }
 0x1ec   : > { %1405 = vrot.lane.b32.xlu1 %v3207_v15, %s2526_s9  ;;  %1333 = vrot.lane.b32.xlu0 %v3207_v15, %s2523_s30  ;;  %v1437_v13 = vsel %vm757_vm10, %v1435_v45, %v3259_v23  ;;  %v1120_v8 = vand.u32 2147483647, %v2390_v49  ;;  %v1084_v45 = vmax.f32 %v1082_v25, 0.0  ;;  %v1140_v49 = vand.u32 2147483647, %v2392_v3 }
 0x1ed   : > { %v999_v52 = vadd.f32 %v997_v21, %v979_v51  ;;  %v1000_v18 = vadd.f32 %v998_v33, %v980_v43  ;;  %1407 = vrot.lane.b32.xlu2 %v3211_v29, %s2526_s9  ;;  %v1103_v43 = vmax.f32 %v1101_v32, 0.0  ;;  %v3355_v21 = vsel %vm2768_vm12, %v3215_v58, %v1436_v50 }
 0x1ee   : > { %v3360_v10 = vsel %vm2752_vm11, %v3213_v35, %v1437_v13  ;;  %v1121_v32 = vsub.f32 1.0, %v1119_v56  ;;  %v1160_v35 = vsub.f32 1.0, %v1158_v9  ;;  %v2394_v50 = vadd.f32 -1.0, %v3295_v42 }
 0x1ef   : > { %v1092_v13 = vperm.slane %v1084_v45, 3 }
 0x1f0   : > { %v3329_v51 = vpop.permute.xlu2 %1127  ;;  %v1088_v20 = vpop.permute.xlu0 %1087 }
 0x1f1   : > { %v1012_v54 = vpop.permute.xlu1 %1011  ;;  %v3339_v36 = vsel %vm360_vm0, %v3283_v14, %v1088_v20  ;;  %v3344_v11 = vsel %vm360_vm0, %v1088_v20, %v3283_v14  ;;  %v1104_v14 = vmax.f32 %v1102_v63, 0.0  ;;  %v2393_v63 = vadd.f32 -1.0, %v3281_v17 }
 0x1f2   : > { %v1013_v28 = vsel %vm495_vm5, %v3261_v19, %v1012_v54  ;;  %v1014_v23 = vsel %vm495_vm5, %v1012_v54, %v3261_v19  ;;  %v1139_v19 = vand.u32 2147483647, %v2391_v6  ;;  %v1091_v20 = vperm.slane %v1083_v1, 3 }
 0x1f3   : > { %v1017_v33 = vmul.f32 %v1015_v47, %v1013_v28  ;;  %v1018_v22 = vmul.f32 %v1016_v48, %v1014_v23  ;;  %v1122_v47 = vsub.f32 1.0, %v1120_v8  ;;  %v1159_v48 = vsub.f32 1.0, %v1157_v24 }
 0x1f4   : > { %1387 = vrot.lane.b32.xlu0 %v3211_v29, %s2525_s8  ;;  %1810 = vrot.lane.b32.xlu1 %v3355_v21, %s2528_s11  ;;  %v1111_v54 = vperm.slane %v1103_v43, 3  ;;  %v1112_v6 = vperm.slane %v1104_v14, 3  ;;  %v1142_v28 = vsub.f32 1.0, %v1140_v49  ;;  %v2395_v23 = vadd.f32 -2.0, %v3281_v17 }
 0x1f5   : > { %v3366_v25 = vadd.f32 %v1017_v33, %v999_v52  ;;  %v3368_v58 = vadd.f32 %v1018_v22, %v1000_v18  ;;  %1461 = vrot.lane.b32.xlu2 %v3360_v10, %s2520_s27  ;;  %v1141_v52 = vsub.f32 1.0, %v1139_v19  ;;  %v2396_v33 = vadd.f32 -2.0, %v3295_v42 }
 0x1f6   : > { %v1123_v8 = vmax.f32 %v1121_v32, 0.0  ;;  %v1124_v1 = vmax.f32 %v1122_v47, 0.0  ;;  %v1171_v22 = vand.u32 2147483647, %v2393_v63  ;;  %v1172_v14 = vand.u32 2147483647, %v2394_v50 }
 0x1f7   : > { %4095 = vst [vmem:[#allocation21_spill] sm:$0xff] %v3366_v25  ;;  %v1093_v19 = vmul.f32 %v1091_v20, %v3344_v11  ;;  %v1094_v49 = vmul.f32 %v1092_v13, %v3339_v36  ;;  %v1161_v32 = vmax.f32 %v1159_v48, 0.0  ;;  %v1162_v47 = vmax.f32 %v1160_v35, 0.0 }
 0x1f8   : > { %4096 = vst [vmem:[#allocation22_spill] sm:$0xff] %v3368_v58  ;;  %v1146_v3 = vpop.permute.xlu2 %1145  ;;  %v1148_v18 = vpop.permute.xlu0 %1147  ;;  %v1143_v63 = vmax.f32 %v1141_v52, 0.0  ;;  %v1144_v50 = vmax.f32 %v1142_v28, 0.0  ;;  %v1173_v20 = vsub.f32 1.0, %v1171_v22  ;;  %v1174_v13 = vsub.f32 1.0, %v1172_v14 }
 0x1f9   : > { %v1106_v56 = vpop.permute.xlu1 %1105  ;;  %v1149_v24 = vsel %vm432_vm3, %v1146_v3, %v1148_v18  ;;  %v1150_v9 = vsel %vm432_vm3, %v1148_v18, %v1146_v3  ;;  %v1191_v3 = vand.u32 2147483647, %v2395_v23  ;;  %v1192_v18 = vand.u32 2147483647, %v2396_v33 }
 0x1fa   : > { %v1109_v45 = vsel %vm384_vm1, %v1106_v56, %v3307_v27  ;;  %v1110_v43 = vsel %vm384_vm1, %v3307_v27, %v1106_v56  ;;  %v2397_v56 = vadd.f32 -3.0, %v3281_v17  ;;  %v2399_v48 = vadd.f32 -4.0, %v3281_v17 }
 0x1fb   : > { %v1113_v58 = vmul.f32 %v1111_v54, %v1110_v43  ;;  %v1114_v25 = vmul.f32 %v1112_v6, %v1109_v45  ;;  %v1131_v54 = vperm.slane %v1123_v8, 3  ;;  %v1132_v6 = vperm.slane %v1124_v1, 3 }
 0x1fc   : > { %1808 = vrot.lane.b32.xlu0 %v3360_v10, %s2528_s11  ;;  %1481 = vrot.lane.b32.xlu1 %v3360_v10, %s2521_s28  ;;  %v2398_v45 = vadd.f32 -3.0, %v3295_v42  ;;  %v2400_v35 = vadd.f32 -4.0, %v3295_v42  ;;  %v1151_v52 = vperm.slane %v1143_v63, 3  ;;  %v1152_v28 = vperm.slane %v1144_v50, 3 }
 0x1fd   : > { %v1115_v44 = vadd.f32 %v1113_v58, %v1093_v19  ;;  %v1116_v27 = vadd.f32 %v1114_v25, %v1094_v49  ;;  %1483 = vrot.lane.b32.xlu2 %v3355_v21, %s2521_s28  ;;  %v1193_v58 = vsub.f32 1.0, %v1191_v3  ;;  %v1194_v25 = vsub.f32 1.0, %v1192_v18 }
 0x1fe   : > { %v1163_v43 = vperm.slane %v1161_v32, 3  ;;  %v1164_v19 = vperm.slane %v1162_v47, 3  ;;  %v1175_v22 = vmax.f32 %v1173_v20, 0.0  ;;  %v1176_v17 = vmax.f32 %v1174_v13, 0.0 }
 0x1ff   : > { %v1211_v49 = vand.u32 2147483647, %v2397_v56  ;;  %v1212_v3 = vand.u32 2147483647, %v2398_v45  ;;  %v1231_v18 = vand.u32 2147483647, %v2399_v48  ;;  %v1153_v50 = vmul.f32 %v1151_v52, %v1150_v9 }
 0x200   : > { %v1178_v23 = vpop.permute.xlu0 %1177  ;;  %v1232_v63 = vand.u32 2147483647, %v2400_v35  ;;  %v1195_v32 = vmax.f32 %v1193_v58, 0.0  ;;  %v1196_v47 = vmax.f32 %v1194_v25, 0.0  ;;  %v1154_v57 = vmul.f32 %v1152_v28, %v1149_v24  ;;  %v1198_v25 = vpop.permute.xlu2 %1197 }
 0x201   : > { %v1126_v33 = vpop.permute.xlu1 %1125  ;;  %v1165_v20 = vmul.f32 %v1163_v43, %v3036_v53  ;;  %v1166_v13 = vmul.f32 %v1164_v19, %v2986_v40  ;;  %v1213_v48 = vsub.f32 1.0, %v1211_v49  ;;  %v1214_v35 = vsub.f32 1.0, %v1212_v3 }
 0x202   : > { %v1129_v8 = vsel %vm408_vm2, %v1126_v33, %v3329_v51  ;;  %v1130_v1 = vsel %vm408_vm2, %v3329_v51, %v1126_v33  ;;  %v1233_v33 = vsub.f32 1.0, %v1231_v18  ;;  %v1234_v58 = vsub.f32 1.0, %v1232_v63 }
 0x203   : > { %v1133_v14 = vmul.f32 %v1131_v54, %v1130_v1  ;;  %v1134_v42 = vmul.f32 %v1132_v6, %v1129_v8  ;;  %v1183_v54 = vperm.slane %v1175_v22, 3  ;;  %v1184_v6 = vperm.slane %v1176_v17, 3 }
 0x204   : > { %1463 = vrot.lane.b32.xlu0 %v3355_v21, %s2520_s27  ;;  %1503 = vrot.lane.b32.xlu1 %v3355_v21, %s2522_s29  ;;  %v1203_v9 = vperm.slane %v1195_v32, 3  ;;  %v1204_v24 = vperm.slane %v1196_v47, 3  ;;  %v1215_v8 = vmax.f32 %v1213_v48, 0.0  ;;  %v1216_v1 = vmax.f32 %v1214_v35, 0.0 }
 0x205   : > { %v1135_v39 = vadd.f32 %v1133_v14, %v1115_v44  ;;  %v1136_v51 = vadd.f32 %v1134_v42, %v1116_v27  ;;  %1523 = vrot.lane.b32.xlu2 %v3355_v21, %s2523_s30  ;;  %v1235_v22 = vmax.f32 %v1233_v33, 0.0  ;;  %v1236_v17 = vmax.f32 %v1234_v58, 0.0 }
 0x206   : > { %v1223_v63 = vperm.slane %v1215_v8, 3  ;;  %v1224_v32 = vperm.slane %v1216_v1, 3 }
 0x207   : > { %v1155_v56 = vadd.f32 %v1153_v50, %v1135_v39  ;;  %v1156_v45 = vadd.f32 %v1154_v57, %v1136_v51  ;;  %v1237_v50 = vperm.slane %v1235_v22, 3  ;;  %v1238_v51 = vperm.slane %v1236_v17, 3 }
 0x208   : > { %v1200_v44 = vpop.permute.xlu0 %1199 }
 0x209   : > { %v1180_v27 = vpop.permute.xlu1 %1179  ;;  %v1167_v52 = vadd.f32 %v1165_v20, %v1155_v56  ;;  %v1168_v28 = vadd.f32 %v1166_v13, %v1156_v45  ;;  %v1201_v53 = vsel %vm495_vm5, %v1198_v25, %v1200_v44  ;;  %v1202_v40 = vsel %vm495_vm5, %v1200_v44, %v1198_v25  ;;  %v1628_v44 = vld.sshfl [vmem:[#allocation1 + $0x8] sm:$0xff pattern:$0x75316420] }
 0x20a   : > { %v1181_v39 = vsel %vm471_vm4, %v1178_v23, %v1180_v27  ;;  %v1182_v57 = vsel %vm471_vm4, %v1180_v27, %v1178_v23  ;;  %v1205_v49 = vmul.f32 %v1203_v9, %v1201_v53  ;;  %v1206_v3 = vmul.f32 %v1204_v24, %v1202_v40  ;;  %v1627_v24 = vld.sshfl [vmem:[#allocation1] sm:$0xff pattern:$0x75316420]  ;;  %v2509_v27 = vld [vmem:[%s2813_s15 + $0x8] sm:$0xff] }
 0x20b   : > { %v1185_v43 = vmul.f32 %v1183_v54, %v1181_v39  ;;  %v1186_v19 = vmul.f32 %v1184_v6, %v1182_v57  ;;  %v1239_v45 = vmul.f32 %v1237_v50, %v3339_v36  ;;  %v1240_v48 = vmul.f32 %v1238_v51, %v3344_v11  ;;  %1814 = vst [vmem:[#allocation1] ss:$2 sm:$0xff] %v2580_v0  ;;  %v2508_v36 = vld [vmem:[%s2813_s15] sm:$0xff] }
 0x20c   : > { %1501 = vrot.lane.b32.xlu0 %v3360_v10, %s2522_s29  ;;  %1521 = vrot.lane.b32.xlu1 %v3360_v10, %s2523_s30  ;;  %v308_v11 = vrot.slane %v2508_v36, 2  ;;  %v314_v22 = vrot.slane %v2508_v36, 6 }
 0x20d   : > { %v1187_v14 = vadd.f32 %v1185_v43, %v1167_v52  ;;  %v1188_v42 = vadd.f32 %v1186_v19, %v1168_v28  ;;  %1555 = vrot.lane.b32.xlu2 %v3355_v21, %s2524_s7  ;;  %v309_v52 = vrot.slane %v2509_v27, 2 }
 0x20e   : > { %v3448_v28 = vadd.f32 %v308_v11, %v3174_v41 }
 0x20f   : > { %v1207_v23 = vadd.f32 %v1205_v49, %v1187_v14  ;;  %v1208_v18 = vadd.f32 %v1206_v3, %v1188_v42  ;;  %v3451_v53 = vadd.f32 %v309_v52, %v3177_v16  ;;  %v315_v16 = vrot.slane %v2509_v27, 6 }
 0x210   : > { %v1218_v47 = vpop.permute.xlu0 %1217  ;;  %v1257_v40 = vadd.f32 %v3448_v28, %v2632_v30 }
 0x211   : > { %v1220_v20 = vpop.permute.xlu1 %1219  ;;  %v1258_v39 = vadd.f32 %v3451_v53, %v2634_v31 }
 0x212   : > { %v1221_v13 = vsel %vm519_vm6, %v1218_v47, %v1220_v20  ;;  %v1222_v54 = vsel %vm519_vm6, %v1220_v20, %v1218_v47  ;;  %v1259_v57 = vmax.f32 %v1257_v40, 0.0 }
 0x213   : > { %v1225_v6 = vmul.f32 %v1223_v63, %v1221_v13  ;;  %v1226_v56 = vmul.f32 %v1224_v32, %v1222_v54  ;;  %v1260_v43 = vmax.f32 %v1258_v39, 0.0  ;;  %v3470_v63 = vadd.f32 %v314_v22, %v3223_v34 }
 0x214   : > { %1593 = vrot.lane.b32.xlu0 %v3360_v10, %s2526_s9  ;;  %1553 = vrot.lane.b32.xlu1 %v3360_v10, %s2524_s7  ;;  %v1261_v19 = vmin.f32 %v1259_v57, 15.0  ;;  %v3473_v32 = vadd.f32 %v315_v16, %v3232_v55 }
 0x215   : > { %v1227_v35 = vadd.f32 %v1225_v6, %v1207_v23  ;;  %v1228_v33 = vadd.f32 %v1226_v56, %v1208_v18  ;;  %1575 = vrot.lane.b32.xlu2 %v3355_v21, %s2525_s8  ;;  %v1262_v8 = vmin.f32 %v1260_v43, 15.0  ;;  %v1445_v60 = vadd.f32 %v3470_v63, %v2632_v30 }
 0x216   : > { %v3458_v1 = vsub.f32 %v1261_v19, %v2632_v30  ;;  %v1446_v56 = vadd.f32 %v3473_v32, %v2634_v31 }
 0x217   : > { %v1241_v58 = vadd.f32 %v1239_v45, %v1227_v35  ;;  %v1242_v25 = vadd.f32 %v1240_v48, %v1228_v33  ;;  %v3461_v41 = vsub.f32 %v1262_v8, %v2634_v31  ;;  %v1447_v52 = vmax.f32 %v1445_v60, 0.0 }
 0x218   : > { %v2401_v14 = vadd.f32 4.0, %v3458_v1  ;;  %v2403_v49 = vadd.f32 3.0, %v3458_v1  ;;  %v2405_v55 = vadd.f32 2.0, %v3458_v1  ;;  %v1448_v40 = vmax.f32 %v1446_v56, 0.0 }
 0x219   : > { %v3438_v9 = vpack.c.bf16 %v1242_v25, %v1241_v58  ;;  %v2402_v42 = vadd.f32 4.0, %v3461_v41  ;;  %v2404_v3 = vadd.f32 3.0, %v3461_v41  ;;  %v2406_v59 = vadd.f32 2.0, %v3461_v41 }
 0x21a   : > { %v1267_v51 = vand.u32 2147483647, %v2401_v14  ;;  %v1287_v34 = vand.u32 2147483647, %v2403_v49  ;;  %v1345_v25 = vand.u32 2147483647, %v3458_v1 }
 0x21b   : > { %v1268_v20 = vand.u32 2147483647, %v2402_v42  ;;  %v1288_v6 = vand.u32 2147483647, %v2404_v3  ;;  %v1307_v11 = vand.u32 2147483647, %v2405_v55 }
 0x21c   : > { %1573 = vrot.lane.b32.xlu1 %v3360_v10, %s2525_s8  ;;  %v1269_v45 = vsub.f32 1.0, %v1267_v51  ;;  %v1289_v35 = vsub.f32 1.0, %v1287_v34  ;;  %v1308_v27 = vand.u32 2147483647, %v2406_v59  ;;  %v1347_v22 = vsub.f32 1.0, %v1345_v25 }
 0x21d   : > { %v1270_v48 = vsub.f32 1.0, %v1268_v20  ;;  %v1290_v33 = vsub.f32 1.0, %v1288_v6  ;;  %v1309_v14 = vsub.f32 1.0, %v1307_v11  ;;  %v1449_v49 = vmin.f32 %v1447_v52, 15.0 }
 0x21e   : > { %v1271_v57 = vmax.f32 %v1269_v45, 0.0  ;;  %v1291_v19 = vmax.f32 %v1289_v35, 0.0  ;;  %v1310_v42 = vsub.f32 1.0, %v1308_v27  ;;  %v1450_v3 = vmin.f32 %v1448_v40, 15.0 }
 0x21f   : > { %v1272_v43 = vmax.f32 %v1270_v48, 0.0  ;;  %v1292_v8 = vmax.f32 %v1290_v33, 0.0  ;;  %v2409_v34 = vadd.f32 -1.0, %v3458_v1  ;;  %v2410_v6 = vadd.f32 -1.0, %v3461_v41 }
 0x220   : > { %v1299_v51 = vperm.slane %v1291_v19, 5  ;;  %v1349_v55 = vmax.f32 %v1347_v22, 0.0  ;;  %v1311_v45 = vmax.f32 %v1309_v14, 0.0  ;;  %v1312_v48 = vmax.f32 %v1310_v42, 0.0 }
 0x221   : > { %v1300_v20 = vperm.slane %v1292_v8, 5  ;;  %v3526_v35 = vsub.f32 %v1449_v49, %v2632_v30  ;;  %v3529_v33 = vsub.f32 %v1450_v3, %v2634_v31  ;;  %v2415_v19 = vadd.f32 -4.0, %v3458_v1 }
 0x222   : > { %v1359_v8 = vand.u32 2147483647, %v2409_v34  ;;  %v1360_v22 = vand.u32 2147483647, %v2410_v6  ;;  %v2411_v14 = vadd.f32 -2.0, %v3458_v1  ;;  %v2412_v42 = vadd.f32 -2.0, %v3461_v41 }
 0x223   : > { %v1351_v49 = vperm.slane %v1349_v55, 5  ;;  %v2416_v34 = vadd.f32 -4.0, %v3461_v41  ;;  %v1419_v6 = vand.u32 2147483647, %v2415_v19 }
 0x224   : > { %1595 = vrot.lane.b32.xlu1 %v3355_v21, %s2526_s9 }
 0x227   : > { %v1621_v0 = vpop.permute.xlu2 %1620 }
 0x22f   : > { %v3463_v17 = vpop.permute.xlu2 %1293 }
 0x237   : > { %v3499_v58 = vpop.permute.xlu2 %1367 }
 0x23e   : > { %v1276_v23 = vpop.permute.xlu1 %1275  ;;  %v1623_v18 = vpop.permute.xlu0 %1622 }
 0x23f   : > { %v1624_v47 = vsel %vm559_vm7, %v1621_v0, %v1623_v18  ;;  %v1625_v50 = vsel %vm559_vm7, %v1623_v18, %v1621_v0  ;;  %v2408_v18 = vadd.f32 1.0, %v3461_v41  ;;  %v3531_v25 = vpop.permute.xlu2 %1385 }
 0x240   : > { %v3481_v13 = vsel %vm2705_vm8, %v1627_v24, %v1624_v47  ;;  %v3485_v54 = vsel %vm2709_vm9, %v1628_v44, %v1625_v50  ;;  %v1346_v24 = vand.u32 2147483647, %v3461_v41  ;;  %v1279_v47 = vperm.slane %v1271_v57, 5 }
 0x241   : > { %1651 = vrot.lane.b32.xlu0 %v3485_v54, %s2520_s27  ;;  %1669 = vrot.lane.b32.xlu1 %v3481_v13, %s2521_s28  ;;  %v1280_v50 = vperm.slane %v1272_v43, 5  ;;  %v1328_v27 = vand.u32 2147483647, %v2408_v18  ;;  %v1534_v18 = vand.u32 2147483647, %v3529_v33 }
 0x242   : > { %1649 = vrot.lane.b32.xlu2 %v3481_v13, %s2520_s27  ;;  %v1348_v16 = vsub.f32 1.0, %v1346_v24 }
 0x244   : > { %v1350_v59 = vmax.f32 %v1348_v16, 0.0 }
 0x246   : > { %v3503_v44 = vpop.permute.xlu1 %1315  ;;  %v1274_v36 = vpop.permute.xlu0 %1273  ;;  %v1352_v3 = vperm.slane %v1350_v59, 5  ;;  %v1379_v59 = vand.u32 2147483647, %v2411_v14 }
 0x247   : > { %v3507_v39 = vsel %vm360_vm0, %v1274_v36, %v1276_v23  ;;  %v3511_v0 = vsel %vm360_vm0, %v1276_v23, %v1274_v36  ;;  %v2407_v23 = vadd.f32 1.0, %v3458_v1 }
 0x248   : > { %v1281_v52 = vmul.f32 %v1279_v47, %v3511_v0  ;;  %v1282_v40 = vmul.f32 %v1280_v50, %v3507_v39  ;;  %v1319_v47 = vperm.slane %v1311_v45, 5  ;;  %v1320_v50 = vperm.slane %v1312_v48, 5 }
 0x249   : > { %1691 = vrot.lane.b32.xlu0 %v3485_v54, %s2522_s29  ;;  %1709 = vrot.lane.b32.xlu1 %v3481_v13, %s2523_s30  ;;  %v1327_v11 = vand.u32 2147483647, %v2407_v23  ;;  %v1533_v23 = vand.u32 2147483647, %v3526_v35 }
 0x24a   : > { %1671 = vrot.lane.b32.xlu2 %v3485_v54, %s2521_s28 }
 0x24e   : > { %v3523_v60 = vpop.permute.xlu1 %1335  ;;  %v1296_v56 = vpop.permute.xlu0 %1295 }
 0x24f   : > { %v1297_v24 = vsel %vm384_vm1, %v3463_v17, %v1296_v56  ;;  %v1298_v36 = vsel %vm384_vm1, %v1296_v56, %v3463_v17  ;;  %v2413_v56 = vadd.f32 -3.0, %v3458_v1 }
 0x250   : > { %v1301_v57 = vmul.f32 %v1299_v51, %v1298_v36  ;;  %v1302_v43 = vmul.f32 %v1300_v20, %v1297_v24  ;;  %v1329_v51 = vsub.f32 1.0, %v1327_v11  ;;  %v1330_v20 = vsub.f32 1.0, %v1328_v27 }
 0x251   : > { %1761 = vrot.lane.b32.xlu0 %v3481_v13, %s2525_s8  ;;  %1741 = vrot.lane.b32.xlu1 %v3481_v13, %s2524_s7  ;;  %v2414_v24 = vadd.f32 -3.0, %v3461_v41  ;;  %v1361_v36 = vsub.f32 1.0, %v1359_v8  ;;  %v1408_v8 = vpop.permute.xlu2 %1407 }
 0x252   : > { %v1303_v16 = vadd.f32 %v1301_v57, %v1281_v52  ;;  %v1304_v17 = vadd.f32 %v1302_v43, %v1282_v40  ;;  %1689 = vrot.lane.b32.xlu2 %v3481_v13, %s2522_s29  ;;  %v1362_v52 = vsub.f32 1.0, %v1360_v22  ;;  %v1380_v57 = vand.u32 2147483647, %v2412_v42 }
 0x253   : > { %v1331_v43 = vmax.f32 %v1329_v51, 0.0  ;;  %v1332_v19 = vmax.f32 %v1330_v20, 0.0  ;;  %v1420_v22 = vand.u32 2147483647, %v2416_v34  ;;  %v1400_v14 = vand.u32 2147483647, %v2414_v24 }
 0x254   : > { %v1354_v51 = vmul.f32 %v1352_v3, %v3211_v29  ;;  %v3575_v20 = vsub.f32 1.0, %v1533_v23  ;;  %v3577_v34 = vsub.f32 1.0, %v1534_v18  ;;  %v1421_v24 = vsub.f32 1.0, %v1419_v6 }
 0x255   : > { %v2420_v29 = vadd.f32 3.0, %v3529_v33 }
 0x256   : > { %v1366_v40 = vpop.permute.xlu1 %1365  ;;  %v1314_v55 = vpop.permute.xlu0 %1313 }
 0x257   : > { %v1369_v45 = vsel %vm471_vm4, %v1366_v40, %v3499_v58  ;;  %v1370_v48 = vsel %vm471_vm4, %v3499_v58, %v1366_v40  ;;  %v1317_v1 = vsel %vm408_vm2, %v1314_v55, %v3503_v44  ;;  %v1318_v41 = vsel %vm408_vm2, %v3503_v44, %v1314_v55 }
 0x258   : > { %v1321_v11 = vmul.f32 %v1319_v47, %v1318_v41  ;;  %v1322_v27 = vmul.f32 %v1320_v50, %v1317_v1  ;;  %v1399_v58 = vand.u32 2147483647, %v2413_v56  ;;  %v1381_v44 = vsub.f32 1.0, %v1379_v59 }
 0x259   : > { %1783 = vrot.lane.b32.xlu0 %v3485_v54, %s2526_s9  ;;  %1763 = vrot.lane.b32.xlu1 %v3485_v54, %s2525_s8  ;;  %v1382_v47 = vsub.f32 1.0, %v1380_v57  ;;  %v1353_v50 = vmul.f32 %v1351_v49, %v3207_v15  ;;  %v1363_v55 = vmax.f32 %v1361_v36, 0.0  ;;  %v1364_v1 = vmax.f32 %v1362_v52, 0.0  ;;  %v3593_v62 = vpop.permute.xlu2 %1461 }
 0x25a   : > { %v1323_v42 = vadd.f32 %v1321_v11, %v1303_v16  ;;  %v1324_v40 = vadd.f32 %v1322_v27, %v1304_v17  ;;  %1711 = vrot.lane.b32.xlu2 %v3485_v54, %s2523_s30  ;;  %v1339_v41 = vperm.slane %v1331_v43, 5  ;;  %v1340_v56 = vperm.slane %v1332_v19, 5 }
 0x25b   : > { %v1422_v16 = vsub.f32 1.0, %v1420_v22  ;;  %v1401_v17 = vsub.f32 1.0, %v1399_v58  ;;  %v1402_v11 = vsub.f32 1.0, %v1400_v14  ;;  %v1383_v59 = vmax.f32 %v1381_v44, 0.0 }
 0x25c   : > { %v1384_v57 = vmax.f32 %v1382_v47, 0.0  ;;  %v2419_v15 = vadd.f32 3.0, %v3526_v35  ;;  %v1371_v6 = vperm.slane %v1363_v55, 5  ;;  %v1372_v36 = vperm.slane %v1364_v1, 5 }
 0x25d   : > { %v1423_v19 = vmax.f32 %v1421_v24, 0.0  ;;  %v1424_v22 = vmax.f32 %v1422_v16, 0.0  ;;  %v1403_v58 = vmax.f32 %v1401_v17, 0.0  ;;  %v1404_v14 = vmax.f32 %v1402_v11, 0.0 }
 0x25e   : > { %v1406_v27 = vpop.permute.xlu1 %1405  ;;  %v1334_v61 = vpop.permute.xlu0 %1333  ;;  %v1475_v38 = vand.u32 2147483647, %v2419_v15  ;;  %v1476_v12 = vand.u32 2147483647, %v2420_v29  ;;  %v1373_v55 = vmul.f32 %v1371_v6, %v1369_v45  ;;  %v1374_v1 = vmul.f32 %v1372_v36, %v1370_v48 }
 0x25f   : > { %v1409_v49 = vsel %vm519_vm6, %v1406_v27, %v1408_v8  ;;  %v1410_v3 = vsel %vm519_vm6, %v1408_v8, %v1406_v27  ;;  %v1337_v23 = vsel %vm432_vm3, %v1334_v61, %v3523_v60  ;;  %v1338_v18 = vsel %vm432_vm3, %v3523_v60, %v1334_v61 }
 0x260   : > { %v1341_v52 = vmul.f32 %v1339_v41, %v1338_v18  ;;  %v1342_v43 = vmul.f32 %v1340_v56, %v1337_v23  ;;  %v1391_v8 = vperm.slane %v1383_v59, 5  ;;  %v1392_v27 = vperm.slane %v1384_v57, 5 }
 0x261   : > { %v2417_v61 = vadd.f32 4.0, %v3526_v35  ;;  %v2418_v60 = vadd.f32 4.0, %v3529_v33  ;;  %v1425_v24 = vperm.slane %v1423_v19, 5  ;;  %v1538_v16 = vmax.f32 %v3577_v34, 0.0 }
 0x262   : > { %v1343_v44 = vadd.f32 %v1341_v52, %v1323_v42  ;;  %v1344_v47 = vadd.f32 %v1342_v43, %v1324_v40  ;;  %1743 = vrot.lane.b32.xlu2 %v3485_v54, %s2524_s7  ;;  %v1426_v42 = vperm.slane %v1424_v22, 5  ;;  %v1537_v40 = vmax.f32 %v3575_v20, 0.0 }
 0x263   : > { %v1411_v17 = vperm.slane %v1403_v58, 5  ;;  %v1412_v11 = vperm.slane %v1404_v14, 5  ;;  %v1477_v48 = vsub.f32 1.0, %v1475_v38  ;;  %v1455_v6 = vand.u32 2147483647, %v2417_v61 }
 0x264   : > { %v1355_v41 = vadd.f32 %v1353_v50, %v1343_v44  ;;  %v1356_v56 = vadd.f32 %v1354_v51, %v1344_v47  ;;  %v1478_v50 = vsub.f32 1.0, %v1476_v12  ;;  %v1456_v36 = vand.u32 2147483647, %v2418_v60 }
 0x265   : > { %v2423_v52 = vadd.f32 1.0, %v3526_v35  ;;  %v2424_v43 = vadd.f32 1.0, %v3529_v33  ;;  %v2421_v19 = vadd.f32 2.0, %v3526_v35  ;;  %v2422_v22 = vadd.f32 2.0, %v3529_v33 }
 0x266   : > { %v1811_v59 = vpop.permute.xlu1 %1810  ;;  %v1375_v57 = vadd.f32 %v1373_v55, %v1355_v41  ;;  %v1376_v15 = vadd.f32 %v1374_v1, %v1356_v56  ;;  %v1388_v29 = vpop.permute.xlu0 %1387  ;;  %v1413_v58 = vmul.f32 %v1411_v17, %v1409_v49  ;;  %v1414_v14 = vmul.f32 %v1412_v11, %v1410_v3  ;;  %v1816_v55 = vld.sshfl [vmem:[#allocation1 + $0x8] sm:$0xff pattern:$0x75316420] }
 0x267   : > { %v1389_v23 = vsel %vm495_vm5, %v3531_v25, %v1388_v29  ;;  %v1390_v45 = vsel %vm495_vm5, %v1388_v29, %v3531_v25  ;;  %v1427_v38 = vmul.f32 %v1425_v24, %v3507_v39  ;;  %v1428_v12 = vmul.f32 %v1426_v42, %v3511_v0  ;;  %v1815_v25 = vld.sshfl [vmem:[#allocation1] sm:$0xff pattern:$0x75316420]  ;;  %v1484_v3 = vpop.permute.xlu2 %1483 }
 0x268   : > { %v1393_v51 = vmul.f32 %v1391_v8, %v1389_v23  ;;  %v1394_v18 = vmul.f32 %v1392_v27, %v1390_v45  ;;  %v2021_v8 = vunpack.c.l.b16 %v3438_v9  ;;  %v2022_v27 = vunpack.c.h.b16 %v3438_v9 }
 0x269   : > { %v1457_v1 = vsub.f32 1.0, %v1455_v6  ;;  %v1458_v49 = vsub.f32 1.0, %v1456_v36  ;;  %v1479_v41 = vmax.f32 %v1477_v48, 0.0  ;;  %v1480_v56 = vmax.f32 %v1478_v50, 0.0 }
 0x26a   : > { %v1395_v44 = vadd.f32 %v1393_v51, %v1375_v57  ;;  %v1396_v47 = vadd.f32 %v1394_v18, %v1376_v15  ;;  %1781 = vrot.lane.b32.xlu2 %v3481_v13, %s2526_s9  ;;  %v1515_v17 = vand.u32 2147483647, %v2423_v52  ;;  %v1516_v11 = vand.u32 2147483647, %v2424_v43 }
 0x26b   : > { %v1495_v0 = vand.u32 2147483647, %v2421_v19  ;;  %v1496_v42 = vand.u32 2147483647, %v2422_v22  ;;  %v1459_v51 = vmax.f32 %v1457_v1, 0.0  ;;  %v1460_v18 = vmax.f32 %v1458_v49, 0.0 }
 0x26c   : > { %v1415_v61 = vadd.f32 %v1413_v58, %v1395_v44  ;;  %v1416_v60 = vadd.f32 %v1414_v14, %v1396_v47  ;;  %v2425_v36 = vadd.f32 -1.0, %v3526_v35  ;;  %v2023_v52 = vpack.c.b16 %v2021_v8, %v2021_v8 }
 0x26d   : > { %v1517_v2 = vsub.f32 1.0, %v1515_v17  ;;  %v1518_v43 = vsub.f32 1.0, %v1516_v11  ;;  %v1497_v19 = vsub.f32 1.0, %v1495_v0  ;;  %v1487_v22 = vperm.slane %v1479_v41, 3 }
 0x26e   : > { %v1429_v57 = vadd.f32 %v1427_v38, %v1415_v61  ;;  %v1430_v15 = vadd.f32 %v1428_v12, %v1416_v60  ;;  %v1482_v39 = vpop.permute.xlu1 %1481  ;;  %v1809_v24 = vpop.permute.xlu0 %1808  ;;  %v1498_v58 = vsub.f32 1.0, %v1496_v42  ;;  %v2024_v14 = vpack.c.b16 %v2022_v27, %v2022_v27 }
 0x26f   : > { %v1485_v29 = vsel %vm384_vm1, %v1482_v39, %v1484_v3  ;;  %v1486_v9 = vsel %vm384_vm1, %v1484_v3, %v1482_v39  ;;  %v1812_v23 = vsel %vm757_vm10, %v1809_v24, %v1811_v59  ;;  %v1813_v45 = vsel %vm757_vm10, %v1811_v59, %v1809_v24 }
 0x270   : > { %v1431_v48 = vpack.c.bf16 %v1430_v15, %v1429_v57  ;;  %v3625_v50 = vsel %vm2752_vm11, %v1815_v25, %v1813_v45  ;;  %v3629_v6 = vsel %vm2768_vm12, %v1816_v55, %v1812_v23  ;;  %v2426_v59 = vadd.f32 -1.0, %v3529_v33 }
 0x271   : > { %1857 = vrot.lane.b32.xlu0 %v3625_v50, %s2521_s28  ;;  %1837 = vrot.lane.b32.xlu1 %v3625_v50, %s2520_s27  ;;  %v1488_v47 = vperm.slane %v1480_v56, 3  ;;  %v1467_v38 = vperm.slane %v1459_v51, 3  ;;  %v1468_v12 = vperm.slane %v1460_v18, 3  ;;  %v1547_v61 = vand.u32 2147483647, %v2425_v36 }
 0x272   : > { %1839 = vrot.lane.b32.xlu2 %v3629_v6, %s2520_s27  ;;  %v2026_v5 = vunpack.c.l.b16 %v1431_v48  ;;  %v2027_v44 = vunpack.c.h.b16 %v1431_v48  ;;  %v1548_v60 = vand.u32 2147483647, %v2426_v59  ;;  %v1519_v49 = vmax.f32 %v1517_v2, 0.0 }
 0x273   : > { %v1520_v3 = vmax.f32 %v1518_v43, 0.0  ;;  %v1499_v17 = vmax.f32 %v1497_v19, 0.0  ;;  %v1500_v56 = vmax.f32 %v1498_v58, 0.0  ;;  %v1489_v15 = vmul.f32 %v1487_v22, %v1486_v9  ;;  %v1524_v9 = vpop.permute.xlu2 %1523 }
 0x274   : > { %v2028_v25 = vpack.c.b16 %v2026_v5, %v2026_v5  ;;  %v2029_v55 = vpack.c.b16 %v2027_v44, %v2027_v44  ;;  %v1490_v39 = vmul.f32 %v1488_v47, %v1485_v29  ;;  %v1549_v42 = vsub.f32 1.0, %v1547_v61 }
 0x275   : > { %v1550_v23 = vsub.f32 1.0, %v1548_v60  ;;  %v2427_v51 = vadd.f32 -2.0, %v3526_v35  ;;  %v2428_v18 = vadd.f32 -2.0, %v3529_v33  ;;  %v1507_v36 = vperm.slane %v1499_v17, 3 }
 0x276   : > { %v1504_v8 = vpop.permute.xlu1 %1503  ;;  %v1464_v1 = vpop.permute.xlu0 %1463  ;;  %v2030_v11 = vrot.slane %v2028_v25, 6  ;;  %v2031_v57 = vrot.slane %v2029_v55, 6  ;;  %v1508_v59 = vperm.slane %v1500_v56, 3  ;;  %v1527_v2 = vperm.slane %v1519_v49, 3 }
 0x277   : > { %v3642_v41 = vsel %vm360_vm0, %v3593_v62, %v1464_v1  ;;  %v3647_v27 = vsel %vm360_vm0, %v1464_v1, %v3593_v62  ;;  %v1528_v43 = vperm.slane %v1520_v3, 3  ;;  %v1540_v19 = vperm.slane %v1538_v16, 3 }
 0x278   : > { %v1469_v24 = vmul.f32 %v1467_v38, %v3647_v27  ;;  %v1470_v0 = vmul.f32 %v1468_v12, %v3642_v41  ;;  %v3656_v45 = vsel %vm2049_vm13, %v2023_v52, %v2030_v11  ;;  %v3659_v62 = vsel %vm2049_vm13, %v2024_v14, %v2031_v57 }
 0x279   : > { %1877 = vrot.lane.b32.xlu0 %v3625_v50, %s2522_s29  ;;  %1859 = vrot.lane.b32.xlu1 %v3629_v6, %s2521_s28  ;;  %v1539_v52 = vperm.slane %v1537_v40, 3  ;;  %v1551_v58 = vmax.f32 %v1549_v42, 0.0  ;;  %v1552_v14 = vmax.f32 %v1550_v23, 0.0  ;;  %v1567_v44 = vand.u32 2147483647, %v2427_v51 }
 0x27a   : > { %v1491_v29 = vadd.f32 %v1489_v15, %v1469_v24  ;;  %v1492_v48 = vadd.f32 %v1490_v39, %v1470_v0  ;;  %1899 = vrot.lane.b32.xlu2 %v3629_v6, %s2523_s30  ;;  %v1568_v47 = vand.u32 2147483647, %v2428_v18  ;;  %v1542_v61 = vmul.f32 %v1540_v19, %v3355_v21  ;;  %v277_v19 = vld [vmem:[%s2813_s15 + $0x18] sm:$0xff] }
 0x27b   : > { %v1541_v16 = vmul.f32 %v1539_v52, %v3360_v10  ;;  %v1560_v3 = vperm.slane %v1552_v14, 3  ;;  %v1569_v17 = vsub.f32 1.0, %v1567_v44  ;;  %v1556_v56 = vpop.permute.xlu2 %1555  ;;  %v2429_v39 = vadd.f32 -3.0, %v3526_v35  ;;  %v276_v52 = vld [vmem:[%s2813_s15 + $0x10] sm:$0xff] }
 0x27c   : > { %v1570_v11 = vsub.f32 1.0, %v1568_v47  ;;  %v2430_v10 = vadd.f32 -3.0, %v3529_v33  ;;  %v2431_v21 = vadd.f32 -4.0, %v3526_v35  ;;  %v2432_v24 = vadd.f32 -4.0, %v3529_v33 }
 0x27d   : > { %v322_v44 = vrot.slane %v276_v52, 3  ;;  %v323_v47 = vrot.slane %v277_v19, 3 }
 0x27e   : > { %v1522_v5 = vpop.permute.xlu1 %1521  ;;  %v1502_v22 = vpop.permute.xlu0 %1501  ;;  %v1607_v35 = vand.u32 2147483647, %v2431_v21  ;;  %v1608_v33 = vand.u32 2147483647, %v2432_v24 }
 0x27f   : > { %v1525_v38 = vsel %vm432_vm3, %v1522_v5, %v1524_v9  ;;  %v1526_v12 = vsel %vm432_vm3, %v1524_v9, %v1522_v5  ;;  %v1505_v25 = vsel %vm408_vm2, %v1502_v22, %v1504_v8  ;;  %v1506_v20 = vsel %vm408_vm2, %v1504_v8, %v1502_v22 }
 0x280   : > { %v1509_v34 = vmul.f32 %v1507_v36, %v1506_v20  ;;  %v1510_v40 = vmul.f32 %v1508_v59, %v1505_v25  ;;  %v1529_v60 = vmul.f32 %v1527_v2, %v1526_v12  ;;  %v1530_v55 = vmul.f32 %v1528_v43, %v1525_v38 }
 0x281   : > { %1929 = vrot.lane.b32.xlu0 %v3625_v50, %s2524_s7  ;;  %1879 = vrot.lane.b32.xlu1 %v3629_v6, %s2522_s29  ;;  %v1559_v8 = vperm.slane %v1551_v58, 3  ;;  %v1587_v36 = vand.u32 2147483647, %v2429_v39  ;;  %v1588_v59 = vand.u32 2147483647, %v2430_v10  ;;  %v1609_v12 = vsub.f32 1.0, %v1607_v35 }
 0x282   : > { %v1511_v1 = vadd.f32 %v1509_v34, %v1491_v29  ;;  %v1512_v49 = vadd.f32 %v1510_v40, %v1492_v48  ;;  %849 = vrot.lane.b32.xlu2 %v2760_v4, %s2526_s9  ;;  %v1571_v29 = vmax.f32 %v1569_v17, 0.0  ;;  %v1572_v48 = vmax.f32 %v1570_v11, 0.0 }
 0x283   : > { %v1589_v58 = vsub.f32 1.0, %v1587_v36  ;;  %v1590_v14 = vsub.f32 1.0, %v1588_v59  ;;  %v1576_v38 = vpop.permute.xlu2 %1575  ;;  %v1610_v25 = vsub.f32 1.0, %v1608_v33 }
 0x284   : > { %v1531_v57 = vadd.f32 %v1529_v60, %v1511_v1  ;;  %v1532_v15 = vadd.f32 %v1530_v55, %v1512_v49  ;;  %v1579_v5 = vperm.slane %v1571_v29, 3  ;;  %v1580_v22 = vperm.slane %v1572_v48, 3 }
 0x285   : > { %v1591_v60 = vmax.f32 %v1589_v58, 0.0  ;;  %v1592_v55 = vmax.f32 %v1590_v14, 0.0  ;;  %v326_v1 = vadd.f32 %v322_v44, %v3448_v28  ;;  %v327_v49 = vadd.f32 %v323_v47, %v3451_v53 }
 0x286   : > { %v1554_v0 = vpop.permute.xlu1 %1553  ;;  %v1543_v42 = vadd.f32 %v1541_v16, %v1531_v57  ;;  %v1544_v23 = vadd.f32 %v1542_v61, %v1532_v15 }
 0x287   : > { %v1557_v4 = vsel %vm471_vm4, %v1554_v0, %v1556_v56  ;;  %v1558_v9 = vsel %vm471_vm4, %v1556_v56, %v1554_v0  ;;  %v4097_v56 = vld [vmem:[#allocation3_spill] sm:$0xff]  ;;  %v1599_v57 = vperm.slane %v1591_v60, 3  ;;  %v1600_v15 = vperm.slane %v1592_v55, 3  ;;  %v1594_v0 = vpop.permute.xlu0 %1593  ;;  %v4098_v60 = vld [vmem:[#allocation2_spill] sm:$0xff] }
 0x288   : > { %v1561_v51 = vmul.f32 %v1559_v8, %v1557_v4  ;;  %v1562_v18 = vmul.f32 %v1560_v3, %v1558_v9  ;;  %v1611_v8 = vmax.f32 %v1609_v12, 0.0  ;;  %v1612_v3 = vmax.f32 %v1610_v25, 0.0 }
 0x289   : > { %1949 = vrot.lane.b32.xlu0 %v3625_v50, %s2525_s8  ;;  %1897 = vrot.lane.b32.xlu1 %v3625_v50, %s2523_s30  ;;  %v1633_v39 = vadd.f32 %v326_v1, %v2632_v30  ;;  %v1634_v10 = vadd.f32 %v327_v49, %v2634_v31  ;;  %s2470_s30 = sshll.u32 %s4123_s22, 4 }
 0x28a   : > { %v1563_v2 = vadd.f32 %v1561_v51, %v1543_v42  ;;  %v1564_v43 = vadd.f32 %v1562_v18, %v1544_v23  ;;  %1969 = vrot.lane.b32.xlu2 %v3625_v50, %s2526_s9  ;;  %v1613_v21 = vperm.slane %v1611_v8, 3  ;;  %v1614_v24 = vperm.slane %v1612_v3, 3 }
 0x28b   : > { %v1635_v9 = vmax.f32 %v1633_v39, 0.0  ;;  %v1636_v29 = vmax.f32 %v1634_v10, 0.0 }
 0x28c   : > { %v1615_v48 = vmul.f32 %v1613_v21, %v3642_v41  ;;  %v1616_v51 = vmul.f32 %v1614_v24, %v3647_v27 }
 0x28d   : > { %v1638_v52 = vmin.f32 %v1636_v29, 15.0 }
 0x28e   : > { %v1574_v20 = vpop.permute.xlu1 %1573 }
 0x28f   : > { %v1577_v34 = vsel %vm495_vm5, %v1574_v20, %v1576_v38  ;;  %v1578_v40 = vsel %vm495_vm5, %v1576_v38, %v1574_v20  ;;  %v3733_v41 = vsub.f32 %v1638_v52, %v2634_v31 }
 0x290   : > { %v1581_v16 = vmul.f32 %v1579_v5, %v1577_v34  ;;  %v1582_v61 = vmul.f32 %v1580_v22, %v1578_v40 }
 0x291   : > { %1971 = vrot.lane.b32.xlu0 %v3629_v6, %s2526_s9  ;;  %1931 = vrot.lane.b32.xlu1 %v3629_v6, %s2524_s7  ;;  %v2436_v44 = vadd.f32 3.0, %v3733_v41  ;;  %v2434_v38 = vadd.f32 4.0, %v3733_v41  ;;  %v1722_v20 = vand.u32 2147483647, %v3733_v41 }
 0x292   : > { %v1583_v17 = vadd.f32 %v1581_v16, %v1563_v2  ;;  %v1584_v11 = vadd.f32 %v1582_v61, %v1564_v43  ;;  %541 = vrot.lane.b32.xlu2 %v4097_v56, %s2520_s27  ;;  %v1637_v2 = vmin.f32 %v1635_v9, 15.0  ;;  %v2438_v61 = vadd.f32 2.0, %v3733_v41 }
 0x293   : > { %v1664_v40 = vand.u32 2147483647, %v2436_v44  ;;  %v1724_v8 = vsub.f32 1.0, %v1722_v20 }
 0x294   : > { %v3730_v5 = vsub.f32 %v1637_v2, %v2632_v30 }
 0x296   : > { %v1596_v42 = vpop.permute.xlu1 %1595  ;;  %v2435_v14 = vadd.f32 3.0, %v3730_v5  ;;  %v2433_v47 = vadd.f32 4.0, %v3730_v5  ;;  %v1721_v25 = vand.u32 2147483647, %v3730_v5  ;;  %v2437_v16 = vadd.f32 2.0, %v3730_v5 }
 0x297   : > { %v1597_v28 = vsel %vm519_vm6, %v1594_v0, %v1596_v42  ;;  %v1598_v53 = vsel %vm519_vm6, %v1596_v42, %v1594_v0  ;;  %v2439_v1 = vadd.f32 1.0, %v3730_v5  ;;  %v1726_v0 = vmax.f32 %v1724_v8, 0.0 }
 0x298   : > { %v1601_v23 = vmul.f32 %v1599_v57, %v1597_v28  ;;  %v1602_v4 = vmul.f32 %v1600_v15, %v1598_v53  ;;  %v1663_v34 = vand.u32 2147483647, %v2435_v14  ;;  %v1643_v55 = vand.u32 2147483647, %v2433_v47 }
 0x299   : > { %851 = vrot.lane.b32.xlu0 %v2776_v7, %s2526_s9  ;;  %1951 = vrot.lane.b32.xlu1 %v3629_v6, %s2525_s8  ;;  %v1723_v49 = vsub.f32 1.0, %v1721_v25  ;;  %v1683_v56 = vand.u32 2147483647, %v2437_v16  ;;  %v1684_v57 = vand.u32 2147483647, %v2438_v61  ;;  %v2441_v2 = vadd.f32 -1.0, %v3730_v5 }
 0x29a   : > { %v1603_v18 = vadd.f32 %v1601_v23, %v1583_v17  ;;  %v1604_v36 = vadd.f32 %v1602_v4, %v1584_v11  ;;  %v1665_v17 = vsub.f32 1.0, %v1663_v34  ;;  %v1666_v11 = vsub.f32 1.0, %v1664_v40 }
 0x29b   : > { %v1645_v15 = vsub.f32 1.0, %v1643_v55  ;;  %v1703_v10 = vand.u32 2147483647, %v2439_v1  ;;  %v1725_v24 = vmax.f32 %v1723_v49, 0.0  ;;  %v1685_v53 = vsub.f32 1.0, %v1683_v56 }
 0x29c   : > { %v1617_v59 = vadd.f32 %v1615_v48, %v1603_v18  ;;  %v1618_v35 = vadd.f32 %v1616_v51, %v1604_v36  ;;  %v3725_v33 = vpop.permute.xlu2 %1649  ;;  %v1667_v42 = vmax.f32 %v1665_v17, 0.0  ;;  %v1668_v28 = vmax.f32 %v1666_v11, 0.0 }
 0x29d   : > { %v1686_v23 = vsub.f32 1.0, %v1684_v57  ;;  %v1647_v4 = vmax.f32 %v1645_v15, 0.0  ;;  %v1705_v29 = vsub.f32 1.0, %v1703_v10  ;;  %v1727_v51 = vperm.slane %v1725_v24, 5 }
 0x29e   : > { %v1619_v43 = vpack.c.bf16 %v1618_v35, %v1617_v59  ;;  %v3758_v36 = vadd.f32 -4.0, %v3730_v5  ;;  %v1728_v35 = vperm.slane %v1726_v0, 5  ;;  %v1675_v52 = vperm.slane %v1667_v42, 5 }
 0x29f   : > { %v1707_v44 = vmax.f32 %v1705_v29, 0.0  ;;  %v1735_v16 = vand.u32 2147483647, %v2441_v2  ;;  %v2444_v55 = vadd.f32 -2.0, %v3733_v41  ;;  %v2445_v57 = vadd.f32 -3.0, %v3730_v5 }
 0x2a0   : > { %v2033_v19 = vunpack.c.l.b16 %v1619_v43  ;;  %v2034_v7 = vunpack.c.h.b16 %v1619_v43  ;;  %v2442_v43 = vadd.f32 -1.0, %v3733_v41  ;;  %v2446_v15 = vadd.f32 -3.0, %v3733_v41 }
 0x2a1   : > { %1031 = vrot.lane.b32.xlu1 %v2856_v46, %s2526_s9  ;;  %v1756_v42 = vand.u32 2147483647, %v2444_v55  ;;  %s271_s9 = scalar_lea.vmem %s4027_s6, %s2470_s30 }
 0x2a2   : > { %v2035_v27 = vpack.c.b16 %v2033_v19, %v2033_v19  ;;  %v2036_v22 = vpack.c.b16 %v2034_v7, %v2034_v7  ;;  %v1676_v19 = vperm.slane %v1668_v28, 5  ;;  %v1687_v7 = vmax.f32 %v1685_v53, 0.0 }
 0x2a3   : > { %v1736_v61 = vand.u32 2147483647, %v2442_v43 }
 0x2a4   : > { %v1672_v58 = vpop.permute.xlu2 %1671  ;;  %v3741_v46 = vsel %vm2056_vm14, %v3656_v45, %v2035_v27  ;;  %v3745_v12 = vsel %vm2056_vm14, %v3659_v62, %v2036_v22  ;;  %v1644_v45 = vand.u32 2147483647, %v2434_v38  ;;  %v2440_v62 = vadd.f32 1.0, %v3733_v41 }
 0x2a5   : > { %v1688_v27 = vmax.f32 %v1686_v23, 0.0  ;;  %v1655_v22 = vperm.slane %v1647_v4, 5  ;;  %v1695_v1 = vperm.slane %v1687_v7, 5  ;;  %v1738_v24 = vsub.f32 1.0, %v1736_v61 }
 0x2a6   : > { %v1646_v39 = vsub.f32 1.0, %v1644_v45  ;;  %v1704_v21 = vand.u32 2147483647, %v2440_v62  ;;  %v2448_v45 = vadd.f32 -4.0, %v3733_v41  ;;  %v1730_v7 = vmul.f32 %v1728_v35, %v3485_v54 }
 0x2a7   : > { %v1696_v62 = vperm.slane %v1688_v27, 5 }
 0x2a8   : > { %v1648_v9 = vmax.f32 %v1646_v39, 0.0  ;;  %v1706_v48 = vsub.f32 1.0, %v1704_v21  ;;  %v1737_v21 = vsub.f32 1.0, %v1735_v16 }
 0x2a9   : > { %539 = vrot.lane.b32.xlu1 %v4098_v60, %s2520_s27  ;;  %v2443_v60 = vadd.f32 -2.0, %v3730_v5 }
 0x2aa   : > { %v1656_v14 = vperm.slane %v1648_v9, 5  ;;  %v1708_v47 = vmax.f32 %v1706_v48, 0.0  ;;  %v1796_v48 = vand.u32 2147483647, %v2448_v45  ;;  %v1739_v27 = vmax.f32 %v1737_v21, 0.0 }
 0x2ab   : > { %v1755_v0 = vand.u32 2147483647, %v2443_v60 }
 0x2ac   : > { %v3755_v3 = vpop.permute.xlu2 %1689  ;;  %v1716_v56 = vperm.slane %v1708_v47, 5 }
 0x2ad   : > { %v1757_v47 = vsub.f32 1.0, %v1755_v0 }
 0x2b3   : > { %v1670_v18 = vpop.permute.xlu1 %1669  ;;  %v1652_v59 = vpop.permute.xlu0 %1651 }
 0x2b4   : > { %v1673_v38 = vsel %vm384_vm1, %v1670_v18, %v1672_v58  ;;  %v1674_v25 = vsel %vm384_vm1, %v1672_v58, %v1670_v18  ;;  %v1712_v20 = vpop.permute.xlu2 %1711  ;;  %v3769_v34 = vsel %vm360_vm0, %v3725_v33, %v1652_v59  ;;  %v3774_v40 = vsel %vm360_vm0, %v1652_v59, %v3725_v33 }
 0x2b5   : > { %v1795_v58 = vand.u32 2147483647, %v3758_v36  ;;  %v1677_v49 = vmul.f32 %v1675_v52, %v1674_v25  ;;  %v1678_v8 = vmul.f32 %v1676_v19, %v1673_v38  ;;  %v1657_v17 = vmul.f32 %v1655_v22, %v3774_v40 }
 0x2b6   : > { %v1658_v11 = vmul.f32 %v1656_v14, %v3769_v34  ;;  %v1715_v33 = vperm.slane %v1707_v44, 5  ;;  %v1775_v18 = vand.u32 2147483647, %v2445_v57  ;;  %v1776_v36 = vand.u32 2147483647, %v2446_v15 }
 0x2b7   : > { %v1679_v41 = vadd.f32 %v1677_v49, %v1657_v17  ;;  %v1740_v22 = vmax.f32 %v1738_v24, 0.0  ;;  %v1729_v14 = vmul.f32 %v1727_v51, %v3481_v13  ;;  %v1758_v38 = vsub.f32 1.0, %v1756_v42 }
 0x2b8   : > { %v1680_v4 = vadd.f32 %v1678_v8, %v1658_v11  ;;  %v1797_v25 = vsub.f32 1.0, %v1795_v58  ;;  %v1777_v45 = vsub.f32 1.0, %v1775_v18  ;;  %v1759_v8 = vmax.f32 %v1757_v47, 0.0 }
 0x2b9   : > { %v1748_v49 = vperm.slane %v1740_v22, 5  ;;  %v1760_v54 = vmax.f32 %v1758_v38, 0.0 }
 0x2ba   : > { %v1799_v51 = vmax.f32 %v1797_v25, 0.0  ;;  %v1779_v58 = vmax.f32 %v1777_v45, 0.0  ;;  %v1767_v57 = vperm.slane %v1759_v8, 5 }
 0x2bb   : > { %v1710_v39 = vpop.permute.xlu1 %1709  ;;  %v1692_v10 = vpop.permute.xlu0 %1691  ;;  %v1768_v15 = vperm.slane %v1760_v54, 5 }
 0x2bc   : > { %v1713_v28 = vsel %vm432_vm3, %v1710_v39, %v1712_v20  ;;  %v1714_v53 = vsel %vm432_vm3, %v1712_v20, %v1710_v39  ;;  %v1693_v23 = vsel %vm408_vm2, %v3755_v3, %v1692_v10  ;;  %v1694_v5 = vsel %vm408_vm2, %v1692_v10, %v3755_v3  ;;  %v1744_v19 = vpop.permute.xlu2 %1743 }
 0x2bd   : > { %v1697_v9 = vmul.f32 %v1695_v1, %v1694_v5  ;;  %v1698_v29 = vmul.f32 %v1696_v62, %v1693_v23  ;;  %v1717_v59 = vmul.f32 %v1715_v33, %v1714_v53  ;;  %v1718_v2 = vmul.f32 %v1716_v56, %v1713_v28 }
 0x2be   : > { %v1798_v20 = vsub.f32 1.0, %v1796_v48  ;;  %v1778_v1 = vsub.f32 1.0, %v1776_v36  ;;  %v1747_v62 = vperm.slane %v1739_v27, 5  ;;  %v1801_v10 = vperm.slane %v1799_v51, 5 }
 0x2bf   : > { %v1699_v43 = vadd.f32 %v1697_v9, %v1679_v41  ;;  %v1700_v52 = vadd.f32 %v1698_v29, %v1680_v4  ;;  %v1787_v0 = vperm.slane %v1779_v58, 5  ;;  %v2383_v58 = vadd.f32 -4.0, %v3184_v37 }
 0x2c0   : > { %v1800_v17 = vmax.f32 %v1798_v20, 0.0  ;;  %v1780_v11 = vmax.f32 %v1778_v1, 0.0  ;;  %v1803_v27 = vmul.f32 %v1801_v10, %v3769_v34 }
 0x2c1   : > { %v1719_v44 = vadd.f32 %v1717_v59, %v1699_v43  ;;  %v1720_v3 = vadd.f32 %v1718_v2, %v1700_v52  ;;  %v2510_v43 = vld [vmem:[%s2813_s15] sm:$0xff] }
 0x2c2   : > { %v1802_v21 = vperm.slane %v1800_v17, 5  ;;  %v1788_v42 = vperm.slane %v1780_v11, 5  ;;  %v328_v52 = vrot.slane %v2510_v43, 5 }
 0x2c3   : > { %v1742_v16 = vpop.permute.xlu1 %1741  ;;  %v1731_v61 = vadd.f32 %v1729_v14, %v1719_v44  ;;  %v1732_v60 = vadd.f32 %v1730_v7, %v1720_v3  ;;  %v1762_v55 = vpop.permute.xlu0 %1761 }
 0x2c4   : > { %v1745_v35 = vsel %vm471_vm4, %v1742_v16, %v1744_v19  ;;  %v1746_v13 = vsel %vm471_vm4, %v1744_v19, %v1742_v16  ;;  %v1782_v39 = vpop.permute.xlu2 %1781  ;;  %v2511_v19 = vld [vmem:[%s2813_s15 + $0x8] sm:$0xff]  ;;  %v1804_v22 = vmul.f32 %v1802_v21, %v3774_v40  ;;  %v332_v38 = vadd.f32 %v328_v52, %v3470_v63  ;;  %v4102_v21 = vld [vmem:[#allocation11_spill] sm:$0xff] }
 0x2c5   : > { %v1749_v33 = vmul.f32 %v1747_v62, %v1745_v35  ;;  %v1750_v56 = vmul.f32 %v1748_v49, %v1746_v13  ;;  %v329_v7 = vrot.slane %v2511_v19, 5  ;;  %v4104_v19 = vld [vmem:[#allocation12_spill] sm:$0xff] }
 0x2c7   : > { %v1751_v4 = vadd.f32 %v1749_v33, %v1731_v61  ;;  %v1752_v9 = vadd.f32 %v1750_v56, %v1732_v60  ;;  %v333_v25 = vadd.f32 %v329_v7, %v3473_v32  ;;  %v1821_v60 = vadd.f32 %v332_v38, %v2632_v30 }
 0x2c9   : > { %v1823_v62 = vmax.f32 %v1821_v60, 0.0 }
 0x2cb   : > { %v1764_v24 = vpop.permute.xlu1 %1763  ;;  %v1784_v28 = vpop.permute.xlu0 %1783  ;;  %v1825_v32 = vmin.f32 %v1823_v62, 15.0 }
 0x2cc   : > { %v1765_v53 = vsel %vm495_vm5, %v1762_v55, %v1764_v24  ;;  %v1766_v23 = vsel %vm495_vm5, %v1764_v24, %v1762_v55  ;;  %v1785_v5 = vsel %vm519_vm6, %v1782_v39, %v1784_v28  ;;  %v1786_v41 = vsel %vm519_vm6, %v1784_v28, %v1782_v39  ;;  %v4100_v39 = vld [vmem:[#allocation8_spill] sm:$0xff] }
 0x2cd   : > { %v1769_v29 = vmul.f32 %v1767_v57, %v1765_v53  ;;  %v1770_v48 = vmul.f32 %v1768_v15, %v1766_v23  ;;  %v1789_v59 = vmul.f32 %v1787_v0, %v1785_v5  ;;  %v1790_v2 = vmul.f32 %v1788_v42, %v1786_v41 }
 0x2ce   : > { %v1822_v55 = vadd.f32 %v333_v25, %v2634_v31  ;;  %v3829_v51 = vsub.f32 %v1825_v32, %v2632_v30  ;;  %v4101_v10 = vmax.f32 %v4100_v39, 0.0  ;;  %v4103_v24 = vmax.f32 %v4102_v21, 0.0 }
 0x2cf   : > { %v1771_v18 = vadd.f32 %v1769_v29, %v1751_v4  ;;  %v1772_v36 = vadd.f32 %v1770_v48, %v1752_v9  ;;  %v1043_v53 = vand.u32 2147483647, %v2383_v58 }
 0x2d0   : > { %v1824_v49 = vmax.f32 %v1822_v55, 0.0  ;;  %v2449_v33 = vadd.f32 4.0, %v3829_v51  ;;  %v2451_v56 = vadd.f32 3.0, %v3829_v51  ;;  %v1909_v15 = vand.u32 2147483647, %v3829_v51 }
 0x2d1   : > { %v1791_v14 = vadd.f32 %v1789_v59, %v1771_v18  ;;  %v1792_v44 = vadd.f32 %v1790_v2, %v1772_v36  ;;  %v862_v0 = vperm.slane %v4103_v24, 3  ;;  %v2453_v42 = vadd.f32 2.0, %v3829_v51  ;;  %v3855_v36 = vpop.permute.xlu2 %1839 }
 0x2d2   : > { %v1826_v54 = vmin.f32 %v1824_v49, 15.0  ;;  %v2463_v23 = vadd.f32 -4.0, %v3829_v51  ;;  %v2455_v5 = vadd.f32 1.0, %v3829_v51  ;;  %v1831_v9 = vand.u32 2147483647, %v2449_v33 }
 0x2d3   : > { %v1805_v3 = vadd.f32 %v1803_v27, %v1791_v14  ;;  %v1806_v47 = vadd.f32 %v1804_v22, %v1792_v44  ;;  %v1851_v59 = vand.u32 2147483647, %v2451_v56  ;;  %v1911_v43 = vsub.f32 1.0, %v1909_v15  ;;  %v4105_v44 = vld [vmem:[#allocation13_spill] sm:$0xff] }
 0x2d4   : > { %v3832_v17 = vsub.f32 %v1826_v54, %v2634_v31  ;;  %v861_v31 = vperm.slane %v4101_v10, 3  ;;  %v1871_v22 = vand.u32 2147483647, %v2453_v42  ;;  %v1891_v38 = vand.u32 2147483647, %v2455_v5 }
 0x2d5   : > { %v1807_v20 = vpack.c.bf16 %v1806_v47, %v1805_v3  ;;  %v3862_v3 = vmul.f32 %v862_v0, %v4105_v44  ;;  %v1983_v47 = vand.u32 2147483647, %v2463_v23  ;;  %v1853_v55 = vsub.f32 1.0, %v1851_v59 }
 0x2d6   : > { %v2452_v57 = vadd.f32 3.0, %v3832_v17  ;;  %v1910_v30 = vand.u32 2147483647, %v3832_v17  ;;  %v2454_v28 = vadd.f32 2.0, %v3832_v17  ;;  %v2456_v41 = vadd.f32 1.0, %v3832_v17 }
 0x2d7   : > { %v2038_v16 = vunpack.c.l.b16 %v1807_v20  ;;  %v2039_v61 = vunpack.c.h.b16 %v1807_v20  ;;  %v3858_v7 = vmul.f32 %v861_v31, %v4104_v19  ;;  %v2464_v27 = vadd.f32 -4.0, %v3832_v17 }
 0x2d8   : > { %v1852_v2 = vand.u32 2147483647, %v2452_v57  ;;  %v1912_v52 = vsub.f32 1.0, %v1910_v30  ;;  %v1872_v14 = vand.u32 2147483647, %v2454_v28  ;;  %v3864_v20 = vsub.f32 1.0, %v1043_v53 }
 0x2d9   : > { %v2040_v45 = vpack.c.b16 %v2038_v16, %v2038_v16  ;;  %v2041_v1 = vpack.c.b16 %v2039_v61, %v2039_v61  ;;  %v1892_v25 = vand.u32 2147483647, %v2456_v41  ;;  %v1833_v61 = vsub.f32 1.0, %v1831_v9  ;;  %v1900_v23 = vpop.permute.xlu2 %1899 }
 0x2da   : > { %v1874_v62 = vsub.f32 1.0, %v1872_v14  ;;  %v2457_v49 = vadd.f32 -1.0, %v3829_v51  ;;  %v2458_v32 = vadd.f32 -1.0, %v3832_v17  ;;  %v1984_v54 = vand.u32 2147483647, %v2464_v27 }
 0x2db   : > { %v2042_v34 = vrot.slane %v2040_v45, 2  ;;  %v2043_v40 = vrot.slane %v2041_v1, 2  ;;  %v1854_v45 = vsub.f32 1.0, %v1852_v2  ;;  %v1913_v1 = vmax.f32 %v1911_v43, 0.0 }
 0x2dc   : > { %v3870_v58 = vsub.f32 1.0, %v1983_v47  ;;  %v1894_v33 = vsub.f32 1.0, %v1892_v25  ;;  %v1835_v57 = vmax.f32 %v1833_v61, 0.0  ;;  %v1855_v10 = vmax.f32 %v1853_v55, 0.0 }
 0x2dd   : > { %v3818_v8 = vsel %vm2061_vm15, %v3741_v46, %v2042_v34  ;;  %v3822_v63 = vsel %vm2061_vm15, %v3745_v12, %v2043_v40  ;;  %v4099_v46 = vld [vmem:[#allocation17_spill] sm:$0xff]  ;;  %v2450_v12 = vadd.f32 4.0, %v3832_v17  ;;  %v1914_v34 = vmax.f32 %v1912_v52, 0.0 }
 0x2de   : > { %v2384_v11 = vadd.f32 -4.0, %v4099_v46  ;;  %v1873_v40 = vsub.f32 1.0, %v1871_v22  ;;  %v1856_v31 = vmax.f32 %v1854_v45, 0.0  ;;  %v3876_v21 = vperm.slane %v1913_v1, 3 }
 0x2df   : > { %v1832_v29 = vand.u32 2147483647, %v2450_v12  ;;  %v1047_v12 = vmax.f32 %v3864_v20, 0.0  ;;  %v3878_v24 = vperm.slane %v1914_v34, 3  ;;  %v1876_v42 = vmax.f32 %v1874_v62, 0.0 }
 0x2e0   : > { %v1044_v4 = vand.u32 2147483647, %v2384_v11  ;;  %v1893_v11 = vsub.f32 1.0, %v1891_v38  ;;  %v1875_v0 = vmax.f32 %v1873_v40, 0.0  ;;  %v1923_v28 = vand.u32 2147483647, %v2457_v49 }
 0x2e1   : > { %v1834_v60 = vsub.f32 1.0, %v1832_v29  ;;  %v1924_v53 = vand.u32 2147483647, %v2458_v32  ;;  %v3880_v5 = vsub.f32 1.0, %v1984_v54  ;;  %v1987_v41 = vmax.f32 %v3870_v58, 0.0 }
 0x2e2   : > { %v3866_v16 = vsub.f32 1.0, %v1044_v4  ;;  %v1895_v4 = vmax.f32 %v1893_v11, 0.0  ;;  %v1896_v9 = vmax.f32 %v1894_v33, 0.0  ;;  %v1843_v29 = vperm.slane %v1835_v57, 3 }
 0x2e3   : > { %v3824_v35 = vpop.permute.xlu1 %1837  ;;  %v3826_v13 = vpop.permute.xlu0 %1857  ;;  %v1836_v15 = vmax.f32 %v1834_v60, 0.0  ;;  %v2461_v2 = vadd.f32 -3.0, %v3829_v51  ;;  %v2462_v43 = vadd.f32 -3.0, %v3832_v17  ;;  %v1863_v52 = vperm.slane %v1855_v10, 3 }
 0x2e4   : > { %v1048_v56 = vmax.f32 %v3866_v16, 0.0  ;;  %v1864_v19 = vperm.slane %v1856_v31, 3  ;;  %v2459_v27 = vadd.f32 -2.0, %v3829_v51  ;;  %v2460_v22 = vadd.f32 -2.0, %v3832_v17  ;;  %v850_v31 = vpop.permute.xlu2 %849 }
 0x2e5   : > { %v1844_v59 = vperm.slane %v1836_v15, 3  ;;  %v1883_v14 = vperm.slane %v1875_v0, 3  ;;  %v1884_v44 = vperm.slane %v1876_v42, 3  ;;  %v1925_v47 = vsub.f32 1.0, %v1923_v28 }
 0x2e6   : > { %v1926_v38 = vsub.f32 1.0, %v1924_v53  ;;  %v1903_v60 = vperm.slane %v1895_v4, 3  ;;  %v1904_v55 = vperm.slane %v1896_v9, 3  ;;  %v1841_v51 = vsel %vm360_vm0, %v3824_v35, %v3855_v36 }
 0x2e7   : > { %v3903_v17 = vsel %vm360_vm0, %v3855_v36, %v3824_v35  ;;  %v1963_v34 = vand.u32 2147483647, %v2461_v2  ;;  %v1964_v40 = vand.u32 2147483647, %v2462_v43  ;;  %v1943_v62 = vand.u32 2147483647, %v2459_v27 }
 0x2e8   : > { %v1944_v49 = vand.u32 2147483647, %v2460_v22  ;;  %v1927_v58 = vmax.f32 %v1925_v47, 0.0  ;;  %v1928_v35 = vmax.f32 %v1926_v38, 0.0  ;;  %v2381_v33 = vadd.f32 -3.0, %v3184_v37 }
 0x2e9   : > { %v2382_v57 = vadd.f32 -3.0, %v4099_v46  ;;  %v1845_v15 = vmul.f32 %v1843_v29, %v3903_v17  ;;  %v1846_v10 = vmul.f32 %v1844_v59, %v1841_v51  ;;  %v1965_v0 = vsub.f32 1.0, %v1963_v34 }
 0x2ea   : > { %v1966_v42 = vsub.f32 1.0, %v1964_v40  ;;  %v1945_v28 = vsub.f32 1.0, %v1943_v62  ;;  %v1946_v53 = vsub.f32 1.0, %v1944_v49  ;;  %v1023_v37 = vand.u32 2147483647, %v2381_v33 }
 0x2eb   : > { %v3851_v48 = vpop.permute.xlu1 %1859  ;;  %v3853_v18 = vpop.permute.xlu0 %1877  ;;  %v1935_v29 = vperm.slane %v1927_v58, 3  ;;  %v1936_v59 = vperm.slane %v1928_v35, 3  ;;  %v1967_v38 = vmax.f32 %v1965_v0, 0.0 }
 0x2ec   : > { %v1861_v25 = vsel %vm384_vm1, %v3826_v13, %v3851_v48  ;;  %v1862_v61 = vsel %vm384_vm1, %v3851_v48, %v3826_v13  ;;  %v1025_v34 = vsub.f32 1.0, %v1023_v37  ;;  %vm2136_vm1 = vcmask 3072  }
 0x2ed   : > { %v1865_v32 = vmul.f32 %v1863_v52, %v1862_v61  ;;  %v1866_v54 = vmul.f32 %v1864_v19, %v1861_v25  ;;  %v1989_v52 = vperm.slane %v1987_v41, 3  ;;  %v1024_v19 = vand.u32 2147483647, %v2382_v57 }
 0x2ee   : > { %v1968_v25 = vmax.f32 %v1966_v42, 0.0  ;;  %v1947_v61 = vmax.f32 %v1945_v28, 0.0 }
 0x2ef   : > { %v1867_v4 = vadd.f32 %v1865_v32, %v1845_v15  ;;  %v1868_v9 = vadd.f32 %v1866_v54, %v1846_v10  ;;  %v1026_v40 = vsub.f32 1.0, %v1024_v19  ;;  %v1975_v32 = vperm.slane %v1967_v38, 3  ;;  %v4106_v54 = vld [vmem:[#allocation9_spill] sm:$0xff]  ;;  %v1970_v10 = vpop.permute.xlu2 %1969  ;;  %v4112_v38 = vld [vmem:[#allocation15_spill] sm:$0xff] }
 0x2f0   : > { %v4107_v58 = vmax.f32 %v4106_v54, 0.0 }
 0x2f2   : > { %v855_v35 = vperm.slane %v4107_v58, 3 }
 0x2f3   : > { %v1880_v30 = vpop.permute.xlu1 %1879  ;;  %v3874_v39 = vpop.permute.xlu0 %1929 }
 0x2f4   : > { %v1881_v13 = vsel %vm408_vm2, %v3853_v18, %v1880_v30  ;;  %v1882_v48 = vsel %vm408_vm2, %v1880_v30, %v3853_v18 }
 0x2f5   : > { %v1885_v18 = vmul.f32 %v1883_v14, %v1882_v48  ;;  %v1886_v30 = vmul.f32 %v1884_v44, %v1881_v13  ;;  %v1991_v48 = vmul.f32 %v1989_v52, %v1841_v51  ;;  %v4111_v51 = vld [vmem:[#allocation5_spill] sm:$0xff] }
 0x2f6   : > { %v2352_v0 = vadd.f32 -4.0, %v4111_v51 }
 0x2f7   : > { %v1887_v46 = vadd.f32 %v1885_v18, %v1867_v4  ;;  %v1888_v27 = vadd.f32 %v1886_v30, %v1868_v9  ;;  %v4110_v18 = vld [vmem:[#allocation4_spill] sm:$0xff] }
 0x2f8   : > { %v2351_v30 = vadd.f32 -4.0, %v4110_v18 }
 0x2fb   : > { %v1898_v45 = vpop.permute.xlu1 %1897  ;;  %v3905_v1 = vpop.permute.xlu0 %1949 }
 0x2fc   : > { %v1901_v36 = vsel %vm432_vm3, %v1898_v45, %v1900_v23  ;;  %v1902_v11 = vsel %vm432_vm3, %v1900_v23, %v1898_v45  ;;  %v1988_v23 = vmax.f32 %v3880_v5, 0.0  ;;  %v1918_v45 = vmul.f32 %v3878_v24, %v3629_v6 }
 0x2fd   : > { %v1905_v2 = vmul.f32 %v1903_v60, %v1902_v11  ;;  %v1906_v43 = vmul.f32 %v1904_v55, %v1901_v36  ;;  %v1948_v60 = vmax.f32 %v1946_v53, 0.0  ;;  %v1917_v55 = vmul.f32 %v3876_v21, %v3625_v50  ;;  %v4108_v36 = vld [vmem:[#allocation10_spill] sm:$0xff] }
 0x2fe   : > { %v1990_v13 = vperm.slane %v1988_v23, 3  ;;  %v4109_v11 = vmax.f32 %v4108_v36, 0.0  ;;  %v1955_v50 = vperm.slane %v1947_v61, 3  ;;  %v1027_v6 = vmax.f32 %v1025_v34, 0.0 }
 0x2ff   : > { %v1907_v5 = vadd.f32 %v1905_v2, %v1887_v46  ;;  %v1908_v41 = vadd.f32 %v1906_v43, %v1888_v27  ;;  %v1956_v21 = vperm.slane %v1948_v60, 3  ;;  %v1028_v24 = vmax.f32 %v1026_v40, 0.0 }
 0x300   : > { %v856_v33 = vperm.slane %v4109_v11, 3  ;;  %v2529_v61 = vmov 0  }
 0x301   : > { %v1919_v57 = vadd.f32 %v1917_v55, %v1907_v5  ;;  %v1920_v15 = vadd.f32 %v1918_v45, %v1908_v41  ;;  %v4113_v5 = vld [vmem:[#allocation16_spill] sm:$0xff]  ;;  %2499 = vset.pattern.permute.xlu0 %v2529_v61  ;;  %v1036_v60 = vperm.slane %v1028_v24, 5  ;;  %v528_v55 = vand.u32 2147483647, %v2351_v30  ;;  %2500 = vset.pattern.permute.xlu1 %v2529_v61 }
 0x302   : > { %v529_v45 = vand.u32 2147483647, %v2352_v0  ;;  %2501 = vset.pattern.permute.xlu2 %v2529_v61 }
 0x303   : > { %v1932_v22 = vpop.permute.xlu1 %1931  ;;  %v1972_v14 = vpop.permute.xlu0 %1971 }
 0x304   : > { %v1933_v44 = vsel %vm471_vm4, %v3874_v39, %v1932_v22  ;;  %v1934_v47 = vsel %vm471_vm4, %v1932_v22, %v3874_v39  ;;  %v1976_v39 = vperm.slane %v1968_v25, 3  ;;  %v1973_v53 = vsel %vm519_vm6, %v1970_v10, %v1972_v14 }
 0x305   : > { %v1937_v62 = vmul.f32 %v1935_v29, %v1933_v44  ;;  %v1938_v49 = vmul.f32 %v1936_v59, %v1934_v47  ;;  %v1974_v4 = vsel %vm519_vm6, %v1972_v14, %v1970_v10  ;;  %v2084_v59 = vld [vmem:[%s4024_s3] sm:$0xff]  ;;  %v1992_v22 = vmul.f32 %v1990_v13, %v3903_v17 }
 0x306   : > { %v1977_v14 = vmul.f32 %v1975_v32, %v1973_v53  ;;  %v1978_v44 = vmul.f32 %v1976_v39, %v1974_v4  ;;  %2087 = vperm.xlu0 %2499, %v2084_v59   ;;  %v531_v11 = vsub.f32 1.0, %v529_v45  ;;  %v4120_v59 = vld [vmem:[#allocation6_spill] sm:$0xff] }
 0x307   : > { %v1939_v42 = vadd.f32 %v1937_v62, %v1919_v57  ;;  %v1940_v28 = vadd.f32 %v1938_v49, %v1920_v15  ;;  %v1049_v62 = vperm.slane %v1047_v12, 5  ;;  %v1050_v49 = vperm.slane %v1048_v56, 5  ;;  %v4115_v57 = vld [vmem:[#allocation18_spill] sm:$0xff]  ;;  %v4116_v56 = vld [vmem:[#allocation19_spill] sm:$0xff] }
 0x308   : > { %v533_v30 = vmax.f32 %v531_v11, 0.0 }
 0x309   : > { %v1051_v16 = vmul.f32 %v1049_v62, %v4115_v57  ;;  %v1052_v15 = vmul.f32 %v1050_v49, %v4116_v56 }
 0x30b   : > { %v1952_v9 = vpop.permute.xlu1 %1951  ;;  %v852_v2 = vpop.permute.xlu0 %851 }
 0x30c   : > { %v1953_v43 = vsel %vm495_vm5, %v3905_v1, %v1952_v9  ;;  %v1954_v23 = vsel %vm495_vm5, %v1952_v9, %v3905_v1  ;;  %v853_v52 = vsel %vm519_vm6, %v850_v31, %v852_v2  ;;  %v854_v37 = vsel %vm519_vm6, %v852_v2, %v850_v31 }
 0x30d   : > { %v1957_v19 = vmul.f32 %v1955_v50, %v1953_v43  ;;  %v1958_v46 = vmul.f32 %v1956_v21, %v1954_v23  ;;  %v857_v27 = vmul.f32 %v855_v35, %v853_v52  ;;  %v858_v29 = vmul.f32 %v856_v33, %v854_v37  ;;  %v4114_v35 = vld [vmem:[#allocation20_spill] sm:$0xff]  ;;  %v4117_v50 = vld [vmem:[#allocation21_spill] sm:$0xff]  ;;  %v4118_v21 = vld [vmem:[#allocation22_spill] sm:$0xff] }
 0x30e   : > { %v1035_v31 = vperm.slane %v1027_v6, 5 }
 0x30f   : > { %v1959_v47 = vadd.f32 %v1957_v19, %v1939_v42  ;;  %v1960_v1 = vadd.f32 %v1958_v46, %v1940_v28  ;;  %v859_v25 = vadd.f32 %v857_v27, %v4112_v38  ;;  %v860_v41 = vadd.f32 %v858_v29, %v4113_v5  ;;  %v542_v42 = vpop.permute.xlu2 %541  ;;  %v4119_v46 = vld [vmem:[#allocation14_spill] sm:$0xff] }
 0x310   : > { %v2002_v27 = vunpack.c.l.b16 %v4119_v46  ;;  %v2003_v29 = vunpack.c.h.b16 %v4119_v46 }
 0x311   : > { %v1979_v34 = vadd.f32 %v1977_v14, %v1959_v47  ;;  %v1980_v40 = vadd.f32 %v1978_v44, %v1960_v1  ;;  %v865_v17 = vadd.f32 %v3858_v7, %v859_v25  ;;  %v866_v13 = vadd.f32 %v3862_v3, %v860_v41  ;;  %v4121_v14 = vld [vmem:[#allocation7_spill] sm:$0xff] }
 0x312   : > { %v530_v3 = vsub.f32 1.0, %v528_v55  ;;  %v2004_v38 = vpack.c.b16 %v2002_v27, %v2002_v27  ;;  %v2005_v25 = vpack.c.b16 %v2003_v29, %v2003_v29 }
 0x313   : > { %v867_v32 = vpack.c.bf16 %v866_v13, %v865_v17  ;;  %v1032_v39 = vpop.permute.xlu1 %1031  ;;  %v1993_v54 = vadd.f32 %v1991_v48, %v1979_v34  ;;  %v1994_v58 = vadd.f32 %v1992_v22, %v1980_v40 }
 0x314   : > { %v1033_v36 = vsel %vm519_vm6, %v4114_v35, %v1032_v39  ;;  %v1034_v7 = vsel %vm519_vm6, %v1032_v39, %v4114_v35  ;;  %v532_v18 = vmax.f32 %v530_v3, 0.0  ;;  %v2006_v40 = vrot.slane %v2004_v38, 6 }
 0x315   : > { %v1037_v33 = vmul.f32 %v1035_v31, %v1033_v36  ;;  %v1038_v20 = vmul.f32 %v1036_v60, %v1034_v7  ;;  %v1995_v12 = vpack.c.bf16 %v1994_v58, %v1993_v54  ;;  %v2009_v5 = vunpack.c.l.b16 %v867_v32  ;;  %v278_v36 = vld [vmem:[%s4023_s2] sm:$0xf] }
 0x316   : > { %v2010_v41 = vunpack.c.h.b16 %v867_v32  ;;  %v2007_v17 = vrot.slane %v2005_v25, 6 }
 0x317   : > { %v1039_v48 = vadd.f32 %v1037_v33, %v4117_v50  ;;  %v1040_v10 = vadd.f32 %v1038_v20, %v4118_v21  ;;  %v2045_v6 = vunpack.c.l.b16 %v1995_v12  ;;  %v2046_v24 = vunpack.c.h.b16 %v1995_v12 }
 0x318   : > { %v2011_v13 = vpack.c.b16 %v2009_v5, %v2009_v5  ;;  %v2012_v62 = vpack.c.b16 %v2010_v41, %v2010_v41 }
 0x319   : > { %v1053_v51 = vadd.f32 %v1051_v16, %v1039_v48  ;;  %v1054_v0 = vadd.f32 %v1052_v15, %v1040_v10  ;;  %v2047_v28 = vpack.c.b16 %v2045_v6, %v2045_v6  ;;  %v2048_v53 = vpack.c.b16 %v2046_v24, %v2046_v24 }
 0x31b   : > { %v540_v4 = vpop.permute.xlu1 %539  ;;  %v2095_v9 = vsel %vm2049_vm13, %v2047_v28, 0  ;;  %v2098_v2 = vsel %vm2049_vm13, %v2048_v53, 0  ;;  %v1055_v43 = vpack.c.bf16 %v1054_v0, %v1053_v51  ;;  %v2126_v0 = vld [vmem:[%s4025_s4] sm:$0xff] }
 0x31c   : > { %v543_v23 = vsel %vm360_vm0, %v540_v4, %v542_v42  ;;  %v544_v52 = vsel %vm360_vm0, %v542_v42, %v540_v4  ;;  %2105 = vmatpush.bf16.msra.mxu0 %v2095_v9  ;;  %2118 = vmatpush.bf16.msra.mxu1 %v2098_v2  ;;  %vm2090_vm0 = vcmask 293888  }
 0x31d   : > { %v545_v37 = vmul.f32 %v543_v23, %v532_v18  ;;  %v546_v19 = vmul.f32 %v544_v52, %v533_v30  ;;  %v2014_v47 = vunpack.c.l.b16 %v1055_v43  ;;  %v2015_v1 = vunpack.c.h.b16 %v1055_v43 }
 0x31f   : > { %v547_v22 = vadd.f32 %v545_v37, %v4120_v59  ;;  %v548_v44 = vadd.f32 %v546_v19, %v4121_v14  ;;  %v2016_v60 = vpack.c.b16 %v2014_v47, %v2014_v47  ;;  %v2017_v55 = vpack.c.b16 %v2015_v1, %v2015_v1 }
 0x320   : > { %2106 = vmatpush.bf16.msra.mxu0 %v3818_v8  ;;  %2119 = vmatpush.bf16.msra.mxu1 %v3822_v63 }
 0x321   : > { %v549_v26 = vpack.c.bf16 %v548_v44, %v547_v22  ;;  %v2018_v49 = vrot.slane %v2016_v60, 2  ;;  %v2019_v39 = vrot.slane %v2017_v55, 2  ;;  %v2530_v55 = vmov 1024.0  }
 0x322   : > { %2502 = vrcp.f32 %v2530_v55 }
 0x323   : > { %v1997_v61 = vunpack.c.l.b16 %v549_v26  ;;  %v1998_v31 = vunpack.c.h.b16 %v549_v26 }
 0x325   : > { %v1999_v45 = vpack.c.b16 %v1997_v61, %v1997_v61  ;;  %v2000_v34 = vpack.c.b16 %v1998_v31, %v1998_v31 }
 0x327   : > { %v2052_v8 = vsel %vm2049_vm13, %v1999_v45, %v2006_v40  ;;  %v2055_v63 = vsel %vm2049_vm13, %v2000_v34, %v2007_v17 }
 0x328   : > { %v2058_v54 = vsel %vm2056_vm14, %v2052_v8, %v2011_v13  ;;  %v2060_v32 = vsel %vm2056_vm14, %v2055_v63, %v2012_v62  ;;  %v2503_v45 = vpop.eup %2502 }
 0x329   : > { %v2063_v58 = vsel %vm2061_vm15, %v2058_v54, %v2018_v49  ;;  %v2066_v35 = vsel %vm2061_vm15, %v2060_v32, %v2019_v39  ;;  %v2160_v34 = vmul.f32 1024.0, %v2503_v45  ;;  %vm2164_vm2 = vweird.f32 %v2503_v45 }
 0x32a   : > { %2107 = vmatpush.bf16.msra.mxu0 %v2063_v58  ;;  %2120 = vmatpush.bf16.msra.mxu1 %v2066_v35 }
 0x32b   : > { %v2161_v40 = vsub.f32 1.0, %v2160_v34 }
 0x32d   : > { %2465 = vmatmul.msk.bf16.vlgmr.msra.gmra.mxu0 %vm2090_vm0, %v278_v36  ;;  %2466 = vmatmul.msk.bf16.vlgmr.msra.gmra.mxu1 %vm2090_vm0, %v278_v36  ;;  %v2162_v17 = vmul.f32 %v2503_v45, %v2161_v40 }
 0x32f   : > { %v2163_v13 = vadd.f32 %v2503_v45, %v2162_v17 }
 0x331   : > { %v2165_v62 = vsel %vm2164_vm2, %v2503_v45, %v2163_v13 }
 0x378   : > { %v2088_v7 = vpop.permute.xlu0 %2087 }
 0x3aa   : > { %v2109_v3 = vpop.f32.mrf.mxu0  ;;  %v2122_v11 = vpop.f32.mrf.mxu1 }
 0x3ab   : > { %v3994_v33 = vadd.f32 %v2109_v3, %v2088_v7  ;;  %v3996_v20 = vadd.f32 %v2122_v11, %v2088_v7 }
 0x3ad   : > { %v2128_v12 = vadd.f32 %v3996_v20, %v3994_v33  ;;  %v2131_v57 = vmul.f32 %v3994_v33, %v3994_v33  ;;  %v2132_v16 = vmul.f32 %v3996_v20, %v3996_v20 }
 0x3af   : > { %2129 = vadd.xlane.f32.xlu1 %v2128_v12  ;;  %v2133_v56 = vadd.f32 %v2132_v16, %v2131_v57  ;;  %v2127_v16 = vld [vmem:[%s4026_s5] sm:$0xff] }
 0x3b1   : > { %2134 = vadd.xlane.f32.xlu2 %v2133_v56 }
 0x3b2   : > { %v2111_v15 = vpop.f32.mrf.mxu0  ;;  %v2124_v50 = vpop.f32.mrf.mxu1 }
 0x422   : > { %v2130_v48 = vpop.xlane.xlu1 %2129 }
 0x423   : > { %v2183_v21 = vrot.slane %v2130_v48, 4  ;;  %v2137_v10 = vsel %vm2136_vm1, %v2130_v48, 0.0 }
 0x424   : > { %v2135_v6 = vpop.xlane.xlu2 %2134  ;;  %2138 = vadd.xlane.f32.xlu0 %v2137_v10 }
 0x425   : > { %v2148_v24 = vsel %vm2136_vm1, %v2135_v6, 0.0  ;;  %v2185_v18 = vsel %vm2136_vm1, %v2183_v21, 0.0  ;;  %v2197_v30 = vrot.slane %v2135_v6, 4 }
 0x426   : > { %2149 = vadd.xlane.f32.xlu2 %v2148_v24  ;;  %2186 = vadd.xlane.f32.xlu1 %v2185_v18 }
 0x427   : > { %v2199_v51 = vsel %vm2136_vm1, %v2197_v30, 0.0 }
 0x42e   : > { %2200 = vadd.xlane.f32.xlu2 %v2199_v51 }
 0x438   : > { %2244 = vperm.xlu0 %2499, %v2126_v0  }
 0x497   : > { %v2139_v42 = vpop.xlane.xlu0 %2138 }
 0x498   : > { %v2140_v28 = vrot.slane %v2139_v42, 4 }
 0x499   : > { %v2150_v53 = vpop.xlane.xlu2 %2149  ;;  %v2187_v4 = vpop.xlane.xlu1 %2186 }
 0x49a   : > { %v2141_v9 = vadd.f32 %v2140_v28, %v2139_v42  ;;  %v2151_v2 = vrot.slane %v2150_v53, 4  ;;  %v2188_v43 = vrot.slane %v2187_v4, 4 }
 0x49c   : > { %v2142_v23 = vrot.slane %v2141_v9, 2  ;;  %v2152_v52 = vadd.f32 %v2151_v2, %v2150_v53  ;;  %v2189_v37 = vadd.f32 %v2188_v43, %v2187_v4 }
 0x49e   : > { %v2153_v19 = vrot.slane %v2152_v52, 2  ;;  %v2190_v46 = vrot.slane %v2189_v37, 2  ;;  %v2143_v27 = vadd.f32 %v2142_v23, %v2141_v9 }
 0x4a0   : > { %v2144_v29 = vrot.slane %v2143_v27, 1  ;;  %v2154_v59 = vadd.f32 %v2153_v19, %v2152_v52  ;;  %v2191_v22 = vadd.f32 %v2190_v46, %v2189_v37 }
 0x4a1   : > { %v2201_v14 = vpop.xlane.xlu2 %2200 }
 0x4a2   : > { %v2202_v44 = vrot.slane %v2201_v14, 4  ;;  %v2145_v47 = vadd.f32 %v2144_v29, %v2143_v27  ;;  %v2155_v1 = vrot.slane %v2154_v59, 1  ;;  %v2192_v26 = vrot.slane %v2191_v22, 1 }
 0x4a4   : > { %v2203_v38 = vadd.f32 %v2202_v44, %v2201_v14  ;;  %2472 = vpush %v2145_v47  ;;  %v2156_v25 = vadd.f32 %v2155_v1, %v2154_v59  ;;  %v2193_v5 = vadd.f32 %v2192_v26, %v2191_v22 }
 0x4a6   : > { %v2204_v41 = vrot.slane %v2203_v38, 2  ;;  %2474 = vpush %v2156_v25 }
 0x4a7   : > { %2476 = vpush %v2193_v5 }
 0x4a8   : > { %v2205_v61 = vadd.f32 %v2204_v41, %v2203_v38 }
 0x4aa   : > { %v2206_v31 = vrot.slane %v2205_v61, 1  ;;  %v2245_v27 = vpop.permute.xlu0 %2244 }
 0x4ac   : > { %v2207_v60 = vadd.f32 %v2206_v31, %v2205_v61 }
 0x4ae   : > { %2478 = vpush %v2207_v60 }
 0x4d5   : > { %s2473_s24 = spop %2472 }
 0x4d6   : > { %v2147_v49 = vstv %s2473_s24 }
 0x4d7   : > { %v2166_v8 = vmul.f32 %v2165_v62, %v2147_v49  ;;  %s2475_s25 = spop %2474 }
 0x4d8   : > { %v2158_v39 = vstv %s2475_s25  ;;  %s2477_s26 = spop %2476 }
 0x4d9   : > { %v2168_v63 = vmul.f32 %v2166_v8, %v2166_v8  ;;  %v2167_v54 = vmul.f32 %v2165_v62, %v2158_v39  ;;  %v2195_v32 = vstv %s2477_s26 }
 0x4da   : > { %v2210_v58 = vmul.f32 %v2195_v32, %v2165_v62 }
 0x4db   : > { %v2169_v35 = vsub.f32 %v2167_v54, %v2168_v63 }
 0x4dc   : > { %v2226_v36 = vsel %vm2056_vm14, %v2166_v8, %v2210_v58  ;;  %v2212_v12 = vmul.f32 %v2210_v58, %v2210_v58 }
 0x4dd   : > { %v2170_v7 = vmax.f32 %v2169_v35, 0.0  ;;  %2230 = vperm.xlu1 %2500, %v2226_v36  }
 0x4df   : > { %v2171_v3 = vadd.f32 1e-05, %v2170_v7  ;;  %s2479_s27 = spop %2478 }
 0x4e0   : > { %v2209_v11 = vstv %s2479_s27 }
 0x4e1   : > { %2504 = vrsqrt.f32 %v2171_v3  ;;  %v2211_v57 = vmul.f32 %v2209_v11, %v2165_v62  ;;  %vm2178_vm5 = vweird.f32 %v2171_v3 }
 0x4e3   : > { %v2213_v56 = vsub.f32 %v2211_v57, %v2212_v12 }
 0x4e5   : > { %v2214_v15 = vmax.f32 %v2213_v56, 0.0  ;;  %2251 = vperm.xlu1 %2500, %v2127_v16  }
 0x4e7   : > { %v2505_v50 = vpop.eup %2504  ;;  %v2215_v48 = vadd.f32 1e-05, %v2214_v15 }
 0x4e8   : > { %v2173_v21 = vmul.f32 %v2505_v50, %v2171_v3  ;;  %vm2179_vm3 = vweird.f32 %v2505_v50 }
 0x4e9   : > { %2506 = vrsqrt.f32 %v2215_v48  ;;  %vm2222_vm6 = vweird.f32 %v2215_v48  ;;  %vm2180_vm7 = vmor %vm2178_vm5, %vm2179_vm3 }
 0x4ea   : > { %v2174_v10 = vmul.f32 %v2505_v50, %v2173_v21 }
 0x4ec   : > { %v2175_v6 = vmul.f32 0.5, %v2174_v10 }
 0x4ee   : > { %v2176_v30 = vsub.f32 1.5, %v2175_v6 }
 0x4ef   : > { %v2507_v24 = vpop.eup %2506 }
 0x4f0   : > { %v2217_v18 = vmul.f32 %v2507_v24, %v2215_v48  ;;  %v2177_v28 = vmul.f32 %v2505_v50, %v2176_v30  ;;  %vm2223_vm4 = vweird.f32 %v2507_v24 }
 0x4f1   : > { %vm2224_vm8 = vmor %vm2222_vm6, %vm2223_vm4 }
 0x4f2   : > { %v2218_v51 = vmul.f32 %v2507_v24, %v2217_v18  ;;  %v2181_v4 = vsel %vm2180_vm7, %v2505_v50, %v2177_v28 }
 0x4f4   : > { %v2219_v0 = vmul.f32 0.5, %v2218_v51 }
 0x4f6   : > { %v2220_v42 = vsub.f32 1.5, %v2219_v0 }
 0x4f8   : > { %v2221_v53 = vmul.f32 %v2507_v24, %v2220_v42 }
 0x4fa   : > { %v2225_v9 = vsel %vm2224_vm8, %v2507_v24, %v2221_v53 }
 0x4fb   : > { %v2227_v2 = vsel %vm2056_vm14, %v2181_v4, %v2225_v9 }
 0x4fc   : > { %2237 = vperm.xlu2 %2501, %v2227_v2  }
 0x54f   : > { %v2231_v43 = vpop.permute.xlu1 %2230 }
 0x550   : > { %v2233_v23 = vsub.f32 %v3994_v33, %v2231_v43  ;;  %v2234_v52 = vsub.f32 %v3996_v20, %v2231_v43 }
 0x556   : > { %v2238_v37 = vpop.permute.xlu2 %2237 }
 0x557   : > { %v2240_v19 = vmul.f32 %v2238_v37, %v2233_v23  ;;  %v2241_v46 = vmul.f32 %v2238_v37, %v2234_v52  ;;  %v2252_v22 = vpop.permute.xlu1 %2251 }
 0x559   : > { %v2247_v29 = vmul.f32 %v2245_v27, %v2240_v19  ;;  %v2248_v59 = vmul.f32 %v2245_v27, %v2241_v46 }
 0x55b   : > { %v2254_v14 = vadd.f32 %v2252_v22, %v2247_v29  ;;  %v2255_v44 = vadd.f32 %v2252_v22, %v2248_v59 }
 0x55d   : > { %v2256_v47 = vmax.f32 %v2254_v14, 0.0  ;;  %v2257_v1 = vmax.f32 %v2255_v44, 0.0 }
 0x55f   : > { %2258 = vst [vmem:[%s271_s9] sm:$0xff] %v2256_v47 }
 0x560   : > { %2259 = vst [vmem:[%s271_s9 + $0x8] sm:$0xff] %v2257_v1 }
 0x561 PF: > { %s16_s21 = sadd.s32 1, %s2518_s21  }
 0x562   : > { %p13_p4 = scmp.ge.s32.totalorder %s16_s21, 4  }
 0x564   :  { %15 = sbr.rel (!%p13_p4) target bundleno = 1 (0x1), region = 77 }

</bundles_post_ra>
